<compile_context>
chip_gen: v7x
topology: tpu7x:2x2x1
jax: 0.10.0
libtpu: 0.0.40
codegen_flags: <defaults>
</compile_context>

<pallas_src>
import functools

import jax
import jax.numpy as jnp
from jax.experimental import pallas as pl
from jax.experimental.pallas import tpu as pltpu


# ----------------------------------------------------------------------------
# Pallas kernels: tiled matmul + fused BN-bias / residual / ReLU epilogue
# ----------------------------------------------------------------------------
def _conv_bn_kernel(p_ref, w_ref, b_ref, o_ref, acc_ref, *, relu):
    """acc += p @ w over the K grid axis; epilogue: acc + bias [+ relu]."""
    @pl.when(pl.program_id(2) == 0)
    def _():
        acc_ref[...] = jnp.zeros_like(acc_ref)

    acc_ref[...] += jnp.dot(p_ref[...], w_ref[...],
                            preferred_element_type=jnp.float32)

    @pl.when(pl.program_id(2) == pl.num_programs(2) - 1)
    def _():
        y = acc_ref[...] + b_ref[...]
        if relu:
            y = jnp.maximum(y, 0.0)
        o_ref[...] = y.astype(o_ref.dtype)


def _conv_bn_residual_kernel(p_ref, w_ref, b_ref, r_ref, o_ref, acc_ref):
    """BasicBlock tail: relu(acc + bias + residual), residual tiled like output."""
    @pl.when(pl.program_id(2) == 0)
    def _():
        acc_ref[...] = jnp.zeros_like(acc_ref)

    acc_ref[...] += jnp.dot(p_ref[...], w_ref[...],
                            preferred_element_type=jnp.float32)

    @pl.when(pl.program_id(2) == pl.num_programs(2) - 1)
    def _():
        y = acc_ref[...] + b_ref[...] + r_ref[...].astype(jnp.float32)
        o_ref[...] = jnp.maximum(y, 0.0).astype(o_ref.dtype)


# ----------------------------------------------------------------------------
# Tiling heuristics
# ----------------------------------------------------------------------------
def _round_up(x, m):
    return ((x + m - 1) // m) * m


def _tile_sizes(m, k, cout):
    """Pick (tm, tn, tk, m_padded) respecting (8,128) rules and megacore."""
    # Cout tile: lane-dense multiple of 128 when possible (64 -> full dim).
    if cout % 256 == 0:
        tn = 256
    elif cout % 128 == 0:
        tn = 128
    else:
        tn = cout           # e.g. 64: full-dim block (masked stores; small layer)
    # M tile.
    if m >= 256:
        tm = 256
        mp = _round_up(m, tm)
    else:
        mp = _round_up(m, 8)
        tm = mp
    # K tile (reduction axis, last in grid): full K when modest, else a
    # 128-multiple divisor (256/512 preferred to match the 256-deep MXU).
    if k <= 768:
        tk = k
    else:
        tk = next((c for c in (512, 256, 384, 128) if k % c == 0), k)
    # Megacore: make sure at least two programs land on a "parallel" axis.
    if (mp // tm) * (cout // tn) < 2:
        if cout // tn == 1 and tn >= 256 and (tn // 2) % 128 == 0:
            tn //= 2
        elif tm >= 16 and (tm // 2) % 8 == 0 and mp % (tm // 2) == 0:
            tm //= 2
    return tm, tn, tk, mp


# ----------------------------------------------------------------------------
# Glue: im2col (bf16) + tiled pallas_call
# ----------------------------------------------------------------------------
def _extract_patches(x, kh, kw, stride, pad):
    """x: NHWC -> patches [N*OH*OW, kh*kw*C] (order: kh, kw, C)."""
    n, h, w, c = x.shape
    if pad > 0:
        x = jnp.pad(x, ((0, 0), (pad, pad), (pad, pad), (0, 0)))
    hp, wp = h + 2 * pad, w + 2 * pad
    oh = (hp - kh) // stride + 1
    ow = (wp - kw) // stride + 1
    wins = []
    for i in range(kh):
        for j in range(kw):
            wins.append(x[:, i:i + stride * (oh - 1) + 1:stride,
                          j:j + stride * (ow - 1) + 1:stride, :])
    p = jnp.stack(wins, axis=3)                      # [N, OH, OW, kh*kw, C]
    return p.reshape(n * oh * ow, kh * kw * c), (n, oh, ow)


def conv_bn(x, params, *, stride, pad, relu=True, residual=None):
    """Conv2d(no bias) + folded eval-mode BN [+ residual] [+ ReLU].

    x: [N, H, W, Cin] bf16. params['w']: [KH, KW, Cin, Cout] bf16 (scale folded),
    params['bias']: [1, Cout] f32. Returns [N, OH, OW, Cout] bf16.
    """
    w = params["w"]
    bias = params["bias"]
    kh, kw, cin, cout = w.shape

    if kh == 1 and kw == 1 and pad == 0:
        xs = x[:, ::stride, ::stride, :]             # 1x1 conv: no im2col needed
        n, oh, ow, _ = xs.shape
        patches = xs.reshape(n * oh * ow, cin)
    else:
        patches, (n, oh, ow) = _extract_patches(x, kh, kw, stride, pad)

    m, k = patches.shape
    w2 = w.reshape(k, cout)
    tm, tn, tk, mp = _tile_sizes(m, k, cout)
    if mp != m:
        patches = jnp.pad(patches, ((0, mp - m), (0, 0)))

    grid = (mp // tm, cout // tn, k // tk)
    p_spec = pl.BlockSpec((tm, tk), lambda i, j, kk: (i, kk))
    w_spec = pl.BlockSpec((tk, tn), lambda i, j, kk: (kk, j))
    b_spec = pl.BlockSpec((1, tn), lambda i, j, kk: (0, j))
    o_spec = pl.BlockSpec((tm, tn), lambda i, j, kk: (i, j))
    out_shape = jax.ShapeDtypeStruct((mp, cout), jnp.bfloat16)
    scratch = [pltpu.VMEM((tm, tn), jnp.float32)]
    cparams = pltpu.CompilerParams(
        dimension_semantics=("parallel", "parallel", "arbitrary"),
        vmem_limit_bytes=32 * 1024 * 1024,
    )

    if residual is None:
        out = pl.pallas_call(
            functools.partial(_conv_bn_kernel, relu=relu),
            grid=grid,
            in_specs=[p_spec, w_spec, b_spec],
            out_specs=o_spec,
            out_shape=out_shape,
            scratch_shapes=scratch,
            compiler_params=cparams,
        )(patches, w2, bias)
    else:
        r2 = residual.reshape(m, cout)
        if mp != m:
            r2 = jnp.pad(r2, ((0, mp - m), (0, 0)))
        r_spec = pl.BlockSpec((tm, tn), lambda i, j, kk: (i, j))
        out = pl.pallas_call(
            _conv_bn_residual_kernel,
            grid=grid,
            in_specs=[p_spec, w_spec, b_spec, r_spec],
            out_specs=o_spec,
            out_shape=out_shape,
            scratch_shapes=scratch,
            compiler_params=cparams,
        )(patches, w2, bias, r2)

    return out[:m].reshape(n, oh, ow, cout)


# ----------------------------------------------------------------------------
# Parameter construction (deterministic, synthetic — no checkpoint load)
# ----------------------------------------------------------------------------
_BN_EPS = 1e-5


def _init_conv_bn(key, kh, kw, cin, cout):
    k1, k2, k3, k4, k5 = jax.random.split(key, 5)
    fan_in = kh * kw * cin
    w = jax.random.normal(k1, (kh, kw, cin, cout), jnp.float32) * (2.0 / fan_in) ** 0.5
    gamma = jax.random.uniform(k2, (cout,), jnp.float32, 0.5, 1.5)
    beta = jax.random.normal(k3, (cout,), jnp.float32) * 0.1
    running_mean = jax.random.normal(k4, (cout,), jnp.float32) * 0.1
    running_var = jax.random.uniform(k5, (cout,), jnp.float32, 0.5, 1.5)
    # Fold eval-mode BN: scale goes straight into the weights, bias stays f32.
    scale = gamma / jnp.sqrt(running_var + _BN_EPS)
    bias = beta - running_mean * scale
    w_folded = (w * scale[None, None, None, :]).astype(jnp.bfloat16)
    return {"w": w_folded, "bias": bias.reshape(1, cout).astype(jnp.float32)}


def _init_basic_block(key, cin, cout, stride):
    k1, k2, k3 = jax.random.split(key, 3)
    block = {
        "conv1": _init_conv_bn(k1, 3, 3, cin, cout),
        "conv2": _init_conv_bn(k2, 3, 3, cout, cout),
    }
    if stride != 1 or cin != cout:                   # matches the PyTorch shortcut rule
        block["down"] = _init_conv_bn(k3, 1, 1, cin, cout)
    return block


def init_resnet18_params(key, input_channels=1):
    keys = jax.random.split(key, 9)
    params = {"conv1": _init_conv_bn(keys[0], 3, 3, input_channels, 64)}
    cfg = [("conv2_x", 64, 64), ("conv3_x", 64, 128),
           ("conv4_x", 128, 256), ("conv5_x", 256, 512)]
    ki = 1
    for name, cin, cout in cfg:
        b0 = _init_basic_block(keys[ki], cin, cout, 2)   # first block of each stage: stride 2
        b1 = _init_basic_block(keys[ki + 1], cout, cout, 1)
        params[name] = [b0, b1]
        ki += 2
    return params


# ----------------------------------------------------------------------------
# Forward pass (eval-mode BN semantics)
# ----------------------------------------------------------------------------
def _basic_block_fwd(x, p, stride):
    identity = x
    out = conv_bn(x, p["conv1"], stride=stride, pad=1, relu=True)
    if "down" in p:
        identity = conv_bn(x, p["down"], stride=stride, pad=0, relu=False)
    # conv2 + bn2 + residual add + relu, fused into one tiled Pallas kernel.
    return conv_bn(out, p["conv2"], stride=1, pad=1, residual=identity)


def resnet18_forward(x_nchw, params):
    """Input NCHW float32, output NCHW float32 (same layout as the PyTorch module)."""
    x = jnp.transpose(x_nchw, (0, 2, 3, 1)).astype(jnp.bfloat16)   # NCHW -> NHWC, bf16
    x = conv_bn(x, params["conv1"], stride=1, pad=1, relu=True)    # conv1 + bn + relu
    for name in ("conv2_x", "conv3_x", "conv4_x", "conv5_x"):
        b0, b1 = params[name]
        x = _basic_block_fwd(x, b0, 2)
        x = _basic_block_fwd(x, b1, 1)
    return jnp.transpose(x, (0, 3, 1, 2)).astype(jnp.float32)      # NHWC -> NCHW


if __name__ == "__main__":
    key = jax.random.PRNGKey(0)
    k_x, k_p = jax.random.split(key)
    # Module default input_channels=1; small 32x32 spatial -> output (2, 512, 2, 2).
    x = jax.random.normal(k_x, (2, 1, 32, 32), jnp.float32)
    params = init_resnet18_params(k_p, input_channels=1)

    fwd = jax.jit(lambda inp: resnet18_forward(inp, params))
    out = jax.block_until_ready(fwd(x))

    assert out.shape == (2, 512, 2, 2), out.shape
    assert out.dtype == jnp.float32
    assert bool(jnp.all(jnp.isfinite(out)))
    print("KERNEL_OK")
</pallas_src>

<mosaic_0001>
module attributes {stable_mosaic.version = 11 : i64} {
  func.func @_conv_bn_kernel(%arg0: i32, %arg1: i32, %arg2: i32, %arg3: memref<256x9xbf16, #tpu.memory_space<vmem>>, %arg4: memref<9x64xbf16, #tpu.memory_space<vmem>>, %arg5: memref<1x64xf32, #tpu.memory_space<vmem>>, %arg6: memref<256x64xbf16, #tpu.memory_space<vmem>>, %arg7: memref<256x64xf32, #tpu.memory_space<vmem>>) attributes {dimension_semantics = [#tpu.dimension_semantics<parallel>, #tpu.dimension_semantics<parallel>, #tpu.dimension_semantics<arbitrary>], iteration_bounds = array<i64: 8, 1, 1>, scalar_prefetch = 0 : i64, scratch_operands = 1 : i64, tpu.core_type = #tpu.core_type<tc>, window_params = [{transform_indices = @transform_0, window_bounds = array<i64: 256, 9>}, {transform_indices = @transform_1, window_bounds = array<i64: 9, 64>}, {transform_indices = @transform_2, window_bounds = array<i64: 1, 64>}, {transform_indices = @transform_3, window_bounds = array<i64: 256, 64>}]} {
    %c0_i32 = arith.constant 0 : i32
    %0 = arith.cmpi eq, %arg2, %c0_i32 : i32
    %1 = arith.extui %0 : i1 to i32
    %c0_i32_0 = arith.constant 0 : i32
    %2 = arith.cmpi ne, %1, %c0_i32_0 : i32
    scf.if %2 {
      %cst_10 = arith.constant 0.000000e+00 : f32
      %12 = vector.broadcast %cst_10 : f32 to vector<256x64xf32>
      %c0_11 = arith.constant 0 : index
      %c0_12 = arith.constant 0 : index
      %13 = vector.load %arg7[%c0_11, %c0_12] : memref<256x64xf32, #tpu.memory_space<vmem>>, vector<256x64xf32>
      tpu.vector_store %arg7[%c0_11, %c0_12], %12 {strides = array<i32>} : memref<256x64xf32, #tpu.memory_space<vmem>>, vector<256x64xf32>,
    } else {
    }
    %c0 = arith.constant 0 : index
    %c0_1 = arith.constant 0 : index
    %3 = vector.load %arg7[%c0, %c0_1] : memref<256x64xf32, #tpu.memory_space<vmem>>, vector<256x64xf32>
    %c0_2 = arith.constant 0 : index
    %c0_3 = arith.constant 0 : index
    %4 = vector.load %arg3[%c0_2, %c0_3] : memref<256x9xbf16, #tpu.memory_space<vmem>>, vector<256x9xbf16>
    %c0_4 = arith.constant 0 : index
    %c0_5 = arith.constant 0 : index
    %5 = vector.load %arg4[%c0_4, %c0_5] : memref<9x64xbf16, #tpu.memory_space<vmem>>, vector<9x64xbf16>
    %cst = arith.constant dense<0.000000e+00> : vector<256x64xf32>
    %6 = tpu.matmul %4, %5, %cst {dimension_numbers = #tpu.dot_dimension_numbers<[1], [0], [0], [1], [0, 0, 1, 1], [], []>} : vector<256x9xbf16>, vector<9x64xbf16>, vector<256x64xf32> -> vector<256x64xf32>
    %7 = arith.addf %3, %6 : vector<256x64xf32>
    %c0_6 = arith.constant 0 : index
    %c0_7 = arith.constant 0 : index
    %8 = vector.load %arg7[%c0_6, %c0_7] : memref<256x64xf32, #tpu.memory_space<vmem>>, vector<256x64xf32>
    tpu.vector_store %arg7[%c0_6, %c0_7], %7 {strides = array<i32>} : memref<256x64xf32, #tpu.memory_space<vmem>>, vector<256x64xf32>,
    %c0_i32_8 = arith.constant 0 : i32
    %9 = arith.cmpi eq, %arg2, %c0_i32_8 : i32
    %10 = arith.extui %9 : i1 to i32
    %c0_i32_9 = arith.constant 0 : i32
    %11 = arith.cmpi ne, %10, %c0_i32_9 : i32
    scf.if %11 {
      %c0_10 = arith.constant 0 : index
      %c0_11 = arith.constant 0 : index
      %12 = vector.load %arg7[%c0_10, %c0_11] : memref<256x64xf32, #tpu.memory_space<vmem>>, vector<256x64xf32>
      %c0_12 = arith.constant 0 : index
      %c0_13 = arith.constant 0 : index
      %13 = vector.load %arg5[%c0_12, %c0_13] : memref<1x64xf32, #tpu.memory_space<vmem>>, vector<1x64xf32>
      %14 = vector.broadcast %13 : vector<1x64xf32> to vector<256x64xf32>
      %15 = arith.addf %12, %14 : vector<256x64xf32>
      %cst_14 = arith.constant 0.000000e+00 : f32
      %16 = vector.broadcast %cst_14 : f32 to vector<256x64xf32>
      %17 = arith.maximumf %15, %16 : vector<256x64xf32>
      %18 = arith.truncf %17 : vector<256x64xf32> to vector<256x64xbf16>
      %c0_15 = arith.constant 0 : index
      %c0_16 = arith.constant 0 : index
      %19 = vector.load %arg6[%c0_15, %c0_16] : memref<256x64xbf16, #tpu.memory_space<vmem>>, vector<256x64xbf16>
      tpu.vector_store %arg6[%c0_15, %c0_16], %18 {strides = array<i32>} : memref<256x64xbf16, #tpu.memory_space<vmem>>, vector<256x64xbf16>,
    } else {
    }
    return
  }
  func.func @transform_0(%arg0: i32, %arg1: i32, %arg2: i32) -> (i32, i32) {
    %c0_i32 = arith.constant 0 : i32
    return %arg0, %arg2 : i32, i32
  }
  func.func @transform_1(%arg0: i32, %arg1: i32, %arg2: i32) -> (i32, i32) {
    %c0_i32 = arith.constant 0 : i32
    return %arg2, %arg1 : i32, i32
  }
  func.func @transform_2(%arg0: i32, %arg1: i32, %arg2: i32) -> (i32, i32) {
    %c0_i32 = arith.constant 0 : i32
    %c0_i32_0 = arith.constant 0 : i32
    return %c0_i32, %arg1 : i32, i32
  }
  func.func @transform_3(%arg0: i32, %arg1: i32, %arg2: i32) -> (i32, i32) {
    %c0_i32 = arith.constant 0 : i32
    return %arg0, %arg1 : i32, i32
  }
}

module attributes {stable_mosaic.version = 11 : i64} {
  func.func @_conv_bn_kernel(%arg0: i32, %arg1: i32, %arg2: i32, %arg3: memref<256x576xbf16, #tpu.memory_space<vmem>>, %arg4: memref<576x64xbf16, #tpu.memory_space<vmem>>, %arg5: memref<1x64xf32, #tpu.memory_space<vmem>>, %arg6: memref<256x64xbf16, #tpu.memory_space<vmem>>, %arg7: memref<256x64xf32, #tpu.memory_space<vmem>>) attributes {dimension_semantics = [#tpu.dimension_semantics<parallel>, #tpu.dimension_semantics<parallel>, #tpu.dimension_semantics<arbitrary>], iteration_bounds = array<i64: 2, 1, 1>, scalar_prefetch = 0 : i64, scratch_operands = 1 : i64, tpu.core_type = #tpu.core_type<tc>, window_params = [{transform_indices = @transform_0, window_bounds = array<i64: 256, 576>}, {transform_indices = @transform_1, window_bounds = array<i64: 576, 64>}, {transform_indices = @transform_2, window_bounds = array<i64: 1, 64>}, {transform_indices = @transform_3, window_bounds = array<i64: 256, 64>}]} {
    %c0_i32 = arith.constant 0 : i32
    %0 = arith.cmpi eq, %arg2, %c0_i32 : i32
    %1 = arith.extui %0 : i1 to i32
    %c0_i32_0 = arith.constant 0 : i32
    %2 = arith.cmpi ne, %1, %c0_i32_0 : i32
    scf.if %2 {
      %cst_10 = arith.constant 0.000000e+00 : f32
      %12 = vector.broadcast %cst_10 : f32 to vector<256x64xf32>
      %c0_11 = arith.constant 0 : index
      %c0_12 = arith.constant 0 : index
      %13 = vector.load %arg7[%c0_11, %c0_12] : memref<256x64xf32, #tpu.memory_space<vmem>>, vector<256x64xf32>
      tpu.vector_store %arg7[%c0_11, %c0_12], %12 {strides = array<i32>} : memref<256x64xf32, #tpu.memory_space<vmem>>, vector<256x64xf32>,
    } else {
    }
    %c0 = arith.constant 0 : index
    %c0_1 = arith.constant 0 : index
    %3 = vector.load %arg7[%c0, %c0_1] : memref<256x64xf32, #tpu.memory_space<vmem>>, vector<256x64xf32>
    %c0_2 = arith.constant 0 : index
    %c0_3 = arith.constant 0 : index
    %4 = vector.load %arg3[%c0_2, %c0_3] : memref<256x576xbf16, #tpu.memory_space<vmem>>, vector<256x576xbf16>
    %c0_4 = arith.constant 0 : index
    %c0_5 = arith.constant 0 : index
    %5 = vector.load %arg4[%c0_4, %c0_5] : memref<576x64xbf16, #tpu.memory_space<vmem>>, vector<576x64xbf16>
    %cst = arith.constant dense<0.000000e+00> : vector<256x64xf32>
    %6 = tpu.matmul %4, %5, %cst {dimension_numbers = #tpu.dot_dimension_numbers<[1], [0], [0], [1], [0, 0, 1, 1], [], []>} : vector<256x576xbf16>, vector<576x64xbf16>, vector<256x64xf32> -> vector<256x64xf32>
    %7 = arith.addf %3, %6 : vector<256x64xf32>
    %c0_6 = arith.constant 0 : index
    %c0_7 = arith.constant 0 : index
    %8 = vector.load %arg7[%c0_6, %c0_7] : memref<256x64xf32, #tpu.memory_space<vmem>>, vector<256x64xf32>
    tpu.vector_store %arg7[%c0_6, %c0_7], %7 {strides = array<i32>} : memref<256x64xf32, #tpu.memory_space<vmem>>, vector<256x64xf32>,
    %c0_i32_8 = arith.constant 0 : i32
    %9 = arith.cmpi eq, %arg2, %c0_i32_8 : i32
    %10 = arith.extui %9 : i1 to i32
    %c0_i32_9 = arith.constant 0 : i32
    %11 = arith.cmpi ne, %10, %c0_i32_9 : i32
    scf.if %11 {
      %c0_10 = arith.constant 0 : index
      %c0_11 = arith.constant 0 : index
      %12 = vector.load %arg7[%c0_10, %c0_11] : memref<256x64xf32, #tpu.memory_space<vmem>>, vector<256x64xf32>
      %c0_12 = arith.constant 0 : index
      %c0_13 = arith.constant 0 : index
      %13 = vector.load %arg5[%c0_12, %c0_13] : memref<1x64xf32, #tpu.memory_space<vmem>>, vector<1x64xf32>
      %14 = vector.broadcast %13 : vector<1x64xf32> to vector<256x64xf32>
      %15 = arith.addf %12, %14 : vector<256x64xf32>
      %cst_14 = arith.constant 0.000000e+00 : f32
      %16 = vector.broadcast %cst_14 : f32 to vector<256x64xf32>
      %17 = arith.maximumf %15, %16 : vector<256x64xf32>
      %18 = arith.truncf %17 : vector<256x64xf32> to vector<256x64xbf16>
      %c0_15 = arith.constant 0 : index
      %c0_16 = arith.constant 0 : index
      %19 = vector.load %arg6[%c0_15, %c0_16] : memref<256x64xbf16, #tpu.memory_space<vmem>>, vector<256x64xbf16>
      tpu.vector_store %arg6[%c0_15, %c0_16], %18 {strides = array<i32>} : memref<256x64xbf16, #tpu.memory_space<vmem>>, vector<256x64xbf16>,
    } else {
    }
    return
  }
  func.func @transform_0(%arg0: i32, %arg1: i32, %arg2: i32) -> (i32, i32) {
    %c0_i32 = arith.constant 0 : i32
    return %arg0, %arg2 : i32, i32
  }
  func.func @transform_1(%arg0: i32, %arg1: i32, %arg2: i32) -> (i32, i32) {
    %c0_i32 = arith.constant 0 : i32
    return %arg2, %arg1 : i32, i32
  }
  func.func @transform_2(%arg0: i32, %arg1: i32, %arg2: i32) -> (i32, i32) {
    %c0_i32 = arith.constant 0 : i32
    %c0_i32_0 = arith.constant 0 : i32
    return %c0_i32, %arg1 : i32, i32
  }
  func.func @transform_3(%arg0: i32, %arg1: i32, %arg2: i32) -> (i32, i32) {
    %c0_i32 = arith.constant 0 : i32
    return %arg0, %arg1 : i32, i32
  }
}

module attributes {stable_mosaic.version = 11 : i64} {
  func.func @_conv_bn_kernel(%arg0: i32, %arg1: i32, %arg2: i32, %arg3: memref<256x64xbf16, #tpu.memory_space<vmem>>, %arg4: memref<64x64xbf16, #tpu.memory_space<vmem>>, %arg5: memref<1x64xf32, #tpu.memory_space<vmem>>, %arg6: memref<256x64xbf16, #tpu.memory_space<vmem>>, %arg7: memref<256x64xf32, #tpu.memory_space<vmem>>) attributes {dimension_semantics = [#tpu.dimension_semantics<parallel>, #tpu.dimension_semantics<parallel>, #tpu.dimension_semantics<arbitrary>], iteration_bounds = array<i64: 2, 1, 1>, scalar_prefetch = 0 : i64, scratch_operands = 1 : i64, tpu.core_type = #tpu.core_type<tc>, window_params = [{transform_indices = @transform_0, window_bounds = array<i64: 256, 64>}, {transform_indices = @transform_1, window_bounds = array<i64: 64, 64>}, {transform_indices = @transform_2, window_bounds = array<i64: 1, 64>}, {transform_indices = @transform_3, window_bounds = array<i64: 256, 64>}]} {
    %c0_i32 = arith.constant 0 : i32
    %0 = arith.cmpi eq, %arg2, %c0_i32 : i32
    %1 = arith.extui %0 : i1 to i32
    %c0_i32_0 = arith.constant 0 : i32
    %2 = arith.cmpi ne, %1, %c0_i32_0 : i32
    scf.if %2 {
      %cst_10 = arith.constant 0.000000e+00 : f32
      %12 = vector.broadcast %cst_10 : f32 to vector<256x64xf32>
      %c0_11 = arith.constant 0 : index
      %c0_12 = arith.constant 0 : index
      %13 = vector.load %arg7[%c0_11, %c0_12] : memref<256x64xf32, #tpu.memory_space<vmem>>, vector<256x64xf32>
      tpu.vector_store %arg7[%c0_11, %c0_12], %12 {strides = array<i32>} : memref<256x64xf32, #tpu.memory_space<vmem>>, vector<256x64xf32>,
    } else {
    }
    %c0 = arith.constant 0 : index
    %c0_1 = arith.constant 0 : index
    %3 = vector.load %arg7[%c0, %c0_1] : memref<256x64xf32, #tpu.memory_space<vmem>>, vector<256x64xf32>
    %c0_2 = arith.constant 0 : index
    %c0_3 = arith.constant 0 : index
    %4 = vector.load %arg3[%c0_2, %c0_3] : memref<256x64xbf16, #tpu.memory_space<vmem>>, vector<256x64xbf16>
    %c0_4 = arith.constant 0 : index
    %c0_5 = arith.constant 0 : index
    %5 = vector.load %arg4[%c0_4, %c0_5] : memref<64x64xbf16, #tpu.memory_space<vmem>>, vector<64x64xbf16>
    %cst = arith.constant dense<0.000000e+00> : vector<256x64xf32>
    %6 = tpu.matmul %4, %5, %cst {dimension_numbers = #tpu.dot_dimension_numbers<[1], [0], [0], [1], [0, 0, 1, 1], [], []>} : vector<256x64xbf16>, vector<64x64xbf16>, vector<256x64xf32> -> vector<256x64xf32>
    %7 = arith.addf %3, %6 : vector<256x64xf32>
    %c0_6 = arith.constant 0 : index
    %c0_7 = arith.constant 0 : index
    %8 = vector.load %arg7[%c0_6, %c0_7] : memref<256x64xf32, #tpu.memory_space<vmem>>, vector<256x64xf32>
    tpu.vector_store %arg7[%c0_6, %c0_7], %7 {strides = array<i32>} : memref<256x64xf32, #tpu.memory_space<vmem>>, vector<256x64xf32>,
    %c0_i32_8 = arith.constant 0 : i32
    %9 = arith.cmpi eq, %arg2, %c0_i32_8 : i32
    %10 = arith.extui %9 : i1 to i32
    %c0_i32_9 = arith.constant 0 : i32
    %11 = arith.cmpi ne, %10, %c0_i32_9 : i32
    scf.if %11 {
      %c0_10 = arith.constant 0 : index
      %c0_11 = arith.constant 0 : index
      %12 = vector.load %arg7[%c0_10, %c0_11] : memref<256x64xf32, #tpu.memory_space<vmem>>, vector<256x64xf32>
      %c0_12 = arith.constant 0 : index
      %c0_13 = arith.constant 0 : index
      %13 = vector.load %arg5[%c0_12, %c0_13] : memref<1x64xf32, #tpu.memory_space<vmem>>, vector<1x64xf32>
      %14 = vector.broadcast %13 : vector<1x64xf32> to vector<256x64xf32>
      %15 = arith.addf %12, %14 : vector<256x64xf32>
      %16 = arith.truncf %15 : vector<256x64xf32> to vector<256x64xbf16>
      %c0_14 = arith.constant 0 : index
      %c0_15 = arith.constant 0 : index
      %17 = vector.load %arg6[%c0_14, %c0_15] : memref<256x64xbf16, #tpu.memory_space<vmem>>, vector<256x64xbf16>
      tpu.vector_store %arg6[%c0_14, %c0_15], %16 {strides = array<i32>} : memref<256x64xbf16, #tpu.memory_space<vmem>>, vector<256x64xbf16>,
    } else {
    }
    return
  }
  func.func @transform_0(%arg0: i32, %arg1: i32, %arg2: i32) -> (i32, i32) {
    %c0_i32 = arith.constant 0 : i32
    return %arg0, %arg2 : i32, i32
  }
  func.func @transform_1(%arg0: i32, %arg1: i32, %arg2: i32) -> (i32, i32) {
    %c0_i32 = arith.constant 0 : i32
    return %arg2, %arg1 : i32, i32
  }
  func.func @transform_2(%arg0: i32, %arg1: i32, %arg2: i32) -> (i32, i32) {
    %c0_i32 = arith.constant 0 : i32
    %c0_i32_0 = arith.constant 0 : i32
    return %c0_i32, %arg1 : i32, i32
  }
  func.func @transform_3(%arg0: i32, %arg1: i32, %arg2: i32) -> (i32, i32) {
    %c0_i32 = arith.constant 0 : i32
    return %arg0, %arg1 : i32, i32
  }
}

module attributes {stable_mosaic.version = 11 : i64} {
  func.func @_conv_bn_residual_kernel(%arg0: i32, %arg1: i32, %arg2: i32, %arg3: memref<256x576xbf16, #tpu.memory_space<vmem>>, %arg4: memref<576x64xbf16, #tpu.memory_space<vmem>>, %arg5: memref<1x64xf32, #tpu.memory_space<vmem>>, %arg6: memref<256x64xbf16, #tpu.memory_space<vmem>>, %arg7: memref<256x64xbf16, #tpu.memory_space<vmem>>, %arg8: memref<256x64xf32, #tpu.memory_space<vmem>>) attributes {dimension_semantics = [#tpu.dimension_semantics<parallel>, #tpu.dimension_semantics<parallel>, #tpu.dimension_semantics<arbitrary>], iteration_bounds = array<i64: 2, 1, 1>, scalar_prefetch = 0 : i64, scratch_operands = 1 : i64, tpu.core_type = #tpu.core_type<tc>, window_params = [{transform_indices = @transform_0, window_bounds = array<i64: 256, 576>}, {transform_indices = @transform_1, window_bounds = array<i64: 576, 64>}, {transform_indices = @transform_2, window_bounds = array<i64: 1, 64>}, {transform_indices = @transform_3, window_bounds = array<i64: 256, 64>}, {transform_indices = @transform_4, window_bounds = array<i64: 256, 64>}]} {
    %c0_i32 = arith.constant 0 : i32
    %0 = arith.cmpi eq, %arg2, %c0_i32 : i32
    %1 = arith.extui %0 : i1 to i32
    %c0_i32_0 = arith.constant 0 : i32
    %2 = arith.cmpi ne, %1, %c0_i32_0 : i32
    scf.if %2 {
      %cst_10 = arith.constant 0.000000e+00 : f32
      %12 = vector.broadcast %cst_10 : f32 to vector<256x64xf32>
      %c0_11 = arith.constant 0 : index
      %c0_12 = arith.constant 0 : index
      %13 = vector.load %arg8[%c0_11, %c0_12] : memref<256x64xf32, #tpu.memory_space<vmem>>, vector<256x64xf32>
      tpu.vector_store %arg8[%c0_11, %c0_12], %12 {strides = array<i32>} : memref<256x64xf32, #tpu.memory_space<vmem>>, vector<256x64xf32>,
    } else {
    }
    %c0 = arith.constant 0 : index
    %c0_1 = arith.constant 0 : index
    %3 = vector.load %arg8[%c0, %c0_1] : memref<256x64xf32, #tpu.memory_space<vmem>>, vector<256x64xf32>
    %c0_2 = arith.constant 0 : index
    %c0_3 = arith.constant 0 : index
    %4 = vector.load %arg3[%c0_2, %c0_3] : memref<256x576xbf16, #tpu.memory_space<vmem>>, vector<256x576xbf16>
    %c0_4 = arith.constant 0 : index
    %c0_5 = arith.constant 0 : index
    %5 = vector.load %arg4[%c0_4, %c0_5] : memref<576x64xbf16, #tpu.memory_space<vmem>>, vector<576x64xbf16>
    %cst = arith.constant dense<0.000000e+00> : vector<256x64xf32>
    %6 = tpu.matmul %4, %5, %cst {dimension_numbers = #tpu.dot_dimension_numbers<[1], [0], [0], [1], [0, 0, 1, 1], [], []>} : vector<256x576xbf16>, vector<576x64xbf16>, vector<256x64xf32> -> vector<256x64xf32>
    %7 = arith.addf %3, %6 : vector<256x64xf32>
    %c0_6 = arith.constant 0 : index
    %c0_7 = arith.constant 0 : index
    %8 = vector.load %arg8[%c0_6, %c0_7] : memref<256x64xf32, #tpu.memory_space<vmem>>, vector<256x64xf32>
    tpu.vector_store %arg8[%c0_6, %c0_7], %7 {strides = array<i32>} : memref<256x64xf32, #tpu.memory_space<vmem>>, vector<256x64xf32>,
    %c0_i32_8 = arith.constant 0 : i32
    %9 = arith.cmpi eq, %arg2, %c0_i32_8 : i32
    %10 = arith.extui %9 : i1 to i32
    %c0_i32_9 = arith.constant 0 : i32
    %11 = arith.cmpi ne, %10, %c0_i32_9 : i32
    scf.if %11 {
      %c0_10 = arith.constant 0 : index
      %c0_11 = arith.constant 0 : index
      %12 = vector.load %arg8[%c0_10, %c0_11] : memref<256x64xf32, #tpu.memory_space<vmem>>, vector<256x64xf32>
      %c0_12 = arith.constant 0 : index
      %c0_13 = arith.constant 0 : index
      %13 = vector.load %arg5[%c0_12, %c0_13] : memref<1x64xf32, #tpu.memory_space<vmem>>, vector<1x64xf32>
      %14 = vector.broadcast %13 : vector<1x64xf32> to vector<256x64xf32>
      %15 = arith.addf %12, %14 : vector<256x64xf32>
      %c0_14 = arith.constant 0 : index
      %c0_15 = arith.constant 0 : index
      %16 = vector.load %arg6[%c0_14, %c0_15] : memref<256x64xbf16, #tpu.memory_space<vmem>>, vector<256x64xbf16>
      %17 = arith.extf %16 : vector<256x64xbf16> to vector<256x64xf32>
      %18 = arith.addf %15, %17 : vector<256x64xf32>
      %cst_16 = arith.constant 0.000000e+00 : f32
      %19 = vector.broadcast %cst_16 : f32 to vector<256x64xf32>
      %20 = arith.maximumf %18, %19 : vector<256x64xf32>
      %21 = arith.truncf %20 : vector<256x64xf32> to vector<256x64xbf16>
      %c0_17 = arith.constant 0 : index
      %c0_18 = arith.constant 0 : index
      %22 = vector.load %arg7[%c0_17, %c0_18] : memref<256x64xbf16, #tpu.memory_space<vmem>>, vector<256x64xbf16>
      tpu.vector_store %arg7[%c0_17, %c0_18], %21 {strides = array<i32>} : memref<256x64xbf16, #tpu.memory_space<vmem>>, vector<256x64xbf16>,
    } else {
    }
    return
  }
  func.func @transform_0(%arg0: i32, %arg1: i32, %arg2: i32) -> (i32, i32) {
    %c0_i32 = arith.constant 0 : i32
    return %arg0, %arg2 : i32, i32
  }
  func.func @transform_1(%arg0: i32, %arg1: i32, %arg2: i32) -> (i32, i32) {
    %c0_i32 = arith.constant 0 : i32
    return %arg2, %arg1 : i32, i32
  }
  func.func @transform_2(%arg0: i32, %arg1: i32, %arg2: i32) -> (i32, i32) {
    %c0_i32 = arith.constant 0 : i32
    %c0_i32_0 = arith.constant 0 : i32
    return %c0_i32, %arg1 : i32, i32
  }
  func.func @transform_3(%arg0: i32, %arg1: i32, %arg2: i32) -> (i32, i32) {
    %c0_i32 = arith.constant 0 : i32
    return %arg0, %arg1 : i32, i32
  }
  func.func @transform_4(%arg0: i32, %arg1: i32, %arg2: i32) -> (i32, i32) {
    %c0_i32 = arith.constant 0 : i32
    return %arg0, %arg1 : i32, i32
  }
}

module attributes {stable_mosaic.version = 11 : i64} {
  func.func @_conv_bn_kernel(%arg0: i32, %arg1: i32, %arg2: i32, %arg3: memref<64x576xbf16, #tpu.memory_space<vmem>>, %arg4: memref<576x128xbf16, #tpu.memory_space<vmem>>, %arg5: memref<1x128xf32, #tpu.memory_space<vmem>>, %arg6: memref<64x128xbf16, #tpu.memory_space<vmem>>, %arg7: memref<64x128xf32, #tpu.memory_space<vmem>>) attributes {dimension_semantics = [#tpu.dimension_semantics<parallel>, #tpu.dimension_semantics<parallel>, #tpu.dimension_semantics<arbitrary>], iteration_bounds = array<i64: 2, 1, 1>, scalar_prefetch = 0 : i64, scratch_operands = 1 : i64, tpu.core_type = #tpu.core_type<tc>, window_params = [{transform_indices = @transform_0, window_bounds = array<i64: 64, 576>}, {transform_indices = @transform_1, window_bounds = array<i64: 576, 128>}, {transform_indices = @transform_2, window_bounds = array<i64: 1, 128>}, {transform_indices = @transform_3, window_bounds = array<i64: 64, 128>}]} {
    %c0_i32 = arith.constant 0 : i32
    %0 = arith.cmpi eq, %arg2, %c0_i32 : i32
    %1 = arith.extui %0 : i1 to i32
    %c0_i32_0 = arith.constant 0 : i32
    %2 = arith.cmpi ne, %1, %c0_i32_0 : i32
    scf.if %2 {
      %cst_10 = arith.constant 0.000000e+00 : f32
      %12 = vector.broadcast %cst_10 : f32 to vector<64x128xf32>
      %c0_11 = arith.constant 0 : index
      %c0_12 = arith.constant 0 : index
      %13 = vector.load %arg7[%c0_11, %c0_12] : memref<64x128xf32, #tpu.memory_space<vmem>>, vector<64x128xf32>
      tpu.vector_store %arg7[%c0_11, %c0_12], %12 {strides = array<i32>} : memref<64x128xf32, #tpu.memory_space<vmem>>, vector<64x128xf32>,
    } else {
    }
    %c0 = arith.constant 0 : index
    %c0_1 = arith.constant 0 : index
    %3 = vector.load %arg7[%c0, %c0_1] : memref<64x128xf32, #tpu.memory_space<vmem>>, vector<64x128xf32>
    %c0_2 = arith.constant 0 : index
    %c0_3 = arith.constant 0 : index
    %4 = vector.load %arg3[%c0_2, %c0_3] : memref<64x576xbf16, #tpu.memory_space<vmem>>, vector<64x576xbf16>
    %c0_4 = arith.constant 0 : index
    %c0_5 = arith.constant 0 : index
    %5 = vector.load %arg4[%c0_4, %c0_5] : memref<576x128xbf16, #tpu.memory_space<vmem>>, vector<576x128xbf16>
    %cst = arith.constant dense<0.000000e+00> : vector<64x128xf32>
    %6 = tpu.matmul %4, %5, %cst {dimension_numbers = #tpu.dot_dimension_numbers<[1], [0], [0], [1], [0, 0, 1, 1], [], []>} : vector<64x576xbf16>, vector<576x128xbf16>, vector<64x128xf32> -> vector<64x128xf32>
    %7 = arith.addf %3, %6 : vector<64x128xf32>
    %c0_6 = arith.constant 0 : index
    %c0_7 = arith.constant 0 : index
    %8 = vector.load %arg7[%c0_6, %c0_7] : memref<64x128xf32, #tpu.memory_space<vmem>>, vector<64x128xf32>
    tpu.vector_store %arg7[%c0_6, %c0_7], %7 {strides = array<i32>} : memref<64x128xf32, #tpu.memory_space<vmem>>, vector<64x128xf32>,
    %c0_i32_8 = arith.constant 0 : i32
    %9 = arith.cmpi eq, %arg2, %c0_i32_8 : i32
    %10 = arith.extui %9 : i1 to i32
    %c0_i32_9 = arith.constant 0 : i32
    %11 = arith.cmpi ne, %10, %c0_i32_9 : i32
    scf.if %11 {
      %c0_10 = arith.constant 0 : index
      %c0_11 = arith.constant 0 : index
      %12 = vector.load %arg7[%c0_10, %c0_11] : memref<64x128xf32, #tpu.memory_space<vmem>>, vector<64x128xf32>
      %c0_12 = arith.constant 0 : index
      %c0_13 = arith.constant 0 : index
      %13 = vector.load %arg5[%c0_12, %c0_13] : memref<1x128xf32, #tpu.memory_space<vmem>>, vector<1x128xf32>
      %14 = vector.broadcast %13 : vector<1x128xf32> to vector<64x128xf32>
      %15 = arith.addf %12, %14 : vector<64x128xf32>
      %cst_14 = arith.constant 0.000000e+00 : f32
      %16 = vector.broadcast %cst_14 : f32 to vector<64x128xf32>
      %17 = arith.maximumf %15, %16 : vector<64x128xf32>
      %18 = arith.truncf %17 : vector<64x128xf32> to vector<64x128xbf16>
      %c0_15 = arith.constant 0 : index
      %c0_16 = arith.constant 0 : index
      %19 = vector.load %arg6[%c0_15, %c0_16] : memref<64x128xbf16, #tpu.memory_space<vmem>>, vector<64x128xbf16>
      tpu.vector_store %arg6[%c0_15, %c0_16], %18 {strides = array<i32>} : memref<64x128xbf16, #tpu.memory_space<vmem>>, vector<64x128xbf16>,
    } else {
    }
    return
  }
  func.func @transform_0(%arg0: i32, %arg1: i32, %arg2: i32) -> (i32, i32) {
    %c0_i32 = arith.constant 0 : i32
    return %arg0, %arg2 : i32, i32
  }
  func.func @transform_1(%arg0: i32, %arg1: i32, %arg2: i32) -> (i32, i32) {
    %c0_i32 = arith.constant 0 : i32
    return %arg2, %arg1 : i32, i32
  }
  func.func @transform_2(%arg0: i32, %arg1: i32, %arg2: i32) -> (i32, i32) {
    %c0_i32 = arith.constant 0 : i32
    %c0_i32_0 = arith.constant 0 : i32
    return %c0_i32, %arg1 : i32, i32
  }
  func.func @transform_3(%arg0: i32, %arg1: i32, %arg2: i32) -> (i32, i32) {
    %c0_i32 = arith.constant 0 : i32
    return %arg0, %arg1 : i32, i32
  }
}

module attributes {stable_mosaic.version = 11 : i64} {
  func.func @_conv_bn_kernel(%arg0: i32, %arg1: i32, %arg2: i32, %arg3: memref<64x64xbf16, #tpu.memory_space<vmem>>, %arg4: memref<64x128xbf16, #tpu.memory_space<vmem>>, %arg5: memref<1x128xf32, #tpu.memory_space<vmem>>, %arg6: memref<64x128xbf16, #tpu.memory_space<vmem>>, %arg7: memref<64x128xf32, #tpu.memory_space<vmem>>) attributes {dimension_semantics = [#tpu.dimension_semantics<parallel>, #tpu.dimension_semantics<parallel>, #tpu.dimension_semantics<arbitrary>], iteration_bounds = array<i64: 2, 1, 1>, scalar_prefetch = 0 : i64, scratch_operands = 1 : i64, tpu.core_type = #tpu.core_type<tc>, window_params = [{transform_indices = @transform_0, window_bounds = array<i64: 64, 64>}, {transform_indices = @transform_1, window_bounds = array<i64: 64, 128>}, {transform_indices = @transform_2, window_bounds = array<i64: 1, 128>}, {transform_indices = @transform_3, window_bounds = array<i64: 64, 128>}]} {
    %c0_i32 = arith.constant 0 : i32
    %0 = arith.cmpi eq, %arg2, %c0_i32 : i32
    %1 = arith.extui %0 : i1 to i32
    %c0_i32_0 = arith.constant 0 : i32
    %2 = arith.cmpi ne, %1, %c0_i32_0 : i32
    scf.if %2 {
      %cst_10 = arith.constant 0.000000e+00 : f32
      %12 = vector.broadcast %cst_10 : f32 to vector<64x128xf32>
      %c0_11 = arith.constant 0 : index
      %c0_12 = arith.constant 0 : index
      %13 = vector.load %arg7[%c0_11, %c0_12] : memref<64x128xf32, #tpu.memory_space<vmem>>, vector<64x128xf32>
      tpu.vector_store %arg7[%c0_11, %c0_12], %12 {strides = array<i32>} : memref<64x128xf32, #tpu.memory_space<vmem>>, vector<64x128xf32>,
    } else {
    }
    %c0 = arith.constant 0 : index
    %c0_1 = arith.constant 0 : index
    %3 = vector.load %arg7[%c0, %c0_1] : memref<64x128xf32, #tpu.memory_space<vmem>>, vector<64x128xf32>
    %c0_2 = arith.constant 0 : index
    %c0_3 = arith.constant 0 : index
    %4 = vector.load %arg3[%c0_2, %c0_3] : memref<64x64xbf16, #tpu.memory_space<vmem>>, vector<64x64xbf16>
    %c0_4 = arith.constant 0 : index
    %c0_5 = arith.constant 0 : index
    %5 = vector.load %arg4[%c0_4, %c0_5] : memref<64x128xbf16, #tpu.memory_space<vmem>>, vector<64x128xbf16>
    %cst = arith.constant dense<0.000000e+00> : vector<64x128xf32>
    %6 = tpu.matmul %4, %5, %cst {dimension_numbers = #tpu.dot_dimension_numbers<[1], [0], [0], [1], [0, 0, 1, 1], [], []>} : vector<64x64xbf16>, vector<64x128xbf16>, vector<64x128xf32> -> vector<64x128xf32>
    %7 = arith.addf %3, %6 : vector<64x128xf32>
    %c0_6 = arith.constant 0 : index
    %c0_7 = arith.constant 0 : index
    %8 = vector.load %arg7[%c0_6, %c0_7] : memref<64x128xf32, #tpu.memory_space<vmem>>, vector<64x128xf32>
    tpu.vector_store %arg7[%c0_6, %c0_7], %7 {strides = array<i32>} : memref<64x128xf32, #tpu.memory_space<vmem>>, vector<64x128xf32>,
    %c0_i32_8 = arith.constant 0 : i32
    %9 = arith.cmpi eq, %arg2, %c0_i32_8 : i32
    %10 = arith.extui %9 : i1 to i32
    %c0_i32_9 = arith.constant 0 : i32
    %11 = arith.cmpi ne, %10, %c0_i32_9 : i32
    scf.if %11 {
      %c0_10 = arith.constant 0 : index
      %c0_11 = arith.constant 0 : index
      %12 = vector.load %arg7[%c0_10, %c0_11] : memref<64x128xf32, #tpu.memory_space<vmem>>, vector<64x128xf32>
      %c0_12 = arith.constant 0 : index
      %c0_13 = arith.constant 0 : index
      %13 = vector.load %arg5[%c0_12, %c0_13] : memref<1x128xf32, #tpu.memory_space<vmem>>, vector<1x128xf32>
      %14 = vector.broadcast %13 : vector<1x128xf32> to vector<64x128xf32>
      %15 = arith.addf %12, %14 : vector<64x128xf32>
      %16 = arith.truncf %15 : vector<64x128xf32> to vector<64x128xbf16>
      %c0_14 = arith.constant 0 : index
      %c0_15 = arith.constant 0 : index
      %17 = vector.load %arg6[%c0_14, %c0_15] : memref<64x128xbf16, #tpu.memory_space<vmem>>, vector<64x128xbf16>
      tpu.vector_store %arg6[%c0_14, %c0_15], %16 {strides = array<i32>} : memref<64x128xbf16, #tpu.memory_space<vmem>>, vector<64x128xbf16>,
    } else {
    }
    return
  }
  func.func @transform_0(%arg0: i32, %arg1: i32, %arg2: i32) -> (i32, i32) {
    %c0_i32 = arith.constant 0 : i32
    return %arg0, %arg2 : i32, i32
  }
  func.func @transform_1(%arg0: i32, %arg1: i32, %arg2: i32) -> (i32, i32) {
    %c0_i32 = arith.constant 0 : i32
    return %arg2, %arg1 : i32, i32
  }
  func.func @transform_2(%arg0: i32, %arg1: i32, %arg2: i32) -> (i32, i32) {
    %c0_i32 = arith.constant 0 : i32
    %c0_i32_0 = arith.constant 0 : i32
    return %c0_i32, %arg1 : i32, i32
  }
  func.func @transform_3(%arg0: i32, %arg1: i32, %arg2: i32) -> (i32, i32) {
    %c0_i32 = arith.constant 0 : i32
    return %arg0, %arg1 : i32, i32
  }
}

module attributes {stable_mosaic.version = 11 : i64} {
  func.func @_conv_bn_residual_kernel(%arg0: i32, %arg1: i32, %arg2: i32, %arg3: memref<64x384xbf16, #tpu.memory_space<vmem>>, %arg4: memref<384x128xbf16, #tpu.memory_space<vmem>>, %arg5: memref<1x128xf32, #tpu.memory_space<vmem>>, %arg6: memref<64x128xbf16, #tpu.memory_space<vmem>>, %arg7: memref<64x128xbf16, #tpu.memory_space<vmem>>, %arg8: memref<64x128xf32, #tpu.memory_space<vmem>>) attributes {dimension_semantics = [#tpu.dimension_semantics<parallel>, #tpu.dimension_semantics<parallel>, #tpu.dimension_semantics<arbitrary>], iteration_bounds = array<i64: 2, 1, 3>, scalar_prefetch = 0 : i64, scratch_operands = 1 : i64, tpu.core_type = #tpu.core_type<tc>, window_params = [{transform_indices = @transform_0, window_bounds = array<i64: 64, 384>}, {transform_indices = @transform_1, window_bounds = array<i64: 384, 128>}, {transform_indices = @transform_2, window_bounds = array<i64: 1, 128>}, {transform_indices = @transform_3, window_bounds = array<i64: 64, 128>}, {transform_indices = @transform_4, window_bounds = array<i64: 64, 128>}]} {
    %c0_i32 = arith.constant 0 : i32
    %0 = arith.cmpi eq, %arg2, %c0_i32 : i32
    %1 = arith.extui %0 : i1 to i32
    %c0_i32_0 = arith.constant 0 : i32
    %2 = arith.cmpi ne, %1, %c0_i32_0 : i32
    scf.if %2 {
      %cst_9 = arith.constant 0.000000e+00 : f32
      %12 = vector.broadcast %cst_9 : f32 to vector<64x128xf32>
      %c0_10 = arith.constant 0 : index
      %c0_11 = arith.constant 0 : index
      %13 = vector.load %arg8[%c0_10, %c0_11] : memref<64x128xf32, #tpu.memory_space<vmem>>, vector<64x128xf32>
      tpu.vector_store %arg8[%c0_10, %c0_11], %12 {strides = array<i32>} : memref<64x128xf32, #tpu.memory_space<vmem>>, vector<64x128xf32>,
    } else {
    }
    %c0 = arith.constant 0 : index
    %c0_1 = arith.constant 0 : index
    %3 = vector.load %arg8[%c0, %c0_1] : memref<64x128xf32, #tpu.memory_space<vmem>>, vector<64x128xf32>
    %c0_2 = arith.constant 0 : index
    %c0_3 = arith.constant 0 : index
    %4 = vector.load %arg3[%c0_2, %c0_3] : memref<64x384xbf16, #tpu.memory_space<vmem>>, vector<64x384xbf16>
    %c0_4 = arith.constant 0 : index
    %c0_5 = arith.constant 0 : index
    %5 = vector.load %arg4[%c0_4, %c0_5] : memref<384x128xbf16, #tpu.memory_space<vmem>>, vector<384x128xbf16>
    %cst = arith.constant dense<0.000000e+00> : vector<64x128xf32>
    %6 = tpu.matmul %4, %5, %cst {dimension_numbers = #tpu.dot_dimension_numbers<[1], [0], [0], [1], [0, 0, 1, 1], [], []>} : vector<64x384xbf16>, vector<384x128xbf16>, vector<64x128xf32> -> vector<64x128xf32>
    %7 = arith.addf %3, %6 : vector<64x128xf32>
    %c0_6 = arith.constant 0 : index
    %c0_7 = arith.constant 0 : index
    %8 = vector.load %arg8[%c0_6, %c0_7] : memref<64x128xf32, #tpu.memory_space<vmem>>, vector<64x128xf32>
    tpu.vector_store %arg8[%c0_6, %c0_7], %7 {strides = array<i32>} : memref<64x128xf32, #tpu.memory_space<vmem>>, vector<64x128xf32>,
    %c2_i32 = arith.constant 2 : i32
    %9 = arith.cmpi eq, %arg2, %c2_i32 : i32
    %10 = arith.extui %9 : i1 to i32
    %c0_i32_8 = arith.constant 0 : i32
    %11 = arith.cmpi ne, %10, %c0_i32_8 : i32
    scf.if %11 {
      %c0_9 = arith.constant 0 : index
      %c0_10 = arith.constant 0 : index
      %12 = vector.load %arg8[%c0_9, %c0_10] : memref<64x128xf32, #tpu.memory_space<vmem>>, vector<64x128xf32>
      %c0_11 = arith.constant 0 : index
      %c0_12 = arith.constant 0 : index
      %13 = vector.load %arg5[%c0_11, %c0_12] : memref<1x128xf32, #tpu.memory_space<vmem>>, vector<1x128xf32>
      %14 = vector.broadcast %13 : vector<1x128xf32> to vector<64x128xf32>
      %15 = arith.addf %12, %14 : vector<64x128xf32>
      %c0_13 = arith.constant 0 : index
      %c0_14 = arith.constant 0 : index
      %16 = vector.load %arg6[%c0_13, %c0_14] : memref<64x128xbf16, #tpu.memory_space<vmem>>, vector<64x128xbf16>
      %17 = arith.extf %16 : vector<64x128xbf16> to vector<64x128xf32>
      %18 = arith.addf %15, %17 : vector<64x128xf32>
      %cst_15 = arith.constant 0.000000e+00 : f32
      %19 = vector.broadcast %cst_15 : f32 to vector<64x128xf32>
      %20 = arith.maximumf %18, %19 : vector<64x128xf32>
      %21 = arith.truncf %20 : vector<64x128xf32> to vector<64x128xbf16>
      %c0_16 = arith.constant 0 : index
      %c0_17 = arith.constant 0 : index
      %22 = vector.load %arg7[%c0_16, %c0_17] : memref<64x128xbf16, #tpu.memory_space<vmem>>, vector<64x128xbf16>
      tpu.vector_store %arg7[%c0_16, %c0_17], %21 {strides = array<i32>} : memref<64x128xbf16, #tpu.memory_space<vmem>>, vector<64x128xbf16>,
    } else {
    }
    return
  }
  func.func @transform_0(%arg0: i32, %arg1: i32, %arg2: i32) -> (i32, i32) {
    %c0_i32 = arith.constant 0 : i32
    return %arg0, %arg2 : i32, i32
  }
  func.func @transform_1(%arg0: i32, %arg1: i32, %arg2: i32) -> (i32, i32) {
    %c0_i32 = arith.constant 0 : i32
    return %arg2, %arg1 : i32, i32
  }
  func.func @transform_2(%arg0: i32, %arg1: i32, %arg2: i32) -> (i32, i32) {
    %c0_i32 = arith.constant 0 : i32
    %c0_i32_0 = arith.constant 0 : i32
    return %c0_i32, %arg1 : i32, i32
  }
  func.func @transform_3(%arg0: i32, %arg1: i32, %arg2: i32) -> (i32, i32) {
    %c0_i32 = arith.constant 0 : i32
    return %arg0, %arg1 : i32, i32
  }
  func.func @transform_4(%arg0: i32, %arg1: i32, %arg2: i32) -> (i32, i32) {
    %c0_i32 = arith.constant 0 : i32
    return %arg0, %arg1 : i32, i32
  }
}

module attributes {stable_mosaic.version = 11 : i64} {
  func.func @_conv_bn_kernel(%arg0: i32, %arg1: i32, %arg2: i32, %arg3: memref<64x384xbf16, #tpu.memory_space<vmem>>, %arg4: memref<384x128xbf16, #tpu.memory_space<vmem>>, %arg5: memref<1x128xf32, #tpu.memory_space<vmem>>, %arg6: memref<64x128xbf16, #tpu.memory_space<vmem>>, %arg7: memref<64x128xf32, #tpu.memory_space<vmem>>) attributes {dimension_semantics = [#tpu.dimension_semantics<parallel>, #tpu.dimension_semantics<parallel>, #tpu.dimension_semantics<arbitrary>], iteration_bounds = array<i64: 2, 1, 3>, scalar_prefetch = 0 : i64, scratch_operands = 1 : i64, tpu.core_type = #tpu.core_type<tc>, window_params = [{transform_indices = @transform_0, window_bounds = array<i64: 64, 384>}, {transform_indices = @transform_1, window_bounds = array<i64: 384, 128>}, {transform_indices = @transform_2, window_bounds = array<i64: 1, 128>}, {transform_indices = @transform_3, window_bounds = array<i64: 64, 128>}]} {
    %c0_i32 = arith.constant 0 : i32
    %0 = arith.cmpi eq, %arg2, %c0_i32 : i32
    %1 = arith.extui %0 : i1 to i32
    %c0_i32_0 = arith.constant 0 : i32
    %2 = arith.cmpi ne, %1, %c0_i32_0 : i32
    scf.if %2 {
      %cst_9 = arith.constant 0.000000e+00 : f32
      %12 = vector.broadcast %cst_9 : f32 to vector<64x128xf32>
      %c0_10 = arith.constant 0 : index
      %c0_11 = arith.constant 0 : index
      %13 = vector.load %arg7[%c0_10, %c0_11] : memref<64x128xf32, #tpu.memory_space<vmem>>, vector<64x128xf32>
      tpu.vector_store %arg7[%c0_10, %c0_11], %12 {strides = array<i32>} : memref<64x128xf32, #tpu.memory_space<vmem>>, vector<64x128xf32>,
    } else {
    }
    %c0 = arith.constant 0 : index
    %c0_1 = arith.constant 0 : index
    %3 = vector.load %arg7[%c0, %c0_1] : memref<64x128xf32, #tpu.memory_space<vmem>>, vector<64x128xf32>
    %c0_2 = arith.constant 0 : index
    %c0_3 = arith.constant 0 : index
    %4 = vector.load %arg3[%c0_2, %c0_3] : memref<64x384xbf16, #tpu.memory_space<vmem>>, vector<64x384xbf16>
    %c0_4 = arith.constant 0 : index
    %c0_5 = arith.constant 0 : index
    %5 = vector.load %arg4[%c0_4, %c0_5] : memref<384x128xbf16, #tpu.memory_space<vmem>>, vector<384x128xbf16>
    %cst = arith.constant dense<0.000000e+00> : vector<64x128xf32>
    %6 = tpu.matmul %4, %5, %cst {dimension_numbers = #tpu.dot_dimension_numbers<[1], [0], [0], [1], [0, 0, 1, 1], [], []>} : vector<64x384xbf16>, vector<384x128xbf16>, vector<64x128xf32> -> vector<64x128xf32>
    %7 = arith.addf %3, %6 : vector<64x128xf32>
    %c0_6 = arith.constant 0 : index
    %c0_7 = arith.constant 0 : index
    %8 = vector.load %arg7[%c0_6, %c0_7] : memref<64x128xf32, #tpu.memory_space<vmem>>, vector<64x128xf32>
    tpu.vector_store %arg7[%c0_6, %c0_7], %7 {strides = array<i32>} : memref<64x128xf32, #tpu.memory_space<vmem>>, vector<64x128xf32>,
    %c2_i32 = arith.constant 2 : i32
    %9 = arith.cmpi eq, %arg2, %c2_i32 : i32
    %10 = arith.extui %9 : i1 to i32
    %c0_i32_8 = arith.constant 0 : i32
    %11 = arith.cmpi ne, %10, %c0_i32_8 : i32
    scf.if %11 {
      %c0_9 = arith.constant 0 : index
      %c0_10 = arith.constant 0 : index
      %12 = vector.load %arg7[%c0_9, %c0_10] : memref<64x128xf32, #tpu.memory_space<vmem>>, vector<64x128xf32>
      %c0_11 = arith.constant 0 : index
      %c0_12 = arith.constant 0 : index
      %13 = vector.load %arg5[%c0_11, %c0_12] : memref<1x128xf32, #tpu.memory_space<vmem>>, vector<1x128xf32>
      %14 = vector.broadcast %13 : vector<1x128xf32> to vector<64x128xf32>
      %15 = arith.addf %12, %14 : vector<64x128xf32>
      %cst_13 = arith.constant 0.000000e+00 : f32
      %16 = vector.broadcast %cst_13 : f32 to vector<64x128xf32>
      %17 = arith.maximumf %15, %16 : vector<64x128xf32>
      %18 = arith.truncf %17 : vector<64x128xf32> to vector<64x128xbf16>
      %c0_14 = arith.constant 0 : index
      %c0_15 = arith.constant 0 : index
      %19 = vector.load %arg6[%c0_14, %c0_15] : memref<64x128xbf16, #tpu.memory_space<vmem>>, vector<64x128xbf16>
      tpu.vector_store %arg6[%c0_14, %c0_15], %18 {strides = array<i32>} : memref<64x128xbf16, #tpu.memory_space<vmem>>, vector<64x128xbf16>,
    } else {
    }
    return
  }
  func.func @transform_0(%arg0: i32, %arg1: i32, %arg2: i32) -> (i32, i32) {
    %c0_i32 = arith.constant 0 : i32
    return %arg0, %arg2 : i32, i32
  }
  func.func @transform_1(%arg0: i32, %arg1: i32, %arg2: i32) -> (i32, i32) {
    %c0_i32 = arith.constant 0 : i32
    return %arg2, %arg1 : i32, i32
  }
  func.func @transform_2(%arg0: i32, %arg1: i32, %arg2: i32) -> (i32, i32) {
    %c0_i32 = arith.constant 0 : i32
    %c0_i32_0 = arith.constant 0 : i32
    return %c0_i32, %arg1 : i32, i32
  }
  func.func @transform_3(%arg0: i32, %arg1: i32, %arg2: i32) -> (i32, i32) {
    %c0_i32 = arith.constant 0 : i32
    return %arg0, %arg1 : i32, i32
  }
}

module attributes {stable_mosaic.version = 11 : i64} {
  func.func @_conv_bn_kernel(%arg0: i32, %arg1: i32, %arg2: i32, %arg3: memref<32x384xbf16, #tpu.memory_space<vmem>>, %arg4: memref<384x128xbf16, #tpu.memory_space<vmem>>, %arg5: memref<1x128xf32, #tpu.memory_space<vmem>>, %arg6: memref<32x128xbf16, #tpu.memory_space<vmem>>, %arg7: memref<32x128xf32, #tpu.memory_space<vmem>>) attributes {dimension_semantics = [#tpu.dimension_semantics<parallel>, #tpu.dimension_semantics<parallel>, #tpu.dimension_semantics<arbitrary>], iteration_bounds = array<i64: 1, 2, 3>, scalar_prefetch = 0 : i64, scratch_operands = 1 : i64, tpu.core_type = #tpu.core_type<tc>, window_params = [{transform_indices = @transform_0, window_bounds = array<i64: 32, 384>}, {transform_indices = @transform_1, window_bounds = array<i64: 384, 128>}, {transform_indices = @transform_2, window_bounds = array<i64: 1, 128>}, {transform_indices = @transform_3, window_bounds = array<i64: 32, 128>}]} {
    %c0_i32 = arith.constant 0 : i32
    %0 = arith.cmpi eq, %arg2, %c0_i32 : i32
    %1 = arith.extui %0 : i1 to i32
    %c0_i32_0 = arith.constant 0 : i32
    %2 = arith.cmpi ne, %1, %c0_i32_0 : i32
    scf.if %2 {
      %cst_9 = arith.constant 0.000000e+00 : f32
      %12 = vector.broadcast %cst_9 : f32 to vector<32x128xf32>
      %c0_10 = arith.constant 0 : index
      %c0_11 = arith.constant 0 : index
      %13 = vector.load %arg7[%c0_10, %c0_11] : memref<32x128xf32, #tpu.memory_space<vmem>>, vector<32x128xf32>
      tpu.vector_store %arg7[%c0_10, %c0_11], %12 {strides = array<i32>} : memref<32x128xf32, #tpu.memory_space<vmem>>, vector<32x128xf32>,
    } else {
    }
    %c0 = arith.constant 0 : index
    %c0_1 = arith.constant 0 : index
    %3 = vector.load %arg7[%c0, %c0_1] : memref<32x128xf32, #tpu.memory_space<vmem>>, vector<32x128xf32>
    %c0_2 = arith.constant 0 : index
    %c0_3 = arith.constant 0 : index
    %4 = vector.load %arg3[%c0_2, %c0_3] : memref<32x384xbf16, #tpu.memory_space<vmem>>, vector<32x384xbf16>
    %c0_4 = arith.constant 0 : index
    %c0_5 = arith.constant 0 : index
    %5 = vector.load %arg4[%c0_4, %c0_5] : memref<384x128xbf16, #tpu.memory_space<vmem>>, vector<384x128xbf16>
    %cst = arith.constant dense<0.000000e+00> : vector<32x128xf32>
    %6 = tpu.matmul %4, %5, %cst {dimension_numbers = #tpu.dot_dimension_numbers<[1], [0], [0], [1], [0, 0, 1, 1], [], []>} : vector<32x384xbf16>, vector<384x128xbf16>, vector<32x128xf32> -> vector<32x128xf32>
    %7 = arith.addf %3, %6 : vector<32x128xf32>
    %c0_6 = arith.constant 0 : index
    %c0_7 = arith.constant 0 : index
    %8 = vector.load %arg7[%c0_6, %c0_7] : memref<32x128xf32, #tpu.memory_space<vmem>>, vector<32x128xf32>
    tpu.vector_store %arg7[%c0_6, %c0_7], %7 {strides = array<i32>} : memref<32x128xf32, #tpu.memory_space<vmem>>, vector<32x128xf32>,
    %c2_i32 = arith.constant 2 : i32
    %9 = arith.cmpi eq, %arg2, %c2_i32 : i32
    %10 = arith.extui %9 : i1 to i32
    %c0_i32_8 = arith.constant 0 : i32
    %11 = arith.cmpi ne, %10, %c0_i32_8 : i32
    scf.if %11 {
      %c0_9 = arith.constant 0 : index
      %c0_10 = arith.constant 0 : index
      %12 = vector.load %arg7[%c0_9, %c0_10] : memref<32x128xf32, #tpu.memory_space<vmem>>, vector<32x128xf32>
      %c0_11 = arith.constant 0 : index
      %c0_12 = arith.constant 0 : index
      %13 = vector.load %arg5[%c0_11, %c0_12] : memref<1x128xf32, #tpu.memory_space<vmem>>, vector<1x128xf32>
      %14 = vector.broadcast %13 : vector<1x128xf32> to vector<32x128xf32>
      %15 = arith.addf %12, %14 : vector<32x128xf32>
      %cst_13 = arith.constant 0.000000e+00 : f32
      %16 = vector.broadcast %cst_13 : f32 to vector<32x128xf32>
      %17 = arith.maximumf %15, %16 : vector<32x128xf32>
      %18 = arith.truncf %17 : vector<32x128xf32> to vector<32x128xbf16>
      %c0_14 = arith.constant 0 : index
      %c0_15 = arith.constant 0 : index
      %19 = vector.load %arg6[%c0_14, %c0_15] : memref<32x128xbf16, #tpu.memory_space<vmem>>, vector<32x128xbf16>
      tpu.vector_store %arg6[%c0_14, %c0_15], %18 {strides = array<i32>} : memref<32x128xbf16, #tpu.memory_space<vmem>>, vector<32x128xbf16>,
    } else {
    }
    return
  }
  func.func @transform_0(%arg0: i32, %arg1: i32, %arg2: i32) -> (i32, i32) {
    %c0_i32 = arith.constant 0 : i32
    return %arg0, %arg2 : i32, i32
  }
  func.func @transform_1(%arg0: i32, %arg1: i32, %arg2: i32) -> (i32, i32) {
    %c0_i32 = arith.constant 0 : i32
    return %arg2, %arg1 : i32, i32
  }
  func.func @transform_2(%arg0: i32, %arg1: i32, %arg2: i32) -> (i32, i32) {
    %c0_i32 = arith.constant 0 : i32
    %c0_i32_0 = arith.constant 0 : i32
    return %c0_i32, %arg1 : i32, i32
  }
  func.func @transform_3(%arg0: i32, %arg1: i32, %arg2: i32) -> (i32, i32) {
    %c0_i32 = arith.constant 0 : i32
    return %arg0, %arg1 : i32, i32
  }
}

module attributes {stable_mosaic.version = 11 : i64} {
  func.func @_conv_bn_kernel(%arg0: i32, %arg1: i32, %arg2: i32, %arg3: memref<32x128xbf16, #tpu.memory_space<vmem>>, %arg4: memref<128x128xbf16, #tpu.memory_space<vmem>>, %arg5: memref<1x128xf32, #tpu.memory_space<vmem>>, %arg6: memref<32x128xbf16, #tpu.memory_space<vmem>>, %arg7: memref<32x128xf32, #tpu.memory_space<vmem>>) attributes {dimension_semantics = [#tpu.dimension_semantics<parallel>, #tpu.dimension_semantics<parallel>, #tpu.dimension_semantics<arbitrary>], iteration_bounds = array<i64: 1, 2, 1>, scalar_prefetch = 0 : i64, scratch_operands = 1 : i64, tpu.core_type = #tpu.core_type<tc>, window_params = [{transform_indices = @transform_0, window_bounds = array<i64: 32, 128>}, {transform_indices = @transform_1, window_bounds = array<i64: 128, 128>}, {transform_indices = @transform_2, window_bounds = array<i64: 1, 128>}, {transform_indices = @transform_3, window_bounds = array<i64: 32, 128>}]} {
    %c0_i32 = arith.constant 0 : i32
    %0 = arith.cmpi eq, %arg2, %c0_i32 : i32
    %1 = arith.extui %0 : i1 to i32
    %c0_i32_0 = arith.constant 0 : i32
    %2 = arith.cmpi ne, %1, %c0_i32_0 : i32
    scf.if %2 {
      %cst_10 = arith.constant 0.000000e+00 : f32
      %12 = vector.broadcast %cst_10 : f32 to vector<32x128xf32>
      %c0_11 = arith.constant 0 : index
      %c0_12 = arith.constant 0 : index
      %13 = vector.load %arg7[%c0_11, %c0_12] : memref<32x128xf32, #tpu.memory_space<vmem>>, vector<32x128xf32>
      tpu.vector_store %arg7[%c0_11, %c0_12], %12 {strides = array<i32>} : memref<32x128xf32, #tpu.memory_space<vmem>>, vector<32x128xf32>,
    } else {
    }
    %c0 = arith.constant 0 : index
    %c0_1 = arith.constant 0 : index
    %3 = vector.load %arg7[%c0, %c0_1] : memref<32x128xf32, #tpu.memory_space<vmem>>, vector<32x128xf32>
    %c0_2 = arith.constant 0 : index
    %c0_3 = arith.constant 0 : index
    %4 = vector.load %arg3[%c0_2, %c0_3] : memref<32x128xbf16, #tpu.memory_space<vmem>>, vector<32x128xbf16>
    %c0_4 = arith.constant 0 : index
    %c0_5 = arith.constant 0 : index
    %5 = vector.load %arg4[%c0_4, %c0_5] : memref<128x128xbf16, #tpu.memory_space<vmem>>, vector<128x128xbf16>
    %cst = arith.constant dense<0.000000e+00> : vector<32x128xf32>
    %6 = tpu.matmul %4, %5, %cst {dimension_numbers = #tpu.dot_dimension_numbers<[1], [0], [0], [1], [0, 0, 1, 1], [], []>} : vector<32x128xbf16>, vector<128x128xbf16>, vector<32x128xf32> -> vector<32x128xf32>
    %7 = arith.addf %3, %6 : vector<32x128xf32>
    %c0_6 = arith.constant 0 : index
    %c0_7 = arith.constant 0 : index
    %8 = vector.load %arg7[%c0_6, %c0_7] : memref<32x128xf32, #tpu.memory_space<vmem>>, vector<32x128xf32>
    tpu.vector_store %arg7[%c0_6, %c0_7], %7 {strides = array<i32>} : memref<32x128xf32, #tpu.memory_space<vmem>>, vector<32x128xf32>,
    %c0_i32_8 = arith.constant 0 : i32
    %9 = arith.cmpi eq, %arg2, %c0_i32_8 : i32
    %10 = arith.extui %9 : i1 to i32
    %c0_i32_9 = arith.constant 0 : i32
    %11 = arith.cmpi ne, %10, %c0_i32_9 : i32
    scf.if %11 {
      %c0_10 = arith.constant 0 : index
      %c0_11 = arith.constant 0 : index
      %12 = vector.load %arg7[%c0_10, %c0_11] : memref<32x128xf32, #tpu.memory_space<vmem>>, vector<32x128xf32>
      %c0_12 = arith.constant 0 : index
      %c0_13 = arith.constant 0 : index
      %13 = vector.load %arg5[%c0_12, %c0_13] : memref<1x128xf32, #tpu.memory_space<vmem>>, vector<1x128xf32>
      %14 = vector.broadcast %13 : vector<1x128xf32> to vector<32x128xf32>
      %15 = arith.addf %12, %14 : vector<32x128xf32>
      %16 = arith.truncf %15 : vector<32x128xf32> to vector<32x128xbf16>
      %c0_14 = arith.constant 0 : index
      %c0_15 = arith.constant 0 : index
      %17 = vector.load %arg6[%c0_14, %c0_15] : memref<32x128xbf16, #tpu.memory_space<vmem>>, vector<32x128xbf16>
      tpu.vector_store %arg6[%c0_14, %c0_15], %16 {strides = array<i32>} : memref<32x128xbf16, #tpu.memory_space<vmem>>, vector<32x128xbf16>,
    } else {
    }
    return
  }
  func.func @transform_0(%arg0: i32, %arg1: i32, %arg2: i32) -> (i32, i32) {
    %c0_i32 = arith.constant 0 : i32
    return %arg0, %arg2 : i32, i32
  }
  func.func @transform_1(%arg0: i32, %arg1: i32, %arg2: i32) -> (i32, i32) {
    %c0_i32 = arith.constant 0 : i32
    return %arg2, %arg1 : i32, i32
  }
  func.func @transform_2(%arg0: i32, %arg1: i32, %arg2: i32) -> (i32, i32) {
    %c0_i32 = arith.constant 0 : i32
    %c0_i32_0 = arith.constant 0 : i32
    return %c0_i32, %arg1 : i32, i32
  }
  func.func @transform_3(%arg0: i32, %arg1: i32, %arg2: i32) -> (i32, i32) {
    %c0_i32 = arith.constant 0 : i32
    return %arg0, %arg1 : i32, i32
  }
}

module attributes {stable_mosaic.version = 11 : i64} {
  func.func @_conv_bn_residual_kernel(%arg0: i32, %arg1: i32, %arg2: i32, %arg3: memref<32x256xbf16, #tpu.memory_space<vmem>>, %arg4: memref<256x128xbf16, #tpu.memory_space<vmem>>, %arg5: memref<1x128xf32, #tpu.memory_space<vmem>>, %arg6: memref<32x128xbf16, #tpu.memory_space<vmem>>, %arg7: memref<32x128xbf16, #tpu.memory_space<vmem>>, %arg8: memref<32x128xf32, #tpu.memory_space<vmem>>) attributes {dimension_semantics = [#tpu.dimension_semantics<parallel>, #tpu.dimension_semantics<parallel>, #tpu.dimension_semantics<arbitrary>], iteration_bounds = array<i64: 1, 2, 9>, scalar_prefetch = 0 : i64, scratch_operands = 1 : i64, tpu.core_type = #tpu.core_type<tc>, window_params = [{transform_indices = @transform_0, window_bounds = array<i64: 32, 256>}, {transform_indices = @transform_1, window_bounds = array<i64: 256, 128>}, {transform_indices = @transform_2, window_bounds = array<i64: 1, 128>}, {transform_indices = @transform_3, window_bounds = array<i64: 32, 128>}, {transform_indices = @transform_4, window_bounds = array<i64: 32, 128>}]} {
    %c0_i32 = arith.constant 0 : i32
    %0 = arith.cmpi eq, %arg2, %c0_i32 : i32
    %1 = arith.extui %0 : i1 to i32
    %c0_i32_0 = arith.constant 0 : i32
    %2 = arith.cmpi ne, %1, %c0_i32_0 : i32
    scf.if %2 {
      %cst_9 = arith.constant 0.000000e+00 : f32
      %12 = vector.broadcast %cst_9 : f32 to vector<32x128xf32>
      %c0_10 = arith.constant 0 : index
      %c0_11 = arith.constant 0 : index
      %13 = vector.load %arg8[%c0_10, %c0_11] : memref<32x128xf32, #tpu.memory_space<vmem>>, vector<32x128xf32>
      tpu.vector_store %arg8[%c0_10, %c0_11], %12 {strides = array<i32>} : memref<32x128xf32, #tpu.memory_space<vmem>>, vector<32x128xf32>,
    } else {
    }
    %c0 = arith.constant 0 : index
    %c0_1 = arith.constant 0 : index
    %3 = vector.load %arg8[%c0, %c0_1] : memref<32x128xf32, #tpu.memory_space<vmem>>, vector<32x128xf32>
    %c0_2 = arith.constant 0 : index
    %c0_3 = arith.constant 0 : index
    %4 = vector.load %arg3[%c0_2, %c0_3] : memref<32x256xbf16, #tpu.memory_space<vmem>>, vector<32x256xbf16>
    %c0_4 = arith.constant 0 : index
    %c0_5 = arith.constant 0 : index
    %5 = vector.load %arg4[%c0_4, %c0_5] : memref<256x128xbf16, #tpu.memory_space<vmem>>, vector<256x128xbf16>
    %cst = arith.constant dense<0.000000e+00> : vector<32x128xf32>
    %6 = tpu.matmul %4, %5, %cst {dimension_numbers = #tpu.dot_dimension_numbers<[1], [0], [0], [1], [0, 0, 1, 1], [], []>} : vector<32x256xbf16>, vector<256x128xbf16>, vector<32x128xf32> -> vector<32x128xf32>
    %7 = arith.addf %3, %6 : vector<32x128xf32>
    %c0_6 = arith.constant 0 : index
    %c0_7 = arith.constant 0 : index
    %8 = vector.load %arg8[%c0_6, %c0_7] : memref<32x128xf32, #tpu.memory_space<vmem>>, vector<32x128xf32>
    tpu.vector_store %arg8[%c0_6, %c0_7], %7 {strides = array<i32>} : memref<32x128xf32, #tpu.memory_space<vmem>>, vector<32x128xf32>,
    %c8_i32 = arith.constant 8 : i32
    %9 = arith.cmpi eq, %arg2, %c8_i32 : i32
    %10 = arith.extui %9 : i1 to i32
    %c0_i32_8 = arith.constant 0 : i32
    %11 = arith.cmpi ne, %10, %c0_i32_8 : i32
    scf.if %11 {
      %c0_9 = arith.constant 0 : index
      %c0_10 = arith.constant 0 : index
      %12 = vector.load %arg8[%c0_9, %c0_10] : memref<32x128xf32, #tpu.memory_space<vmem>>, vector<32x128xf32>
      %c0_11 = arith.constant 0 : index
      %c0_12 = arith.constant 0 : index
      %13 = vector.load %arg5[%c0_11, %c0_12] : memref<1x128xf32, #tpu.memory_space<vmem>>, vector<1x128xf32>
      %14 = vector.broadcast %13 : vector<1x128xf32> to vector<32x128xf32>
      %15 = arith.addf %12, %14 : vector<32x128xf32>
      %c0_13 = arith.constant 0 : index
      %c0_14 = arith.constant 0 : index
      %16 = vector.load %arg6[%c0_13, %c0_14] : memref<32x128xbf16, #tpu.memory_space<vmem>>, vector<32x128xbf16>
      %17 = arith.extf %16 : vector<32x128xbf16> to vector<32x128xf32>
      %18 = arith.addf %15, %17 : vector<32x128xf32>
      %cst_15 = arith.constant 0.000000e+00 : f32
      %19 = vector.broadcast %cst_15 : f32 to vector<32x128xf32>
      %20 = arith.maximumf %18, %19 : vector<32x128xf32>
      %21 = arith.truncf %20 : vector<32x128xf32> to vector<32x128xbf16>
      %c0_16 = arith.constant 0 : index
      %c0_17 = arith.constant 0 : index
      %22 = vector.load %arg7[%c0_16, %c0_17] : memref<32x128xbf16, #tpu.memory_space<vmem>>, vector<32x128xbf16>
      tpu.vector_store %arg7[%c0_16, %c0_17], %21 {strides = array<i32>} : memref<32x128xbf16, #tpu.memory_space<vmem>>, vector<32x128xbf16>,
    } else {
    }
    return
  }
  func.func @transform_0(%arg0: i32, %arg1: i32, %arg2: i32) -> (i32, i32) {
    %c0_i32 = arith.constant 0 : i32
    return %arg0, %arg2 : i32, i32
  }
  func.func @transform_1(%arg0: i32, %arg1: i32, %arg2: i32) -> (i32, i32) {
    %c0_i32 = arith.constant 0 : i32
    return %arg2, %arg1 : i32, i32
  }
  func.func @transform_2(%arg0: i32, %arg1: i32, %arg2: i32) -> (i32, i32) {
    %c0_i32 = arith.constant 0 : i32
    %c0_i32_0 = arith.constant 0 : i32
    return %c0_i32, %arg1 : i32, i32
  }
  func.func @transform_3(%arg0: i32, %arg1: i32, %arg2: i32) -> (i32, i32) {
    %c0_i32 = arith.constant 0 : i32
    return %arg0, %arg1 : i32, i32
  }
  func.func @transform_4(%arg0: i32, %arg1: i32, %arg2: i32) -> (i32, i32) {
    %c0_i32 = arith.constant 0 : i32
    return %arg0, %arg1 : i32, i32
  }
}

module attributes {stable_mosaic.version = 11 : i64} {
  func.func @_conv_bn_kernel(%arg0: i32, %arg1: i32, %arg2: i32, %arg3: memref<32x256xbf16, #tpu.memory_space<vmem>>, %arg4: memref<256x128xbf16, #tpu.memory_space<vmem>>, %arg5: memref<1x128xf32, #tpu.memory_space<vmem>>, %arg6: memref<32x128xbf16, #tpu.memory_space<vmem>>, %arg7: memref<32x128xf32, #tpu.memory_space<vmem>>) attributes {dimension_semantics = [#tpu.dimension_semantics<parallel>, #tpu.dimension_semantics<parallel>, #tpu.dimension_semantics<arbitrary>], iteration_bounds = array<i64: 1, 2, 9>, scalar_prefetch = 0 : i64, scratch_operands = 1 : i64, tpu.core_type = #tpu.core_type<tc>, window_params = [{transform_indices = @transform_0, window_bounds = array<i64: 32, 256>}, {transform_indices = @transform_1, window_bounds = array<i64: 256, 128>}, {transform_indices = @transform_2, window_bounds = array<i64: 1, 128>}, {transform_indices = @transform_3, window_bounds = array<i64: 32, 128>}]} {
    %c0_i32 = arith.constant 0 : i32
    %0 = arith.cmpi eq, %arg2, %c0_i32 : i32
    %1 = arith.extui %0 : i1 to i32
    %c0_i32_0 = arith.constant 0 : i32
    %2 = arith.cmpi ne, %1, %c0_i32_0 : i32
    scf.if %2 {
      %cst_9 = arith.constant 0.000000e+00 : f32
      %12 = vector.broadcast %cst_9 : f32 to vector<32x128xf32>
      %c0_10 = arith.constant 0 : index
      %c0_11 = arith.constant 0 : index
      %13 = vector.load %arg7[%c0_10, %c0_11] : memref<32x128xf32, #tpu.memory_space<vmem>>, vector<32x128xf32>
      tpu.vector_store %arg7[%c0_10, %c0_11], %12 {strides = array<i32>} : memref<32x128xf32, #tpu.memory_space<vmem>>, vector<32x128xf32>,
    } else {
    }
    %c0 = arith.constant 0 : index
    %c0_1 = arith.constant 0 : index
    %3 = vector.load %arg7[%c0, %c0_1] : memref<32x128xf32, #tpu.memory_space<vmem>>, vector<32x128xf32>
    %c0_2 = arith.constant 0 : index
    %c0_3 = arith.constant 0 : index
    %4 = vector.load %arg3[%c0_2, %c0_3] : memref<32x256xbf16, #tpu.memory_space<vmem>>, vector<32x256xbf16>
    %c0_4 = arith.constant 0 : index
    %c0_5 = arith.constant 0 : index
    %5 = vector.load %arg4[%c0_4, %c0_5] : memref<256x128xbf16, #tpu.memory_space<vmem>>, vector<256x128xbf16>
    %cst = arith.constant dense<0.000000e+00> : vector<32x128xf32>
    %6 = tpu.matmul %4, %5, %cst {dimension_numbers = #tpu.dot_dimension_numbers<[1], [0], [0], [1], [0, 0, 1, 1], [], []>} : vector<32x256xbf16>, vector<256x128xbf16>, vector<32x128xf32> -> vector<32x128xf32>
    %7 = arith.addf %3, %6 : vector<32x128xf32>
    %c0_6 = arith.constant 0 : index
    %c0_7 = arith.constant 0 : index
    %8 = vector.load %arg7[%c0_6, %c0_7] : memref<32x128xf32, #tpu.memory_space<vmem>>, vector<32x128xf32>
    tpu.vector_store %arg7[%c0_6, %c0_7], %7 {strides = array<i32>} : memref<32x128xf32, #tpu.memory_space<vmem>>, vector<32x128xf32>,
    %c8_i32 = arith.constant 8 : i32
    %9 = arith.cmpi eq, %arg2, %c8_i32 : i32
    %10 = arith.extui %9 : i1 to i32
    %c0_i32_8 = arith.constant 0 : i32
    %11 = arith.cmpi ne, %10, %c0_i32_8 : i32
    scf.if %11 {
      %c0_9 = arith.constant 0 : index
      %c0_10 = arith.constant 0 : index
      %12 = vector.load %arg7[%c0_9, %c0_10] : memref<32x128xf32, #tpu.memory_space<vmem>>, vector<32x128xf32>
      %c0_11 = arith.constant 0 : index
      %c0_12 = arith.constant 0 : index
      %13 = vector.load %arg5[%c0_11, %c0_12] : memref<1x128xf32, #tpu.memory_space<vmem>>, vector<1x128xf32>
      %14 = vector.broadcast %13 : vector<1x128xf32> to vector<32x128xf32>
      %15 = arith.addf %12, %14 : vector<32x128xf32>
      %cst_13 = arith.constant 0.000000e+00 : f32
      %16 = vector.broadcast %cst_13 : f32 to vector<32x128xf32>
      %17 = arith.maximumf %15, %16 : vector<32x128xf32>
      %18 = arith.truncf %17 : vector<32x128xf32> to vector<32x128xbf16>
      %c0_14 = arith.constant 0 : index
      %c0_15 = arith.constant 0 : index
      %19 = vector.load %arg6[%c0_14, %c0_15] : memref<32x128xbf16, #tpu.memory_space<vmem>>, vector<32x128xbf16>
      tpu.vector_store %arg6[%c0_14, %c0_15], %18 {strides = array<i32>} : memref<32x128xbf16, #tpu.memory_space<vmem>>, vector<32x128xbf16>,
    } else {
    }
    return
  }
  func.func @transform_0(%arg0: i32, %arg1: i32, %arg2: i32) -> (i32, i32) {
    %c0_i32 = arith.constant 0 : i32
    return %arg0, %arg2 : i32, i32
  }
  func.func @transform_1(%arg0: i32, %arg1: i32, %arg2: i32) -> (i32, i32) {
    %c0_i32 = arith.constant 0 : i32
    return %arg2, %arg1 : i32, i32
  }
  func.func @transform_2(%arg0: i32, %arg1: i32, %arg2: i32) -> (i32, i32) {
    %c0_i32 = arith.constant 0 : i32
    %c0_i32_0 = arith.constant 0 : i32
    return %c0_i32, %arg1 : i32, i32
  }
  func.func @transform_3(%arg0: i32, %arg1: i32, %arg2: i32) -> (i32, i32) {
    %c0_i32 = arith.constant 0 : i32
    return %arg0, %arg1 : i32, i32
  }
}

module attributes {stable_mosaic.version = 11 : i64} {
  func.func @_conv_bn_kernel(%arg0: i32, %arg1: i32, %arg2: i32, %arg3: memref<8x256xbf16, #tpu.memory_space<vmem>>, %arg4: memref<256x256xbf16, #tpu.memory_space<vmem>>, %arg5: memref<1x256xf32, #tpu.memory_space<vmem>>, %arg6: memref<8x256xbf16, #tpu.memory_space<vmem>>, %arg7: memref<8x256xf32, #tpu.memory_space<vmem>>) attributes {dimension_semantics = [#tpu.dimension_semantics<parallel>, #tpu.dimension_semantics<parallel>, #tpu.dimension_semantics<arbitrary>], iteration_bounds = array<i64: 1, 2, 9>, scalar_prefetch = 0 : i64, scratch_operands = 1 : i64, tpu.core_type = #tpu.core_type<tc>, window_params = [{transform_indices = @transform_0, window_bounds = array<i64: 8, 256>}, {transform_indices = @transform_1, window_bounds = array<i64: 256, 256>}, {transform_indices = @transform_2, window_bounds = array<i64: 1, 256>}, {transform_indices = @transform_3, window_bounds = array<i64: 8, 256>}]} {
    %c0_i32 = arith.constant 0 : i32
    %0 = arith.cmpi eq, %arg2, %c0_i32 : i32
    %1 = arith.extui %0 : i1 to i32
    %c0_i32_0 = arith.constant 0 : i32
    %2 = arith.cmpi ne, %1, %c0_i32_0 : i32
    scf.if %2 {
      %cst_9 = arith.constant 0.000000e+00 : f32
      %12 = vector.broadcast %cst_9 : f32 to vector<8x256xf32>
      %c0_10 = arith.constant 0 : index
      %c0_11 = arith.constant 0 : index
      %13 = vector.load %arg7[%c0_10, %c0_11] : memref<8x256xf32, #tpu.memory_space<vmem>>, vector<8x256xf32>
      tpu.vector_store %arg7[%c0_10, %c0_11], %12 {strides = array<i32>} : memref<8x256xf32, #tpu.memory_space<vmem>>, vector<8x256xf32>,
    } else {
    }
    %c0 = arith.constant 0 : index
    %c0_1 = arith.constant 0 : index
    %3 = vector.load %arg7[%c0, %c0_1] : memref<8x256xf32, #tpu.memory_space<vmem>>, vector<8x256xf32>
    %c0_2 = arith.constant 0 : index
    %c0_3 = arith.constant 0 : index
    %4 = vector.load %arg3[%c0_2, %c0_3] : memref<8x256xbf16, #tpu.memory_space<vmem>>, vector<8x256xbf16>
    %c0_4 = arith.constant 0 : index
    %c0_5 = arith.constant 0 : index
    %5 = vector.load %arg4[%c0_4, %c0_5] : memref<256x256xbf16, #tpu.memory_space<vmem>>, vector<256x256xbf16>
    %cst = arith.constant dense<0.000000e+00> : vector<8x256xf32>
    %6 = tpu.matmul %4, %5, %cst {dimension_numbers = #tpu.dot_dimension_numbers<[1], [0], [0], [1], [0, 0, 1, 1], [], []>} : vector<8x256xbf16>, vector<256x256xbf16>, vector<8x256xf32> -> vector<8x256xf32>
    %7 = arith.addf %3, %6 : vector<8x256xf32>
    %c0_6 = arith.constant 0 : index
    %c0_7 = arith.constant 0 : index
    %8 = vector.load %arg7[%c0_6, %c0_7] : memref<8x256xf32, #tpu.memory_space<vmem>>, vector<8x256xf32>
    tpu.vector_store %arg7[%c0_6, %c0_7], %7 {strides = array<i32>} : memref<8x256xf32, #tpu.memory_space<vmem>>, vector<8x256xf32>,
    %c8_i32 = arith.constant 8 : i32
    %9 = arith.cmpi eq, %arg2, %c8_i32 : i32
    %10 = arith.extui %9 : i1 to i32
    %c0_i32_8 = arith.constant 0 : i32
    %11 = arith.cmpi ne, %10, %c0_i32_8 : i32
    scf.if %11 {
      %c0_9 = arith.constant 0 : index
      %c0_10 = arith.constant 0 : index
      %12 = vector.load %arg7[%c0_9, %c0_10] : memref<8x256xf32, #tpu.memory_space<vmem>>, vector<8x256xf32>
      %c0_11 = arith.constant 0 : index
      %c0_12 = arith.constant 0 : index
      %13 = vector.load %arg5[%c0_11, %c0_12] : memref<1x256xf32, #tpu.memory_space<vmem>>, vector<1x256xf32>
      %14 = vector.broadcast %13 : vector<1x256xf32> to vector<8x256xf32>
      %15 = arith.addf %12, %14 : vector<8x256xf32>
      %cst_13 = arith.constant 0.000000e+00 : f32
      %16 = vector.broadcast %cst_13 : f32 to vector<8x256xf32>
      %17 = arith.maximumf %15, %16 : vector<8x256xf32>
      %18 = arith.truncf %17 : vector<8x256xf32> to vector<8x256xbf16>
      %c0_14 = arith.constant 0 : index
      %c0_15 = arith.constant 0 : index
      %19 = vector.load %arg6[%c0_14, %c0_15] : memref<8x256xbf16, #tpu.memory_space<vmem>>, vector<8x256xbf16>
      tpu.vector_store %arg6[%c0_14, %c0_15], %18 {strides = array<i32>} : memref<8x256xbf16, #tpu.memory_space<vmem>>, vector<8x256xbf16>,
    } else {
    }
    return
  }
  func.func @transform_0(%arg0: i32, %arg1: i32, %arg2: i32) -> (i32, i32) {
    %c0_i32 = arith.constant 0 : i32
    return %arg0, %arg2 : i32, i32
  }
  func.func @transform_1(%arg0: i32, %arg1: i32, %arg2: i32) -> (i32, i32) {
    %c0_i32 = arith.constant 0 : i32
    return %arg2, %arg1 : i32, i32
  }
  func.func @transform_2(%arg0: i32, %arg1: i32, %arg2: i32) -> (i32, i32) {
    %c0_i32 = arith.constant 0 : i32
    %c0_i32_0 = arith.constant 0 : i32
    return %c0_i32, %arg1 : i32, i32
  }
  func.func @transform_3(%arg0: i32, %arg1: i32, %arg2: i32) -> (i32, i32) {
    %c0_i32 = arith.constant 0 : i32
    return %arg0, %arg1 : i32, i32
  }
}

module attributes {stable_mosaic.version = 11 : i64} {
  func.func @_conv_bn_kernel(%arg0: i32, %arg1: i32, %arg2: i32, %arg3: memref<8x256xbf16, #tpu.memory_space<vmem>>, %arg4: memref<256x256xbf16, #tpu.memory_space<vmem>>, %arg5: memref<1x256xf32, #tpu.memory_space<vmem>>, %arg6: memref<8x256xbf16, #tpu.memory_space<vmem>>, %arg7: memref<8x256xf32, #tpu.memory_space<vmem>>) attributes {dimension_semantics = [#tpu.dimension_semantics<parallel>, #tpu.dimension_semantics<parallel>, #tpu.dimension_semantics<arbitrary>], iteration_bounds = array<i64: 1, 2, 1>, scalar_prefetch = 0 : i64, scratch_operands = 1 : i64, tpu.core_type = #tpu.core_type<tc>, window_params = [{transform_indices = @transform_0, window_bounds = array<i64: 8, 256>}, {transform_indices = @transform_1, window_bounds = array<i64: 256, 256>}, {transform_indices = @transform_2, window_bounds = array<i64: 1, 256>}, {transform_indices = @transform_3, window_bounds = array<i64: 8, 256>}]} {
    %c0_i32 = arith.constant 0 : i32
    %0 = arith.cmpi eq, %arg2, %c0_i32 : i32
    %1 = arith.extui %0 : i1 to i32
    %c0_i32_0 = arith.constant 0 : i32
    %2 = arith.cmpi ne, %1, %c0_i32_0 : i32
    scf.if %2 {
      %cst_10 = arith.constant 0.000000e+00 : f32
      %12 = vector.broadcast %cst_10 : f32 to vector<8x256xf32>
      %c0_11 = arith.constant 0 : index
      %c0_12 = arith.constant 0 : index
      %13 = vector.load %arg7[%c0_11, %c0_12] : memref<8x256xf32, #tpu.memory_space<vmem>>, vector<8x256xf32>
      tpu.vector_store %arg7[%c0_11, %c0_12], %12 {strides = array<i32>} : memref<8x256xf32, #tpu.memory_space<vmem>>, vector<8x256xf32>,
    } else {
    }
    %c0 = arith.constant 0 : index
    %c0_1 = arith.constant 0 : index
    %3 = vector.load %arg7[%c0, %c0_1] : memref<8x256xf32, #tpu.memory_space<vmem>>, vector<8x256xf32>
    %c0_2 = arith.constant 0 : index
    %c0_3 = arith.constant 0 : index
    %4 = vector.load %arg3[%c0_2, %c0_3] : memref<8x256xbf16, #tpu.memory_space<vmem>>, vector<8x256xbf16>
    %c0_4 = arith.constant 0 : index
    %c0_5 = arith.constant 0 : index
    %5 = vector.load %arg4[%c0_4, %c0_5] : memref<256x256xbf16, #tpu.memory_space<vmem>>, vector<256x256xbf16>
    %cst = arith.constant dense<0.000000e+00> : vector<8x256xf32>
    %6 = tpu.matmul %4, %5, %cst {dimension_numbers = #tpu.dot_dimension_numbers<[1], [0], [0], [1], [0, 0, 1, 1], [], []>} : vector<8x256xbf16>, vector<256x256xbf16>, vector<8x256xf32> -> vector<8x256xf32>
    %7 = arith.addf %3, %6 : vector<8x256xf32>
    %c0_6 = arith.constant 0 : index
    %c0_7 = arith.constant 0 : index
    %8 = vector.load %arg7[%c0_6, %c0_7] : memref<8x256xf32, #tpu.memory_space<vmem>>, vector<8x256xf32>
    tpu.vector_store %arg7[%c0_6, %c0_7], %7 {strides = array<i32>} : memref<8x256xf32, #tpu.memory_space<vmem>>, vector<8x256xf32>,
    %c0_i32_8 = arith.constant 0 : i32
    %9 = arith.cmpi eq, %arg2, %c0_i32_8 : i32
    %10 = arith.extui %9 : i1 to i32
    %c0_i32_9 = arith.constant 0 : i32
    %11 = arith.cmpi ne, %10, %c0_i32_9 : i32
    scf.if %11 {
      %c0_10 = arith.constant 0 : index
      %c0_11 = arith.constant 0 : index
      %12 = vector.load %arg7[%c0_10, %c0_11] : memref<8x256xf32, #tpu.memory_space<vmem>>, vector<8x256xf32>
      %c0_12 = arith.constant 0 : index
      %c0_13 = arith.constant 0 : index
      %13 = vector.load %arg5[%c0_12, %c0_13] : memref<1x256xf32, #tpu.memory_space<vmem>>, vector<1x256xf32>
      %14 = vector.broadcast %13 : vector<1x256xf32> to vector<8x256xf32>
      %15 = arith.addf %12, %14 : vector<8x256xf32>
      %16 = arith.truncf %15 : vector<8x256xf32> to vector<8x256xbf16>
      %c0_14 = arith.constant 0 : index
      %c0_15 = arith.constant 0 : index
      %17 = vector.load %arg6[%c0_14, %c0_15] : memref<8x256xbf16, #tpu.memory_space<vmem>>, vector<8x256xbf16>
      tpu.vector_store %arg6[%c0_14, %c0_15], %16 {strides = array<i32>} : memref<8x256xbf16, #tpu.memory_space<vmem>>, vector<8x256xbf16>,
    } else {
    }
    return
  }
  func.func @transform_0(%arg0: i32, %arg1: i32, %arg2: i32) -> (i32, i32) {
    %c0_i32 = arith.constant 0 : i32
    return %arg0, %arg2 : i32, i32
  }
  func.func @transform_1(%arg0: i32, %arg1: i32, %arg2: i32) -> (i32, i32) {
    %c0_i32 = arith.constant 0 : i32
    return %arg2, %arg1 : i32, i32
  }
  func.func @transform_2(%arg0: i32, %arg1: i32, %arg2: i32) -> (i32, i32) {
    %c0_i32 = arith.constant 0 : i32
    %c0_i32_0 = arith.constant 0 : i32
    return %c0_i32, %arg1 : i32, i32
  }
  func.func @transform_3(%arg0: i32, %arg1: i32, %arg2: i32) -> (i32, i32) {
    %c0_i32 = arith.constant 0 : i32
    return %arg0, %arg1 : i32, i32
  }
}

module attributes {stable_mosaic.version = 11 : i64} {
  func.func @_conv_bn_residual_kernel(%arg0: i32, %arg1: i32, %arg2: i32, %arg3: memref<8x512xbf16, #tpu.memory_space<vmem>>, %arg4: memref<512x256xbf16, #tpu.memory_space<vmem>>, %arg5: memref<1x256xf32, #tpu.memory_space<vmem>>, %arg6: memref<8x256xbf16, #tpu.memory_space<vmem>>, %arg7: memref<8x256xbf16, #tpu.memory_space<vmem>>, %arg8: memref<8x256xf32, #tpu.memory_space<vmem>>) attributes {dimension_semantics = [#tpu.dimension_semantics<parallel>, #tpu.dimension_semantics<parallel>, #tpu.dimension_semantics<arbitrary>], iteration_bounds = array<i64: 1, 2, 9>, scalar_prefetch = 0 : i64, scratch_operands = 1 : i64, tpu.core_type = #tpu.core_type<tc>, window_params = [{transform_indices = @transform_0, window_bounds = array<i64: 8, 512>}, {transform_indices = @transform_1, window_bounds = array<i64: 512, 256>}, {transform_indices = @transform_2, window_bounds = array<i64: 1, 256>}, {transform_indices = @transform_3, window_bounds = array<i64: 8, 256>}, {transform_indices = @transform_4, window_bounds = array<i64: 8, 256>}]} {
    %c0_i32 = arith.constant 0 : i32
    %0 = arith.cmpi eq, %arg2, %c0_i32 : i32
    %1 = arith.extui %0 : i1 to i32
    %c0_i32_0 = arith.constant 0 : i32
    %2 = arith.cmpi ne, %1, %c0_i32_0 : i32
    scf.if %2 {
      %cst_9 = arith.constant 0.000000e+00 : f32
      %12 = vector.broadcast %cst_9 : f32 to vector<8x256xf32>
      %c0_10 = arith.constant 0 : index
      %c0_11 = arith.constant 0 : index
      %13 = vector.load %arg8[%c0_10, %c0_11] : memref<8x256xf32, #tpu.memory_space<vmem>>, vector<8x256xf32>
      tpu.vector_store %arg8[%c0_10, %c0_11], %12 {strides = array<i32>} : memref<8x256xf32, #tpu.memory_space<vmem>>, vector<8x256xf32>,
    } else {
    }
    %c0 = arith.constant 0 : index
    %c0_1 = arith.constant 0 : index
    %3 = vector.load %arg8[%c0, %c0_1] : memref<8x256xf32, #tpu.memory_space<vmem>>, vector<8x256xf32>
    %c0_2 = arith.constant 0 : index
    %c0_3 = arith.constant 0 : index
    %4 = vector.load %arg3[%c0_2, %c0_3] : memref<8x512xbf16, #tpu.memory_space<vmem>>, vector<8x512xbf16>
    %c0_4 = arith.constant 0 : index
    %c0_5 = arith.constant 0 : index
    %5 = vector.load %arg4[%c0_4, %c0_5] : memref<512x256xbf16, #tpu.memory_space<vmem>>, vector<512x256xbf16>
    %cst = arith.constant dense<0.000000e+00> : vector<8x256xf32>
    %6 = tpu.matmul %4, %5, %cst {dimension_numbers = #tpu.dot_dimension_numbers<[1], [0], [0], [1], [0, 0, 1, 1], [], []>} : vector<8x512xbf16>, vector<512x256xbf16>, vector<8x256xf32> -> vector<8x256xf32>
    %7 = arith.addf %3, %6 : vector<8x256xf32>
    %c0_6 = arith.constant 0 : index
    %c0_7 = arith.constant 0 : index
    %8 = vector.load %arg8[%c0_6, %c0_7] : memref<8x256xf32, #tpu.memory_space<vmem>>, vector<8x256xf32>
    tpu.vector_store %arg8[%c0_6, %c0_7], %7 {strides = array<i32>} : memref<8x256xf32, #tpu.memory_space<vmem>>, vector<8x256xf32>,
    %c8_i32 = arith.constant 8 : i32
    %9 = arith.cmpi eq, %arg2, %c8_i32 : i32
    %10 = arith.extui %9 : i1 to i32
    %c0_i32_8 = arith.constant 0 : i32
    %11 = arith.cmpi ne, %10, %c0_i32_8 : i32
    scf.if %11 {
      %c0_9 = arith.constant 0 : index
      %c0_10 = arith.constant 0 : index
      %12 = vector.load %arg8[%c0_9, %c0_10] : memref<8x256xf32, #tpu.memory_space<vmem>>, vector<8x256xf32>
      %c0_11 = arith.constant 0 : index
      %c0_12 = arith.constant 0 : index
      %13 = vector.load %arg5[%c0_11, %c0_12] : memref<1x256xf32, #tpu.memory_space<vmem>>, vector<1x256xf32>
      %14 = vector.broadcast %13 : vector<1x256xf32> to vector<8x256xf32>
      %15 = arith.addf %12, %14 : vector<8x256xf32>
      %c0_13 = arith.constant 0 : index
      %c0_14 = arith.constant 0 : index
      %16 = vector.load %arg6[%c0_13, %c0_14] : memref<8x256xbf16, #tpu.memory_space<vmem>>, vector<8x256xbf16>
      %17 = arith.extf %16 : vector<8x256xbf16> to vector<8x256xf32>
      %18 = arith.addf %15, %17 : vector<8x256xf32>
      %cst_15 = arith.constant 0.000000e+00 : f32
      %19 = vector.broadcast %cst_15 : f32 to vector<8x256xf32>
      %20 = arith.maximumf %18, %19 : vector<8x256xf32>
      %21 = arith.truncf %20 : vector<8x256xf32> to vector<8x256xbf16>
      %c0_16 = arith.constant 0 : index
      %c0_17 = arith.constant 0 : index
      %22 = vector.load %arg7[%c0_16, %c0_17] : memref<8x256xbf16, #tpu.memory_space<vmem>>, vector<8x256xbf16>
      tpu.vector_store %arg7[%c0_16, %c0_17], %21 {strides = array<i32>} : memref<8x256xbf16, #tpu.memory_space<vmem>>, vector<8x256xbf16>,
    } else {
    }
    return
  }
  func.func @transform_0(%arg0: i32, %arg1: i32, %arg2: i32) -> (i32, i32) {
    %c0_i32 = arith.constant 0 : i32
    return %arg0, %arg2 : i32, i32
  }
  func.func @transform_1(%arg0: i32, %arg1: i32, %arg2: i32) -> (i32, i32) {
    %c0_i32 = arith.constant 0 : i32
    return %arg2, %arg1 : i32, i32
  }
  func.func @transform_2(%arg0: i32, %arg1: i32, %arg2: i32) -> (i32, i32) {
    %c0_i32 = arith.constant 0 : i32
    %c0_i32_0 = arith.constant 0 : i32
    return %c0_i32, %arg1 : i32, i32
  }
  func.func @transform_3(%arg0: i32, %arg1: i32, %arg2: i32) -> (i32, i32) {
    %c0_i32 = arith.constant 0 : i32
    return %arg0, %arg1 : i32, i32
  }
  func.func @transform_4(%arg0: i32, %arg1: i32, %arg2: i32) -> (i32, i32) {
    %c0_i32 = arith.constant 0 : i32
    return %arg0, %arg1 : i32, i32
  }
}

module attributes {stable_mosaic.version = 11 : i64} {
  func.func @_conv_bn_kernel(%arg0: i32, %arg1: i32, %arg2: i32, %arg3: memref<8x512xbf16, #tpu.memory_space<vmem>>, %arg4: memref<512x256xbf16, #tpu.memory_space<vmem>>, %arg5: memref<1x256xf32, #tpu.memory_space<vmem>>, %arg6: memref<8x256xbf16, #tpu.memory_space<vmem>>, %arg7: memref<8x256xf32, #tpu.memory_space<vmem>>) attributes {dimension_semantics = [#tpu.dimension_semantics<parallel>, #tpu.dimension_semantics<parallel>, #tpu.dimension_semantics<arbitrary>], iteration_bounds = array<i64: 1, 2, 9>, scalar_prefetch = 0 : i64, scratch_operands = 1 : i64, tpu.core_type = #tpu.core_type<tc>, window_params = [{transform_indices = @transform_0, window_bounds = array<i64: 8, 512>}, {transform_indices = @transform_1, window_bounds = array<i64: 512, 256>}, {transform_indices = @transform_2, window_bounds = array<i64: 1, 256>}, {transform_indices = @transform_3, window_bounds = array<i64: 8, 256>}]} {
    %c0_i32 = arith.constant 0 : i32
    %0 = arith.cmpi eq, %arg2, %c0_i32 : i32
    %1 = arith.extui %0 : i1 to i32
    %c0_i32_0 = arith.constant 0 : i32
    %2 = arith.cmpi ne, %1, %c0_i32_0 : i32
    scf.if %2 {
      %cst_9 = arith.constant 0.000000e+00 : f32
      %12 = vector.broadcast %cst_9 : f32 to vector<8x256xf32>
      %c0_10 = arith.constant 0 : index
      %c0_11 = arith.constant 0 : index
      %13 = vector.load %arg7[%c0_10, %c0_11] : memref<8x256xf32, #tpu.memory_space<vmem>>, vector<8x256xf32>
      tpu.vector_store %arg7[%c0_10, %c0_11], %12 {strides = array<i32>} : memref<8x256xf32, #tpu.memory_space<vmem>>, vector<8x256xf32>,
    } else {
    }
    %c0 = arith.constant 0 : index
    %c0_1 = arith.constant 0 : index
    %3 = vector.load %arg7[%c0, %c0_1] : memref<8x256xf32, #tpu.memory_space<vmem>>, vector<8x256xf32>
    %c0_2 = arith.constant 0 : index
    %c0_3 = arith.constant 0 : index
    %4 = vector.load %arg3[%c0_2, %c0_3] : memref<8x512xbf16, #tpu.memory_space<vmem>>, vector<8x512xbf16>
    %c0_4 = arith.constant 0 : index
    %c0_5 = arith.constant 0 : index
    %5 = vector.load %arg4[%c0_4, %c0_5] : memref<512x256xbf16, #tpu.memory_space<vmem>>, vector<512x256xbf16>
    %cst = arith.constant dense<0.000000e+00> : vector<8x256xf32>
    %6 = tpu.matmul %4, %5, %cst {dimension_numbers = #tpu.dot_dimension_numbers<[1], [0], [0], [1], [0, 0, 1, 1], [], []>} : vector<8x512xbf16>, vector<512x256xbf16>, vector<8x256xf32> -> vector<8x256xf32>
    %7 = arith.addf %3, %6 : vector<8x256xf32>
    %c0_6 = arith.constant 0 : index
    %c0_7 = arith.constant 0 : index
    %8 = vector.load %arg7[%c0_6, %c0_7] : memref<8x256xf32, #tpu.memory_space<vmem>>, vector<8x256xf32>
    tpu.vector_store %arg7[%c0_6, %c0_7], %7 {strides = array<i32>} : memref<8x256xf32, #tpu.memory_space<vmem>>, vector<8x256xf32>,
    %c8_i32 = arith.constant 8 : i32
    %9 = arith.cmpi eq, %arg2, %c8_i32 : i32
    %10 = arith.extui %9 : i1 to i32
    %c0_i32_8 = arith.constant 0 : i32
    %11 = arith.cmpi ne, %10, %c0_i32_8 : i32
    scf.if %11 {
      %c0_9 = arith.constant 0 : index
      %c0_10 = arith.constant 0 : index
      %12 = vector.load %arg7[%c0_9, %c0_10] : memref<8x256xf32, #tpu.memory_space<vmem>>, vector<8x256xf32>
      %c0_11 = arith.constant 0 : index
      %c0_12 = arith.constant 0 : index
      %13 = vector.load %arg5[%c0_11, %c0_12] : memref<1x256xf32, #tpu.memory_space<vmem>>, vector<1x256xf32>
      %14 = vector.broadcast %13 : vector<1x256xf32> to vector<8x256xf32>
      %15 = arith.addf %12, %14 : vector<8x256xf32>
      %cst_13 = arith.constant 0.000000e+00 : f32
      %16 = vector.broadcast %cst_13 : f32 to vector<8x256xf32>
      %17 = arith.maximumf %15, %16 : vector<8x256xf32>
      %18 = arith.truncf %17 : vector<8x256xf32> to vector<8x256xbf16>
      %c0_14 = arith.constant 0 : index
      %c0_15 = arith.constant 0 : index
      %19 = vector.load %arg6[%c0_14, %c0_15] : memref<8x256xbf16, #tpu.memory_space<vmem>>, vector<8x256xbf16>
      tpu.vector_store %arg6[%c0_14, %c0_15], %18 {strides = array<i32>} : memref<8x256xbf16, #tpu.memory_space<vmem>>, vector<8x256xbf16>,
    } else {
    }
    return
  }
  func.func @transform_0(%arg0: i32, %arg1: i32, %arg2: i32) -> (i32, i32) {
    %c0_i32 = arith.constant 0 : i32
    return %arg0, %arg2 : i32, i32
  }
  func.func @transform_1(%arg0: i32, %arg1: i32, %arg2: i32) -> (i32, i32) {
    %c0_i32 = arith.constant 0 : i32
    return %arg2, %arg1 : i32, i32
  }
  func.func @transform_2(%arg0: i32, %arg1: i32, %arg2: i32) -> (i32, i32) {
    %c0_i32 = arith.constant 0 : i32
    %c0_i32_0 = arith.constant 0 : i32
    return %c0_i32, %arg1 : i32, i32
  }
  func.func @transform_3(%arg0: i32, %arg1: i32, %arg2: i32) -> (i32, i32) {
    %c0_i32 = arith.constant 0 : i32
    return %arg0, %arg1 : i32, i32
  }
}

</mosaic_0001>

<bundles_post_ra>
// kernel: _lambda_.21
= control target key start
LH: loop header
LB: loop body
LE: loop exit
PB: predicated region body
PF: predicated region fallthrough
CT: control target
= control target key end

     0   :  { %s1361_s12 = smov 0   ;;  %s1363_s13 = smov 0   ;;  %s1618_s0 = inlined_call_operand.vmem [shape: bf16[2048,9], index: 0, kind: input, shape index: {}]   ;;  %s1619_s1 = inlined_call_operand.vmem [shape: bf16[9,64], index: 1, kind: input, shape index: {}]   ;;  %s1620_s2 = inlined_call_operand.vmem [shape: f32[1,64], index: 2, kind: input, shape index: {}]   ;;  %s1621_s3 = inlined_call_operand.vmem [shape: bf16[2048,64], index: 3, kind: output, shape index: {}]  }
   0x1   :  { %s1365_s14 = smov 0  }
   0x2 LB: > { %s32_s15 = sadd.s32 1, %s1333_s13  ;;  %p1114_p0 = scmp.ge.s32.totalorder %s1337_s14, 1  ;;  %s1337_s14 = sphi %s1365_s14, %s13_s14   ;;  %s1333_s13 = sphi %s1363_s13, %s1624_s13   ;;  %s1329_s12 = sphi %s1361_s12, %s1623_s12  }
   0x3   : > { %p34_p1 = scmp.ge.s32.totalorder %s32_s15, 8  ;;  %p188_p2 = scmp.lt.s32.totalorder %s1337_s14, 9 }
   0x5   : > { %s1626_s15 = smov (%p34_p1, %s32_s15), 0  ;;  %p189_p3 = pnand %p1114_p0, %p188_p2 }
   0x6   : > { %v1298_v0 = vld [vmem:[%s1619_s1] sm:$0x1f] (!%p189_p3)   ;;  %vm497_vm0 = vcmask (!%p189_p3), 1043456   ;;  %vm498_vm1 = vcmask (!%p189_p3), 1044480   ;;  %s1115_s18 = sshll.u32 (!%p189_p3), %s1329_s12, 5  ;;  %v1339_v1 = vmov (!%p189_p3), 65535  }
   0x7   : > { %192 = sbr.rel (%p189_p3) target bundleno = 281 (0x119), region = 32  ;;  %v499_v2 = vsel (!%p189_p3), %vm497_vm0, 4294967295, %v1339_v1  ;;  %p1387_p4 = scmp.lt.s32.totalorder (!%p189_p3), %s1115_s18, 255  ;;  %vm264_vm2 = vcmask (!%p189_p3), 523264   ;;  %v1340_v4 = vmov (!%p189_p3), 0.0   ;;  %vm448_vm3 = vcmask (!%p189_p3), 72704  }
   0x8   : > { %v500_v3 = vsel (!%p189_p3), %vm498_vm1, %v499_v2, 0  ;;  %267 = vst.msk [vmem:[#allocation2 + $0x10] sm:$0xff] (!%p189_p3), %vm264_vm2, %v1340_v4  ;;  %265 = vst.msk [vmem:[#allocation2] sm:$0xff] (!%p189_p3), %vm264_vm2, %v1340_v4  ;;  %v1480_v49 = vld [vmem:[%s1620_s2] ss:$0 sm:$0xff] (!%p189_p3)  ;;  %vm964_vm4 = vcmask (!%p189_p3), 519168  }
   0x9   : > { %266 = vst.msk [vmem:[#allocation2 + $0x8] sm:$0xff] (!%p189_p3), %vm264_vm2, %v1340_v4  ;;  %268 = vst.msk [vmem:[#allocation2 + $0x18] sm:$0xff] (!%p189_p3), %vm264_vm2, %v1340_v4  ;;  %v502_v5 = vand.u32 (!%p189_p3), %v1298_v0, %v500_v3 }
   0xa   : > { %269 = vst.msk [vmem:[#allocation2 + $0x20] sm:$0xff] (!%p189_p3), %vm264_vm2, %v1340_v4  ;;  %270 = vst.msk [vmem:[#allocation2 + $0x28] sm:$0xff] (!%p189_p3), %vm264_vm2, %v1340_v4 }
   0xb   : > { %271 = vst.msk [vmem:[#allocation2 + $0x30] sm:$0xff] (!%p189_p3), %vm264_vm2, %v1340_v4  ;;  %272 = vst.msk [vmem:[#allocation2 + $0x38] sm:$0xff] (!%p189_p3), %vm264_vm2, %v1340_v4  ;;  %1236 = vmatprep.subr.bf16.mxu0 (!%p189_p3), %v502_v5  ;;  %1270 = vmatprep.subr.bf16.mxu1 (!%p189_p3), %v502_v5 }
   0xc   : > { %273 = vst.msk [vmem:[#allocation2 + $0x40] sm:$0xff] (!%p189_p3), %vm264_vm2, %v1340_v4  ;;  %274 = vst.msk [vmem:[#allocation2 + $0x48] sm:$0xff] (!%p189_p3), %vm264_vm2, %v1340_v4  ;;  %1237 = vmatpush3.bf16.msra.mxu0 (!%p189_p3), %v502_v5  ;;  %1271 = vmatpush3.bf16.msra.mxu1 (!%p189_p3), %v502_v5 }
   0xd   : > { %275 = vst.msk [vmem:[#allocation2 + $0x50] sm:$0xff] (!%p189_p3), %vm264_vm2, %v1340_v4  ;;  %276 = vst.msk [vmem:[#allocation2 + $0x58] sm:$0xff] (!%p189_p3), %vm264_vm2, %v1340_v4 }
   0xe   : > { %277 = vst.msk [vmem:[#allocation2 + $0x60] sm:$0xff] %vm264_vm2, %v1340_v4  ;;  %278 = vst.msk [vmem:[#allocation2 + $0x68] sm:$0xff] %vm264_vm2, %v1340_v4  ;;  %s1628_s18 = smov (!%p1387_p4, %s1115_s18), 255 }
   0xf   : > { %279 = vst.msk [vmem:[#allocation2 + $0x70] sm:$0xff] %vm264_vm2, %v1340_v4  ;;  %280 = vst.msk [vmem:[#allocation2 + $0x78] sm:$0xff] %vm264_vm2, %v1340_v4  ;;  %s1116_s20 = sshll.u32 %s1628_s18, 2  ;;  %v299_v22 = vld [vmem:[#allocation2 + $0x10] sm:$0xff]  ;;  %v297_v24 = vld [vmem:[#allocation2] sm:$0xff] }
  0x10   : > { %281 = vst.msk [vmem:[#allocation2 + $0x80] sm:$0xff] %vm264_vm2, %v1340_v4  ;;  %282 = vst.msk [vmem:[#allocation2 + $0x88] sm:$0xff] %vm264_vm2, %v1340_v4  ;;  %s1435_s23 = scalar_lea.vmem %s1618_s0, %s1116_s20  ;;  %v300_v27 = vld [vmem:[#allocation2 + $0x18] sm:$0xff]  ;;  %v298_v32 = vld [vmem:[#allocation2 + $0x8] sm:$0xff]  ;;  %s1497_s28 = scalar_lea.vmem %s1621_s3, %s1116_s20 }
  0x11   : > { %283 = vst.msk [vmem:[#allocation2 + $0x90] sm:$0xff] %vm264_vm2, %v1340_v4  ;;  %284 = vst.msk [vmem:[#allocation2 + $0x98] sm:$0xff] %vm264_vm2, %v1340_v4  ;;  %v1299_v6 = vld [vmem:[%s1435_s23] sm:$0xff]   ;;  %v1301_v8 = vld [vmem:[%s1435_s23 + $0x8] sm:$0xff]  }
  0x12   : > { %285 = vst.msk [vmem:[#allocation2 + $0xa0] sm:$0xff] %vm264_vm2, %v1340_v4  ;;  %286 = vst.msk [vmem:[#allocation2 + $0xa8] sm:$0xff] %vm264_vm2, %v1340_v4  ;;  %v1300_v7 = vld [vmem:[%s1435_s23 + $0x40] sm:$0xff]   ;;  %1238 = vmatprep.mubr.msk.bf16.mxu0 %vm448_vm3, %v1299_v6  ;;  %v1302_v9 = vld [vmem:[%s1435_s23 + $0x48] sm:$0xff]  }
  0x13   : > { %287 = vst.msk [vmem:[#allocation2 + $0xb0] sm:$0xff] %vm264_vm2, %v1340_v4  ;;  %288 = vst.msk [vmem:[#allocation2 + $0xb8] sm:$0xff] %vm264_vm2, %v1340_v4  ;;  %1254 = vmatprep.mubr.msk.bf16.mxu1 %vm448_vm3, %v1300_v7  ;;  %1239 = vmatmul.mubr.msk.bf16.vlgmr.msra.gmra.mrb[0].mxu0 %vm448_vm3, %v1301_v8  ;;  %v1303_v10 = vld [vmem:[%s1435_s23 + $0x10] sm:$0xff]   ;;  %v1305_v12 = vld [vmem:[%s1435_s23 + $0x18] sm:$0xff]  }
  0x14   : > { %289 = vst.msk [vmem:[#allocation2 + $0xc0] sm:$0xff] %vm264_vm2, %v1340_v4  ;;  %290 = vst.msk [vmem:[#allocation2 + $0xc8] sm:$0xff] %vm264_vm2, %v1340_v4  ;;  %1255 = vmatmul.mubr.msk.bf16.vlgmr.msra.gmra.mrb[0].mxu1 %vm448_vm3, %v1302_v9  ;;  %v1304_v11 = vld [vmem:[%s1435_s23 + $0x50] sm:$0xff]   ;;  %1242 = vmatprep.mubr.msk.bf16.mxu0 %vm448_vm3, %v1303_v10  ;;  %v1306_v13 = vld [vmem:[%s1435_s23 + $0x58] sm:$0xff]  }
  0x15   : > { %291 = vst.msk [vmem:[#allocation2 + $0xd0] sm:$0xff] %vm264_vm2, %v1340_v4  ;;  %292 = vst.msk [vmem:[#allocation2 + $0xd8] sm:$0xff] %vm264_vm2, %v1340_v4  ;;  %1258 = vmatprep.mubr.msk.bf16.mxu1 %vm448_vm3, %v1304_v11  ;;  %v1307_v14 = vld [vmem:[%s1435_s23 + $0x20] sm:$0xff]   ;;  %v1309_v16 = vld [vmem:[%s1435_s23 + $0x28] sm:$0xff]  }
  0x16   : > { %293 = vst.msk [vmem:[#allocation2 + $0xe0] sm:$0xff] %vm264_vm2, %v1340_v4  ;;  %294 = vst.msk [vmem:[#allocation2 + $0xe8] sm:$0xff] %vm264_vm2, %v1340_v4  ;;  %v1308_v15 = vld [vmem:[%s1435_s23 + $0x60] sm:$0xff]   ;;  %v1310_v17 = vld [vmem:[%s1435_s23 + $0x68] sm:$0xff]  }
  0x17   : > { %295 = vst.msk [vmem:[#allocation2 + $0xf0] sm:$0xff] %vm264_vm2, %v1340_v4  ;;  %296 = vst.msk [vmem:[#allocation2 + $0xf8] sm:$0xff] %vm264_vm2, %v1340_v4  ;;  %v1311_v18 = vld [vmem:[%s1435_s23 + $0x30] sm:$0xff]   ;;  %v1313_v20 = vld [vmem:[%s1435_s23 + $0x38] sm:$0xff]  }
  0x18   : > { %v1312_v19 = vld [vmem:[%s1435_s23 + $0x70] sm:$0xff]   ;;  %v1314_v21 = vld [vmem:[%s1435_s23 + $0x78] sm:$0xff]   ;;  %v313_v26 = vld [vmem:[#allocation2 + $0x80] sm:$0xff] }
  0x19   : > { %v315_v23 = vld [vmem:[#allocation2 + $0x90] sm:$0xff]  ;;  %v316_v31 = vld [vmem:[#allocation2 + $0x98] sm:$0xff]  ;;  %v314_v37 = vld [vmem:[#allocation2 + $0x88] sm:$0xff] }
  0x1a   : > { %v303_v46 = vld [vmem:[#allocation2 + $0x30] sm:$0xff]  ;;  %v301_v48 = vld [vmem:[#allocation2 + $0x20] sm:$0xff]  ;;  %v304_v52 = vld [vmem:[#allocation2 + $0x38] sm:$0xff] }
  0x1b   : > { %1243 = vmatmul.mubr.msk.bf16.gmra.mrb[4].mxu0 %vm448_vm3, %v1305_v12  ;;  %v319_v47 = vld [vmem:[#allocation2 + $0xb0] sm:$0xff]  ;;  %v317_v51 = vld [vmem:[#allocation2 + $0xa0] sm:$0xff]  ;;  %v320_v56 = vld [vmem:[#allocation2 + $0xb8] sm:$0xff] }
  0x1c   : > { %1259 = vmatmul.mubr.msk.bf16.gmra.mrb[4].mxu1 %vm448_vm3, %v1306_v13  ;;  %1246 = vmatprep.mubr.msk.bf16.mxu0 %vm448_vm3, %v1307_v14  ;;  %v302_v57 = vld [vmem:[#allocation2 + $0x28] sm:$0xff] }
  0x1d   : > { %1262 = vmatprep.mubr.msk.bf16.mxu1 %vm448_vm3, %v1308_v15  ;;  %v318_v63 = vld [vmem:[#allocation2 + $0xa8] sm:$0xff] }
  0x23   : > { %1247 = vmatmul.mubr.msk.bf16.gmra.mrb[8].mxu0 %vm448_vm3, %v1309_v16 }
  0x24   : > { %1263 = vmatmul.mubr.msk.bf16.gmra.mrb[8].mxu1 %vm448_vm3, %v1310_v17  ;;  %1250 = vmatprep.mubr.msk.bf16.mxu0 %vm448_vm3, %v1311_v18 }
  0x25   : > { %1266 = vmatprep.mubr.msk.bf16.mxu1 %vm448_vm3, %v1312_v19 }
  0x2b   : > { %1251 = vmatmul.mubr.msk.bf16.gmra.mrb[12].mxu0 %vm448_vm3, %v1313_v20 }
  0x2c   : > { %1267 = vmatmul.mubr.msk.bf16.gmra.mrb[12].mxu1 %vm448_vm3, %v1314_v21 }
  0xe6   : > { %v1240_v25 = vpop.f32.mrb[0].mxu0 }
  0xe7   : > { %v667_v28 = vadd.f32 %v1240_v25, %v299_v22  ;;  %v1256_v29 = vpop.f32.mrb[0].mxu1  ;;  %v538_v30 = vpop.f32.mrb[1].mxu0  ;;  %v307_v25 = vld [vmem:[#allocation2 + $0x50] sm:$0xff] }
  0xe8   : > { %v683_v33 = vadd.f32 %v1256_v29, %v315_v23  ;;  %v665_v34 = vadd.f32 %v538_v30, %v297_v24  ;;  %v602_v35 = vpop.f32.mrb[1].mxu1  ;;  %v1241_v36 = vpop.f32.mrb[2].mxu0  ;;  %v323_v30 = vld [vmem:[#allocation2 + $0xd0] sm:$0xff] }
  0xe9   : > { %700 = vst.msk [vmem:[#allocation2 + $0x10] sm:$0xff] %vm264_vm2, %v667_v28  ;;  %v681_v38 = vadd.f32 %v602_v35, %v313_v26  ;;  %v668_v39 = vadd.f32 %v1241_v36, %v300_v27  ;;  %v1257_v40 = vpop.f32.mrb[2].mxu1  ;;  %v541_v41 = vpop.f32.mrb[3].mxu0 }
  0xea   : > { %716 = vst.msk [vmem:[#allocation2 + $0x90] sm:$0xff] %vm264_vm2, %v683_v33  ;;  %698 = vst.msk [vmem:[#allocation2] sm:$0xff] %vm264_vm2, %v665_v34  ;;  %v684_v42 = vadd.f32 %v1257_v40, %v316_v31  ;;  %v666_v43 = vadd.f32 %v541_v41, %v298_v32  ;;  %v605_v44 = vpop.f32.mrb[3].mxu1  ;;  %v305_v31 = vld [vmem:[#allocation2 + $0x40] sm:$0xff] }
  0xeb   : > { %714 = vst.msk [vmem:[#allocation2 + $0x80] sm:$0xff] %vm264_vm2, %v681_v38  ;;  %701 = vst.msk [vmem:[#allocation2 + $0x18] sm:$0xff] %vm264_vm2, %v668_v39  ;;  %v682_v45 = vadd.f32 %v605_v44, %v314_v37  ;;  %v321_v37 = vld [vmem:[#allocation2 + $0xc0] sm:$0xff]  ;;  %v308_v38 = vld [vmem:[#allocation2 + $0x58] sm:$0xff] }
  0xec   : > { %717 = vst.msk [vmem:[#allocation2 + $0x98] sm:$0xff] %vm264_vm2, %v684_v42  ;;  %699 = vst.msk [vmem:[#allocation2 + $0x8] sm:$0xff] %vm264_vm2, %v666_v43 }
  0xed   : > { %715 = vst.msk [vmem:[#allocation2 + $0x88] sm:$0xff] %vm264_vm2, %v682_v45  ;;  %v324_v45 = vld [vmem:[#allocation2 + $0xd8] sm:$0xff] }
  0xee   : > { %v1244_v50 = vpop.f32.mrb[4].mxu0 }
  0xef   : > { %v671_v53 = vadd.f32 %v1244_v50, %v303_v46  ;;  %v1260_v54 = vpop.f32.mrb[4].mxu1  ;;  %v554_v55 = vpop.f32.mrb[5].mxu0  ;;  %v306_v46 = vld [vmem:[#allocation2 + $0x48] sm:$0xff] }
  0xf0   : > { %v735_v58 = vld [vmem:[#allocation2 + $0x10] sm:$0xff]  ;;  %v687_v59 = vadd.f32 %v1260_v54, %v319_v47  ;;  %v669_v60 = vadd.f32 %v554_v55, %v301_v48  ;;  %v618_v61 = vpop.f32.mrb[5].mxu1  ;;  %v1245_v62 = vpop.f32.mrb[6].mxu0  ;;  %v322_v55 = vld [vmem:[#allocation2 + $0xc8] sm:$0xff] }
  0xf1   : > { %v774_v0 = vadd.f32 %v1480_v49, %v735_v58  ;;  %v751_v1 = vld [vmem:[#allocation2 + $0x90] sm:$0xff]  ;;  %v733_v2 = vld [vmem:[#allocation2] sm:$0xff]  ;;  %704 = vst.msk [vmem:[#allocation2 + $0x30] sm:$0xff] %vm264_vm2, %v671_v53  ;;  %v685_v3 = vadd.f32 %v618_v61, %v317_v51  ;;  %v672_v4 = vadd.f32 %v1245_v62, %v304_v52  ;;  %v1261_v5 = vpop.f32.mrb[6].mxu1  ;;  %v557_v6 = vpop.f32.mrb[7].mxu0 }
  0xf2   : > { %v790_v7 = vadd.f32 %v1480_v49, %v751_v1  ;;  %v772_v8 = vadd.f32 %v1480_v49, %v733_v2  ;;  %v749_v9 = vld [vmem:[#allocation2 + $0x80] sm:$0xff]  ;;  %v736_v10 = vld [vmem:[#allocation2 + $0x18] sm:$0xff]  ;;  %720 = vst.msk [vmem:[#allocation2 + $0xb0] sm:$0xff] %vm264_vm2, %v687_v59  ;;  %702 = vst.msk [vmem:[#allocation2 + $0x20] sm:$0xff] %vm264_vm2, %v669_v60  ;;  %v688_v11 = vadd.f32 %v1261_v5, %v320_v56  ;;  %v621_v13 = vpop.f32.mrb[7].mxu1 }
  0xf3   : > { %v670_v12 = vadd.f32 %v557_v6, %v302_v57  ;;  %v806_v14 = vmax.f32 %v774_v0, 0.0  ;;  %v788_v15 = vadd.f32 %v1480_v49, %v749_v9  ;;  %v775_v16 = vadd.f32 %v1480_v49, %v736_v10  ;;  %v752_v17 = vld [vmem:[#allocation2 + $0x98] sm:$0xff]  ;;  %v734_v18 = vld [vmem:[#allocation2 + $0x8] sm:$0xff]  ;;  %718 = vst.msk [vmem:[#allocation2 + $0xa0] sm:$0xff] %vm264_vm2, %v685_v3  ;;  %705 = vst.msk [vmem:[#allocation2 + $0x38] sm:$0xff] %vm264_vm2, %v672_v4 }
  0xf4   : > { %v686_v19 = vadd.f32 %v621_v13, %v318_v63  ;;  %v822_v20 = vmax.f32 %v790_v7, 0.0  ;;  %v804_v21 = vmax.f32 %v772_v8, 0.0  ;;  %v791_v22 = vadd.f32 %v1480_v49, %v752_v17  ;;  %v750_v24 = vld [vmem:[#allocation2 + $0x88] sm:$0xff]  ;;  %721 = vst.msk [vmem:[#allocation2 + $0xb8] sm:$0xff] %vm264_vm2, %v688_v11 }
  0xf5   : > { %v773_v23 = vadd.f32 %v1480_v49, %v734_v18  ;;  %703 = vst.msk [vmem:[#allocation2 + $0x28] sm:$0xff] %vm264_vm2, %v670_v12  ;;  %v1189_v26 = vpack.c.bf16 %v806_v14, %v806_v14  ;;  %v820_v27 = vmax.f32 %v788_v15, 0.0  ;;  %v807_v28 = vmax.f32 %v775_v16, 0.0  ;;  %v311_v18 = vld [vmem:[#allocation2 + $0x70] sm:$0xff] }
  0xf6   : > { %v789_v29 = vadd.f32 %v1480_v49, %v750_v24  ;;  %719 = vst.msk [vmem:[#allocation2 + $0xa8] sm:$0xff] %vm264_vm2, %v686_v19  ;;  %v1205_v32 = vpack.c.bf16 %v822_v20, %v822_v20  ;;  %v1187_v33 = vpack.c.bf16 %v804_v21, %v804_v21  ;;  %v823_v34 = vmax.f32 %v791_v22, 0.0  ;;  %v1248_v36 = vpop.f32.mrb[8].mxu0  ;;  %v309_v24 = vld [vmem:[#allocation2 + $0x60] sm:$0xff] }
  0xf7   : > { %v805_v35 = vmax.f32 %v773_v23, 0.0  ;;  %967 = vst.msk [vmem:[%s1497_s28 + $0x8] sm:$0xf] %vm964_vm4, %v1189_v26  ;;  %v1203_v39 = vpack.c.bf16 %v820_v27, %v820_v27  ;;  %v1190_v40 = vpack.c.bf16 %v807_v28, %v807_v28  ;;  %v675_v42 = vadd.f32 %v1248_v36, %v307_v25  ;;  %v1264_v43 = vpop.f32.mrb[8].mxu1  ;;  %v570_v44 = vpop.f32.mrb[9].mxu0  ;;  %v327_v23 = vld [vmem:[#allocation2 + $0xf0] sm:$0xff] }
  0xf8   : > { %v821_v41 = vmax.f32 %v789_v29, 0.0  ;;  %983 = vst.msk [vmem:[%s1497_s28 + $0x48] sm:$0xf] %vm964_vm4, %v1205_v32  ;;  %965 = vst.msk [vmem:[%s1497_s28] sm:$0xf] %vm964_vm4, %v1187_v33  ;;  %v1206_v47 = vpack.c.bf16 %v823_v34, %v823_v34  ;;  %v739_v50 = vld [vmem:[#allocation2 + $0x30] sm:$0xff]  ;;  %v691_v51 = vadd.f32 %v1264_v43, %v323_v30  ;;  %v673_v52 = vadd.f32 %v570_v44, %v305_v31 }
  0xf9   : > { %v1188_v48 = vpack.c.bf16 %v805_v35, %v805_v35  ;;  %v634_v53 = vpop.f32.mrb[9].mxu1  ;;  %v1249_v54 = vpop.f32.mrb[10].mxu0  ;;  %981 = vst.msk [vmem:[%s1497_s28 + $0x40] sm:$0xf] %vm964_vm4, %v1203_v39  ;;  %968 = vst.msk [vmem:[%s1497_s28 + $0xc] sm:$0xf] %vm964_vm4, %v1190_v40  ;;  %v778_v57 = vadd.f32 %v1480_v49, %v739_v50 }
  0xfa   : > { %v1204_v56 = vpack.c.bf16 %v821_v41, %v821_v41  ;;  %v755_v58 = vld [vmem:[#allocation2 + $0xb0] sm:$0xff]  ;;  %v737_v59 = vld [vmem:[#allocation2 + $0x20] sm:$0xff]  ;;  %708 = vst.msk [vmem:[#allocation2 + $0x50] sm:$0xff] %vm264_vm2, %v675_v42  ;;  %v689_v60 = vadd.f32 %v634_v53, %v321_v37  ;;  %v676_v61 = vadd.f32 %v1249_v54, %v308_v38  ;;  %v1265_v62 = vpop.f32.mrb[10].mxu1  ;;  %v573_v63 = vpop.f32.mrb[11].mxu0  ;;  %v740_v3 = vld [vmem:[#allocation2 + $0x38] sm:$0xff] }
  0xfb   : > { %984 = vst.msk [vmem:[%s1497_s28 + $0x4c] sm:$0xf] %vm964_vm4, %v1206_v47  ;;  %966 = vst.msk [vmem:[%s1497_s28 + $0x4] sm:$0xf] %vm964_vm4, %v1188_v48  ;;  %v794_v0 = vadd.f32 %v1480_v49, %v755_v58  ;;  %v776_v1 = vadd.f32 %v1480_v49, %v737_v59  ;;  %v753_v2 = vld [vmem:[#allocation2 + $0xa0] sm:$0xff]  ;;  %v692_v4 = vadd.f32 %v1265_v62, %v324_v45  ;;  %v637_v6 = vpop.f32.mrb[11].mxu1 }
  0xfc   : > { %724 = vst.msk [vmem:[#allocation2 + $0xd0] sm:$0xff] %vm264_vm2, %v691_v51  ;;  %706 = vst.msk [vmem:[#allocation2 + $0x40] sm:$0xff] %vm264_vm2, %v673_v52  ;;  %v674_v5 = vadd.f32 %v573_v63, %v306_v46  ;;  %v810_v7 = vmax.f32 %v778_v57, 0.0  ;;  %v792_v8 = vadd.f32 %v1480_v49, %v753_v2  ;;  %v779_v9 = vadd.f32 %v1480_v49, %v740_v3  ;;  %v756_v10 = vld [vmem:[#allocation2 + $0xb8] sm:$0xff]  ;;  %v738_v11 = vld [vmem:[#allocation2 + $0x28] sm:$0xff] }
  0xfd   : > { %982 = vst.msk [vmem:[%s1497_s28 + $0x44] sm:$0xf] %vm964_vm4, %v1204_v56  ;;  %v690_v12 = vadd.f32 %v637_v6, %v322_v55  ;;  %v826_v13 = vmax.f32 %v794_v0, 0.0  ;;  %v808_v14 = vmax.f32 %v776_v1, 0.0  ;;  %v795_v15 = vadd.f32 %v1480_v49, %v756_v10  ;;  %v754_v17 = vld [vmem:[#allocation2 + $0xa8] sm:$0xff]  ;;  %v325_v30 = vld [vmem:[#allocation2 + $0xe0] sm:$0xff] }
  0xfe   : > { %722 = vst.msk [vmem:[#allocation2 + $0xc0] sm:$0xff] %vm264_vm2, %v689_v60  ;;  %709 = vst.msk [vmem:[#allocation2 + $0x58] sm:$0xff] %vm264_vm2, %v676_v61  ;;  %v777_v16 = vadd.f32 %v1480_v49, %v738_v11  ;;  %v1193_v19 = vpack.c.bf16 %v810_v7, %v810_v7  ;;  %v824_v20 = vmax.f32 %v792_v8, 0.0  ;;  %v811_v21 = vmax.f32 %v779_v9, 0.0  ;;  %v1252_v29 = vpop.f32.mrb[12].mxu0  ;;  %v312_v31 = vld [vmem:[#allocation2 + $0x78] sm:$0xff] }
  0xff   : > { %725 = vst.msk [vmem:[#allocation2 + $0xd8] sm:$0xff] %vm264_vm2, %v692_v4  ;;  %707 = vst.msk [vmem:[#allocation2 + $0x48] sm:$0xff] %vm264_vm2, %v674_v5  ;;  %v793_v22 = vadd.f32 %v1480_v49, %v754_v17  ;;  %v1209_v25 = vpack.c.bf16 %v826_v13, %v826_v13  ;;  %v1191_v26 = vpack.c.bf16 %v808_v14, %v808_v14  ;;  %v827_v27 = vmax.f32 %v795_v15, 0.0  ;;  %v1268_v36 = vpop.f32.mrb[12].mxu1  ;;  %v586_v37 = vpop.f32.mrb[13].mxu0  ;;  %v328_v38 = vld [vmem:[#allocation2 + $0xf8] sm:$0xff] }
 0x100   : > { %723 = vst.msk [vmem:[#allocation2 + $0xc8] sm:$0xff] %vm264_vm2, %v690_v12  ;;  %v809_v28 = vmax.f32 %v777_v16, 0.0  ;;  %v1207_v32 = vpack.c.bf16 %v824_v20, %v824_v20  ;;  %v1194_v33 = vpack.c.bf16 %v811_v21, %v811_v21  ;;  %v679_v35 = vadd.f32 %v1252_v29, %v311_v18  ;;  %v310_v39 = vld [vmem:[#allocation2 + $0x68] sm:$0xff]  ;;  %v650_v45 = vpop.f32.mrb[13].mxu1  ;;  %v1253_v46 = vpop.f32.mrb[14].mxu0 }
 0x101   : > { %971 = vst.msk [vmem:[%s1497_s28 + $0x18] sm:$0xf] %vm964_vm4, %v1193_v19  ;;  %v825_v34 = vmax.f32 %v793_v22, 0.0  ;;  %987 = vst.msk [vmem:[%s1497_s28 + $0x58] sm:$0xf] %vm964_vm4, %v1209_v25  ;;  %v1210_v40 = vpack.c.bf16 %v827_v27, %v827_v27  ;;  %v743_v42 = vld [vmem:[#allocation2 + $0x50] sm:$0xff]  ;;  %v695_v43 = vadd.f32 %v1268_v36, %v327_v23  ;;  %v677_v44 = vadd.f32 %v586_v37, %v309_v24 }
 0x102   : > { %969 = vst.msk [vmem:[%s1497_s28 + $0x10] sm:$0xf] %vm964_vm4, %v1191_v26  ;;  %v1192_v41 = vpack.c.bf16 %v809_v28, %v809_v28  ;;  %v326_v47 = vld [vmem:[#allocation2 + $0xe8] sm:$0xff]  ;;  %985 = vst.msk [vmem:[%s1497_s28 + $0x50] sm:$0xf] %vm964_vm4, %v1207_v32  ;;  %v782_v50 = vadd.f32 %v1480_v49, %v743_v42  ;;  %v693_v53 = vadd.f32 %v650_v45, %v325_v30  ;;  %v1269_v55 = vpop.f32.mrb[14].mxu1 }
 0x103   : > { %972 = vst.msk [vmem:[%s1497_s28 + $0x1c] sm:$0xf] %vm964_vm4, %v1194_v33  ;;  %v1208_v48 = vpack.c.bf16 %v825_v34, %v825_v34  ;;  %v759_v51 = vld [vmem:[#allocation2 + $0xd0] sm:$0xff]  ;;  %v741_v52 = vld [vmem:[#allocation2 + $0x40] sm:$0xff]  ;;  %v680_v54 = vadd.f32 %v1253_v46, %v312_v31  ;;  %v589_v56 = vpop.f32.mrb[15].mxu0  ;;  %v696_v61 = vadd.f32 %v1269_v55, %v328_v38  ;;  %v653_v63 = vpop.f32.mrb[15].mxu1 }
 0x104   : > { %712 = vst.msk [vmem:[#allocation2 + $0x70] sm:$0xff] %vm264_vm2, %v679_v35  ;;  %v798_v57 = vadd.f32 %v1480_v49, %v759_v51  ;;  %v780_v58 = vadd.f32 %v1480_v49, %v741_v52  ;;  %728 = vst.msk [vmem:[#allocation2 + $0xf0] sm:$0xff] %vm264_vm2, %v695_v43  ;;  %v678_v62 = vadd.f32 %v589_v56, %v310_v39  ;;  %v814_v0 = vmax.f32 %v782_v50, 0.0 }
 0x105   : > { %988 = vst.msk [vmem:[%s1497_s28 + $0x5c] sm:$0xf] %vm964_vm4, %v1210_v40  ;;  %970 = vst.msk [vmem:[%s1497_s28 + $0x14] sm:$0xf] %vm964_vm4, %v1192_v41  ;;  %v757_v59 = vld [vmem:[#allocation2 + $0xc0] sm:$0xff]  ;;  %v744_v60 = vld [vmem:[#allocation2 + $0x58] sm:$0xff]  ;;  %v694_v5 = vadd.f32 %v653_v63, %v326_v47 }
 0x106   : > { %710 = vst.msk [vmem:[#allocation2 + $0x60] sm:$0xff] %vm264_vm2, %v677_v44  ;;  %v796_v1 = vadd.f32 %v1480_v49, %v757_v59  ;;  %v783_v2 = vadd.f32 %v1480_v49, %v744_v60  ;;  %v760_v3 = vld [vmem:[#allocation2 + $0xd8] sm:$0xff]  ;;  %v742_v4 = vld [vmem:[#allocation2 + $0x48] sm:$0xff]  ;;  %726 = vst.msk [vmem:[#allocation2 + $0xe0] sm:$0xff] %vm264_vm2, %v693_v53  ;;  %v830_v6 = vmax.f32 %v798_v57, 0.0  ;;  %v812_v7 = vmax.f32 %v780_v58, 0.0 }
 0x107   : > { %986 = vst.msk [vmem:[%s1497_s28 + $0x54] sm:$0xf] %vm964_vm4, %v1208_v48  ;;  %v799_v8 = vadd.f32 %v1480_v49, %v760_v3  ;;  %v781_v9 = vadd.f32 %v1480_v49, %v742_v4  ;;  %v758_v10 = vld [vmem:[#allocation2 + $0xc8] sm:$0xff]  ;;  %v1197_v11 = vpack.c.bf16 %v814_v0, %v814_v0 }
 0x108   : > { %713 = vst.msk [vmem:[#allocation2 + $0x78] sm:$0xff] %vm264_vm2, %v680_v54  ;;  %729 = vst.msk [vmem:[#allocation2 + $0xf8] sm:$0xff] %vm264_vm2, %v696_v61  ;;  %v828_v12 = vmax.f32 %v796_v1, 0.0  ;;  %v815_v13 = vmax.f32 %v783_v2, 0.0  ;;  %v797_v14 = vadd.f32 %v1480_v49, %v758_v10  ;;  %v1213_v15 = vpack.c.bf16 %v830_v6, %v830_v6 }
 0x109   : > { %711 = vst.msk [vmem:[#allocation2 + $0x68] sm:$0xff] %vm264_vm2, %v678_v62  ;;  %727 = vst.msk [vmem:[#allocation2 + $0xe8] sm:$0xff] %vm264_vm2, %v694_v5  ;;  %v1195_v16 = vpack.c.bf16 %v812_v7, %v812_v7  ;;  %v831_v17 = vmax.f32 %v799_v8, 0.0  ;;  %v813_v18 = vmax.f32 %v781_v9, 0.0 }
 0x10a   : > { %975 = vst.msk [vmem:[%s1497_s28 + $0x28] sm:$0xf] %vm964_vm4, %v1197_v11  ;;  %v1211_v19 = vpack.c.bf16 %v828_v12, %v828_v12  ;;  %v1198_v20 = vpack.c.bf16 %v815_v13, %v815_v13  ;;  %v829_v21 = vmax.f32 %v797_v14, 0.0  ;;  %991 = vst.msk [vmem:[%s1497_s28 + $0x68] sm:$0xf] %vm964_vm4, %v1213_v15 }
 0x10b   : > { %973 = vst.msk [vmem:[%s1497_s28 + $0x20] sm:$0xf] %vm964_vm4, %v1195_v16  ;;  %v1214_v22 = vpack.c.bf16 %v831_v17, %v831_v17  ;;  %v1196_v23 = vpack.c.bf16 %v813_v18, %v813_v18  ;;  %v747_v24 = vld [vmem:[#allocation2 + $0x70] sm:$0xff] }
 0x10c   : > { %989 = vst.msk [vmem:[%s1497_s28 + $0x60] sm:$0xf] %vm964_vm4, %v1211_v19  ;;  %976 = vst.msk [vmem:[%s1497_s28 + $0x2c] sm:$0xf] %vm964_vm4, %v1198_v20  ;;  %v1212_v25 = vpack.c.bf16 %v829_v21, %v829_v21  ;;  %v786_v26 = vadd.f32 %v1480_v49, %v747_v24  ;;  %v763_v27 = vld [vmem:[#allocation2 + $0xf0] sm:$0xff] }
 0x10d   : > { %v745_v28 = vld [vmem:[#allocation2 + $0x60] sm:$0xff]  ;;  %992 = vst.msk [vmem:[%s1497_s28 + $0x6c] sm:$0xf] %vm964_vm4, %v1214_v22  ;;  %974 = vst.msk [vmem:[%s1497_s28 + $0x24] sm:$0xf] %vm964_vm4, %v1196_v23  ;;  %v802_v29 = vadd.f32 %v1480_v49, %v763_v27 }
 0x10e   : > { %v784_v30 = vadd.f32 %v1480_v49, %v745_v28  ;;  %v761_v31 = vld [vmem:[#allocation2 + $0xe0] sm:$0xff]  ;;  %990 = vst.msk [vmem:[%s1497_s28 + $0x64] sm:$0xf] %vm964_vm4, %v1212_v25  ;;  %v818_v33 = vmax.f32 %v786_v26, 0.0 }
 0x10f   : > { %v748_v32 = vld [vmem:[#allocation2 + $0x78] sm:$0xff]  ;;  %v800_v34 = vadd.f32 %v1480_v49, %v761_v31  ;;  %v834_v38 = vmax.f32 %v802_v29, 0.0 }
 0x110   : > { %v787_v35 = vadd.f32 %v1480_v49, %v748_v32  ;;  %v764_v36 = vld [vmem:[#allocation2 + $0xf8] sm:$0xff]  ;;  %v746_v37 = vld [vmem:[#allocation2 + $0x68] sm:$0xff]  ;;  %v816_v39 = vmax.f32 %v784_v30, 0.0  ;;  %v1201_v43 = vpack.c.bf16 %v818_v33, %v818_v33 }
 0x111   : > { %v803_v40 = vadd.f32 %v1480_v49, %v764_v36  ;;  %v785_v41 = vadd.f32 %v1480_v49, %v746_v37  ;;  %v762_v42 = vld [vmem:[#allocation2 + $0xe8] sm:$0xff]  ;;  %v832_v44 = vmax.f32 %v800_v34, 0.0  ;;  %v1217_v47 = vpack.c.bf16 %v834_v38, %v834_v38 }
 0x112   : > { %v819_v45 = vmax.f32 %v787_v35, 0.0  ;;  %v801_v46 = vadd.f32 %v1480_v49, %v762_v42  ;;  %v1199_v48 = vpack.c.bf16 %v816_v39, %v816_v39  ;;  %979 = vst.msk [vmem:[%s1497_s28 + $0x38] sm:$0xf] %vm964_vm4, %v1201_v43 }
 0x113   : > { %v835_v50 = vmax.f32 %v803_v40, 0.0  ;;  %v817_v51 = vmax.f32 %v785_v41, 0.0  ;;  %v1215_v52 = vpack.c.bf16 %v832_v44, %v832_v44  ;;  %995 = vst.msk [vmem:[%s1497_s28 + $0x78] sm:$0xf] %vm964_vm4, %v1217_v47 }
 0x114   : > { %v1202_v53 = vpack.c.bf16 %v819_v45, %v819_v45  ;;  %v833_v54 = vmax.f32 %v801_v46, 0.0  ;;  %977 = vst.msk [vmem:[%s1497_s28 + $0x30] sm:$0xf] %vm964_vm4, %v1199_v48 }
 0x115   : > { %v1218_v55 = vpack.c.bf16 %v835_v50, %v835_v50  ;;  %v1200_v56 = vpack.c.bf16 %v817_v51, %v817_v51  ;;  %993 = vst.msk [vmem:[%s1497_s28 + $0x70] sm:$0xf] %vm964_vm4, %v1215_v52 }
 0x116   : > { %980 = vst.msk [vmem:[%s1497_s28 + $0x3c] sm:$0xf] %vm964_vm4, %v1202_v53  ;;  %v1216_v49 = vpack.c.bf16 %v833_v54, %v833_v54 }
 0x117   : > { %996 = vst.msk [vmem:[%s1497_s28 + $0x7c] sm:$0xf] %vm964_vm4, %v1218_v55  ;;  %978 = vst.msk [vmem:[%s1497_s28 + $0x34] sm:$0xf] %vm964_vm4, %v1200_v56 }
 0x118   : > { %994 = vst.msk [vmem:[%s1497_s28 + $0x74] sm:$0xf] %vm964_vm4, %v1216_v49 }
 0x119 PF: > { %s13_s14 = sadd.s32 1, %s1337_s14   ;;  %s1623_s12 = smov %s1333_s13 }
 0x11a   : > { %p10_p5 = scmp.ge.s32.totalorder %s13_s14, 10   ;;  %s1624_s13 = smov %s1626_s15 }
 0x11c   :  { %12 = sbr.rel (!%p10_p5) target bundleno = 2 (0x2), region = 76 }

// kernel: _lambda_.22
= control target key start
LH: loop header
LB: loop body
LE: loop exit
PB: predicated region body
PF: predicated region fallthrough
CT: control target
= control target key end

     0   :  { %s2827_s12 = smov 0   ;;  %s2829_s13 = smov 0   ;;  %s3363_s0 = inlined_call_operand.vmem [shape: bf16[512,576], index: 0, kind: input, shape index: {}]   ;;  %s3364_s1 = inlined_call_operand.vmem [shape: bf16[576,64], index: 1, kind: input, shape index: {}]   ;;  %s3365_s2 = inlined_call_operand.vmem [shape: f32[1,64], index: 2, kind: input, shape index: {}]   ;;  %s3366_s3 = inlined_call_operand.vmem [shape: bf16[512,64], index: 3, kind: output, shape index: {}]  }
   0x1   :  { %s2831_s14 = smov 0  }
   0x2 LB: > { %s32_s15 = sadd.s32 1, %s2800_s13  ;;  %p2104_p0 = scmp.ge.s32.totalorder %s2804_s14, 1  ;;  %s2804_s14 = sphi %s2831_s14, %s13_s14   ;;  %s2800_s13 = sphi %s2829_s13, %s3368_s13   ;;  %s2796_s12 = sphi %s2827_s12, %s3367_s12  }
   0x3   : > { %p34_p1 = scmp.ge.s32.totalorder %s32_s15, 2  ;;  %p191_p2 = scmp.lt.s32.totalorder %s2804_s14, 3 }
   0x5   : > { %s3370_s15 = smov (%p34_p1, %s32_s15), 0  ;;  %p192_p3 = pnand %p2104_p0, %p191_p2 }
   0x6   : > { %v2634_v0 = vld [vmem:[%s3364_s1 + $0x40] sm:$0xff] (!%p192_p3)   ;;  %s2105_s18 = sshll.u32 (!%p192_p3), %s2796_s12, 5  ;;  %v2636_v2 = vld [vmem:[%s3364_s1 + $0x48] sm:$0xff] (!%p192_p3)   ;;  %v2638_v4 = vld [vmem:[%s3364_s1 + $0x50] sm:$0xff] (!%p192_p3)   ;;  %vm272_vm0 = vcmask (!%p192_p3), 523264   ;;  %vm1951_vm1 = vcmask (!%p192_p3), 519168  }
   0x7   : > { %195 = sbr.rel (%p192_p3) target bundleno = 430 (0x1ae), region = 32  ;;  %v2635_v1 = vld [vmem:[%s3364_s1] sm:$0xff] (!%p192_p3)   ;;  %2308 = vmatprep.subr.bf16.mxu0 (!%p192_p3), %v2634_v0  ;;  %2592 = vmatprep.subr.bf16.mxu1 (!%p192_p3), %v2634_v0  ;;  %p236_p4 = scmp.lt.s32.totalorder (!%p192_p3), %s2105_s18, 63  ;;  %v2637_v3 = vld [vmem:[%s3364_s1 + $0x8] sm:$0xff] (!%p192_p3)   ;;  %v2639_v5 = vld [vmem:[%s3364_s1 + $0x10] sm:$0xff] (!%p192_p3)  }
   0x8   : > { %2309 = vmatpush3.bf16.msra.mxu0 (!%p192_p3), %v2635_v1  ;;  %2600 = vmatpush3.bf16.msra.mxu1 (!%p192_p3), %v2635_v1  ;;  %v2640_v6 = vld [vmem:[%s3364_s1 + $0x58] sm:$0xff] (!%p192_p3)   ;;  %v2642_v8 = vld [vmem:[%s3364_s1 + $0x60] sm:$0xff] (!%p192_p3)   ;;  %v2644_v10 = vld [vmem:[%s3364_s1 + $0x68] sm:$0xff] (!%p192_p3)  }
   0x9   : > { %2310 = vmatprep.subr.bf16.mxu0 (!%p192_p3), %v2636_v2  ;;  %2593 = vmatprep.subr.bf16.mxu1 (!%p192_p3), %v2636_v2  ;;  %v2641_v7 = vld [vmem:[%s3364_s1 + $0x18] sm:$0xff] (!%p192_p3)   ;;  %v2643_v9 = vld [vmem:[%s3364_s1 + $0x20] sm:$0xff] (!%p192_p3)   ;;  %v2645_v13 = vld [vmem:[%s3364_s1 + $0x28] sm:$0xff] (!%p192_p3)  }
   0xa   : > { %v2646_v14 = vld [vmem:[%s3364_s1 + $0x70] sm:$0xff] (!%p192_p3)   ;;  %v2648_v16 = vld [vmem:[%s3364_s1 + $0x78] sm:$0xff] (!%p192_p3)   ;;  %v2656_v18 = vld [vmem:[%s3364_s1 + $0xc0] sm:$0xff] (!%p192_p3)  }
   0xb   : > { %v2647_v15 = vld [vmem:[%s3364_s1 + $0x30] sm:$0xff] (!%p192_p3)   ;;  %v2649_v17 = vld [vmem:[%s3364_s1 + $0x38] sm:$0xff] (!%p192_p3)   ;;  %v2659_v19 = vld [vmem:[%s3364_s1 + $0x100] sm:$0xff] (!%p192_p3)  }
   0xc   : > { %2311 = vmatpush3.bf16.msra.mxu0 (!%p192_p3), %v2637_v3  ;;  %2601 = vmatpush3.bf16.msra.mxu1 (!%p192_p3), %v2637_v3  ;;  %v2657_v22 = vld [vmem:[%s3364_s1 + $0x80] sm:$0xff] (!%p192_p3)   ;;  %v2658_v23 = vld [vmem:[%s3364_s1 + $0xc8] sm:$0xff] (!%p192_p3)   ;;  %v2667_v28 = vld [vmem:[%s3364_s1 + $0xd0] sm:$0xff] (!%p192_p3)  }
   0xd   : > { %2312 = vmatprep.subr.bf16.mxu0 (!%p192_p3), %v2638_v4  ;;  %2594 = vmatprep.subr.bf16.mxu1 (!%p192_p3), %v2638_v4  ;;  %v2660_v26 = vld [vmem:[%s3364_s1 + $0x88] sm:$0xff] (!%p192_p3)   ;;  %v2668_v30 = vld [vmem:[%s3364_s1 + $0x90] sm:$0xff] (!%p192_p3)   ;;  %v2669_v31 = vld [vmem:[%s3364_s1 + $0xd8] sm:$0xff] (!%p192_p3)  }
   0xe   : > { %s3372_s18 = smov (!%p236_p4, %s2105_s18), 63  ;;  %v2670_v34 = vld [vmem:[%s3364_s1 + $0x98] sm:$0xff]   ;;  %v2690_v35 = vld [vmem:[%s3364_s1 + $0x108] sm:$0xff]   ;;  %v2677_v37 = vld [vmem:[%s3364_s1 + $0xe0] sm:$0xff]  }
   0xf   : > { %s2608_s4 = smul.u32 20, %s3372_s18  ;;  %v2678_v39 = vld [vmem:[%s3364_s1 + $0xa0] sm:$0xff]   ;;  %v2679_v40 = vld [vmem:[%s3364_s1 + $0xe8] sm:$0xff]   ;;  %v2687_v46 = vld [vmem:[%s3364_s1 + $0xf0] sm:$0xff]   ;;  %s2108_s27 = sshll.u32 %s3372_s18, 2 }
  0x10   : > { %2313 = vmatpush3.bf16.msra.mxu0 %v2639_v5  ;;  %2602 = vmatpush3.bf16.msra.mxu1 %v2639_v5  ;;  %v2680_v43 = vld [vmem:[%s3364_s1 + $0xa8] sm:$0xff]   ;;  %v2710_v47 = vld [vmem:[%s3364_s1 + $0x110] sm:$0xff]   ;;  %v2689_v49 = vld [vmem:[%s3364_s1 + $0xf8] sm:$0xff]   ;;  %s3192_s29 = scalar_lea.vmem %s3366_s3, %s2108_s27 }
  0x11   : > { %2314 = vmatprep.subr.bf16.mxu0 %v2640_v6  ;;  %2595 = vmatprep.subr.bf16.mxu1 %v2640_v6  ;;  %s2878_s11 = scalar_lea.vmem %s3363_s0, %s2608_s4  ;;  %v2688_v48 = vld [vmem:[%s3364_s1 + $0xb0] sm:$0xff]   ;;  %v2691_v52 = vld [vmem:[%s3364_s1 + $0xb8] sm:$0xff]  }
  0x12   : > { %v2652_v11 = vld [vmem:[%s2878_s11 + $0x4] ss:$20 sps:$4 sm:$0xff]   ;;  %v2650_v20 = vld [vmem:[%s2878_s11] ss:$20 sps:$4 sm:$0xff]   ;;  %v2665_v27 = vld [vmem:[%s2878_s11 + $0x28] ss:$20 sps:$4 sm:$0xff]  }
  0x13   : > { %v2655_v12 = vld [vmem:[%s2878_s11 + $0x1e4] ss:$20 sps:$4 sm:$0xff]   ;;  %1202 = vmatprep.mubr.bf16.mxu0 %v2652_v11  ;;  %v2653_v21 = vld [vmem:[%s2878_s11 + $0x1e0] ss:$20 sps:$4 sm:$0xff]   ;;  %v2666_v29 = vld [vmem:[%s2878_s11 + $0x208] ss:$20 sps:$4 sm:$0xff]  }
  0x14   : > { %2315 = vmatpush3.bf16.msra.mxu0 %v2641_v7  ;;  %2603 = vmatpush3.bf16.msra.mxu1 %v2641_v7  ;;  %v2661_v24 = vld [vmem:[%s2878_s11 + $0x2c] ss:$20 sps:$4 sm:$0xff]   ;;  %v2671_v32 = vld [vmem:[%s2878_s11 + $0x54] ss:$20 sps:$4 sm:$0xff]   ;;  %v2675_v36 = vld [vmem:[%s2878_s11 + $0x50] ss:$20 sps:$4 sm:$0xff]  }
  0x15   : > { %2316 = vmatprep.subr.bf16.mxu0 %v2642_v8  ;;  %2596 = vmatprep.subr.bf16.mxu1 %v2642_v8  ;;  %v2663_v25 = vld [vmem:[%s2878_s11 + $0x20c] ss:$20 sps:$4 sm:$0xff]   ;;  %v2673_v33 = vld [vmem:[%s2878_s11 + $0x234] ss:$20 sps:$4 sm:$0xff]   ;;  %v2676_v38 = vld [vmem:[%s2878_s11 + $0x230] ss:$20 sps:$4 sm:$0xff]  }
  0x16   : > { %1298 = vmatprep.mubr.bf16.mxu1 %v2655_v12  ;;  %v2681_v41 = vld [vmem:[%s2878_s11 + $0x7c] ss:$20 sps:$4 sm:$0xff]   ;;  %v2685_v44 = vld [vmem:[%s2878_s11 + $0x78] ss:$20 sps:$4 sm:$0xff]   ;;  %v2697_v54 = vld [vmem:[%s2878_s11 + $0xa0] ss:$20 sps:$4 sm:$0xff]  }
  0x17   : > { %v2683_v42 = vld [vmem:[%s2878_s11 + $0x25c] ss:$20 sps:$4 sm:$0xff]   ;;  %v2686_v45 = vld [vmem:[%s2878_s11 + $0x258] ss:$20 sps:$4 sm:$0xff]   ;;  %v2700_v57 = vld [vmem:[%s2878_s11 + $0x34] ss:$20 sps:$4 sm:$0xff]  }
  0x18   : > { %2317 = vmatpush3.bf16.msra.mxu0 %v2643_v9  ;;  %2604 = vmatpush3.bf16.msra.mxu1 %v2643_v9  ;;  %v2692_v50 = vld [vmem:[%s2878_s11 + $0xa4] ss:$20 sps:$4 sm:$0xff]   ;;  %v2696_v51 = vld [vmem:[%s2878_s11 + $0xc] ss:$20 sps:$4 sm:$0xff]   ;;  %v2694_v53 = vld [vmem:[%s2878_s11 + $0x8] ss:$20 sps:$4 sm:$0xff]  }
  0x19   : > { %2318 = vmatprep.subr.bf16.mxu0 %v2644_v10  ;;  %2597 = vmatprep.subr.bf16.mxu1 %v2644_v10  ;;  %v2698_v55 = vld [vmem:[%s2878_s11 + $0xcc] ss:$20 sps:$4 sm:$0xff]   ;;  %v2729_v56 = vld [vmem:[%s3364_s1 + $0x118] sm:$0xff]   ;;  %v2703_v59 = vld [vmem:[%s2878_s11 + $0x30] ss:$20 sps:$4 sm:$0xff]  }
  0x1a   : > { %v2702_v58 = vld [vmem:[%s2878_s11 + $0xc8] ss:$20 sps:$4 sm:$0xff]   ;;  %v2708_v62 = vld [vmem:[%s2878_s11 + $0xf0] ss:$20 sps:$4 sm:$0xff]   ;;  %v2709_v63 = vld [vmem:[%s2878_s11 + $0x58] ss:$20 sps:$4 sm:$0xff]  }
  0x1b   : > { %v2704_v60 = vld [vmem:[%s2878_s11 + $0xf4] ss:$20 sps:$4 sm:$0xff]   ;;  %v2706_v61 = vld [vmem:[%s2878_s11 + $0x5c] ss:$20 sps:$4 sm:$0xff]   ;;  %v2713_v1 = vld [vmem:[%s2878_s11 + $0x84] ss:$20 sps:$4 sm:$0xff]  }
  0x1c   : > { %2319 = vmatpush3.bf16.msra.mxu0 %v2645_v13  ;;  %2605 = vmatpush3.bf16.msra.mxu1 %v2645_v13  ;;  %v2711_v0 = vld [vmem:[%s2878_s11 + $0x11c] ss:$20 sps:$4 sm:$0xff]   ;;  %v2715_v2 = vld [vmem:[%s2878_s11 + $0x118] ss:$20 sps:$4 sm:$0xff]   ;;  %v2716_v3 = vld [vmem:[%s2878_s11 + $0x80] ss:$20 sps:$4 sm:$0xff]  }
  0x1d   : > { %2320 = vmatprep.subr.bf16.mxu0 %v2646_v14  ;;  %2598 = vmatprep.subr.bf16.mxu1 %v2646_v14  ;;  %v2717_v4 = vld [vmem:[%s2878_s11 + $0x144] ss:$20 sps:$4 sm:$0xff]   ;;  %v2719_v5 = vld [vmem:[%s2878_s11 + $0xac] ss:$20 sps:$4 sm:$0xff]   ;;  %v2722_v7 = vld [vmem:[%s2878_s11 + $0xa8] ss:$20 sps:$4 sm:$0xff]  }
  0x1e   : > { %v2721_v6 = vld [vmem:[%s2878_s11 + $0x140] ss:$20 sps:$4 sm:$0xff]   ;;  %v2727_v10 = vld [vmem:[%s2878_s11 + $0x168] ss:$20 sps:$4 sm:$0xff]   ;;  %v2728_v11 = vld [vmem:[%s2878_s11 + $0xd0] ss:$20 sps:$4 sm:$0xff]  }
  0x1f   : > { %v2723_v8 = vld [vmem:[%s2878_s11 + $0x16c] ss:$20 sps:$4 sm:$0xff]   ;;  %v2725_v9 = vld [vmem:[%s2878_s11 + $0xd4] ss:$20 sps:$4 sm:$0xff]   ;;  %v2732_v13 = vld [vmem:[%s2878_s11 + $0xfc] ss:$20 sps:$4 sm:$0xff]  }
  0x20   : > { %2321 = vmatpush3.bf16.msra.mxu0 %v2647_v15  ;;  %2606 = vmatpush3.bf16.msra.mxu1 %v2647_v15  ;;  %v2730_v12 = vld [vmem:[%s2878_s11 + $0x194] ss:$20 sps:$4 sm:$0xff]   ;;  %v2734_v14 = vld [vmem:[%s2878_s11 + $0x190] ss:$20 sps:$4 sm:$0xff]   ;;  %v2735_v15 = vld [vmem:[%s2878_s11 + $0xf8] ss:$20 sps:$4 sm:$0xff]  }
  0x21   : > { %2322 = vmatprep.subr.bf16.mxu0 %v2648_v16  ;;  %2599 = vmatprep.subr.bf16.mxu1 %v2648_v16  ;;  %v2736_v16 = vld [vmem:[%s2878_s11 + $0x1bc] ss:$20 sps:$4 sm:$0xff]  }
  0x24   : > { %2323 = vmatpush3.bf16.msra.mxu0 %v2649_v17  ;;  %2607 = vmatpush3.bf16.msra.mxu1 %v2649_v17  ;;  %v2738_v17 = vld [vmem:[%s2878_s11 + $0x124] ss:$20 sps:$4 sm:$0xff]  }
  0x25   : > { %2420 = vmatprep.subr.bf16.mxu1 %v2656_v18  ;;  %2552 = vmatprep.subr.bf16.mxu0 %v2659_v19  ;;  %v2740_v18 = vld [vmem:[%s2878_s11 + $0x1b8] ss:$20 sps:$4 sm:$0xff]  }
  0x27   : > { %1203 = vmatmul.mubr.bf16.vlgmr.msra.gmra.mrb[0].mxu0 %v2650_v20  ;;  %1299 = vmatmul.mubr.bf16.vlgmr.msra.gmra.mrb[0].mxu1 %v2653_v21  ;;  %v2742_v20 = vld [vmem:[%s2878_s11 + $0x14c] ss:$20 sps:$4 sm:$0xff]   ;;  %v2744_v21 = vld [vmem:[%s2878_s11 + $0x10] ss:$20 sps:$4 sm:$0xff]  }
  0x28   : > { %2421 = vmatpush3.bf16.msra.mxu1 %v2657_v22  ;;  %2553 = vmatpush3.bf16.msra.mxu0 %v2659_v19  ;;  %v2741_v19 = vld [vmem:[%s2878_s11 + $0x120] ss:$20 sps:$4 sm:$0xff]   ;;  %v2745_v22 = vld [vmem:[%s2878_s11 + $0x148] ss:$20 sps:$4 sm:$0xff]  }
  0x29   : > { %2422 = vmatprep.subr.bf16.mxu1 %v2658_v23  ;;  %1210 = vmatprep.mubr.bf16.mxu0 %v2661_v24  ;;  %v2746_v23 = vld [vmem:[%s2878_s11 + $0x38] ss:$20 sps:$4 sm:$0xff]   ;;  %v2747_v24 = vld [vmem:[%s2878_s11 + $0x174] ss:$20 sps:$4 sm:$0xff]  }
  0x2a   : > { %1306 = vmatprep.mubr.bf16.mxu1 %v2663_v25  ;;  %2554 = vmatprep.subr.bf16.mxu0 %v2690_v35  ;;  %v2749_v25 = vld [vmem:[%s2878_s11 + $0x60] ss:$20 sps:$4 sm:$0xff]  }
  0x2c   : > { %2423 = vmatpush3.bf16.msra.mxu1 %v2660_v26  ;;  %2555 = vmatpush3.bf16.msra.mxu0 %v2690_v35  ;;  %v2750_v26 = vld [vmem:[%s2878_s11 + $0x170] ss:$20 sps:$4 sm:$0xff]   ;;  %v2761_v35 = vld [vmem:[%s2878_s11 + $0x128] ss:$20 sps:$4 sm:$0xff]  }
  0x2d   : > { %2424 = vmatprep.subr.bf16.mxu1 %v2667_v28  ;;  %2556 = vmatprep.subr.bf16.mxu0 %v2710_v47  ;;  %v2752_v28 = vld [vmem:[%s2878_s11 + $0x19c] ss:$20 sps:$4 sm:$0xff]  }
  0x2f   : > { %1211 = vmatmul.mubr.bf16.gmra.mrb[4].mxu0 %v2665_v27  ;;  %1307 = vmatmul.mubr.bf16.gmra.mrb[4].mxu1 %v2666_v29  ;;  %v2751_v27 = vld [vmem:[%s2878_s11 + $0x88] ss:$20 sps:$4 sm:$0xff]   ;;  %v2754_v29 = vld [vmem:[%s2878_s11 + $0xb0] ss:$20 sps:$4 sm:$0xff]  }
  0x30   : > { %2425 = vmatpush3.bf16.msra.mxu1 %v2668_v30  ;;  %1218 = vmatprep.mubr.bf16.mxu0 %v2671_v32  ;;  %v2755_v30 = vld [vmem:[%s2878_s11 + $0x198] ss:$20 sps:$4 sm:$0xff]  }
  0x31   : > { %2426 = vmatprep.subr.bf16.mxu1 %v2669_v31  ;;  %1314 = vmatprep.mubr.bf16.mxu1 %v2673_v33  ;;  %v2756_v31 = vld [vmem:[%s2878_s11 + $0xd8] ss:$20 sps:$4 sm:$0xff]   ;;  %v2759_v33 = vld [vmem:[%s2878_s11 + $0x100] ss:$20 sps:$4 sm:$0xff]  }
  0x32   : > { %2557 = vmatpush3.bf16.msra.mxu0 %v2710_v47  ;;  %v2757_v32 = vld [vmem:[%s2878_s11 + $0x1c4] ss:$20 sps:$4 sm:$0xff]  }
  0x33   : > { %2558 = vmatprep.subr.bf16.mxu0 %v2729_v56  ;;  %v2776_v47 = vld [vmem:[%s2878_s11 + $0x218] ss:$20 sps:$4 sm:$0xff]  }
  0x34   : > { %2427 = vmatpush3.bf16.msra.mxu1 %v2670_v34  ;;  %v2760_v34 = vld [vmem:[%s2878_s11 + $0x1c0] ss:$20 sps:$4 sm:$0xff]  }
  0x35   : > { %2428 = vmatprep.subr.bf16.mxu1 %v2677_v37  ;;  %v2764_v37 = vld [vmem:[%s2878_s11 + $0x150] ss:$20 sps:$4 sm:$0xff]  }
  0x36   : > { %2559 = vmatpush3.bf16.msra.mxu0 %v2729_v56 }
  0x37   : > { %1219 = vmatmul.mubr.bf16.gmra.mrb[8].mxu0 %v2675_v36  ;;  %1315 = vmatmul.mubr.bf16.gmra.mrb[8].mxu1 %v2676_v38  ;;  %v2762_v36 = vld [vmem:[%s2878_s11 + $0x1ec] ss:$20 sps:$4 sm:$0xff]   ;;  %v2765_v38 = vld [vmem:[%s2878_s11 + $0x1e8] ss:$20 sps:$4 sm:$0xff]  }
  0x38   : > { %2429 = vmatpush3.bf16.msra.mxu1 %v2678_v39  ;;  %1226 = vmatprep.mubr.bf16.mxu0 %v2681_v41  ;;  %v2766_v39 = vld [vmem:[%s2878_s11 + $0x178] ss:$20 sps:$4 sm:$0xff]   ;;  %v2769_v41 = vld [vmem:[%s2878_s11 + $0x1a0] ss:$20 sps:$4 sm:$0xff]  }
  0x39   : > { %2430 = vmatprep.subr.bf16.mxu1 %v2679_v40  ;;  %1322 = vmatprep.mubr.bf16.mxu1 %v2683_v42  ;;  %v2767_v40 = vld [vmem:[%s2878_s11 + $0x214] ss:$20 sps:$4 sm:$0xff]   ;;  %v2770_v42 = vld [vmem:[%s2878_s11 + $0x210] ss:$20 sps:$4 sm:$0xff]  }
  0x3c   : > { %2431 = vmatpush3.bf16.msra.mxu1 %v2680_v43  ;;  %v2771_v43 = vld [vmem:[%s2878_s11 + $0x1c8] ss:$20 sps:$4 sm:$0xff]  }
  0x3d   : > { %2432 = vmatprep.subr.bf16.mxu1 %v2687_v46  ;;  %v2775_v46 = vld [vmem:[%s2878_s11 + $0x238] ss:$20 sps:$4 sm:$0xff]  }
  0x3f   : > { %1227 = vmatmul.mubr.bf16.gmra.mrb[12].mxu0 %v2685_v44  ;;  %1323 = vmatmul.mubr.bf16.gmra.mrb[12].mxu1 %v2686_v45  ;;  %v2772_v44 = vld [vmem:[%s2878_s11 + $0x23c] ss:$20 sps:$4 sm:$0xff]  }
  0x40   : > { %2433 = vmatpush3.bf16.msra.mxu1 %v2688_v48  ;;  %1234 = vmatprep.mubr.bf16.mxu0 %v2692_v50  ;;  %v2774_v45 = vld [vmem:[%s2878_s11 + $0x1f0] ss:$20 sps:$4 sm:$0xff]   ;;  %v2780_v50 = vld [vmem:[%s2878_s11 + $0x260] ss:$20 sps:$4 sm:$0xff]  }
  0x41   : > { %2434 = vmatprep.subr.bf16.mxu1 %v2689_v49  ;;  %1363 = vmatprep.mubr.bf16.mxu1 %v2696_v51  ;;  %v2777_v48 = vld [vmem:[%s2878_s11 + $0x264] ss:$20 sps:$4 sm:$0xff]   ;;  %v2779_v49 = vld [vmem:[%s2878_s11 + $0x240] ss:$20 sps:$4 sm:$0xff]   ;;  %v2781_v51 = vld [vmem:[%s2878_s11 + $0x268] ss:$20 sps:$4 sm:$0xff]  }
  0x44   : > { %2435 = vmatpush3.bf16.msra.mxu1 %v2691_v52  ;;  %v2806_v52 = vmov 0.0  }
  0x45   : > { %275 = vst.msk [vmem:[#allocation2 + $0x10] sm:$0xff] %vm272_vm0, %v2806_v52  ;;  %273 = vst.msk [vmem:[#allocation2] sm:$0xff] %vm272_vm0, %v2806_v52 }
  0x46   : > { %274 = vst.msk [vmem:[#allocation2 + $0x8] sm:$0xff] %vm272_vm0, %v2806_v52  ;;  %276 = vst.msk [vmem:[#allocation2 + $0x18] sm:$0xff] %vm272_vm0, %v2806_v52 }
  0x47   : > { %1235 = vmatmul.mubr.bf16.gmra.mrb[16].mxu0 %v2697_v54  ;;  %1364 = vmatmul.mubr.bf16.vlgmr.msra.gmra.mrb[16].mxu1 %v2694_v53  ;;  %277 = vst.msk [vmem:[#allocation2 + $0x20] sm:$0xff] %vm272_vm0, %v2806_v52  ;;  %278 = vst.msk [vmem:[#allocation2 + $0x28] sm:$0xff] %vm272_vm0, %v2806_v52 }
  0x48   : > { %1242 = vmatprep.mubr.bf16.mxu0 %v2698_v55  ;;  %1371 = vmatprep.mubr.bf16.mxu1 %v2700_v57  ;;  %279 = vst.msk [vmem:[#allocation2 + $0x30] sm:$0xff] %vm272_vm0, %v2806_v52  ;;  %280 = vst.msk [vmem:[#allocation2 + $0x38] sm:$0xff] %vm272_vm0, %v2806_v52 }
  0x49   : > { %281 = vst.msk [vmem:[#allocation2 + $0x40] sm:$0xff] %vm272_vm0, %v2806_v52  ;;  %282 = vst.msk [vmem:[#allocation2 + $0x48] sm:$0xff] %vm272_vm0, %v2806_v52 }
  0x4a   : > { %283 = vst.msk [vmem:[#allocation2 + $0x50] sm:$0xff] %vm272_vm0, %v2806_v52  ;;  %284 = vst.msk [vmem:[#allocation2 + $0x58] sm:$0xff] %vm272_vm0, %v2806_v52 }
  0x4b   : > { %285 = vst.msk [vmem:[#allocation2 + $0x60] sm:$0xff] %vm272_vm0, %v2806_v52  ;;  %286 = vst.msk [vmem:[#allocation2 + $0x68] sm:$0xff] %vm272_vm0, %v2806_v52 }
  0x4c   : > { %287 = vst.msk [vmem:[#allocation2 + $0x70] sm:$0xff] %vm272_vm0, %v2806_v52  ;;  %288 = vst.msk [vmem:[#allocation2 + $0x78] sm:$0xff] %vm272_vm0, %v2806_v52 }
  0x4d   : > { %289 = vst.msk [vmem:[#allocation2 + $0x80] sm:$0xff] %vm272_vm0, %v2806_v52  ;;  %290 = vst.msk [vmem:[#allocation2 + $0x88] sm:$0xff] %vm272_vm0, %v2806_v52 }
  0x4e   : > { %291 = vst.msk [vmem:[#allocation2 + $0x90] sm:$0xff] %vm272_vm0, %v2806_v52  ;;  %292 = vst.msk [vmem:[#allocation2 + $0x98] sm:$0xff] %vm272_vm0, %v2806_v52 }
  0x4f   : > { %1243 = vmatmul.mubr.bf16.gmra.mrb[20].mxu0 %v2702_v58  ;;  %1372 = vmatmul.mubr.bf16.gmra.mrb[20].mxu1 %v2703_v59  ;;  %293 = vst.msk [vmem:[#allocation2 + $0xa0] sm:$0xff] %vm272_vm0, %v2806_v52  ;;  %294 = vst.msk [vmem:[#allocation2 + $0xa8] sm:$0xff] %vm272_vm0, %v2806_v52 }
  0x50   : > { %1250 = vmatprep.mubr.bf16.mxu0 %v2704_v60  ;;  %1379 = vmatprep.mubr.bf16.mxu1 %v2706_v61  ;;  %295 = vst.msk [vmem:[#allocation2 + $0xb0] sm:$0xff] %vm272_vm0, %v2806_v52  ;;  %296 = vst.msk [vmem:[#allocation2 + $0xb8] sm:$0xff] %vm272_vm0, %v2806_v52 }
  0x51   : > { %297 = vst.msk [vmem:[#allocation2 + $0xc0] sm:$0xff] %vm272_vm0, %v2806_v52  ;;  %298 = vst.msk [vmem:[#allocation2 + $0xc8] sm:$0xff] %vm272_vm0, %v2806_v52 }
  0x52   : > { %299 = vst.msk [vmem:[#allocation2 + $0xd0] sm:$0xff] %vm272_vm0, %v2806_v52  ;;  %300 = vst.msk [vmem:[#allocation2 + $0xd8] sm:$0xff] %vm272_vm0, %v2806_v52 }
  0x53   : > { %301 = vst.msk [vmem:[#allocation2 + $0xe0] sm:$0xff] %vm272_vm0, %v2806_v52  ;;  %302 = vst.msk [vmem:[#allocation2 + $0xe8] sm:$0xff] %vm272_vm0, %v2806_v52 }
  0x54   : > { %303 = vst.msk [vmem:[#allocation2 + $0xf0] sm:$0xff] %vm272_vm0, %v2806_v52  ;;  %304 = vst.msk [vmem:[#allocation2 + $0xf8] sm:$0xff] %vm272_vm0, %v2806_v52 }
  0x57   : > { %1251 = vmatmul.mubr.bf16.gmra.mrb[24].mxu0 %v2708_v62  ;;  %1380 = vmatmul.mubr.bf16.gmra.mrb[24].mxu1 %v2709_v63 }
  0x58   : > { %1258 = vmatprep.mubr.bf16.mxu0 %v2711_v0  ;;  %1387 = vmatprep.mubr.bf16.mxu1 %v2713_v1 }
  0x5f   : > { %1259 = vmatmul.mubr.bf16.gmra.mrb[28].mxu0 %v2715_v2  ;;  %1388 = vmatmul.mubr.bf16.gmra.mrb[28].mxu1 %v2716_v3 }
  0x60   : > { %1266 = vmatprep.mubr.bf16.mxu0 %v2717_v4  ;;  %1395 = vmatprep.mubr.bf16.mxu1 %v2719_v5 }
  0x67   : > { %1267 = vmatmul.mubr.bf16.gmra.mrb[32].mxu0 %v2721_v6  ;;  %1396 = vmatmul.mubr.bf16.gmra.mrb[32].mxu1 %v2722_v7 }
  0x68   : > { %1274 = vmatprep.mubr.bf16.mxu0 %v2723_v8  ;;  %1403 = vmatprep.mubr.bf16.mxu1 %v2725_v9 }
  0x6f   : > { %1275 = vmatmul.mubr.bf16.gmra.mrb[36].mxu0 %v2727_v10  ;;  %1404 = vmatmul.mubr.bf16.gmra.mrb[36].mxu1 %v2728_v11 }
  0x70   : > { %1282 = vmatprep.mubr.bf16.mxu0 %v2730_v12  ;;  %1411 = vmatprep.mubr.bf16.mxu1 %v2732_v13 }
  0x77   : > { %1283 = vmatmul.mubr.bf16.gmra.mrb[40].mxu0 %v2734_v14  ;;  %1412 = vmatmul.mubr.bf16.gmra.mrb[40].mxu1 %v2735_v15 }
  0x78   : > { %1290 = vmatprep.mubr.bf16.mxu0 %v2736_v16  ;;  %1419 = vmatprep.mubr.bf16.mxu1 %v2738_v17 }
  0x7f   : > { %1291 = vmatmul.mubr.bf16.gmra.mrb[44].mxu0 %v2740_v18  ;;  %1420 = vmatmul.mubr.bf16.gmra.mrb[44].mxu1 %v2741_v19 }
  0x80   : > { %1427 = vmatprep.mubr.bf16.mxu1 %v2742_v20  ;;  %2560 = vmatprep.mubr.msk.bf16.mxu0 %vm272_vm0, %v2744_v21 }
  0x87   : > { %1428 = vmatmul.mubr.bf16.gmra.mrb[48].mxu1 %v2745_v22  ;;  %2561 = vmatmul.mubr.msk.bf16.vlgmr.msra.gmra.mrb[48].mxu0 %vm272_vm0, %v2746_v23 }
  0x88   : > { %1435 = vmatprep.mubr.bf16.mxu1 %v2747_v24  ;;  %2564 = vmatprep.mubr.msk.bf16.mxu0 %vm272_vm0, %v2749_v25 }
  0x8f   : > { %1436 = vmatmul.mubr.bf16.gmra.mrb[52].mxu1 %v2750_v26  ;;  %2565 = vmatmul.mubr.msk.bf16.gmra.mrb[52].mxu0 %vm272_vm0, %v2751_v27 }
  0x90   : > { %1443 = vmatprep.mubr.bf16.mxu1 %v2752_v28  ;;  %2568 = vmatprep.mubr.msk.bf16.mxu0 %vm272_vm0, %v2754_v29 }
  0x97   : > { %1444 = vmatmul.mubr.bf16.gmra.mrb[56].mxu1 %v2755_v30  ;;  %2569 = vmatmul.mubr.msk.bf16.gmra.mrb[56].mxu0 %vm272_vm0, %v2756_v31 }
  0x98   : > { %1451 = vmatprep.mubr.bf16.mxu1 %v2757_v32  ;;  %2572 = vmatprep.mubr.msk.bf16.mxu0 %vm272_vm0, %v2759_v33 }
  0x9f   : > { %1452 = vmatmul.mubr.bf16.gmra.mrb[60].mxu1 %v2760_v34  ;;  %2573 = vmatmul.mubr.msk.bf16.gmra.mrb[60].mxu0 %vm272_vm0, %v2761_v35 }
  0xa0   : > { %1459 = vmatprep.mubr.bf16.mxu1 %v2762_v36  ;;  %2576 = vmatprep.mubr.msk.bf16.mxu0 %vm272_vm0, %v2764_v37 }
  0xa7   : > { %1460 = vmatmul.mubr.bf16.gmra.mrb[64].mxu1 %v2765_v38  ;;  %2577 = vmatmul.mubr.msk.bf16.gmra.mrb[64].mxu0 %vm272_vm0, %v2766_v39 }
  0xa8   : > { %1467 = vmatprep.mubr.bf16.mxu1 %v2767_v40  ;;  %2580 = vmatprep.mubr.msk.bf16.mxu0 %vm272_vm0, %v2769_v41 }
  0xaf   : > { %1468 = vmatmul.mubr.bf16.gmra.mrb[68].mxu1 %v2770_v42  ;;  %2581 = vmatmul.mubr.msk.bf16.gmra.mrb[68].mxu0 %vm272_vm0, %v2771_v43 }
  0xb0   : > { %1475 = vmatprep.mubr.bf16.mxu1 %v2772_v44  ;;  %2584 = vmatprep.mubr.msk.bf16.mxu0 %vm272_vm0, %v2774_v45 }
  0xb7   : > { %1476 = vmatmul.mubr.bf16.gmra.mrb[72].mxu1 %v2775_v46  ;;  %2585 = vmatmul.mubr.msk.bf16.gmra.mrb[72].mxu0 %vm272_vm0, %v2776_v47 }
  0xb8   : > { %1483 = vmatprep.mubr.bf16.mxu1 %v2777_v48  ;;  %2588 = vmatprep.mubr.msk.bf16.mxu0 %vm272_vm0, %v2779_v49 }
  0xbf   : > { %1484 = vmatmul.mubr.bf16.gmra.mrb[76].mxu1 %v2780_v50  ;;  %2589 = vmatmul.mubr.msk.bf16.gmra.mrb[76].mxu0 %vm272_vm0, %v2781_v51 }
  0xfa   : > { %v2396_v53 = vpop.f32.mrb[0].mxu1  ;;  %v2324_v54 = vpop.f32.mrb[0].mxu0 }
  0xfb   : > { %v2397_v55 = vpop.f32.mrb[1].mxu1  ;;  %v2325_v56 = vpop.f32.mrb[1].mxu0 }
  0xfc   : > { %v3089_v57 = vadd.f32 %v2397_v55, %v2396_v53  ;;  %v2399_v58 = vpop.f32.mrb[2].mxu1  ;;  %v2326_v59 = vadd.f32 %v2325_v56, %v2324_v54  ;;  %v2327_v60 = vpop.f32.mrb[2].mxu0 }
  0xfd   : > { %v2400_v61 = vpop.f32.mrb[3].mxu1  ;;  %v2328_v62 = vpop.f32.mrb[3].mxu0 }
  0xfe   : > { %v3091_v63 = vadd.f32 %v2400_v61, %v2399_v58  ;;  %v2329_v0 = vadd.f32 %v2328_v62, %v2327_v60 }
 0x102   : > { %v2402_v1 = vpop.f32.mrb[4].mxu1  ;;  %v2330_v2 = vpop.f32.mrb[4].mxu0 }
 0x103   : > { %v2403_v3 = vpop.f32.mrb[5].mxu1  ;;  %v2331_v4 = vpop.f32.mrb[5].mxu0 }
 0x104   : > { %v3093_v5 = vadd.f32 %v2403_v3, %v2402_v1  ;;  %v2405_v6 = vpop.f32.mrb[6].mxu1  ;;  %v2332_v7 = vadd.f32 %v2331_v4, %v2330_v2  ;;  %v2333_v8 = vpop.f32.mrb[6].mxu0 }
 0x105   : > { %v2406_v9 = vpop.f32.mrb[7].mxu1  ;;  %v2334_v10 = vpop.f32.mrb[7].mxu0 }
 0x106   : > { %v3095_v11 = vadd.f32 %v2406_v9, %v2405_v6  ;;  %v2335_v12 = vadd.f32 %v2334_v10, %v2333_v8 }
 0x10a   : > { %v2408_v13 = vpop.f32.mrb[8].mxu1  ;;  %v2336_v14 = vpop.f32.mrb[8].mxu0 }
 0x10b   : > { %v2409_v15 = vpop.f32.mrb[9].mxu1  ;;  %v2337_v16 = vpop.f32.mrb[9].mxu0 }
 0x10c   : > { %v3097_v17 = vadd.f32 %v2409_v15, %v2408_v13  ;;  %v2411_v18 = vpop.f32.mrb[10].mxu1  ;;  %v2338_v19 = vadd.f32 %v2337_v16, %v2336_v14  ;;  %v2339_v20 = vpop.f32.mrb[10].mxu0 }
 0x10d   : > { %v2412_v21 = vpop.f32.mrb[11].mxu1  ;;  %v2340_v22 = vpop.f32.mrb[11].mxu0 }
 0x10e   : > { %v3099_v23 = vadd.f32 %v2412_v21, %v2411_v18  ;;  %v2341_v24 = vadd.f32 %v2340_v22, %v2339_v20 }
 0x112   : > { %v2414_v25 = vpop.f32.mrb[12].mxu1  ;;  %v2342_v26 = vpop.f32.mrb[12].mxu0 }
 0x113   : > { %v2415_v27 = vpop.f32.mrb[13].mxu1  ;;  %v2343_v28 = vpop.f32.mrb[13].mxu0 }
 0x114   : > { %v3101_v29 = vadd.f32 %v2415_v27, %v2414_v25  ;;  %v2417_v30 = vpop.f32.mrb[14].mxu1  ;;  %v2344_v31 = vadd.f32 %v2343_v28, %v2342_v26  ;;  %v2345_v32 = vpop.f32.mrb[14].mxu0 }
 0x115   : > { %v2418_v33 = vpop.f32.mrb[15].mxu1  ;;  %v2346_v34 = vpop.f32.mrb[15].mxu0 }
 0x116   : > { %v3103_v35 = vadd.f32 %v2418_v33, %v2417_v30  ;;  %v2347_v36 = vadd.f32 %v2346_v34, %v2345_v32 }
 0x11a   : > { %v2436_v37 = vpop.f32.mrb[16].mxu1  ;;  %v2348_v38 = vpop.f32.mrb[16].mxu0 }
 0x11b   : > { %v2437_v39 = vpop.f32.mrb[17].mxu1  ;;  %v2349_v40 = vpop.f32.mrb[17].mxu0 }
 0x11c   : > { %v2438_v41 = vadd.f32 %v2437_v39, %v2436_v37  ;;  %v2439_v42 = vpop.f32.mrb[18].mxu1  ;;  %v2350_v43 = vadd.f32 %v2349_v40, %v2348_v38  ;;  %v2351_v44 = vpop.f32.mrb[18].mxu0 }
 0x11d   : > { %v2440_v45 = vpop.f32.mrb[19].mxu1  ;;  %v2352_v46 = vpop.f32.mrb[19].mxu0 }
 0x11e   : > { %v2441_v47 = vadd.f32 %v2440_v45, %v2439_v42  ;;  %v2353_v48 = vadd.f32 %v2352_v46, %v2351_v44  ;;  %v3105_v49 = vadd.f32 %v2438_v41, %v2326_v59 }
 0x120   : > { %v3107_v50 = vadd.f32 %v2441_v47, %v2329_v0 }
 0x122   : > { %v2442_v51 = vpop.f32.mrb[20].mxu1  ;;  %v2354_v52 = vpop.f32.mrb[20].mxu0 }
 0x123   : > { %v2443_v53 = vpop.f32.mrb[21].mxu1  ;;  %v2355_v54 = vpop.f32.mrb[21].mxu0 }
 0x124   : > { %v2444_v55 = vadd.f32 %v2443_v53, %v2442_v51  ;;  %v2445_v56 = vpop.f32.mrb[22].mxu1  ;;  %v2356_v58 = vadd.f32 %v2355_v54, %v2354_v52  ;;  %v2357_v60 = vpop.f32.mrb[22].mxu0 }
 0x125   : > { %v2446_v61 = vpop.f32.mrb[23].mxu1  ;;  %v2358_v62 = vpop.f32.mrb[23].mxu0 }
 0x126   : > { %v2447_v1 = vadd.f32 %v2446_v61, %v2445_v56  ;;  %v2359_v2 = vadd.f32 %v2358_v62, %v2357_v60  ;;  %v3109_v3 = vadd.f32 %v2444_v55, %v2332_v7 }
 0x128   : > { %v3111_v4 = vadd.f32 %v2447_v1, %v2335_v12 }
 0x12a   : > { %v2448_v59 = vpop.f32.mrb[24].mxu1  ;;  %v2360_v6 = vpop.f32.mrb[24].mxu0 }
 0x12b   : > { %v2449_v0 = vpop.f32.mrb[25].mxu1  ;;  %v2361_v8 = vpop.f32.mrb[25].mxu0 }
 0x12c   : > { %v2450_v9 = vadd.f32 %v2449_v0, %v2448_v59  ;;  %v2451_v10 = vpop.f32.mrb[26].mxu1  ;;  %v2362_v13 = vadd.f32 %v2361_v8, %v2360_v6  ;;  %v2363_v14 = vpop.f32.mrb[26].mxu0 }
 0x12d   : > { %v2452_v15 = vpop.f32.mrb[27].mxu1  ;;  %v2364_v16 = vpop.f32.mrb[27].mxu0 }
 0x12e   : > { %v2453_v18 = vadd.f32 %v2452_v15, %v2451_v10  ;;  %v2365_v20 = vadd.f32 %v2364_v16, %v2363_v14  ;;  %v3113_v21 = vadd.f32 %v2450_v9, %v2338_v19 }
 0x130   : > { %v3115_v22 = vadd.f32 %v2453_v18, %v2341_v24 }
 0x132   : > { %v2454_v7 = vpop.f32.mrb[28].mxu1  ;;  %v2366_v25 = vpop.f32.mrb[28].mxu0 }
 0x133   : > { %v2455_v12 = vpop.f32.mrb[29].mxu1  ;;  %v2367_v26 = vpop.f32.mrb[29].mxu0 }
 0x134   : > { %v2456_v27 = vadd.f32 %v2455_v12, %v2454_v7  ;;  %v2457_v28 = vpop.f32.mrb[30].mxu1  ;;  %v2368_v30 = vadd.f32 %v2367_v26, %v2366_v25  ;;  %v2369_v32 = vpop.f32.mrb[30].mxu0 }
 0x135   : > { %v2458_v33 = vpop.f32.mrb[31].mxu1  ;;  %v2370_v34 = vpop.f32.mrb[31].mxu0 }
 0x136   : > { %v2459_v37 = vadd.f32 %v2458_v33, %v2457_v28  ;;  %v2371_v38 = vadd.f32 %v2370_v34, %v2369_v32  ;;  %v3117_v39 = vadd.f32 %v2456_v27, %v2344_v31 }
 0x138   : > { %v3119_v40 = vadd.f32 %v2459_v37, %v2347_v36 }
 0x13a   : > { %v2460_v19 = vpop.f32.mrb[32].mxu1  ;;  %v2372_v41 = vpop.f32.mrb[32].mxu0 }
 0x13b   : > { %v2461_v24 = vpop.f32.mrb[33].mxu1  ;;  %v2373_v42 = vpop.f32.mrb[33].mxu0 }
 0x13c   : > { %v2462_v44 = vadd.f32 %v2461_v24, %v2460_v19  ;;  %v2463_v45 = vpop.f32.mrb[34].mxu1  ;;  %v3121_v46 = vadd.f32 %v2373_v42, %v2372_v41  ;;  %v2375_v47 = vpop.f32.mrb[34].mxu0 }
 0x13d   : > { %v2464_v51 = vpop.f32.mrb[35].mxu1  ;;  %v2376_v52 = vpop.f32.mrb[35].mxu0 }
 0x13e   : > { %v2465_v53 = vadd.f32 %v2464_v51, %v2463_v45  ;;  %v3123_v54 = vadd.f32 %v2376_v52, %v2375_v47  ;;  %v3125_v55 = vadd.f32 %v2462_v44, %v2350_v43 }
 0x140   : > { %v3127_v31 = vadd.f32 %v2465_v53, %v2353_v48 }
 0x142   : > { %v2466_v36 = vpop.f32.mrb[36].mxu1  ;;  %v2378_v56 = vpop.f32.mrb[36].mxu0 }
 0x143   : > { %v2467_v60 = vpop.f32.mrb[37].mxu1  ;;  %v2379_v61 = vpop.f32.mrb[37].mxu0 }
 0x144   : > { %v2468_v62 = vadd.f32 %v2467_v60, %v2466_v36  ;;  %v2469_v1 = vpop.f32.mrb[38].mxu1  ;;  %v3129_v59 = vadd.f32 %v2379_v61, %v2378_v56  ;;  %v2381_v6 = vpop.f32.mrb[38].mxu0  ;;  %v307_v56 = vld [vmem:[#allocation2 + $0x10] sm:$0xff] }
 0x145   : > { %v2470_v0 = vpop.f32.mrb[39].mxu1  ;;  %v2382_v8 = vpop.f32.mrb[39].mxu0 }
 0x146   : > { %v2471_v9 = vadd.f32 %v2470_v0, %v2469_v1  ;;  %v3131_v10 = vadd.f32 %v2382_v8, %v2381_v6  ;;  %v3133_v14 = vadd.f32 %v2468_v62, %v2356_v58  ;;  %v305_v1 = vld [vmem:[#allocation2] sm:$0xff] }
 0x148   : > { %v3135_v43 = vadd.f32 %v2471_v9, %v2359_v2 }
 0x14a   : > { %v2472_v48 = vpop.f32.mrb[40].mxu1  ;;  %v2384_v15 = vpop.f32.mrb[40].mxu0 }
 0x14b   : > { %v2473_v16 = vpop.f32.mrb[41].mxu1  ;;  %v2385_v18 = vpop.f32.mrb[41].mxu0 }
 0x14c   : > { %v2474_v7 = vadd.f32 %v2473_v16, %v2472_v48  ;;  %v2475_v25 = vpop.f32.mrb[42].mxu1  ;;  %v3137_v12 = vadd.f32 %v2385_v18, %v2384_v15  ;;  %v2387_v26 = vpop.f32.mrb[42].mxu0  ;;  %v308_v48 = vld [vmem:[#allocation2 + $0x18] sm:$0xff] }
 0x14d   : > { %v2476_v27 = vpop.f32.mrb[43].mxu1  ;;  %v2388_v28 = vpop.f32.mrb[43].mxu0 }
 0x14e   : > { %v2477_v32 = vadd.f32 %v2476_v27, %v2475_v25  ;;  %v3139_v33 = vadd.f32 %v2388_v28, %v2387_v26  ;;  %v3141_v34 = vadd.f32 %v2474_v7, %v2362_v13 }
 0x150   : > { %v3143_v58 = vadd.f32 %v2477_v32, %v2365_v20 }
 0x152   : > { %v2478_v2 = vpop.f32.mrb[44].mxu1  ;;  %v2390_v37 = vpop.f32.mrb[44].mxu0 }
 0x153   : > { %v2479_v19 = vpop.f32.mrb[45].mxu1  ;;  %v2391_v41 = vpop.f32.mrb[45].mxu0 }
 0x154   : > { %v2480_v24 = vadd.f32 %v2479_v19, %v2478_v2  ;;  %v2481_v42 = vpop.f32.mrb[46].mxu1  ;;  %v3145_v44 = vadd.f32 %v2391_v41, %v2390_v37  ;;  %v2393_v45 = vpop.f32.mrb[46].mxu0  ;;  %v311_v2 = vld [vmem:[#allocation2 + $0x30] sm:$0xff]  ;;  %v309_v19 = vld [vmem:[#allocation2 + $0x20] sm:$0xff] }
 0x155   : > { %v2482_v47 = vpop.f32.mrb[47].mxu1  ;;  %v2394_v51 = vpop.f32.mrb[47].mxu0 }
 0x156   : > { %v2483_v52 = vadd.f32 %v2482_v47, %v2481_v42  ;;  %v3147_v53 = vadd.f32 %v2394_v51, %v2393_v45  ;;  %v3149_v36 = vadd.f32 %v2480_v24, %v2368_v30  ;;  %v3171_v24 = vld [vmem:[%s3365_s2] ss:$0 sm:$0xff]  ;;  %v312_v47 = vld [vmem:[#allocation2 + $0x38] sm:$0xff] }
 0x158   : > { %v3151_v13 = vadd.f32 %v2483_v52, %v2371_v38  ;;  %v306_v38 = vld [vmem:[#allocation2 + $0x8] sm:$0xff] }
 0x15a   : > { %v2484_v20 = vpop.f32.mrb[48].mxu1  ;;  %v2562_v60 = vpop.f32.mrb[48].mxu0 }
 0x15b   : > { %v1535_v61 = vadd.f32 %v2562_v60, %v3109_v3  ;;  %v2485_v62 = vpop.f32.mrb[49].mxu1  ;;  %v1526_v6 = vpop.f32.mrb[49].mxu0 }
 0x15c   : > { %v2486_v0 = vadd.f32 %v2485_v62, %v2484_v20  ;;  %v1527_v8 = vadd.f32 %v1526_v6, %v3105_v49  ;;  %v2487_v9 = vpop.f32.mrb[50].mxu1  ;;  %v2563_v15 = vpop.f32.mrb[50].mxu0 }
 0x15d   : > { %v1655_v16 = vadd.f32 %v1535_v61, %v307_v56  ;;  %v1538_v30 = vadd.f32 %v2563_v15, %v3111_v4  ;;  %v2488_v18 = vpop.f32.mrb[51].mxu1  ;;  %v1529_v7 = vpop.f32.mrb[51].mxu0 }
 0x15e   : > { %v1653_v25 = vadd.f32 %v1527_v8, %v305_v1  ;;  %v2489_v26 = vadd.f32 %v2488_v18, %v2487_v9  ;;  %v1530_v27 = vadd.f32 %v1529_v7, %v3107_v50  ;;  %v3158_v3 = vadd.f32 %v2486_v0, %v3121_v46 }
 0x15f   : > { %1687 = vst.msk [vmem:[#allocation2 + $0x10] sm:$0xff] %vm272_vm0, %v1655_v16  ;;  %v1656_v28 = vadd.f32 %v1538_v30, %v308_v48 }
 0x160   : > { %1685 = vst.msk [vmem:[#allocation2] sm:$0xff] %vm272_vm0, %v1653_v25  ;;  %v1654_v49 = vadd.f32 %v1530_v27, %v306_v38  ;;  %v3163_v32 = vadd.f32 %v2489_v26, %v3123_v54 }
 0x161   : > { %1688 = vst.msk [vmem:[#allocation2 + $0x18] sm:$0xff] %vm272_vm0, %v1656_v28 }
 0x162   : > { %1686 = vst.msk [vmem:[#allocation2 + $0x8] sm:$0xff] %vm272_vm0, %v1654_v49  ;;  %v2490_v4 = vpop.f32.mrb[52].mxu1  ;;  %v2566_v37 = vpop.f32.mrb[52].mxu0 }
 0x163   : > { %v1551_v50 = vadd.f32 %v2566_v37, %v3117_v39  ;;  %v2491_v46 = vpop.f32.mrb[53].mxu1  ;;  %v1542_v41 = vpop.f32.mrb[53].mxu0  ;;  %v310_v39 = vld [vmem:[#allocation2 + $0x28] sm:$0xff] }
 0x164   : > { %v2492_v54 = vadd.f32 %v2491_v46, %v2490_v4  ;;  %v1543_v42 = vadd.f32 %v1542_v41, %v3113_v21  ;;  %v2493_v45 = vpop.f32.mrb[54].mxu1  ;;  %v2567_v51 = vpop.f32.mrb[54].mxu0  ;;  %v313_v4 = vld [vmem:[#allocation2 + $0x40] sm:$0xff] }
 0x165   : > { %v1659_v52 = vadd.f32 %v1551_v50, %v311_v2  ;;  %v1554_v20 = vadd.f32 %v2567_v51, %v3119_v40  ;;  %v2494_v56 = vpop.f32.mrb[55].mxu1  ;;  %v1545_v60 = vpop.f32.mrb[55].mxu0 }
 0x166   : > { %v1722_v61 = vld [vmem:[#allocation2 + $0x10] sm:$0xff]  ;;  %v1657_v62 = vadd.f32 %v1543_v42, %v309_v19  ;;  %v2495_v1 = vadd.f32 %v2494_v56, %v2493_v45  ;;  %v1546_v6 = vadd.f32 %v1545_v60, %v3115_v22  ;;  %v3177_v0 = vadd.f32 %v2492_v54, %v3129_v59  ;;  %v316_v54 = vld [vmem:[#allocation2 + $0x58] sm:$0xff] }
 0x167   : > { %v1761_v21 = vadd.f32 %v3171_v24, %v1722_v61  ;;  %v1720_v8 = vld [vmem:[#allocation2] sm:$0xff]  ;;  %1691 = vst.msk [vmem:[#allocation2 + $0x30] sm:$0xff] %vm272_vm0, %v1659_v52  ;;  %v1660_v9 = vadd.f32 %v1554_v20, %v312_v47  ;;  %v314_v52 = vld [vmem:[#allocation2 + $0x48] sm:$0xff] }
 0x168   : > { %v1759_v40 = vadd.f32 %v3171_v24, %v1720_v8  ;;  %v1723_v48 = vld [vmem:[#allocation2 + $0x18] sm:$0xff]  ;;  %1689 = vst.msk [vmem:[#allocation2 + $0x20] sm:$0xff] %vm272_vm0, %v1657_v62  ;;  %v1658_v15 = vadd.f32 %v1546_v6, %v310_v39  ;;  %v3185_v16 = vadd.f32 %v2495_v1, %v3131_v10  ;;  %v315_v10 = vld [vmem:[#allocation2 + $0x50] sm:$0xff] }
 0x169   : > { %v1793_v22 = vmax.f32 %v1761_v21, 0.0  ;;  %v1762_v59 = vadd.f32 %v3171_v24, %v1723_v48  ;;  %v1721_v30 = vld [vmem:[#allocation2 + $0x8] sm:$0xff]  ;;  %1692 = vst.msk [vmem:[#allocation2 + $0x38] sm:$0xff] %vm272_vm0, %v1660_v9 }
 0x16a   : > { %v1791_v18 = vmax.f32 %v1759_v40, 0.0  ;;  %v1760_v38 = vadd.f32 %v3171_v24, %v1721_v30  ;;  %1690 = vst.msk [vmem:[#allocation2 + $0x28] sm:$0xff] %vm272_vm0, %v1658_v15  ;;  %v2496_v7 = vpop.f32.mrb[56].mxu1  ;;  %v2570_v25 = vpop.f32.mrb[56].mxu0  ;;  %v319_v30 = vld [vmem:[#allocation2 + $0x70] sm:$0xff] }
 0x16b   : > { %v2278_v26 = vpack.c.bf16 %v1793_v22, %v1793_v22  ;;  %v1794_v27 = vmax.f32 %v1762_v59, 0.0  ;;  %v1567_v28 = vadd.f32 %v2570_v25, %v3133_v14  ;;  %v2497_v49 = vpop.f32.mrb[57].mxu1  ;;  %v1558_v2 = vpop.f32.mrb[57].mxu0  ;;  %v317_v25 = vld [vmem:[#allocation2 + $0x60] sm:$0xff] }
 0x16c   : > { %v2276_v37 = vpack.c.bf16 %v1791_v18, %v1791_v18  ;;  %v1792_v50 = vmax.f32 %v1760_v38, 0.0  ;;  %v2498_v46 = vadd.f32 %v2497_v49, %v2496_v7  ;;  %v1559_v19 = vadd.f32 %v1558_v2, %v3125_v55  ;;  %v2499_v41 = vpop.f32.mrb[58].mxu1  ;;  %v2571_v42 = vpop.f32.mrb[58].mxu0 }
 0x16d   : > { %1954 = vst.msk [vmem:[%s3192_s29 + $0x8] sm:$0xf] %vm1951_vm1, %v2278_v26  ;;  %v2279_v45 = vpack.c.bf16 %v1794_v27, %v1794_v27  ;;  %v1663_v47 = vadd.f32 %v1567_v28, %v315_v10  ;;  %v1570_v51 = vadd.f32 %v2571_v42, %v3135_v43  ;;  %v2500_v14 = vpop.f32.mrb[59].mxu1  ;;  %v1561_v20 = vpop.f32.mrb[59].mxu0 }
 0x16e   : > { %1952 = vst.msk [vmem:[%s3192_s29] sm:$0xf] %vm1951_vm1, %v2276_v37  ;;  %v2277_v56 = vpack.c.bf16 %v1792_v50, %v1792_v50  ;;  %v1726_v39 = vld [vmem:[#allocation2 + $0x30] sm:$0xff]  ;;  %v1661_v60 = vadd.f32 %v1559_v19, %v313_v4  ;;  %v2501_v55 = vadd.f32 %v2500_v14, %v2499_v41  ;;  %v1562_v61 = vadd.f32 %v1561_v20, %v3127_v31  ;;  %v320_v37 = vld [vmem:[#allocation2 + $0x78] sm:$0xff] }
 0x16f   : > { %1955 = vst.msk [vmem:[%s3192_s29 + $0xc] sm:$0xf] %vm1951_vm1, %v2279_v45  ;;  %v1765_v62 = vadd.f32 %v3171_v24, %v1726_v39  ;;  %v1724_v1 = vld [vmem:[#allocation2 + $0x20] sm:$0xff]  ;;  %v1664_v43 = vadd.f32 %v1570_v51, %v316_v54  ;;  %v3209_v6 = vadd.f32 %v2498_v46, %v3137_v12  ;;  %v318_v54 = vld [vmem:[#allocation2 + $0x68] sm:$0xff] }
 0x170   : > { %1695 = vst.msk [vmem:[#allocation2 + $0x50] sm:$0xff] %vm272_vm0, %v1663_v47  ;;  %v1763_v21 = vadd.f32 %v3171_v24, %v1724_v1  ;;  %v1727_v8 = vld [vmem:[#allocation2 + $0x38] sm:$0xff]  ;;  %1693 = vst.msk [vmem:[#allocation2 + $0x40] sm:$0xff] %vm272_vm0, %v1661_v60  ;;  %v1662_v9 = vadd.f32 %v1562_v61, %v314_v52  ;;  %v3216_v31 = vadd.f32 %v2501_v55, %v3139_v33 }
 0x171   : > { %1953 = vst.msk [vmem:[%s3192_s29 + $0x4] sm:$0xf] %vm1951_vm1, %v2277_v56  ;;  %v1797_v40 = vmax.f32 %v1765_v62, 0.0  ;;  %v1766_v48 = vadd.f32 %v3171_v24, %v1727_v8  ;;  %v1725_v15 = vld [vmem:[#allocation2 + $0x28] sm:$0xff]  ;;  %v323_v8 = vld [vmem:[#allocation2 + $0x90] sm:$0xff] }
 0x172   : > { %1696 = vst.msk [vmem:[#allocation2 + $0x58] sm:$0xff] %vm272_vm0, %v1664_v43  ;;  %v1795_v22 = vmax.f32 %v1763_v21, 0.0  ;;  %v1764_v12 = vadd.f32 %v3171_v24, %v1725_v15  ;;  %1694 = vst.msk [vmem:[#allocation2 + $0x48] sm:$0xff] %vm272_vm0, %v1662_v9  ;;  %v2502_v59 = vpop.f32.mrb[60].mxu1  ;;  %v2574_v18 = vpop.f32.mrb[60].mxu0 }
 0x173   : > { %v2282_v38 = vpack.c.bf16 %v1797_v40, %v1797_v40  ;;  %v1798_v7 = vmax.f32 %v1766_v48, 0.0  ;;  %v1583_v33 = vadd.f32 %v2574_v18, %v3149_v36  ;;  %v2503_v10 = vpop.f32.mrb[61].mxu1  ;;  %v1574_v26 = vpop.f32.mrb[61].mxu0 }
 0x174   : > { %v2280_v27 = vpack.c.bf16 %v1795_v22, %v1795_v22  ;;  %v1796_v28 = vmax.f32 %v1764_v12, 0.0  ;;  %v2504_v49 = vadd.f32 %v2503_v10, %v2502_v59  ;;  %v1575_v4 = vadd.f32 %v1574_v26, %v3141_v34  ;;  %v2505_v2 = vpop.f32.mrb[62].mxu1  ;;  %v2575_v50 = vpop.f32.mrb[62].mxu0  ;;  %v321_v22 = vld [vmem:[#allocation2 + $0x80] sm:$0xff] }
 0x175   : > { %1958 = vst.msk [vmem:[%s3192_s29 + $0x18] sm:$0xf] %vm1951_vm1, %v2282_v38  ;;  %v2283_v46 = vpack.c.bf16 %v1798_v7, %v1798_v7  ;;  %v1667_v19 = vadd.f32 %v1583_v33, %v319_v30  ;;  %v1586_v41 = vadd.f32 %v2575_v50, %v3151_v13  ;;  %v2506_v36 = vpop.f32.mrb[63].mxu1  ;;  %v1577_v42 = vpop.f32.mrb[63].mxu0  ;;  %v324_v33 = vld [vmem:[#allocation2 + $0x98] sm:$0xff] }
 0x176   : > { %1956 = vst.msk [vmem:[%s3192_s29 + $0x10] sm:$0xf] %vm1951_vm1, %v2280_v27  ;;  %v2281_v45 = vpack.c.bf16 %v1796_v28, %v1796_v28  ;;  %v1665_v51 = vadd.f32 %v1575_v4, %v317_v25  ;;  %v2507_v34 = vadd.f32 %v2506_v36, %v2505_v2  ;;  %v1578_v14 = vadd.f32 %v1577_v42, %v3143_v58  ;;  %v322_v28 = vld [vmem:[#allocation2 + $0x88] sm:$0xff] }
 0x177   : > { %v1730_v47 = vld [vmem:[#allocation2 + $0x50] sm:$0xff]  ;;  %1959 = vst.msk [vmem:[%s3192_s29 + $0x1c] sm:$0xf] %vm1951_vm1, %v2283_v46  ;;  %v1728_v20 = vld [vmem:[#allocation2 + $0x40] sm:$0xff]  ;;  %v1668_v13 = vadd.f32 %v1586_v41, %v320_v37  ;;  %v3235_v56 = vadd.f32 %v2504_v49, %v3145_v44 }
 0x178   : > { %v1769_v52 = vadd.f32 %v3171_v24, %v1730_v47  ;;  %1699 = vst.msk [vmem:[#allocation2 + $0x70] sm:$0xff] %vm272_vm0, %v1667_v19  ;;  %v1767_v39 = vadd.f32 %v3171_v24, %v1728_v20  ;;  %1697 = vst.msk [vmem:[#allocation2 + $0x60] sm:$0xff] %vm272_vm0, %v1665_v51  ;;  %v1666_v55 = vadd.f32 %v1578_v14, %v318_v54 }
 0x179   : > { %1957 = vst.msk [vmem:[%s3192_s29 + $0x14] sm:$0xf] %vm1951_vm1, %v2281_v45  ;;  %v1731_v60 = vld [vmem:[#allocation2 + $0x58] sm:$0xff]  ;;  %v3242_v58 = vadd.f32 %v2507_v34, %v3147_v53  ;;  %v1729_v1 = vld [vmem:[#allocation2 + $0x48] sm:$0xff] }
 0x17a   : > { %v1801_v61 = vmax.f32 %v1769_v52, 0.0  ;;  %v1770_v62 = vadd.f32 %v3171_v24, %v1731_v60  ;;  %1700 = vst.msk [vmem:[#allocation2 + $0x78] sm:$0xff] %vm272_vm0, %v1668_v13  ;;  %v1799_v43 = vmax.f32 %v1767_v39, 0.0  ;;  %v1768_v44 = vadd.f32 %v3171_v24, %v1729_v1  ;;  %1698 = vst.msk [vmem:[#allocation2 + $0x68] sm:$0xff] %vm272_vm0, %v1666_v55  ;;  %v2508_v21 = vpop.f32.mrb[64].mxu1  ;;  %v2578_v9 = vpop.f32.mrb[64].mxu0 }
 0x17b   : > { %v1599_v53 = vadd.f32 %v2578_v9, %v3177_v0  ;;  %v2509_v15 = vpop.f32.mrb[65].mxu1  ;;  %v1590_v12 = vpop.f32.mrb[65].mxu0  ;;  %v327_v52 = vld [vmem:[#allocation2 + $0xb0] sm:$0xff]  ;;  %v325_v55 = vld [vmem:[#allocation2 + $0xa0] sm:$0xff] }
 0x17c   : > { %v2286_v40 = vpack.c.bf16 %v1801_v61, %v1801_v61  ;;  %v1802_v48 = vmax.f32 %v1770_v62, 0.0  ;;  %v2284_v59 = vpack.c.bf16 %v1799_v43, %v1799_v43  ;;  %v1800_v30 = vmax.f32 %v1768_v44, 0.0  ;;  %v2511_v7 = vpop.f32.mrb[66].mxu1  ;;  %v2579_v10 = vpop.f32.mrb[66].mxu0 }
 0x17d   : > { %v2510_v18 = vadd.f32 %v2509_v15, %v2508_v21  ;;  %v1591_v38 = vadd.f32 %v1590_v12, %v3158_v3  ;;  %v1671_v26 = vadd.f32 %v1599_v53, %v323_v8  ;;  %v1602_v27 = vadd.f32 %v2579_v10, %v3185_v16  ;;  %v2512_v0 = vpop.f32.mrb[67].mxu1  ;;  %v1593_v49 = vpop.f32.mrb[67].mxu0  ;;  %v328_v8 = vld [vmem:[#allocation2 + $0xb8] sm:$0xff]  ;;  %v326_v15 = vld [vmem:[#allocation2 + $0xa8] sm:$0xff] }
 0x17e   : > { %1962 = vst.msk [vmem:[%s3192_s29 + $0x28] sm:$0xf] %vm1951_vm1, %v2286_v40  ;;  %v2287_v25 = vpack.c.bf16 %v1802_v48, %v1802_v48  ;;  %1960 = vst.msk [vmem:[%s3192_s29 + $0x20] sm:$0xf] %vm1951_vm1, %v2284_v59  ;;  %v2285_v4 = vpack.c.bf16 %v1800_v30, %v1800_v30  ;;  %v2513_v3 = vadd.f32 %v2512_v0, %v2511_v7 }
 0x17f   : > { %v1734_v2 = vld [vmem:[#allocation2 + $0x70] sm:$0xff]  ;;  %v1669_v37 = vadd.f32 %v1591_v38, %v321_v22  ;;  %v1594_v50 = vadd.f32 %v1593_v49, %v3163_v32  ;;  %v1732_v19 = vld [vmem:[#allocation2 + $0x60] sm:$0xff]  ;;  %1703 = vst.msk [vmem:[#allocation2 + $0x90] sm:$0xff] %vm272_vm0, %v1671_v26  ;;  %v1672_v16 = vadd.f32 %v1602_v27, %v324_v33  ;;  %v3261_v41 = vadd.f32 %v2510_v18, %v3089_v57 }
 0x180   : > { %1963 = vst.msk [vmem:[%s3192_s29 + $0x2c] sm:$0xf] %vm1951_vm1, %v2287_v25  ;;  %v1773_v46 = vadd.f32 %v3171_v24, %v1734_v2  ;;  %1961 = vst.msk [vmem:[%s3192_s29 + $0x24] sm:$0xf] %vm1951_vm1, %v2285_v4  ;;  %v1771_v36 = vadd.f32 %v3171_v24, %v1732_v19  ;;  %v3268_v32 = vadd.f32 %v2513_v3, %v3091_v63  ;;  %v331_v2 = vld [vmem:[#allocation2 + $0xd0] sm:$0xff] }
 0x181   : > { %v1735_v54 = vld [vmem:[#allocation2 + $0x78] sm:$0xff]  ;;  %1701 = vst.msk [vmem:[#allocation2 + $0x80] sm:$0xff] %vm272_vm0, %v1669_v37  ;;  %v1670_v42 = vadd.f32 %v1594_v50, %v322_v28  ;;  %v1733_v51 = vld [vmem:[#allocation2 + $0x68] sm:$0xff]  ;;  %1704 = vst.msk [vmem:[#allocation2 + $0x98] sm:$0xff] %vm272_vm0, %v1672_v16 }
 0x182   : > { %v1805_v45 = vmax.f32 %v1773_v46, 0.0  ;;  %v1774_v47 = vadd.f32 %v3171_v24, %v1735_v54  ;;  %v1803_v34 = vmax.f32 %v1771_v36, 0.0  ;;  %v1772_v57 = vadd.f32 %v3171_v24, %v1733_v51  ;;  %v2514_v14 = vpop.f32.mrb[68].mxu1  ;;  %v2582_v20 = vpop.f32.mrb[68].mxu0  ;;  %v332_v51 = vld [vmem:[#allocation2 + $0xd8] sm:$0xff] }
 0x183   : > { %1702 = vst.msk [vmem:[#allocation2 + $0x88] sm:$0xff] %vm272_vm0, %v1670_v42  ;;  %v1615_v63 = vadd.f32 %v2582_v20, %v3235_v56  ;;  %v2515_v60 = vpop.f32.mrb[69].mxu1  ;;  %v1606_v61 = vpop.f32.mrb[69].mxu0 }
 0x184   : > { %v2290_v13 = vpack.c.bf16 %v1805_v45, %v1805_v45  ;;  %v1806_v39 = vmax.f32 %v1774_v47, 0.0  ;;  %v2288_v62 = vpack.c.bf16 %v1803_v34, %v1803_v34  ;;  %v1804_v1 = vmax.f32 %v1772_v57, 0.0  ;;  %v2517_v21 = vpop.f32.mrb[70].mxu1  ;;  %v2583_v9 = vpop.f32.mrb[70].mxu0 }
 0x185   : > { %v2516_v43 = vadd.f32 %v2515_v60, %v2514_v14  ;;  %v1607_v44 = vadd.f32 %v1606_v61, %v3209_v6  ;;  %v1675_v48 = vadd.f32 %v1615_v63, %v327_v52  ;;  %v1618_v53 = vadd.f32 %v2583_v9, %v3242_v58  ;;  %v2518_v56 = vpop.f32.mrb[71].mxu1  ;;  %v1609_v22 = vpop.f32.mrb[71].mxu0 }
 0x186   : > { %1966 = vst.msk [vmem:[%s3192_s29 + $0x38] sm:$0xf] %vm1951_vm1, %v2290_v13  ;;  %v2291_v40 = vpack.c.bf16 %v1806_v39, %v1806_v39  ;;  %1964 = vst.msk [vmem:[%s3192_s29 + $0x30] sm:$0xf] %vm1951_vm1, %v2288_v62  ;;  %v2289_v12 = vpack.c.bf16 %v1804_v1, %v1804_v1  ;;  %v1738_v59 = vld [vmem:[#allocation2 + $0x90] sm:$0xff]  ;;  %v2519_v6 = vadd.f32 %v2518_v56, %v2517_v21  ;;  %v330_v13 = vld [vmem:[#allocation2 + $0xc8] sm:$0xff] }
 0x187   : > { %v1673_v30 = vadd.f32 %v1607_v44, %v325_v55  ;;  %v1610_v18 = vadd.f32 %v1609_v22, %v3216_v31  ;;  %v1777_v38 = vadd.f32 %v3171_v24, %v1738_v59  ;;  %1707 = vst.msk [vmem:[#allocation2 + $0xb0] sm:$0xff] %vm272_vm0, %v1675_v48  ;;  %v1676_v58 = vadd.f32 %v1618_v53, %v328_v8 }
 0x188   : > { %1967 = vst.msk [vmem:[%s3192_s29 + $0x3c] sm:$0xf] %vm1951_vm1, %v2291_v40  ;;  %v1736_v7 = vld [vmem:[#allocation2 + $0x80] sm:$0xff]  ;;  %v1470_v33 = vadd.f32 %v2516_v43, %v3093_v5  ;;  %1965 = vst.msk [vmem:[%s3192_s29 + $0x34] sm:$0xf] %vm1951_vm1, %v2289_v12  ;;  %v1739_v25 = vld [vmem:[#allocation2 + $0x98] sm:$0xff]  ;;  %v1473_v31 = vadd.f32 %v2519_v6, %v3095_v11 }
 0x189   : > { %v1775_v10 = vadd.f32 %v3171_v24, %v1736_v7  ;;  %1705 = vst.msk [vmem:[#allocation2 + $0xa0] sm:$0xff] %vm272_vm0, %v1673_v30  ;;  %v1674_v26 = vadd.f32 %v1610_v18, %v326_v15  ;;  %v1809_v27 = vmax.f32 %v1777_v38, 0.0  ;;  %v1778_v0 = vadd.f32 %v3171_v24, %v1739_v25  ;;  %1708 = vst.msk [vmem:[#allocation2 + $0xb8] sm:$0xff] %vm272_vm0, %v1676_v58  ;;  %v329_v11 = vld [vmem:[#allocation2 + $0xc0] sm:$0xff] }
 0x18a   : > { %v1737_v28 = vld [vmem:[#allocation2 + $0x88] sm:$0xff]  ;;  %v2520_v5 = vpop.f32.mrb[72].mxu1  ;;  %v2586_v37 = vpop.f32.mrb[72].mxu0  ;;  %v333_v6 = vld [vmem:[#allocation2 + $0xe0] sm:$0xff] }
 0x18b   : > { %v1807_v49 = vmax.f32 %v1775_v10, 0.0  ;;  %v1776_v4 = vadd.f32 %v3171_v24, %v1737_v28  ;;  %1706 = vst.msk [vmem:[#allocation2 + $0xa8] sm:$0xff] %vm272_vm0, %v1674_v26  ;;  %v2294_v3 = vpack.c.bf16 %v1809_v27, %v1809_v27  ;;  %v1810_v50 = vmax.f32 %v1778_v0, 0.0  ;;  %v2521_v19 = vpop.f32.mrb[73].mxu1  ;;  %v1622_v16 = vpop.f32.mrb[73].mxu0 }
 0x18c   : > { %v1631_v46 = vadd.f32 %v2586_v37, %v1470_v33  ;;  %v2522_v42 = vadd.f32 %v2521_v19, %v2520_v5  ;;  %v1623_v45 = vadd.f32 %v1622_v16, %v3261_v41  ;;  %v2523_v47 = vpop.f32.mrb[74].mxu1  ;;  %v2587_v34 = vpop.f32.mrb[74].mxu0  ;;  %v334_v5 = vld [vmem:[#allocation2 + $0xe8] sm:$0xff] }
 0x18d   : > { %v2292_v36 = vpack.c.bf16 %v1807_v49, %v1807_v49  ;;  %v1808_v54 = vmax.f32 %v1776_v4, 0.0  ;;  %1970 = vst.msk [vmem:[%s3192_s29 + $0x48] sm:$0xf] %vm1951_vm1, %v2294_v3  ;;  %v2295_v57 = vpack.c.bf16 %v1810_v50, %v1810_v50  ;;  %v1634_v52 = vadd.f32 %v2587_v34, %v1473_v31  ;;  %v2524_v20 = vpop.f32.mrb[75].mxu1  ;;  %v1625_v39 = vpop.f32.mrb[75].mxu0  ;;  %v335_v3 = vld [vmem:[#allocation2 + $0xf0] sm:$0xff] }
 0x18e   : > { %v1679_v14 = vadd.f32 %v1631_v46, %v331_v2  ;;  %v1742_v60 = vld [vmem:[#allocation2 + $0xb0] sm:$0xff]  ;;  %v1677_v55 = vadd.f32 %v1623_v45, %v329_v11  ;;  %v2525_v61 = vadd.f32 %v2524_v20, %v2523_v47  ;;  %v1626_v41 = vadd.f32 %v1625_v39, %v3268_v32 }
 0x18f   : > { %1968 = vst.msk [vmem:[%s3192_s29 + $0x40] sm:$0xf] %vm1951_vm1, %v2292_v36  ;;  %v2293_v63 = vpack.c.bf16 %v1808_v54, %v1808_v54  ;;  %1971 = vst.msk [vmem:[%s3192_s29 + $0x4c] sm:$0xf] %vm1951_vm1, %v2295_v57  ;;  %v1781_v62 = vadd.f32 %v3171_v24, %v1742_v60  ;;  %v1680_v43 = vadd.f32 %v1634_v52, %v332_v51 }
 0x190   : > { %v1740_v1 = vld [vmem:[#allocation2 + $0xa0] sm:$0xff]  ;;  %1711 = vst.msk [vmem:[#allocation2 + $0xd0] sm:$0xff] %vm272_vm0, %v1679_v14  ;;  %v1478_v44 = vadd.f32 %v2522_v42, %v3097_v17  ;;  %v1743_v8 = vld [vmem:[#allocation2 + $0xb8] sm:$0xff]  ;;  %1709 = vst.msk [vmem:[#allocation2 + $0xc0] sm:$0xff] %vm272_vm0, %v1677_v55  ;;  %v1678_v9 = vadd.f32 %v1626_v41, %v330_v13  ;;  %v1481_v32 = vadd.f32 %v2525_v61, %v3099_v23 }
 0x191   : > { %1969 = vst.msk [vmem:[%s3192_s29 + $0x44] sm:$0xf] %vm1951_vm1, %v2293_v63  ;;  %v1779_v21 = vadd.f32 %v3171_v24, %v1740_v1  ;;  %v1813_v40 = vmax.f32 %v1781_v62, 0.0  ;;  %v1782_v48 = vadd.f32 %v3171_v24, %v1743_v8  ;;  %v336_v42 = vld [vmem:[#allocation2 + $0xf8] sm:$0xff] }
 0x192   : > { %v1741_v53 = vld [vmem:[#allocation2 + $0xa8] sm:$0xff]  ;;  %1712 = vst.msk [vmem:[#allocation2 + $0xd8] sm:$0xff] %vm272_vm0, %v1680_v43  ;;  %1710 = vst.msk [vmem:[#allocation2 + $0xc8] sm:$0xff] %vm272_vm0, %v1678_v9  ;;  %v2526_v15 = vpop.f32.mrb[76].mxu1  ;;  %v2590_v22 = vpop.f32.mrb[76].mxu0 }
 0x193   : > { %v1811_v56 = vmax.f32 %v1779_v21, 0.0  ;;  %v1780_v17 = vadd.f32 %v3171_v24, %v1741_v53  ;;  %v2298_v12 = vpack.c.bf16 %v1813_v40, %v1813_v40  ;;  %v1814_v59 = vmax.f32 %v1782_v48, 0.0  ;;  %v2527_v30 = vpop.f32.mrb[77].mxu1  ;;  %v1638_v23 = vpop.f32.mrb[77].mxu0 }
 0x194   : > { %v2528_v7 = vadd.f32 %v2527_v30, %v2526_v15  ;;  %v1639_v58 = vadd.f32 %v1638_v23, %v1478_v44  ;;  %v2529_v33 = vpop.f32.mrb[78].mxu1  ;;  %v2591_v10 = vpop.f32.mrb[78].mxu0 }
 0x195   : > { %v2296_v18 = vpack.c.bf16 %v1811_v56, %v1811_v56  ;;  %v1812_v38 = vmax.f32 %v1780_v17, 0.0  ;;  %1974 = vst.msk [vmem:[%s3192_s29 + $0x58] sm:$0xf] %vm1951_vm1, %v2298_v12  ;;  %v2299_v25 = vpack.c.bf16 %v1814_v59, %v1814_v59  ;;  %v2530_v26 = vpop.f32.mrb[79].mxu1  ;;  %v1641_v31 = vpop.f32.mrb[79].mxu0 }
 0x196   : > { %v1486_v28 = vadd.f32 %v2528_v7, %v3101_v29  ;;  %v1681_v49 = vadd.f32 %v1639_v58, %v333_v6  ;;  %v2531_v4 = vadd.f32 %v2530_v26, %v2529_v33  ;;  %v1642_v50 = vadd.f32 %v1641_v31, %v1481_v32 }
 0x197   : > { %1972 = vst.msk [vmem:[%s3192_s29 + $0x50] sm:$0xf] %vm1951_vm1, %v2296_v18  ;;  %v2297_v27 = vpack.c.bf16 %v1812_v38, %v1812_v38  ;;  %v1746_v0 = vld [vmem:[#allocation2 + $0xd0] sm:$0xff]  ;;  %1975 = vst.msk [vmem:[%s3192_s29 + $0x5c] sm:$0xf] %vm1951_vm1, %v2299_v25  ;;  %v1744_v37 = vld [vmem:[#allocation2 + $0xc0] sm:$0xff] }
 0x198   : > { %v1785_v2 = vadd.f32 %v3171_v24, %v1746_v0  ;;  %v1783_v46 = vadd.f32 %v3171_v24, %v1744_v37  ;;  %v1647_v11 = vadd.f32 %v2590_v22, %v1486_v28  ;;  %1713 = vst.msk [vmem:[#allocation2 + $0xe0] sm:$0xff] %vm272_vm0, %v1681_v49  ;;  %v1489_v29 = vadd.f32 %v2531_v4, %v3103_v35 }
 0x199   : > { %1973 = vst.msk [vmem:[%s3192_s29 + $0x54] sm:$0xf] %vm1951_vm1, %v2297_v27  ;;  %v1747_v19 = vld [vmem:[#allocation2 + $0xd8] sm:$0xff]  ;;  %v1745_v54 = vld [vmem:[#allocation2 + $0xc8] sm:$0xff]  ;;  %v1682_v45 = vadd.f32 %v1642_v50, %v334_v5 }
 0x19a   : > { %v1817_v16 = vmax.f32 %v1785_v2, 0.0  ;;  %v1786_v36 = vadd.f32 %v3171_v24, %v1747_v19  ;;  %v1815_v47 = vmax.f32 %v1783_v46, 0.0  ;;  %v1784_v51 = vadd.f32 %v3171_v24, %v1745_v54 }
 0x19b   : > { %v1683_v34 = vadd.f32 %v1647_v11, %v335_v3  ;;  %v1650_v57 = vadd.f32 %v2591_v10, %v1489_v29  ;;  %1714 = vst.msk [vmem:[#allocation2 + $0xe8] sm:$0xff] %vm272_vm0, %v1682_v45 }
 0x19c   : > { %v2302_v14 = vpack.c.bf16 %v1817_v16, %v1817_v16  ;;  %v1818_v52 = vmax.f32 %v1786_v36, 0.0  ;;  %v2300_v35 = vpack.c.bf16 %v1815_v47, %v1815_v47  ;;  %v1816_v20 = vmax.f32 %v1784_v51, 0.0 }
 0x19d   : > { %1715 = vst.msk [vmem:[#allocation2 + $0xf0] sm:$0xff] %vm272_vm0, %v1683_v34  ;;  %v1684_v13 = vadd.f32 %v1650_v57, %v336_v42 }
 0x19e   : > { %1978 = vst.msk [vmem:[%s3192_s29 + $0x68] sm:$0xf] %vm1951_vm1, %v2302_v14  ;;  %v2303_v39 = vpack.c.bf16 %v1818_v52, %v1818_v52  ;;  %1976 = vst.msk [vmem:[%s3192_s29 + $0x60] sm:$0xf] %vm1951_vm1, %v2300_v35  ;;  %v2301_v63 = vpack.c.bf16 %v1816_v20, %v1816_v20 }
 0x19f   : > { %1716 = vst.msk [vmem:[#allocation2 + $0xf8] sm:$0xff] %vm272_vm0, %v1684_v13  ;;  %v1748_v60 = vld [vmem:[#allocation2 + $0xe0] sm:$0xff] }
 0x1a0   : > { %1979 = vst.msk [vmem:[%s3192_s29 + $0x6c] sm:$0xf] %vm1951_vm1, %v2303_v39  ;;  %1977 = vst.msk [vmem:[%s3192_s29 + $0x64] sm:$0xf] %vm1951_vm1, %v2301_v63  ;;  %v1787_v55 = vadd.f32 %v3171_v24, %v1748_v60 }
 0x1a2   : > { %v1819_v61 = vmax.f32 %v1787_v55, 0.0  ;;  %v1749_v41 = vld [vmem:[#allocation2 + $0xe8] sm:$0xff] }
 0x1a3   : > { %v1788_v1 = vadd.f32 %v3171_v24, %v1749_v41 }
 0x1a4   : > { %v1750_v62 = vld [vmem:[#allocation2 + $0xf0] sm:$0xff]  ;;  %v2304_v44 = vpack.c.bf16 %v1819_v61, %v1819_v61 }
 0x1a5   : > { %v1789_v43 = vadd.f32 %v3171_v24, %v1750_v62  ;;  %v1820_v8 = vmax.f32 %v1788_v1, 0.0 }
 0x1a6   : > { %v1751_v21 = vld [vmem:[#allocation2 + $0xf8] sm:$0xff]  ;;  %1980 = vst.msk [vmem:[%s3192_s29 + $0x70] sm:$0xf] %vm1951_vm1, %v2304_v44 }
 0x1a7   : > { %v1821_v9 = vmax.f32 %v1789_v43, 0.0  ;;  %v1790_v32 = vadd.f32 %v3171_v24, %v1751_v21  ;;  %v2305_v40 = vpack.c.bf16 %v1820_v8, %v1820_v8 }
 0x1a9   : > { %v2306_v48 = vpack.c.bf16 %v1821_v9, %v1821_v9  ;;  %v1822_v53 = vmax.f32 %v1790_v32, 0.0  ;;  %1981 = vst.msk [vmem:[%s3192_s29 + $0x74] sm:$0xf] %vm1951_vm1, %v2305_v40 }
 0x1ab   : > { %1982 = vst.msk [vmem:[%s3192_s29 + $0x78] sm:$0xf] %vm1951_vm1, %v2306_v48  ;;  %v2307_v56 = vpack.c.bf16 %v1822_v53, %v1822_v53 }
 0x1ad   : > { %1983 = vst.msk [vmem:[%s3192_s29 + $0x7c] sm:$0xf] %vm1951_vm1, %v2307_v56 }
 0x1ae PF: > { %s13_s14 = sadd.s32 1, %s2804_s14   ;;  %s3367_s12 = smov %s2800_s13 }
 0x1af   : > { %p10_p5 = scmp.ge.s32.totalorder %s13_s14, 4   ;;  %s3368_s13 = smov %s3370_s15 }
 0x1b1   :  { %12 = sbr.rel (!%p10_p5) target bundleno = 2 (0x2), region = 76 }

// kernel: _lambda_.23
= control target key start
LH: loop header
LB: loop body
LE: loop exit
PB: predicated region body
PF: predicated region fallthrough
CT: control target
= control target key end

     0   :  { %s1365_s12 = smov 0   ;;  %s1367_s13 = smov 0   ;;  %s1618_s0 = inlined_call_operand.vmem [shape: bf16[512,64], index: 0, kind: input, shape index: {}]   ;;  %s1619_s1 = inlined_call_operand.vmem [shape: bf16[64,64], index: 1, kind: input, shape index: {}]   ;;  %s1620_s2 = inlined_call_operand.vmem [shape: f32[1,64], index: 2, kind: input, shape index: {}]   ;;  %s1621_s3 = inlined_call_operand.vmem [shape: bf16[512,64], index: 3, kind: output, shape index: {}]  }
   0x1   :  { %s1369_s14 = smov 0  }
   0x2 LB: > { %s32_s15 = sadd.s32 1, %s1338_s13  ;;  %p1099_p0 = scmp.ge.s32.totalorder %s1342_s14, 1  ;;  %s1342_s14 = sphi %s1369_s14, %s13_s14   ;;  %s1338_s13 = sphi %s1367_s13, %s1623_s13   ;;  %s1334_s12 = sphi %s1365_s12, %s1622_s12  }
   0x3   : > { %p34_p1 = scmp.ge.s32.totalorder %s32_s15, 2  ;;  %p188_p2 = scmp.lt.s32.totalorder %s1342_s14, 3 }
   0x5   : > { %s1625_s15 = smov (%p34_p1, %s32_s15), 0  ;;  %p189_p3 = pnand %p1099_p0, %p188_p2 }
   0x6   : > { %v1300_v0 = vld [vmem:[%s1619_s1] sm:$0xff] (!%p189_p3)   ;;  %s1100_s18 = sshll.u32 (!%p189_p3), %s1334_s12, 5  ;;  %v1301_v1 = vld [vmem:[%s1619_s1 + $0x8] sm:$0xff] (!%p189_p3)   ;;  %v1302_v2 = vld [vmem:[%s1619_s1 + $0x10] sm:$0xff] (!%p189_p3)   ;;  %vm264_vm0 = vcmask (!%p189_p3), 523264   ;;  %v1344_v3 = vmov (!%p189_p3), 0.0  }
   0x7   : > { %192 = sbr.rel (%p189_p3) target bundleno = 281 (0x119), region = 32  ;;  %p230_p4 = scmp.lt.s32.totalorder (!%p189_p3), %s1100_s18, 63  ;;  %1227 = vmatprep.subr.bf16.mxu0 (!%p189_p3), %v1300_v0  ;;  %1267 = vmatprep.subr.bf16.mxu1 (!%p189_p3), %v1300_v0  ;;  %267 = vst.msk [vmem:[#allocation2 + $0x10] sm:$0xff] (!%p189_p3), %vm264_vm0, %v1344_v3  ;;  %265 = vst.msk [vmem:[#allocation2] sm:$0xff] (!%p189_p3), %vm264_vm0, %v1344_v3  ;;  %v1303_v4 = vld [vmem:[%s1619_s1 + $0x18] sm:$0xff] (!%p189_p3)   ;;  %vm949_vm1 = vcmask (!%p189_p3), 519168  }
   0x8   : > { %1228 = vmatpush3.bf16.msra.mxu0 (!%p189_p3), %v1300_v0  ;;  %1271 = vmatpush3.bf16.msra.mxu1 (!%p189_p3), %v1300_v0  ;;  %266 = vst.msk [vmem:[#allocation2 + $0x8] sm:$0xff] (!%p189_p3), %vm264_vm0, %v1344_v3  ;;  %268 = vst.msk [vmem:[#allocation2 + $0x18] sm:$0xff] (!%p189_p3), %vm264_vm0, %v1344_v3  ;;  %v1480_v49 = vld [vmem:[%s1620_s2] ss:$0 sm:$0xff] (!%p189_p3) }
   0x9   : > { %1229 = vmatprep.subr.bf16.mxu0 (!%p189_p3), %v1301_v1  ;;  %1268 = vmatprep.subr.bf16.mxu1 (!%p189_p3), %v1301_v1  ;;  %269 = vst.msk [vmem:[#allocation2 + $0x20] sm:$0xff] (!%p189_p3), %vm264_vm0, %v1344_v3  ;;  %270 = vst.msk [vmem:[#allocation2 + $0x28] sm:$0xff] (!%p189_p3), %vm264_vm0, %v1344_v3 }
   0xa   : > { %271 = vst.msk [vmem:[#allocation2 + $0x30] sm:$0xff] (!%p189_p3), %vm264_vm0, %v1344_v3  ;;  %272 = vst.msk [vmem:[#allocation2 + $0x38] sm:$0xff] (!%p189_p3), %vm264_vm0, %v1344_v3 }
   0xb   : > { %273 = vst.msk [vmem:[#allocation2 + $0x40] sm:$0xff] (!%p189_p3), %vm264_vm0, %v1344_v3  ;;  %274 = vst.msk [vmem:[#allocation2 + $0x48] sm:$0xff] (!%p189_p3), %vm264_vm0, %v1344_v3 }
   0xc   : > { %275 = vst.msk [vmem:[#allocation2 + $0x50] sm:$0xff] (!%p189_p3), %vm264_vm0, %v1344_v3  ;;  %276 = vst.msk [vmem:[#allocation2 + $0x58] sm:$0xff] (!%p189_p3), %vm264_vm0, %v1344_v3  ;;  %1230 = vmatpush3.bf16.msra.mxu0 (!%p189_p3), %v1301_v1  ;;  %1272 = vmatpush3.bf16.msra.mxu1 (!%p189_p3), %v1301_v1 }
   0xd   : > { %277 = vst.msk [vmem:[#allocation2 + $0x60] sm:$0xff] (!%p189_p3), %vm264_vm0, %v1344_v3  ;;  %278 = vst.msk [vmem:[#allocation2 + $0x68] sm:$0xff] (!%p189_p3), %vm264_vm0, %v1344_v3  ;;  %1231 = vmatprep.subr.bf16.mxu0 (!%p189_p3), %v1302_v2  ;;  %1269 = vmatprep.subr.bf16.mxu1 (!%p189_p3), %v1302_v2 }
   0xe   : > { %s1627_s18 = smov (!%p230_p4, %s1100_s18), 63  ;;  %279 = vst.msk [vmem:[#allocation2 + $0x70] sm:$0xff] %vm264_vm0, %v1344_v3  ;;  %280 = vst.msk [vmem:[#allocation2 + $0x78] sm:$0xff] %vm264_vm0, %v1344_v3  ;;  %v299_v21 = vld [vmem:[#allocation2 + $0x10] sm:$0xff]  ;;  %v297_v23 = vld [vmem:[#allocation2] sm:$0xff] }
   0xf   : > { %s1101_s23 = sshll.u32 %s1627_s18, 2  ;;  %281 = vst.msk [vmem:[#allocation2 + $0x80] sm:$0xff] %vm264_vm0, %v1344_v3  ;;  %282 = vst.msk [vmem:[#allocation2 + $0x88] sm:$0xff] %vm264_vm0, %v1344_v3  ;;  %v300_v27 = vld [vmem:[#allocation2 + $0x18] sm:$0xff]  ;;  %v298_v33 = vld [vmem:[#allocation2 + $0x8] sm:$0xff] }
  0x10   : > { %283 = vst.msk [vmem:[#allocation2 + $0x90] sm:$0xff] %vm264_vm0, %v1344_v3  ;;  %284 = vst.msk [vmem:[#allocation2 + $0x98] sm:$0xff] %vm264_vm0, %v1344_v3  ;;  %s1435_s28 = scalar_lea.vmem %s1618_s0, %s1101_s23  ;;  %1232 = vmatpush3.bf16.msra.mxu0 %v1302_v2  ;;  %1273 = vmatpush3.bf16.msra.mxu1 %v1302_v2  ;;  %v301_v47 = vld [vmem:[#allocation2 + $0x20] sm:$0xff]  ;;  %v302_v58 = vld [vmem:[#allocation2 + $0x28] sm:$0xff]  ;;  %s1491_s6 = scalar_lea.vmem %s1621_s3, %s1101_s23 }
  0x11   : > { %285 = vst.msk [vmem:[#allocation2 + $0xa0] sm:$0xff] %vm264_vm0, %v1344_v3  ;;  %286 = vst.msk [vmem:[#allocation2 + $0xa8] sm:$0xff] %vm264_vm0, %v1344_v3  ;;  %v1304_v5 = vld [vmem:[%s1435_s28] sm:$0xff]   ;;  %1233 = vmatprep.subr.bf16.mxu0 %v1303_v4  ;;  %1270 = vmatprep.subr.bf16.mxu1 %v1303_v4  ;;  %v1306_v7 = vld [vmem:[%s1435_s28 + $0x8] sm:$0xff]  }
  0x12   : > { %287 = vst.msk [vmem:[#allocation2 + $0xb0] sm:$0xff] %vm264_vm0, %v1344_v3  ;;  %288 = vst.msk [vmem:[#allocation2 + $0xb8] sm:$0xff] %vm264_vm0, %v1344_v3  ;;  %v1305_v6 = vld [vmem:[%s1435_s28 + $0x40] sm:$0xff]   ;;  %1235 = vmatprep.mubr.msk.bf16.mxu0 %vm264_vm0, %v1304_v5  ;;  %v1307_v8 = vld [vmem:[%s1435_s28 + $0x48] sm:$0xff]  }
  0x13   : > { %289 = vst.msk [vmem:[#allocation2 + $0xc0] sm:$0xff] %vm264_vm0, %v1344_v3  ;;  %290 = vst.msk [vmem:[#allocation2 + $0xc8] sm:$0xff] %vm264_vm0, %v1344_v3  ;;  %1251 = vmatprep.mubr.msk.bf16.mxu1 %vm264_vm0, %v1305_v6  ;;  %v1308_v9 = vld [vmem:[%s1435_s28 + $0x10] sm:$0xff]   ;;  %v1310_v11 = vld [vmem:[%s1435_s28 + $0x18] sm:$0xff]  }
  0x14   : > { %291 = vst.msk [vmem:[#allocation2 + $0xd0] sm:$0xff] %vm264_vm0, %v1344_v3  ;;  %292 = vst.msk [vmem:[#allocation2 + $0xd8] sm:$0xff] %vm264_vm0, %v1344_v3  ;;  %1234 = vmatpush3.bf16.msra.mxu0 %v1303_v4  ;;  %1274 = vmatpush3.bf16.msra.mxu1 %v1303_v4  ;;  %v1309_v10 = vld [vmem:[%s1435_s28 + $0x50] sm:$0xff]   ;;  %v1311_v12 = vld [vmem:[%s1435_s28 + $0x58] sm:$0xff]  }
  0x15   : > { %293 = vst.msk [vmem:[#allocation2 + $0xe0] sm:$0xff] %vm264_vm0, %v1344_v3  ;;  %294 = vst.msk [vmem:[#allocation2 + $0xe8] sm:$0xff] %vm264_vm0, %v1344_v3  ;;  %v1312_v13 = vld [vmem:[%s1435_s28 + $0x20] sm:$0xff]   ;;  %v1314_v15 = vld [vmem:[%s1435_s28 + $0x28] sm:$0xff]  }
  0x16   : > { %295 = vst.msk [vmem:[#allocation2 + $0xf0] sm:$0xff] %vm264_vm0, %v1344_v3  ;;  %296 = vst.msk [vmem:[#allocation2 + $0xf8] sm:$0xff] %vm264_vm0, %v1344_v3  ;;  %v1313_v14 = vld [vmem:[%s1435_s28 + $0x60] sm:$0xff]   ;;  %v1315_v16 = vld [vmem:[%s1435_s28 + $0x68] sm:$0xff]  }
  0x17   : > { %1236 = vmatmul.mubr.msk.bf16.vlgmr.msra.gmra.mrb[0].mxu0 %vm264_vm0, %v1306_v7  ;;  %1252 = vmatmul.mubr.msk.bf16.vlgmr.msra.gmra.mrb[0].mxu1 %vm264_vm0, %v1307_v8  ;;  %v1316_v17 = vld [vmem:[%s1435_s28 + $0x30] sm:$0xff]   ;;  %v1318_v19 = vld [vmem:[%s1435_s28 + $0x38] sm:$0xff]   ;;  %v313_v24 = vld [vmem:[#allocation2 + $0x80] sm:$0xff] }
  0x18   : > { %1239 = vmatprep.mubr.msk.bf16.mxu0 %vm264_vm0, %v1308_v9  ;;  %1255 = vmatprep.mubr.msk.bf16.mxu1 %vm264_vm0, %v1309_v10  ;;  %v1317_v18 = vld [vmem:[%s1435_s28 + $0x70] sm:$0xff]   ;;  %v1319_v20 = vld [vmem:[%s1435_s28 + $0x78] sm:$0xff]   ;;  %v314_v34 = vld [vmem:[#allocation2 + $0x88] sm:$0xff] }
  0x19   : > { %v315_v22 = vld [vmem:[#allocation2 + $0x90] sm:$0xff]  ;;  %v316_v28 = vld [vmem:[#allocation2 + $0x98] sm:$0xff]  ;;  %v317_v48 = vld [vmem:[#allocation2 + $0xa0] sm:$0xff] }
  0x1a   : > { %v303_v45 = vld [vmem:[#allocation2 + $0x30] sm:$0xff]  ;;  %v304_v52 = vld [vmem:[#allocation2 + $0x38] sm:$0xff]  ;;  %v318_v59 = vld [vmem:[#allocation2 + $0xa8] sm:$0xff] }
  0x1b   : > { %v319_v46 = vld [vmem:[#allocation2 + $0xb0] sm:$0xff]  ;;  %v320_v53 = vld [vmem:[#allocation2 + $0xb8] sm:$0xff] }
  0x1f   : > { %1240 = vmatmul.mubr.msk.bf16.gmra.mrb[4].mxu0 %vm264_vm0, %v1310_v11  ;;  %1256 = vmatmul.mubr.msk.bf16.gmra.mrb[4].mxu1 %vm264_vm0, %v1311_v12 }
  0x20   : > { %1243 = vmatprep.mubr.msk.bf16.mxu0 %vm264_vm0, %v1312_v13  ;;  %1259 = vmatprep.mubr.msk.bf16.mxu1 %vm264_vm0, %v1313_v14 }
  0x27   : > { %1244 = vmatmul.mubr.msk.bf16.gmra.mrb[8].mxu0 %vm264_vm0, %v1314_v15  ;;  %1260 = vmatmul.mubr.msk.bf16.gmra.mrb[8].mxu1 %vm264_vm0, %v1315_v16 }
  0x28   : > { %1247 = vmatprep.mubr.msk.bf16.mxu0 %vm264_vm0, %v1316_v17  ;;  %1263 = vmatprep.mubr.msk.bf16.mxu1 %vm264_vm0, %v1317_v18 }
  0x2f   : > { %1248 = vmatmul.mubr.msk.bf16.gmra.mrb[12].mxu0 %vm264_vm0, %v1318_v19  ;;  %1264 = vmatmul.mubr.msk.bf16.gmra.mrb[12].mxu1 %vm264_vm0, %v1319_v20 }
  0xea   : > { %v1237_v25 = vpop.f32.mrb[0].mxu0  ;;  %v1253_v26 = vpop.f32.mrb[0].mxu1 }
  0xeb   : > { %v685_v29 = vadd.f32 %v1237_v25, %v299_v21  ;;  %v701_v30 = vadd.f32 %v1253_v26, %v315_v22  ;;  %v556_v31 = vpop.f32.mrb[1].mxu0  ;;  %v620_v32 = vpop.f32.mrb[1].mxu1  ;;  %v307_v26 = vld [vmem:[#allocation2 + $0x50] sm:$0xff] }
  0xec   : > { %v683_v35 = vadd.f32 %v556_v31, %v297_v23  ;;  %v699_v36 = vadd.f32 %v620_v32, %v313_v24  ;;  %v1238_v37 = vpop.f32.mrb[2].mxu0  ;;  %v1254_v38 = vpop.f32.mrb[2].mxu1  ;;  %v321_v31 = vld [vmem:[#allocation2 + $0xc0] sm:$0xff] }
  0xed   : > { %717 = vst.msk [vmem:[#allocation2 + $0x10] sm:$0xff] %vm264_vm0, %v685_v29  ;;  %733 = vst.msk [vmem:[#allocation2 + $0x90] sm:$0xff] %vm264_vm0, %v701_v30  ;;  %v686_v39 = vadd.f32 %v1238_v37, %v300_v27  ;;  %v702_v40 = vadd.f32 %v1254_v38, %v316_v28  ;;  %v559_v41 = vpop.f32.mrb[3].mxu0  ;;  %v623_v42 = vpop.f32.mrb[3].mxu1  ;;  %v323_v27 = vld [vmem:[#allocation2 + $0xd0] sm:$0xff]  ;;  %v305_v30 = vld [vmem:[#allocation2 + $0x40] sm:$0xff] }
  0xee   : > { %715 = vst.msk [vmem:[#allocation2] sm:$0xff] %vm264_vm0, %v683_v35  ;;  %731 = vst.msk [vmem:[#allocation2 + $0x80] sm:$0xff] %vm264_vm0, %v699_v36  ;;  %v684_v43 = vadd.f32 %v559_v41, %v298_v33  ;;  %v700_v44 = vadd.f32 %v623_v42, %v314_v34  ;;  %v308_v36 = vld [vmem:[#allocation2 + $0x58] sm:$0xff]  ;;  %v306_v42 = vld [vmem:[#allocation2 + $0x48] sm:$0xff] }
  0xef   : > { %718 = vst.msk [vmem:[#allocation2 + $0x18] sm:$0xff] %vm264_vm0, %v686_v39  ;;  %734 = vst.msk [vmem:[#allocation2 + $0x98] sm:$0xff] %vm264_vm0, %v702_v40  ;;  %v324_v37 = vld [vmem:[#allocation2 + $0xd8] sm:$0xff] }
  0xf0   : > { %716 = vst.msk [vmem:[#allocation2 + $0x8] sm:$0xff] %vm264_vm0, %v684_v43  ;;  %732 = vst.msk [vmem:[#allocation2 + $0x88] sm:$0xff] %vm264_vm0, %v700_v44  ;;  %v322_v43 = vld [vmem:[#allocation2 + $0xc8] sm:$0xff] }
  0xf2   : > { %v1241_v50 = vpop.f32.mrb[4].mxu0  ;;  %v1257_v51 = vpop.f32.mrb[4].mxu1 }
  0xf3   : > { %v689_v54 = vadd.f32 %v1241_v50, %v303_v45  ;;  %v705_v55 = vadd.f32 %v1257_v51, %v319_v46  ;;  %v572_v56 = vpop.f32.mrb[5].mxu0  ;;  %v636_v57 = vpop.f32.mrb[5].mxu1 }
  0xf4   : > { %v752_v60 = vld [vmem:[#allocation2 + $0x10] sm:$0xff]  ;;  %v687_v62 = vadd.f32 %v572_v56, %v301_v47  ;;  %v703_v63 = vadd.f32 %v636_v57, %v317_v48  ;;  %v1242_v0 = vpop.f32.mrb[6].mxu0  ;;  %v1258_v1 = vpop.f32.mrb[6].mxu1 }
  0xf5   : > { %v768_v61 = vld [vmem:[#allocation2 + $0x90] sm:$0xff]  ;;  %v791_v2 = vadd.f32 %v1480_v49, %v752_v60  ;;  %v750_v4 = vld [vmem:[#allocation2] sm:$0xff]  ;;  %721 = vst.msk [vmem:[#allocation2 + $0x30] sm:$0xff] %vm264_vm0, %v689_v54  ;;  %737 = vst.msk [vmem:[#allocation2 + $0xb0] sm:$0xff] %vm264_vm0, %v705_v55  ;;  %v690_v6 = vadd.f32 %v1242_v0, %v304_v52  ;;  %v706_v7 = vadd.f32 %v1258_v1, %v320_v53  ;;  %v575_v8 = vpop.f32.mrb[7].mxu0  ;;  %v639_v9 = vpop.f32.mrb[7].mxu1 }
  0xf6   : > { %v807_v3 = vadd.f32 %v1480_v49, %v768_v61  ;;  %v766_v5 = vld [vmem:[#allocation2 + $0x80] sm:$0xff]  ;;  %v789_v10 = vadd.f32 %v1480_v49, %v750_v4  ;;  %v753_v12 = vld [vmem:[#allocation2 + $0x18] sm:$0xff]  ;;  %719 = vst.msk [vmem:[#allocation2 + $0x20] sm:$0xff] %vm264_vm0, %v687_v62  ;;  %735 = vst.msk [vmem:[#allocation2 + $0xa0] sm:$0xff] %vm264_vm0, %v703_v63  ;;  %v688_v14 = vadd.f32 %v575_v8, %v302_v58 }
  0xf7   : > { %v805_v11 = vadd.f32 %v1480_v49, %v766_v5  ;;  %v769_v13 = vld [vmem:[#allocation2 + $0x98] sm:$0xff]  ;;  %v704_v15 = vadd.f32 %v639_v9, %v318_v59  ;;  %v1177_v16 = vpack.c.bf16 %v791_v2, %v791_v2  ;;  %v792_v18 = vadd.f32 %v1480_v49, %v753_v12  ;;  %v751_v20 = vld [vmem:[#allocation2 + $0x8] sm:$0xff]  ;;  %722 = vst.msk [vmem:[#allocation2 + $0x38] sm:$0xff] %vm264_vm0, %v690_v6  ;;  %v327_v12 = vld [vmem:[#allocation2 + $0xf0] sm:$0xff] }
  0xf8   : > { %v1193_v17 = vpack.c.bf16 %v807_v3, %v807_v3  ;;  %v808_v19 = vadd.f32 %v1480_v49, %v769_v13  ;;  %v767_v21 = vld [vmem:[#allocation2 + $0x88] sm:$0xff]  ;;  %738 = vst.msk [vmem:[#allocation2 + $0xb8] sm:$0xff] %vm264_vm0, %v706_v7  ;;  %v1175_v22 = vpack.c.bf16 %v789_v10, %v789_v10  ;;  %v790_v24 = vadd.f32 %v1480_v49, %v751_v20 }
  0xf9   : > { %v1191_v23 = vpack.c.bf16 %v805_v11, %v805_v11  ;;  %v806_v25 = vadd.f32 %v1480_v49, %v767_v21  ;;  %720 = vst.msk [vmem:[#allocation2 + $0x28] sm:$0xff] %vm264_vm0, %v688_v14  ;;  %736 = vst.msk [vmem:[#allocation2 + $0xa8] sm:$0xff] %vm264_vm0, %v704_v15  ;;  %v1178_v28 = vpack.c.bf16 %v792_v18, %v792_v18  ;;  %v311_v11 = vld [vmem:[#allocation2 + $0x70] sm:$0xff]  ;;  %v309_v15 = vld [vmem:[#allocation2 + $0x60] sm:$0xff] }
  0xfa   : > { %952 = vst.msk [vmem:[%s1491_s6 + $0x8] sm:$0xf] %vm949_vm1, %v1177_v16  ;;  %968 = vst.msk [vmem:[%s1491_s6 + $0x48] sm:$0xf] %vm949_vm1, %v1193_v17  ;;  %v1194_v29 = vpack.c.bf16 %v808_v19, %v808_v19  ;;  %v1176_v32 = vpack.c.bf16 %v790_v24, %v790_v24  ;;  %v1245_v34 = vpop.f32.mrb[8].mxu0  ;;  %v1261_v35 = vpop.f32.mrb[8].mxu1 }
  0xfb   : > { %950 = vst.msk [vmem:[%s1491_s6] sm:$0xf] %vm949_vm1, %v1175_v22  ;;  %966 = vst.msk [vmem:[%s1491_s6 + $0x40] sm:$0xf] %vm949_vm1, %v1191_v23  ;;  %v1192_v33 = vpack.c.bf16 %v806_v25, %v806_v25  ;;  %v693_v38 = vadd.f32 %v1245_v34, %v307_v26  ;;  %v709_v39 = vadd.f32 %v1261_v35, %v323_v27  ;;  %v588_v40 = vpop.f32.mrb[9].mxu0  ;;  %v652_v41 = vpop.f32.mrb[9].mxu1 }
  0xfc   : > { %953 = vst.msk [vmem:[%s1491_s6 + $0xc] sm:$0xf] %vm949_vm1, %v1178_v28  ;;  %969 = vst.msk [vmem:[%s1491_s6 + $0x4c] sm:$0xf] %vm949_vm1, %v1194_v29  ;;  %v756_v44 = vld [vmem:[#allocation2 + $0x30] sm:$0xff]  ;;  %v691_v46 = vadd.f32 %v588_v40, %v305_v30  ;;  %v707_v47 = vadd.f32 %v652_v41, %v321_v31  ;;  %v1246_v48 = vpop.f32.mrb[10].mxu0 }
  0xfd   : > { %951 = vst.msk [vmem:[%s1491_s6 + $0x4] sm:$0xf] %vm949_vm1, %v1176_v32  ;;  %967 = vst.msk [vmem:[%s1491_s6 + $0x44] sm:$0xf] %vm949_vm1, %v1192_v33  ;;  %v772_v45 = vld [vmem:[#allocation2 + $0xb0] sm:$0xff]  ;;  %v1262_v50 = vpop.f32.mrb[10].mxu1  ;;  %v795_v51 = vadd.f32 %v1480_v49, %v756_v44  ;;  %v694_v55 = vadd.f32 %v1246_v48, %v308_v36 }
  0xfe   : > { %v811_v52 = vadd.f32 %v1480_v49, %v772_v45  ;;  %v754_v53 = vld [vmem:[#allocation2 + $0x20] sm:$0xff]  ;;  %725 = vst.msk [vmem:[#allocation2 + $0x50] sm:$0xff] %vm264_vm0, %v693_v38  ;;  %741 = vst.msk [vmem:[#allocation2 + $0xd0] sm:$0xff] %vm264_vm0, %v709_v39  ;;  %v710_v56 = vadd.f32 %v1262_v50, %v324_v37  ;;  %v591_v57 = vpop.f32.mrb[11].mxu0  ;;  %v655_v58 = vpop.f32.mrb[11].mxu1  ;;  %v757_v61 = vld [vmem:[#allocation2 + $0x38] sm:$0xff] }
  0xff   : > { %v770_v54 = vld [vmem:[#allocation2 + $0xa0] sm:$0xff]  ;;  %v793_v59 = vadd.f32 %v1480_v49, %v754_v53  ;;  %v773_v62 = vld [vmem:[#allocation2 + $0xb8] sm:$0xff]  ;;  %723 = vst.msk [vmem:[#allocation2 + $0x40] sm:$0xff] %vm264_vm0, %v691_v46  ;;  %739 = vst.msk [vmem:[#allocation2 + $0xc0] sm:$0xff] %vm264_vm0, %v707_v47  ;;  %v692_v63 = vadd.f32 %v591_v57, %v306_v42  ;;  %v708_v0 = vadd.f32 %v655_v58, %v322_v43 }
 0x100   : > { %v809_v60 = vadd.f32 %v1480_v49, %v770_v54  ;;  %v1181_v1 = vpack.c.bf16 %v795_v51, %v795_v51  ;;  %v1197_v2 = vpack.c.bf16 %v811_v52, %v811_v52  ;;  %v796_v3 = vadd.f32 %v1480_v49, %v757_v61  ;;  %v755_v5 = vld [vmem:[#allocation2 + $0x28] sm:$0xff]  ;;  %726 = vst.msk [vmem:[#allocation2 + $0x58] sm:$0xff] %vm264_vm0, %v694_v55  ;;  %v325_v16 = vld [vmem:[#allocation2 + $0xe0] sm:$0xff]  ;;  %v312_v21 = vld [vmem:[#allocation2 + $0x78] sm:$0xff] }
 0x101   : > { %v812_v4 = vadd.f32 %v1480_v49, %v773_v62  ;;  %v771_v6 = vld [vmem:[#allocation2 + $0xa8] sm:$0xff]  ;;  %742 = vst.msk [vmem:[#allocation2 + $0xd8] sm:$0xff] %vm264_vm0, %v710_v56  ;;  %v1179_v7 = vpack.c.bf16 %v793_v59, %v793_v59  ;;  %v794_v9 = vadd.f32 %v1480_v49, %v755_v5  ;;  %724 = vst.msk [vmem:[#allocation2 + $0x48] sm:$0xff] %vm264_vm0, %v692_v63  ;;  %v328_v22 = vld [vmem:[#allocation2 + $0xf8] sm:$0xff] }
 0x102   : > { %v1195_v8 = vpack.c.bf16 %v809_v60, %v809_v60  ;;  %v810_v10 = vadd.f32 %v1480_v49, %v771_v6  ;;  %740 = vst.msk [vmem:[#allocation2 + $0xc8] sm:$0xff] %vm264_vm0, %v708_v0  ;;  %v1182_v13 = vpack.c.bf16 %v796_v3, %v796_v3  ;;  %v1249_v19 = vpop.f32.mrb[12].mxu0  ;;  %v1265_v20 = vpop.f32.mrb[12].mxu1  ;;  %v310_v27 = vld [vmem:[#allocation2 + $0x68] sm:$0xff] }
 0x103   : > { %956 = vst.msk [vmem:[%s1491_s6 + $0x18] sm:$0xf] %vm949_vm1, %v1181_v1  ;;  %972 = vst.msk [vmem:[%s1491_s6 + $0x58] sm:$0xf] %vm949_vm1, %v1197_v2  ;;  %v1198_v14 = vpack.c.bf16 %v812_v4, %v812_v4  ;;  %v1180_v17 = vpack.c.bf16 %v794_v9, %v794_v9  ;;  %v697_v23 = vadd.f32 %v1249_v19, %v311_v11  ;;  %v604_v25 = vpop.f32.mrb[13].mxu0  ;;  %v668_v26 = vpop.f32.mrb[13].mxu1 }
 0x104   : > { %954 = vst.msk [vmem:[%s1491_s6 + $0x10] sm:$0xf] %vm949_vm1, %v1179_v7  ;;  %970 = vst.msk [vmem:[%s1491_s6 + $0x50] sm:$0xf] %vm949_vm1, %v1195_v8  ;;  %v1196_v18 = vpack.c.bf16 %v810_v10, %v810_v10  ;;  %v713_v24 = vadd.f32 %v1265_v20, %v327_v12  ;;  %v326_v28 = vld [vmem:[#allocation2 + $0xe8] sm:$0xff]  ;;  %v695_v31 = vadd.f32 %v604_v25, %v309_v15  ;;  %v1250_v33 = vpop.f32.mrb[14].mxu0 }
 0x105   : > { %957 = vst.msk [vmem:[%s1491_s6 + $0x1c] sm:$0xf] %vm949_vm1, %v1182_v13  ;;  %973 = vst.msk [vmem:[%s1491_s6 + $0x5c] sm:$0xf] %vm949_vm1, %v1198_v14  ;;  %v760_v29 = vld [vmem:[#allocation2 + $0x50] sm:$0xff]  ;;  %v711_v32 = vadd.f32 %v668_v26, %v325_v16  ;;  %v1266_v34 = vpop.f32.mrb[14].mxu1  ;;  %v698_v39 = vadd.f32 %v1250_v33, %v312_v21 }
 0x106   : > { %955 = vst.msk [vmem:[%s1491_s6 + $0x14] sm:$0xf] %vm949_vm1, %v1180_v17  ;;  %971 = vst.msk [vmem:[%s1491_s6 + $0x54] sm:$0xf] %vm949_vm1, %v1196_v18  ;;  %v776_v30 = vld [vmem:[#allocation2 + $0xd0] sm:$0xff]  ;;  %v799_v35 = vadd.f32 %v1480_v49, %v760_v29  ;;  %v758_v37 = vld [vmem:[#allocation2 + $0x40] sm:$0xff]  ;;  %v714_v40 = vadd.f32 %v1266_v34, %v328_v22 }
 0x107   : > { %v815_v36 = vadd.f32 %v1480_v49, %v776_v30  ;;  %v774_v38 = vld [vmem:[#allocation2 + $0xc0] sm:$0xff]  ;;  %729 = vst.msk [vmem:[#allocation2 + $0x70] sm:$0xff] %vm264_vm0, %v697_v23  ;;  %745 = vst.msk [vmem:[#allocation2 + $0xf0] sm:$0xff] %vm264_vm0, %v713_v24  ;;  %v607_v41 = vpop.f32.mrb[15].mxu0  ;;  %v671_v42 = vpop.f32.mrb[15].mxu1  ;;  %v797_v43 = vadd.f32 %v1480_v49, %v758_v37  ;;  %v761_v45 = vld [vmem:[#allocation2 + $0x58] sm:$0xff] }
 0x108   : > { %v813_v44 = vadd.f32 %v1480_v49, %v774_v38  ;;  %v777_v46 = vld [vmem:[#allocation2 + $0xd8] sm:$0xff]  ;;  %727 = vst.msk [vmem:[#allocation2 + $0x60] sm:$0xff] %vm264_vm0, %v695_v31  ;;  %743 = vst.msk [vmem:[#allocation2 + $0xe0] sm:$0xff] %vm264_vm0, %v711_v32  ;;  %v696_v47 = vadd.f32 %v607_v41, %v310_v27  ;;  %v712_v48 = vadd.f32 %v671_v42, %v326_v28  ;;  %v759_v54 = vld [vmem:[#allocation2 + $0x48] sm:$0xff] }
 0x109   : > { %v1185_v50 = vpack.c.bf16 %v799_v35, %v799_v35  ;;  %v1201_v51 = vpack.c.bf16 %v815_v36, %v815_v36  ;;  %v800_v52 = vadd.f32 %v1480_v49, %v761_v45  ;;  %v816_v53 = vadd.f32 %v1480_v49, %v777_v46  ;;  %v775_v55 = vld [vmem:[#allocation2 + $0xc8] sm:$0xff]  ;;  %730 = vst.msk [vmem:[#allocation2 + $0x78] sm:$0xff] %vm264_vm0, %v698_v39 }
 0x10a   : > { %746 = vst.msk [vmem:[#allocation2 + $0xf8] sm:$0xff] %vm264_vm0, %v714_v40  ;;  %v1183_v56 = vpack.c.bf16 %v797_v43, %v797_v43  ;;  %v1199_v57 = vpack.c.bf16 %v813_v44, %v813_v44  ;;  %v798_v58 = vadd.f32 %v1480_v49, %v759_v54  ;;  %v814_v59 = vadd.f32 %v1480_v49, %v775_v55 }
 0x10b   : > { %728 = vst.msk [vmem:[#allocation2 + $0x68] sm:$0xff] %vm264_vm0, %v696_v47  ;;  %744 = vst.msk [vmem:[#allocation2 + $0xe8] sm:$0xff] %vm264_vm0, %v712_v48  ;;  %v1186_v60 = vpack.c.bf16 %v800_v52, %v800_v52  ;;  %v1202_v61 = vpack.c.bf16 %v816_v53, %v816_v53 }
 0x10c   : > { %960 = vst.msk [vmem:[%s1491_s6 + $0x28] sm:$0xf] %vm949_vm1, %v1185_v50  ;;  %976 = vst.msk [vmem:[%s1491_s6 + $0x68] sm:$0xf] %vm949_vm1, %v1201_v51  ;;  %v1184_v62 = vpack.c.bf16 %v798_v58, %v798_v58  ;;  %v1200_v63 = vpack.c.bf16 %v814_v59, %v814_v59 }
 0x10d   : > { %958 = vst.msk [vmem:[%s1491_s6 + $0x20] sm:$0xf] %vm949_vm1, %v1183_v56  ;;  %974 = vst.msk [vmem:[%s1491_s6 + $0x60] sm:$0xf] %vm949_vm1, %v1199_v57 }
 0x10e   : > { %961 = vst.msk [vmem:[%s1491_s6 + $0x2c] sm:$0xf] %vm949_vm1, %v1186_v60  ;;  %977 = vst.msk [vmem:[%s1491_s6 + $0x6c] sm:$0xf] %vm949_vm1, %v1202_v61  ;;  %v764_v0 = vld [vmem:[#allocation2 + $0x70] sm:$0xff] }
 0x10f   : > { %959 = vst.msk [vmem:[%s1491_s6 + $0x24] sm:$0xf] %vm949_vm1, %v1184_v62  ;;  %975 = vst.msk [vmem:[%s1491_s6 + $0x64] sm:$0xf] %vm949_vm1, %v1200_v63  ;;  %v780_v1 = vld [vmem:[#allocation2 + $0xf0] sm:$0xff]  ;;  %v803_v2 = vadd.f32 %v1480_v49, %v764_v0  ;;  %v762_v4 = vld [vmem:[#allocation2 + $0x60] sm:$0xff] }
 0x110   : > { %v819_v3 = vadd.f32 %v1480_v49, %v780_v1  ;;  %v778_v5 = vld [vmem:[#allocation2 + $0xe0] sm:$0xff]  ;;  %v801_v6 = vadd.f32 %v1480_v49, %v762_v4  ;;  %v765_v8 = vld [vmem:[#allocation2 + $0x78] sm:$0xff] }
 0x111   : > { %v817_v7 = vadd.f32 %v1480_v49, %v778_v5  ;;  %v781_v9 = vld [vmem:[#allocation2 + $0xf8] sm:$0xff]  ;;  %v1189_v10 = vpack.c.bf16 %v803_v2, %v803_v2  ;;  %v804_v12 = vadd.f32 %v1480_v49, %v765_v8 }
 0x112   : > { %v1205_v11 = vpack.c.bf16 %v819_v3, %v819_v3  ;;  %v820_v13 = vadd.f32 %v1480_v49, %v781_v9  ;;  %v763_v14 = vld [vmem:[#allocation2 + $0x68] sm:$0xff]  ;;  %v1187_v16 = vpack.c.bf16 %v801_v6, %v801_v6 }
 0x113   : > { %v779_v15 = vld [vmem:[#allocation2 + $0xe8] sm:$0xff]  ;;  %v1203_v17 = vpack.c.bf16 %v817_v7, %v817_v7  ;;  %v802_v18 = vadd.f32 %v1480_v49, %v763_v14  ;;  %964 = vst.msk [vmem:[%s1491_s6 + $0x38] sm:$0xf] %vm949_vm1, %v1189_v10  ;;  %v1190_v20 = vpack.c.bf16 %v804_v12, %v804_v12 }
 0x114   : > { %v818_v19 = vadd.f32 %v1480_v49, %v779_v15  ;;  %980 = vst.msk [vmem:[%s1491_s6 + $0x78] sm:$0xf] %vm949_vm1, %v1205_v11  ;;  %v1206_v21 = vpack.c.bf16 %v820_v13, %v820_v13  ;;  %962 = vst.msk [vmem:[%s1491_s6 + $0x30] sm:$0xf] %vm949_vm1, %v1187_v16 }
 0x115   : > { %978 = vst.msk [vmem:[%s1491_s6 + $0x70] sm:$0xf] %vm949_vm1, %v1203_v17  ;;  %v1188_v22 = vpack.c.bf16 %v802_v18, %v802_v18  ;;  %965 = vst.msk [vmem:[%s1491_s6 + $0x3c] sm:$0xf] %vm949_vm1, %v1190_v20 }
 0x116   : > { %v1204_v23 = vpack.c.bf16 %v818_v19, %v818_v19  ;;  %981 = vst.msk [vmem:[%s1491_s6 + $0x7c] sm:$0xf] %vm949_vm1, %v1206_v21 }
 0x117   : > { %963 = vst.msk [vmem:[%s1491_s6 + $0x34] sm:$0xf] %vm949_vm1, %v1188_v22 }
 0x118   : > { %979 = vst.msk [vmem:[%s1491_s6 + $0x74] sm:$0xf] %vm949_vm1, %v1204_v23 }
 0x119 PF: > { %s13_s14 = sadd.s32 1, %s1342_s14   ;;  %s1622_s12 = smov %s1338_s13 }
 0x11a   : > { %p10_p5 = scmp.ge.s32.totalorder %s13_s14, 4   ;;  %s1623_s13 = smov %s1625_s15 }
 0x11c   :  { %12 = sbr.rel (!%p10_p5) target bundleno = 2 (0x2), region = 76 }

// kernel: _lambda_.24
= control target key start
LH: loop header
LB: loop body
LE: loop exit
PB: predicated region body
PF: predicated region fallthrough
CT: control target
= control target key end

     0   :  { %s3084_s15 = smov 0   ;;  %s3086_s16 = smov 0   ;;  %s3703_s0 = inlined_call_operand.vmem [shape: bf16[512,576], index: 0, kind: input, shape index: {}]   ;;  %s3704_s1 = inlined_call_operand.vmem [shape: bf16[576,64], index: 1, kind: input, shape index: {}]   ;;  %s3705_s2 = inlined_call_operand.vmem [shape: f32[1,64], index: 2, kind: input, shape index: {}]   ;;  %s3706_s3 = inlined_call_operand.vmem [shape: bf16[512,64], index: 3, kind: input, shape index: {}]   ;;  %s3707_s4 = inlined_call_operand.vmem [shape: bf16[512,64], index: 4, kind: output, shape index: {}]  }
   0x1   :  { %s3088_s17 = smov 0  }
   0x2 LB: > { %s33_s18 = sadd.s32 1, %s3052_s16  ;;  %p2275_p0 = scmp.ge.s32.totalorder %s3056_s17, 1  ;;  %s3056_s17 = sphi %s3088_s17, %s14_s17   ;;  %s3052_s16 = sphi %s3086_s16, %s3709_s16   ;;  %s3048_s15 = sphi %s3084_s15, %s3708_s15  }
   0x3   : > { %p35_p1 = scmp.ge.s32.totalorder %s33_s18, 2  ;;  %p232_p2 = scmp.lt.s32.totalorder %s3056_s17, 3 }
   0x5   : > { %s3711_s18 = smov (%p35_p1, %s33_s18), 0  ;;  %p233_p3 = pnand %p2275_p0, %p232_p2 }
   0x6   : > { %v2886_v0 = vld [vmem:[%s3704_s1 + $0x40] sm:$0xff] (!%p233_p3)   ;;  %s2276_s21 = sshll.u32 (!%p233_p3), %s3048_s15, 5  ;;  %v2888_v2 = vld [vmem:[%s3704_s1 + $0x48] sm:$0xff] (!%p233_p3)   ;;  %v2890_v4 = vld [vmem:[%s3704_s1 + $0x50] sm:$0xff] (!%p233_p3)   ;;  %vm332_vm0 = vcmask (!%p233_p3), 523264   ;;  %vm2107_vm1 = vcmask (!%p233_p3), 519168  }
   0x7   : > { %236 = sbr.rel (%p233_p3) target bundleno = 432 (0x1b0), region = 36  ;;  %v2887_v1 = vld [vmem:[%s3704_s1] sm:$0xff] (!%p233_p3)   ;;  %2560 = vmatprep.subr.bf16.mxu0 (!%p233_p3), %v2886_v0  ;;  %2844 = vmatprep.subr.bf16.mxu1 (!%p233_p3), %v2886_v0  ;;  %p287_p4 = scmp.lt.s32.totalorder (!%p233_p3), %s2276_s21, 63  ;;  %v2889_v3 = vld [vmem:[%s3704_s1 + $0x8] sm:$0xff] (!%p233_p3)   ;;  %v2891_v5 = vld [vmem:[%s3704_s1 + $0x10] sm:$0xff] (!%p233_p3)  }
   0x8   : > { %2561 = vmatpush3.bf16.msra.mxu0 (!%p233_p3), %v2887_v1  ;;  %2852 = vmatpush3.bf16.msra.mxu1 (!%p233_p3), %v2887_v1  ;;  %v2892_v6 = vld [vmem:[%s3704_s1 + $0x58] sm:$0xff] (!%p233_p3)   ;;  %v2894_v8 = vld [vmem:[%s3704_s1 + $0x60] sm:$0xff] (!%p233_p3)   ;;  %v2896_v10 = vld [vmem:[%s3704_s1 + $0x68] sm:$0xff] (!%p233_p3)  }
   0x9   : > { %2562 = vmatprep.subr.bf16.mxu0 (!%p233_p3), %v2888_v2  ;;  %2845 = vmatprep.subr.bf16.mxu1 (!%p233_p3), %v2888_v2  ;;  %v2893_v7 = vld [vmem:[%s3704_s1 + $0x18] sm:$0xff] (!%p233_p3)   ;;  %v2895_v9 = vld [vmem:[%s3704_s1 + $0x20] sm:$0xff] (!%p233_p3)   ;;  %v2897_v13 = vld [vmem:[%s3704_s1 + $0x28] sm:$0xff] (!%p233_p3)  }
   0xa   : > { %v2898_v14 = vld [vmem:[%s3704_s1 + $0x70] sm:$0xff] (!%p233_p3)   ;;  %v2900_v16 = vld [vmem:[%s3704_s1 + $0x78] sm:$0xff] (!%p233_p3)   ;;  %v2908_v18 = vld [vmem:[%s3704_s1 + $0xc0] sm:$0xff] (!%p233_p3)  }
   0xb   : > { %v2899_v15 = vld [vmem:[%s3704_s1 + $0x30] sm:$0xff] (!%p233_p3)   ;;  %v2901_v17 = vld [vmem:[%s3704_s1 + $0x38] sm:$0xff] (!%p233_p3)   ;;  %v2911_v19 = vld [vmem:[%s3704_s1 + $0x100] sm:$0xff] (!%p233_p3)  }
   0xc   : > { %2563 = vmatpush3.bf16.msra.mxu0 (!%p233_p3), %v2889_v3  ;;  %2853 = vmatpush3.bf16.msra.mxu1 (!%p233_p3), %v2889_v3  ;;  %v2909_v22 = vld [vmem:[%s3704_s1 + $0x80] sm:$0xff] (!%p233_p3)   ;;  %v2910_v23 = vld [vmem:[%s3704_s1 + $0xc8] sm:$0xff] (!%p233_p3)   ;;  %v2919_v28 = vld [vmem:[%s3704_s1 + $0xd0] sm:$0xff] (!%p233_p3)  }
   0xd   : > { %2564 = vmatprep.subr.bf16.mxu0 (!%p233_p3), %v2890_v4  ;;  %2846 = vmatprep.subr.bf16.mxu1 (!%p233_p3), %v2890_v4  ;;  %v2912_v26 = vld [vmem:[%s3704_s1 + $0x88] sm:$0xff] (!%p233_p3)   ;;  %v2920_v30 = vld [vmem:[%s3704_s1 + $0x90] sm:$0xff] (!%p233_p3)   ;;  %v2921_v31 = vld [vmem:[%s3704_s1 + $0xd8] sm:$0xff] (!%p233_p3)  }
   0xe   : > { %s3713_s21 = smov (!%p287_p4, %s2276_s21), 63  ;;  %v2922_v34 = vld [vmem:[%s3704_s1 + $0x98] sm:$0xff]   ;;  %v2942_v35 = vld [vmem:[%s3704_s1 + $0x108] sm:$0xff]   ;;  %v2929_v37 = vld [vmem:[%s3704_s1 + $0xe0] sm:$0xff]  }
   0xf   : > { %s2860_s8 = smul.u32 20, %s3713_s21  ;;  %v2930_v39 = vld [vmem:[%s3704_s1 + $0xa0] sm:$0xff]   ;;  %v2931_v40 = vld [vmem:[%s3704_s1 + $0xe8] sm:$0xff]   ;;  %v2939_v46 = vld [vmem:[%s3704_s1 + $0xf0] sm:$0xff]  }
  0x10   : > { %2565 = vmatpush3.bf16.msra.mxu0 %v2891_v5  ;;  %2854 = vmatpush3.bf16.msra.mxu1 %v2891_v5  ;;  %v2932_v43 = vld [vmem:[%s3704_s1 + $0xa8] sm:$0xff]   ;;  %v2962_v47 = vld [vmem:[%s3704_s1 + $0x110] sm:$0xff]   ;;  %v2941_v49 = vld [vmem:[%s3704_s1 + $0xf8] sm:$0xff]  }
  0x11   : > { %2566 = vmatprep.subr.bf16.mxu0 %v2892_v6  ;;  %2847 = vmatprep.subr.bf16.mxu1 %v2892_v6  ;;  %s3135_s15 = scalar_lea.vmem %s3703_s0, %s2860_s8  ;;  %v2940_v48 = vld [vmem:[%s3704_s1 + $0xb0] sm:$0xff]   ;;  %v2943_v52 = vld [vmem:[%s3704_s1 + $0xb8] sm:$0xff]  }
  0x12   : > { %v2904_v11 = vld [vmem:[%s3135_s15 + $0x4] ss:$20 sps:$4 sm:$0xff]   ;;  %v2902_v20 = vld [vmem:[%s3135_s15] ss:$20 sps:$4 sm:$0xff]   ;;  %v2917_v27 = vld [vmem:[%s3135_s15 + $0x28] ss:$20 sps:$4 sm:$0xff]  }
  0x13   : > { %v2907_v12 = vld [vmem:[%s3135_s15 + $0x1e4] ss:$20 sps:$4 sm:$0xff]   ;;  %1262 = vmatprep.mubr.bf16.mxu0 %v2904_v11  ;;  %v2905_v21 = vld [vmem:[%s3135_s15 + $0x1e0] ss:$20 sps:$4 sm:$0xff]   ;;  %v2918_v29 = vld [vmem:[%s3135_s15 + $0x208] ss:$20 sps:$4 sm:$0xff]  }
  0x14   : > { %2567 = vmatpush3.bf16.msra.mxu0 %v2893_v7  ;;  %2855 = vmatpush3.bf16.msra.mxu1 %v2893_v7  ;;  %v2913_v24 = vld [vmem:[%s3135_s15 + $0x2c] ss:$20 sps:$4 sm:$0xff]   ;;  %v2923_v32 = vld [vmem:[%s3135_s15 + $0x54] ss:$20 sps:$4 sm:$0xff]   ;;  %v2927_v36 = vld [vmem:[%s3135_s15 + $0x50] ss:$20 sps:$4 sm:$0xff]  }
  0x15   : > { %2568 = vmatprep.subr.bf16.mxu0 %v2894_v8  ;;  %2848 = vmatprep.subr.bf16.mxu1 %v2894_v8  ;;  %v2915_v25 = vld [vmem:[%s3135_s15 + $0x20c] ss:$20 sps:$4 sm:$0xff]   ;;  %v2925_v33 = vld [vmem:[%s3135_s15 + $0x234] ss:$20 sps:$4 sm:$0xff]   ;;  %v2928_v38 = vld [vmem:[%s3135_s15 + $0x230] ss:$20 sps:$4 sm:$0xff]  }
  0x16   : > { %1358 = vmatprep.mubr.bf16.mxu1 %v2907_v12  ;;  %v2933_v41 = vld [vmem:[%s3135_s15 + $0x7c] ss:$20 sps:$4 sm:$0xff]   ;;  %v2937_v44 = vld [vmem:[%s3135_s15 + $0x78] ss:$20 sps:$4 sm:$0xff]   ;;  %v2949_v54 = vld [vmem:[%s3135_s15 + $0xa0] ss:$20 sps:$4 sm:$0xff]  }
  0x17   : > { %v2935_v42 = vld [vmem:[%s3135_s15 + $0x25c] ss:$20 sps:$4 sm:$0xff]   ;;  %v2938_v45 = vld [vmem:[%s3135_s15 + $0x258] ss:$20 sps:$4 sm:$0xff]   ;;  %v2952_v57 = vld [vmem:[%s3135_s15 + $0x34] ss:$20 sps:$4 sm:$0xff]  }
  0x18   : > { %2569 = vmatpush3.bf16.msra.mxu0 %v2895_v9  ;;  %2856 = vmatpush3.bf16.msra.mxu1 %v2895_v9  ;;  %v2944_v50 = vld [vmem:[%s3135_s15 + $0xa4] ss:$20 sps:$4 sm:$0xff]   ;;  %v2948_v51 = vld [vmem:[%s3135_s15 + $0xc] ss:$20 sps:$4 sm:$0xff]   ;;  %v2946_v53 = vld [vmem:[%s3135_s15 + $0x8] ss:$20 sps:$4 sm:$0xff]  }
  0x19   : > { %2570 = vmatprep.subr.bf16.mxu0 %v2896_v10  ;;  %2849 = vmatprep.subr.bf16.mxu1 %v2896_v10  ;;  %v2950_v55 = vld [vmem:[%s3135_s15 + $0xcc] ss:$20 sps:$4 sm:$0xff]   ;;  %v2981_v56 = vld [vmem:[%s3704_s1 + $0x118] sm:$0xff]   ;;  %v2955_v59 = vld [vmem:[%s3135_s15 + $0x30] ss:$20 sps:$4 sm:$0xff]  }
  0x1a   : > { %v2954_v58 = vld [vmem:[%s3135_s15 + $0xc8] ss:$20 sps:$4 sm:$0xff]   ;;  %v2960_v62 = vld [vmem:[%s3135_s15 + $0xf0] ss:$20 sps:$4 sm:$0xff]   ;;  %v2961_v63 = vld [vmem:[%s3135_s15 + $0x58] ss:$20 sps:$4 sm:$0xff]  }
  0x1b   : > { %v2956_v60 = vld [vmem:[%s3135_s15 + $0xf4] ss:$20 sps:$4 sm:$0xff]   ;;  %v2958_v61 = vld [vmem:[%s3135_s15 + $0x5c] ss:$20 sps:$4 sm:$0xff]   ;;  %v2965_v1 = vld [vmem:[%s3135_s15 + $0x84] ss:$20 sps:$4 sm:$0xff]  }
  0x1c   : > { %2571 = vmatpush3.bf16.msra.mxu0 %v2897_v13  ;;  %2857 = vmatpush3.bf16.msra.mxu1 %v2897_v13  ;;  %v2963_v0 = vld [vmem:[%s3135_s15 + $0x11c] ss:$20 sps:$4 sm:$0xff]   ;;  %v2967_v2 = vld [vmem:[%s3135_s15 + $0x118] ss:$20 sps:$4 sm:$0xff]   ;;  %v2968_v3 = vld [vmem:[%s3135_s15 + $0x80] ss:$20 sps:$4 sm:$0xff]  }
  0x1d   : > { %2572 = vmatprep.subr.bf16.mxu0 %v2898_v14  ;;  %2850 = vmatprep.subr.bf16.mxu1 %v2898_v14  ;;  %v2969_v4 = vld [vmem:[%s3135_s15 + $0x144] ss:$20 sps:$4 sm:$0xff]   ;;  %v2971_v5 = vld [vmem:[%s3135_s15 + $0xac] ss:$20 sps:$4 sm:$0xff]   ;;  %v2974_v7 = vld [vmem:[%s3135_s15 + $0xa8] ss:$20 sps:$4 sm:$0xff]  }
  0x1e   : > { %v2973_v6 = vld [vmem:[%s3135_s15 + $0x140] ss:$20 sps:$4 sm:$0xff]   ;;  %v2979_v10 = vld [vmem:[%s3135_s15 + $0x168] ss:$20 sps:$4 sm:$0xff]   ;;  %v2980_v11 = vld [vmem:[%s3135_s15 + $0xd0] ss:$20 sps:$4 sm:$0xff]  }
  0x1f   : > { %v2975_v8 = vld [vmem:[%s3135_s15 + $0x16c] ss:$20 sps:$4 sm:$0xff]   ;;  %v2977_v9 = vld [vmem:[%s3135_s15 + $0xd4] ss:$20 sps:$4 sm:$0xff]   ;;  %v2984_v13 = vld [vmem:[%s3135_s15 + $0xfc] ss:$20 sps:$4 sm:$0xff]  }
  0x20   : > { %2573 = vmatpush3.bf16.msra.mxu0 %v2899_v15  ;;  %2858 = vmatpush3.bf16.msra.mxu1 %v2899_v15  ;;  %v2982_v12 = vld [vmem:[%s3135_s15 + $0x194] ss:$20 sps:$4 sm:$0xff]   ;;  %v2986_v14 = vld [vmem:[%s3135_s15 + $0x190] ss:$20 sps:$4 sm:$0xff]   ;;  %v2987_v15 = vld [vmem:[%s3135_s15 + $0xf8] ss:$20 sps:$4 sm:$0xff]  }
  0x21   : > { %2574 = vmatprep.subr.bf16.mxu0 %v2900_v16  ;;  %2851 = vmatprep.subr.bf16.mxu1 %v2900_v16  ;;  %v2988_v16 = vld [vmem:[%s3135_s15 + $0x1bc] ss:$20 sps:$4 sm:$0xff]  }
  0x24   : > { %2575 = vmatpush3.bf16.msra.mxu0 %v2901_v17  ;;  %2859 = vmatpush3.bf16.msra.mxu1 %v2901_v17  ;;  %v2990_v17 = vld [vmem:[%s3135_s15 + $0x124] ss:$20 sps:$4 sm:$0xff]  }
  0x25   : > { %2672 = vmatprep.subr.bf16.mxu1 %v2908_v18  ;;  %2804 = vmatprep.subr.bf16.mxu0 %v2911_v19  ;;  %v2992_v18 = vld [vmem:[%s3135_s15 + $0x1b8] ss:$20 sps:$4 sm:$0xff]  }
  0x27   : > { %1263 = vmatmul.mubr.bf16.vlgmr.msra.gmra.mrb[0].mxu0 %v2902_v20  ;;  %1359 = vmatmul.mubr.bf16.vlgmr.msra.gmra.mrb[0].mxu1 %v2905_v21  ;;  %v2994_v20 = vld [vmem:[%s3135_s15 + $0x14c] ss:$20 sps:$4 sm:$0xff]   ;;  %v2996_v21 = vld [vmem:[%s3135_s15 + $0x10] ss:$20 sps:$4 sm:$0xff]  }
  0x28   : > { %2673 = vmatpush3.bf16.msra.mxu1 %v2909_v22  ;;  %2805 = vmatpush3.bf16.msra.mxu0 %v2911_v19  ;;  %v2993_v19 = vld [vmem:[%s3135_s15 + $0x120] ss:$20 sps:$4 sm:$0xff]   ;;  %v2997_v22 = vld [vmem:[%s3135_s15 + $0x148] ss:$20 sps:$4 sm:$0xff]  }
  0x29   : > { %2674 = vmatprep.subr.bf16.mxu1 %v2910_v23  ;;  %1270 = vmatprep.mubr.bf16.mxu0 %v2913_v24  ;;  %v2998_v23 = vld [vmem:[%s3135_s15 + $0x38] ss:$20 sps:$4 sm:$0xff]   ;;  %v2999_v24 = vld [vmem:[%s3135_s15 + $0x174] ss:$20 sps:$4 sm:$0xff]  }
  0x2a   : > { %1366 = vmatprep.mubr.bf16.mxu1 %v2915_v25  ;;  %2806 = vmatprep.subr.bf16.mxu0 %v2942_v35  ;;  %v3001_v25 = vld [vmem:[%s3135_s15 + $0x60] ss:$20 sps:$4 sm:$0xff]  }
  0x2c   : > { %2675 = vmatpush3.bf16.msra.mxu1 %v2912_v26  ;;  %2807 = vmatpush3.bf16.msra.mxu0 %v2942_v35  ;;  %v3002_v26 = vld [vmem:[%s3135_s15 + $0x170] ss:$20 sps:$4 sm:$0xff]   ;;  %v3013_v35 = vld [vmem:[%s3135_s15 + $0x128] ss:$20 sps:$4 sm:$0xff]  }
  0x2d   : > { %2676 = vmatprep.subr.bf16.mxu1 %v2919_v28  ;;  %2808 = vmatprep.subr.bf16.mxu0 %v2962_v47  ;;  %v3004_v28 = vld [vmem:[%s3135_s15 + $0x19c] ss:$20 sps:$4 sm:$0xff]  }
  0x2f   : > { %1271 = vmatmul.mubr.bf16.gmra.mrb[4].mxu0 %v2917_v27  ;;  %1367 = vmatmul.mubr.bf16.gmra.mrb[4].mxu1 %v2918_v29  ;;  %v3003_v27 = vld [vmem:[%s3135_s15 + $0x88] ss:$20 sps:$4 sm:$0xff]   ;;  %v3006_v29 = vld [vmem:[%s3135_s15 + $0xb0] ss:$20 sps:$4 sm:$0xff]  }
  0x30   : > { %2677 = vmatpush3.bf16.msra.mxu1 %v2920_v30  ;;  %1278 = vmatprep.mubr.bf16.mxu0 %v2923_v32  ;;  %v3007_v30 = vld [vmem:[%s3135_s15 + $0x198] ss:$20 sps:$4 sm:$0xff]  }
  0x31   : > { %2678 = vmatprep.subr.bf16.mxu1 %v2921_v31  ;;  %1374 = vmatprep.mubr.bf16.mxu1 %v2925_v33  ;;  %v3008_v31 = vld [vmem:[%s3135_s15 + $0xd8] ss:$20 sps:$4 sm:$0xff]   ;;  %v3011_v33 = vld [vmem:[%s3135_s15 + $0x100] ss:$20 sps:$4 sm:$0xff]  }
  0x32   : > { %2809 = vmatpush3.bf16.msra.mxu0 %v2962_v47  ;;  %v3009_v32 = vld [vmem:[%s3135_s15 + $0x1c4] ss:$20 sps:$4 sm:$0xff]  }
  0x33   : > { %2810 = vmatprep.subr.bf16.mxu0 %v2981_v56  ;;  %v3028_v47 = vld [vmem:[%s3135_s15 + $0x218] ss:$20 sps:$4 sm:$0xff]  }
  0x34   : > { %2679 = vmatpush3.bf16.msra.mxu1 %v2922_v34  ;;  %v3012_v34 = vld [vmem:[%s3135_s15 + $0x1c0] ss:$20 sps:$4 sm:$0xff]  }
  0x35   : > { %2680 = vmatprep.subr.bf16.mxu1 %v2929_v37  ;;  %v3016_v37 = vld [vmem:[%s3135_s15 + $0x150] ss:$20 sps:$4 sm:$0xff]  }
  0x36   : > { %2811 = vmatpush3.bf16.msra.mxu0 %v2981_v56 }
  0x37   : > { %1279 = vmatmul.mubr.bf16.gmra.mrb[8].mxu0 %v2927_v36  ;;  %1375 = vmatmul.mubr.bf16.gmra.mrb[8].mxu1 %v2928_v38  ;;  %v3014_v36 = vld [vmem:[%s3135_s15 + $0x1ec] ss:$20 sps:$4 sm:$0xff]   ;;  %v3017_v38 = vld [vmem:[%s3135_s15 + $0x1e8] ss:$20 sps:$4 sm:$0xff]  }
  0x38   : > { %2681 = vmatpush3.bf16.msra.mxu1 %v2930_v39  ;;  %1286 = vmatprep.mubr.bf16.mxu0 %v2933_v41  ;;  %v3018_v39 = vld [vmem:[%s3135_s15 + $0x178] ss:$20 sps:$4 sm:$0xff]   ;;  %v3021_v41 = vld [vmem:[%s3135_s15 + $0x1a0] ss:$20 sps:$4 sm:$0xff]  }
  0x39   : > { %2682 = vmatprep.subr.bf16.mxu1 %v2931_v40  ;;  %1382 = vmatprep.mubr.bf16.mxu1 %v2935_v42  ;;  %v3019_v40 = vld [vmem:[%s3135_s15 + $0x214] ss:$20 sps:$4 sm:$0xff]   ;;  %v3022_v42 = vld [vmem:[%s3135_s15 + $0x210] ss:$20 sps:$4 sm:$0xff]  }
  0x3c   : > { %2683 = vmatpush3.bf16.msra.mxu1 %v2932_v43  ;;  %v3023_v43 = vld [vmem:[%s3135_s15 + $0x1c8] ss:$20 sps:$4 sm:$0xff]  }
  0x3d   : > { %2684 = vmatprep.subr.bf16.mxu1 %v2939_v46  ;;  %v3027_v46 = vld [vmem:[%s3135_s15 + $0x238] ss:$20 sps:$4 sm:$0xff]  }
  0x3f   : > { %1287 = vmatmul.mubr.bf16.gmra.mrb[12].mxu0 %v2937_v44  ;;  %1383 = vmatmul.mubr.bf16.gmra.mrb[12].mxu1 %v2938_v45  ;;  %v3024_v44 = vld [vmem:[%s3135_s15 + $0x23c] ss:$20 sps:$4 sm:$0xff]  }
  0x40   : > { %2685 = vmatpush3.bf16.msra.mxu1 %v2940_v48  ;;  %1294 = vmatprep.mubr.bf16.mxu0 %v2944_v50  ;;  %v3026_v45 = vld [vmem:[%s3135_s15 + $0x1f0] ss:$20 sps:$4 sm:$0xff]   ;;  %v3032_v50 = vld [vmem:[%s3135_s15 + $0x260] ss:$20 sps:$4 sm:$0xff]  }
  0x41   : > { %2686 = vmatprep.subr.bf16.mxu1 %v2941_v49  ;;  %1423 = vmatprep.mubr.bf16.mxu1 %v2948_v51  ;;  %v3029_v48 = vld [vmem:[%s3135_s15 + $0x264] ss:$20 sps:$4 sm:$0xff]   ;;  %v3031_v49 = vld [vmem:[%s3135_s15 + $0x240] ss:$20 sps:$4 sm:$0xff]   ;;  %v3033_v51 = vld [vmem:[%s3135_s15 + $0x268] ss:$20 sps:$4 sm:$0xff]  }
  0x42   : > { %s2279_s15 = sshll.u32 %s3713_s21, 2 }
  0x43   : > { %s3423_s8 = scalar_lea.vmem %s3706_s3, %s2279_s15  ;;  %s3477_s13 = scalar_lea.vmem %s3707_s4, %s2279_s15 }
  0x44   : > { %2687 = vmatpush3.bf16.msra.mxu1 %v2943_v52  ;;  %v3058_v52 = vmov 0.0  }
  0x45   : > { %335 = vst.msk [vmem:[#allocation2 + $0x10] sm:$0xff] %vm332_vm0, %v3058_v52  ;;  %333 = vst.msk [vmem:[#allocation2] sm:$0xff] %vm332_vm0, %v3058_v52 }
  0x46   : > { %334 = vst.msk [vmem:[#allocation2 + $0x8] sm:$0xff] %vm332_vm0, %v3058_v52  ;;  %336 = vst.msk [vmem:[#allocation2 + $0x18] sm:$0xff] %vm332_vm0, %v3058_v52 }
  0x47   : > { %1295 = vmatmul.mubr.bf16.gmra.mrb[16].mxu0 %v2949_v54  ;;  %1424 = vmatmul.mubr.bf16.vlgmr.msra.gmra.mrb[16].mxu1 %v2946_v53  ;;  %337 = vst.msk [vmem:[#allocation2 + $0x20] sm:$0xff] %vm332_vm0, %v3058_v52  ;;  %338 = vst.msk [vmem:[#allocation2 + $0x28] sm:$0xff] %vm332_vm0, %v3058_v52 }
  0x48   : > { %1302 = vmatprep.mubr.bf16.mxu0 %v2950_v55  ;;  %1431 = vmatprep.mubr.bf16.mxu1 %v2952_v57  ;;  %339 = vst.msk [vmem:[#allocation2 + $0x30] sm:$0xff] %vm332_vm0, %v3058_v52  ;;  %340 = vst.msk [vmem:[#allocation2 + $0x38] sm:$0xff] %vm332_vm0, %v3058_v52 }
  0x49   : > { %341 = vst.msk [vmem:[#allocation2 + $0x40] sm:$0xff] %vm332_vm0, %v3058_v52  ;;  %342 = vst.msk [vmem:[#allocation2 + $0x48] sm:$0xff] %vm332_vm0, %v3058_v52 }
  0x4a   : > { %343 = vst.msk [vmem:[#allocation2 + $0x50] sm:$0xff] %vm332_vm0, %v3058_v52  ;;  %344 = vst.msk [vmem:[#allocation2 + $0x58] sm:$0xff] %vm332_vm0, %v3058_v52 }
  0x4b   : > { %345 = vst.msk [vmem:[#allocation2 + $0x60] sm:$0xff] %vm332_vm0, %v3058_v52  ;;  %346 = vst.msk [vmem:[#allocation2 + $0x68] sm:$0xff] %vm332_vm0, %v3058_v52 }
  0x4c   : > { %347 = vst.msk [vmem:[#allocation2 + $0x70] sm:$0xff] %vm332_vm0, %v3058_v52  ;;  %348 = vst.msk [vmem:[#allocation2 + $0x78] sm:$0xff] %vm332_vm0, %v3058_v52 }
  0x4d   : > { %349 = vst.msk [vmem:[#allocation2 + $0x80] sm:$0xff] %vm332_vm0, %v3058_v52  ;;  %350 = vst.msk [vmem:[#allocation2 + $0x88] sm:$0xff] %vm332_vm0, %v3058_v52 }
  0x4e   : > { %351 = vst.msk [vmem:[#allocation2 + $0x90] sm:$0xff] %vm332_vm0, %v3058_v52  ;;  %352 = vst.msk [vmem:[#allocation2 + $0x98] sm:$0xff] %vm332_vm0, %v3058_v52 }
  0x4f   : > { %1303 = vmatmul.mubr.bf16.gmra.mrb[20].mxu0 %v2954_v58  ;;  %1432 = vmatmul.mubr.bf16.gmra.mrb[20].mxu1 %v2955_v59  ;;  %353 = vst.msk [vmem:[#allocation2 + $0xa0] sm:$0xff] %vm332_vm0, %v3058_v52  ;;  %354 = vst.msk [vmem:[#allocation2 + $0xa8] sm:$0xff] %vm332_vm0, %v3058_v52 }
  0x50   : > { %1310 = vmatprep.mubr.bf16.mxu0 %v2956_v60  ;;  %1439 = vmatprep.mubr.bf16.mxu1 %v2958_v61  ;;  %355 = vst.msk [vmem:[#allocation2 + $0xb0] sm:$0xff] %vm332_vm0, %v3058_v52  ;;  %356 = vst.msk [vmem:[#allocation2 + $0xb8] sm:$0xff] %vm332_vm0, %v3058_v52 }
  0x51   : > { %357 = vst.msk [vmem:[#allocation2 + $0xc0] sm:$0xff] %vm332_vm0, %v3058_v52  ;;  %358 = vst.msk [vmem:[#allocation2 + $0xc8] sm:$0xff] %vm332_vm0, %v3058_v52 }
  0x52   : > { %359 = vst.msk [vmem:[#allocation2 + $0xd0] sm:$0xff] %vm332_vm0, %v3058_v52  ;;  %360 = vst.msk [vmem:[#allocation2 + $0xd8] sm:$0xff] %vm332_vm0, %v3058_v52 }
  0x53   : > { %361 = vst.msk [vmem:[#allocation2 + $0xe0] sm:$0xff] %vm332_vm0, %v3058_v52  ;;  %362 = vst.msk [vmem:[#allocation2 + $0xe8] sm:$0xff] %vm332_vm0, %v3058_v52 }
  0x54   : > { %363 = vst.msk [vmem:[#allocation2 + $0xf0] sm:$0xff] %vm332_vm0, %v3058_v52  ;;  %364 = vst.msk [vmem:[#allocation2 + $0xf8] sm:$0xff] %vm332_vm0, %v3058_v52 }
  0x57   : > { %1311 = vmatmul.mubr.bf16.gmra.mrb[24].mxu0 %v2960_v62  ;;  %1440 = vmatmul.mubr.bf16.gmra.mrb[24].mxu1 %v2961_v63 }
  0x58   : > { %1318 = vmatprep.mubr.bf16.mxu0 %v2963_v0  ;;  %1447 = vmatprep.mubr.bf16.mxu1 %v2965_v1 }
  0x5f   : > { %1319 = vmatmul.mubr.bf16.gmra.mrb[28].mxu0 %v2967_v2  ;;  %1448 = vmatmul.mubr.bf16.gmra.mrb[28].mxu1 %v2968_v3 }
  0x60   : > { %1326 = vmatprep.mubr.bf16.mxu0 %v2969_v4  ;;  %1455 = vmatprep.mubr.bf16.mxu1 %v2971_v5 }
  0x67   : > { %1327 = vmatmul.mubr.bf16.gmra.mrb[32].mxu0 %v2973_v6  ;;  %1456 = vmatmul.mubr.bf16.gmra.mrb[32].mxu1 %v2974_v7 }
  0x68   : > { %1334 = vmatprep.mubr.bf16.mxu0 %v2975_v8  ;;  %1463 = vmatprep.mubr.bf16.mxu1 %v2977_v9 }
  0x6f   : > { %1335 = vmatmul.mubr.bf16.gmra.mrb[36].mxu0 %v2979_v10  ;;  %1464 = vmatmul.mubr.bf16.gmra.mrb[36].mxu1 %v2980_v11 }
  0x70   : > { %1342 = vmatprep.mubr.bf16.mxu0 %v2982_v12  ;;  %1471 = vmatprep.mubr.bf16.mxu1 %v2984_v13 }
  0x77   : > { %1343 = vmatmul.mubr.bf16.gmra.mrb[40].mxu0 %v2986_v14  ;;  %1472 = vmatmul.mubr.bf16.gmra.mrb[40].mxu1 %v2987_v15 }
  0x78   : > { %1350 = vmatprep.mubr.bf16.mxu0 %v2988_v16  ;;  %1479 = vmatprep.mubr.bf16.mxu1 %v2990_v17 }
  0x7f   : > { %1351 = vmatmul.mubr.bf16.gmra.mrb[44].mxu0 %v2992_v18  ;;  %1480 = vmatmul.mubr.bf16.gmra.mrb[44].mxu1 %v2993_v19 }
  0x80   : > { %1487 = vmatprep.mubr.bf16.mxu1 %v2994_v20  ;;  %2812 = vmatprep.mubr.msk.bf16.mxu0 %vm332_vm0, %v2996_v21 }
  0x87   : > { %1488 = vmatmul.mubr.bf16.gmra.mrb[48].mxu1 %v2997_v22  ;;  %2813 = vmatmul.mubr.msk.bf16.vlgmr.msra.gmra.mrb[48].mxu0 %vm332_vm0, %v2998_v23 }
  0x88   : > { %1495 = vmatprep.mubr.bf16.mxu1 %v2999_v24  ;;  %2816 = vmatprep.mubr.msk.bf16.mxu0 %vm332_vm0, %v3001_v25 }
  0x8f   : > { %1496 = vmatmul.mubr.bf16.gmra.mrb[52].mxu1 %v3002_v26  ;;  %2817 = vmatmul.mubr.msk.bf16.gmra.mrb[52].mxu0 %vm332_vm0, %v3003_v27 }
  0x90   : > { %1503 = vmatprep.mubr.bf16.mxu1 %v3004_v28  ;;  %2820 = vmatprep.mubr.msk.bf16.mxu0 %vm332_vm0, %v3006_v29 }
  0x97   : > { %1504 = vmatmul.mubr.bf16.gmra.mrb[56].mxu1 %v3007_v30  ;;  %2821 = vmatmul.mubr.msk.bf16.gmra.mrb[56].mxu0 %vm332_vm0, %v3008_v31 }
  0x98   : > { %1511 = vmatprep.mubr.bf16.mxu1 %v3009_v32  ;;  %2824 = vmatprep.mubr.msk.bf16.mxu0 %vm332_vm0, %v3011_v33 }
  0x9f   : > { %1512 = vmatmul.mubr.bf16.gmra.mrb[60].mxu1 %v3012_v34  ;;  %2825 = vmatmul.mubr.msk.bf16.gmra.mrb[60].mxu0 %vm332_vm0, %v3013_v35 }
  0xa0   : > { %1519 = vmatprep.mubr.bf16.mxu1 %v3014_v36  ;;  %2828 = vmatprep.mubr.msk.bf16.mxu0 %vm332_vm0, %v3016_v37 }
  0xa7   : > { %1520 = vmatmul.mubr.bf16.gmra.mrb[64].mxu1 %v3017_v38  ;;  %2829 = vmatmul.mubr.msk.bf16.gmra.mrb[64].mxu0 %vm332_vm0, %v3018_v39 }
  0xa8   : > { %1527 = vmatprep.mubr.bf16.mxu1 %v3019_v40  ;;  %2832 = vmatprep.mubr.msk.bf16.mxu0 %vm332_vm0, %v3021_v41 }
  0xaf   : > { %1528 = vmatmul.mubr.bf16.gmra.mrb[68].mxu1 %v3022_v42  ;;  %2833 = vmatmul.mubr.msk.bf16.gmra.mrb[68].mxu0 %vm332_vm0, %v3023_v43 }
  0xb0   : > { %1535 = vmatprep.mubr.bf16.mxu1 %v3024_v44  ;;  %2836 = vmatprep.mubr.msk.bf16.mxu0 %vm332_vm0, %v3026_v45 }
  0xb7   : > { %1536 = vmatmul.mubr.bf16.gmra.mrb[72].mxu1 %v3027_v46  ;;  %2837 = vmatmul.mubr.msk.bf16.gmra.mrb[72].mxu0 %vm332_vm0, %v3028_v47 }
  0xb8   : > { %1543 = vmatprep.mubr.bf16.mxu1 %v3029_v48  ;;  %2840 = vmatprep.mubr.msk.bf16.mxu0 %vm332_vm0, %v3031_v49 }
  0xbf   : > { %1544 = vmatmul.mubr.bf16.gmra.mrb[76].mxu1 %v3032_v50  ;;  %2841 = vmatmul.mubr.msk.bf16.gmra.mrb[76].mxu0 %vm332_vm0, %v3033_v51 }
  0xfa   : > { %v2648_v53 = vpop.f32.mrb[0].mxu1  ;;  %v2576_v54 = vpop.f32.mrb[0].mxu0 }
  0xfb   : > { %v2649_v55 = vpop.f32.mrb[1].mxu1  ;;  %v2577_v56 = vpop.f32.mrb[1].mxu0 }
  0xfc   : > { %v3346_v57 = vadd.f32 %v2649_v55, %v2648_v53  ;;  %v2651_v58 = vpop.f32.mrb[2].mxu1  ;;  %v2578_v59 = vadd.f32 %v2577_v56, %v2576_v54  ;;  %v2579_v60 = vpop.f32.mrb[2].mxu0 }
  0xfd   : > { %v2652_v61 = vpop.f32.mrb[3].mxu1  ;;  %v2580_v62 = vpop.f32.mrb[3].mxu0 }
  0xfe   : > { %v3348_v63 = vadd.f32 %v2652_v61, %v2651_v58  ;;  %v2581_v0 = vadd.f32 %v2580_v62, %v2579_v60 }
 0x102   : > { %v2654_v1 = vpop.f32.mrb[4].mxu1  ;;  %v2582_v2 = vpop.f32.mrb[4].mxu0 }
 0x103   : > { %v2655_v3 = vpop.f32.mrb[5].mxu1  ;;  %v2583_v4 = vpop.f32.mrb[5].mxu0 }
 0x104   : > { %v3350_v5 = vadd.f32 %v2655_v3, %v2654_v1  ;;  %v2657_v6 = vpop.f32.mrb[6].mxu1  ;;  %v2584_v7 = vadd.f32 %v2583_v4, %v2582_v2  ;;  %v2585_v8 = vpop.f32.mrb[6].mxu0 }
 0x105   : > { %v2658_v9 = vpop.f32.mrb[7].mxu1  ;;  %v2586_v10 = vpop.f32.mrb[7].mxu0 }
 0x106   : > { %v3352_v11 = vadd.f32 %v2658_v9, %v2657_v6  ;;  %v2587_v12 = vadd.f32 %v2586_v10, %v2585_v8 }
 0x10a   : > { %v2660_v13 = vpop.f32.mrb[8].mxu1  ;;  %v2588_v14 = vpop.f32.mrb[8].mxu0 }
 0x10b   : > { %v2661_v15 = vpop.f32.mrb[9].mxu1  ;;  %v2589_v16 = vpop.f32.mrb[9].mxu0 }
 0x10c   : > { %v3354_v17 = vadd.f32 %v2661_v15, %v2660_v13  ;;  %v2663_v18 = vpop.f32.mrb[10].mxu1  ;;  %v2590_v19 = vadd.f32 %v2589_v16, %v2588_v14  ;;  %v2591_v20 = vpop.f32.mrb[10].mxu0 }
 0x10d   : > { %v2664_v21 = vpop.f32.mrb[11].mxu1  ;;  %v2592_v22 = vpop.f32.mrb[11].mxu0 }
 0x10e   : > { %v3356_v23 = vadd.f32 %v2664_v21, %v2663_v18  ;;  %v2593_v24 = vadd.f32 %v2592_v22, %v2591_v20 }
 0x112   : > { %v2666_v25 = vpop.f32.mrb[12].mxu1  ;;  %v2594_v26 = vpop.f32.mrb[12].mxu0 }
 0x113   : > { %v2667_v27 = vpop.f32.mrb[13].mxu1  ;;  %v2595_v28 = vpop.f32.mrb[13].mxu0 }
 0x114   : > { %v3358_v29 = vadd.f32 %v2667_v27, %v2666_v25  ;;  %v2669_v30 = vpop.f32.mrb[14].mxu1  ;;  %v2596_v31 = vadd.f32 %v2595_v28, %v2594_v26  ;;  %v2597_v32 = vpop.f32.mrb[14].mxu0 }
 0x115   : > { %v2670_v33 = vpop.f32.mrb[15].mxu1  ;;  %v2598_v34 = vpop.f32.mrb[15].mxu0 }
 0x116   : > { %v3360_v35 = vadd.f32 %v2670_v33, %v2669_v30  ;;  %v2599_v36 = vadd.f32 %v2598_v34, %v2597_v32 }
 0x11a   : > { %v2688_v37 = vpop.f32.mrb[16].mxu1  ;;  %v2600_v38 = vpop.f32.mrb[16].mxu0 }
 0x11b   : > { %v2689_v39 = vpop.f32.mrb[17].mxu1  ;;  %v2601_v40 = vpop.f32.mrb[17].mxu0 }
 0x11c   : > { %v2690_v41 = vadd.f32 %v2689_v39, %v2688_v37  ;;  %v2691_v42 = vpop.f32.mrb[18].mxu1  ;;  %v2602_v43 = vadd.f32 %v2601_v40, %v2600_v38  ;;  %v2603_v44 = vpop.f32.mrb[18].mxu0 }
 0x11d   : > { %v2692_v45 = vpop.f32.mrb[19].mxu1  ;;  %v2604_v46 = vpop.f32.mrb[19].mxu0 }
 0x11e   : > { %v2693_v47 = vadd.f32 %v2692_v45, %v2691_v42  ;;  %v2605_v48 = vadd.f32 %v2604_v46, %v2603_v44  ;;  %v3362_v49 = vadd.f32 %v2690_v41, %v2578_v59 }
 0x120   : > { %v3364_v50 = vadd.f32 %v2693_v47, %v2581_v0 }
 0x122   : > { %v2694_v51 = vpop.f32.mrb[20].mxu1  ;;  %v2606_v52 = vpop.f32.mrb[20].mxu0 }
 0x123   : > { %v2695_v53 = vpop.f32.mrb[21].mxu1  ;;  %v2607_v54 = vpop.f32.mrb[21].mxu0 }
 0x124   : > { %v2696_v55 = vadd.f32 %v2695_v53, %v2694_v51  ;;  %v2697_v56 = vpop.f32.mrb[22].mxu1  ;;  %v2608_v58 = vadd.f32 %v2607_v54, %v2606_v52  ;;  %v2609_v60 = vpop.f32.mrb[22].mxu0 }
 0x125   : > { %v2698_v61 = vpop.f32.mrb[23].mxu1  ;;  %v2610_v62 = vpop.f32.mrb[23].mxu0 }
 0x126   : > { %v2699_v1 = vadd.f32 %v2698_v61, %v2697_v56  ;;  %v2611_v2 = vadd.f32 %v2610_v62, %v2609_v60  ;;  %v3366_v3 = vadd.f32 %v2696_v55, %v2584_v7 }
 0x128   : > { %v3368_v4 = vadd.f32 %v2699_v1, %v2587_v12 }
 0x12a   : > { %v2700_v59 = vpop.f32.mrb[24].mxu1  ;;  %v2612_v6 = vpop.f32.mrb[24].mxu0 }
 0x12b   : > { %v2701_v0 = vpop.f32.mrb[25].mxu1  ;;  %v2613_v8 = vpop.f32.mrb[25].mxu0 }
 0x12c   : > { %v2702_v9 = vadd.f32 %v2701_v0, %v2700_v59  ;;  %v2703_v10 = vpop.f32.mrb[26].mxu1  ;;  %v2614_v13 = vadd.f32 %v2613_v8, %v2612_v6  ;;  %v2615_v14 = vpop.f32.mrb[26].mxu0 }
 0x12d   : > { %v2704_v15 = vpop.f32.mrb[27].mxu1  ;;  %v2616_v16 = vpop.f32.mrb[27].mxu0 }
 0x12e   : > { %v2705_v18 = vadd.f32 %v2704_v15, %v2703_v10  ;;  %v2617_v20 = vadd.f32 %v2616_v16, %v2615_v14  ;;  %v3370_v21 = vadd.f32 %v2702_v9, %v2590_v19 }
 0x130   : > { %v3372_v22 = vadd.f32 %v2705_v18, %v2593_v24 }
 0x132   : > { %v2706_v7 = vpop.f32.mrb[28].mxu1  ;;  %v2618_v25 = vpop.f32.mrb[28].mxu0 }
 0x133   : > { %v2707_v12 = vpop.f32.mrb[29].mxu1  ;;  %v2619_v26 = vpop.f32.mrb[29].mxu0 }
 0x134   : > { %v2708_v27 = vadd.f32 %v2707_v12, %v2706_v7  ;;  %v2709_v28 = vpop.f32.mrb[30].mxu1  ;;  %v2620_v30 = vadd.f32 %v2619_v26, %v2618_v25  ;;  %v2621_v32 = vpop.f32.mrb[30].mxu0 }
 0x135   : > { %v2710_v33 = vpop.f32.mrb[31].mxu1  ;;  %v2622_v34 = vpop.f32.mrb[31].mxu0 }
 0x136   : > { %v2711_v37 = vadd.f32 %v2710_v33, %v2709_v28  ;;  %v2623_v38 = vadd.f32 %v2622_v34, %v2621_v32  ;;  %v3374_v39 = vadd.f32 %v2708_v27, %v2596_v31 }
 0x138   : > { %v3376_v40 = vadd.f32 %v2711_v37, %v2599_v36 }
 0x13a   : > { %v2712_v19 = vpop.f32.mrb[32].mxu1  ;;  %v2624_v41 = vpop.f32.mrb[32].mxu0 }
 0x13b   : > { %v2713_v24 = vpop.f32.mrb[33].mxu1  ;;  %v2625_v42 = vpop.f32.mrb[33].mxu0 }
 0x13c   : > { %v2714_v44 = vadd.f32 %v2713_v24, %v2712_v19  ;;  %v2715_v45 = vpop.f32.mrb[34].mxu1  ;;  %v3378_v46 = vadd.f32 %v2625_v42, %v2624_v41  ;;  %v2627_v47 = vpop.f32.mrb[34].mxu0 }
 0x13d   : > { %v2716_v51 = vpop.f32.mrb[35].mxu1  ;;  %v2628_v52 = vpop.f32.mrb[35].mxu0 }
 0x13e   : > { %v2717_v53 = vadd.f32 %v2716_v51, %v2715_v45  ;;  %v3380_v54 = vadd.f32 %v2628_v52, %v2627_v47  ;;  %v3382_v55 = vadd.f32 %v2714_v44, %v2602_v43 }
 0x140   : > { %v3384_v31 = vadd.f32 %v2717_v53, %v2605_v48 }
 0x142   : > { %v2718_v36 = vpop.f32.mrb[36].mxu1  ;;  %v2630_v56 = vpop.f32.mrb[36].mxu0 }
 0x143   : > { %v2719_v60 = vpop.f32.mrb[37].mxu1  ;;  %v2631_v61 = vpop.f32.mrb[37].mxu0 }
 0x144   : > { %v2720_v62 = vadd.f32 %v2719_v60, %v2718_v36  ;;  %v2721_v1 = vpop.f32.mrb[38].mxu1  ;;  %v3386_v59 = vadd.f32 %v2631_v61, %v2630_v56  ;;  %v2633_v6 = vpop.f32.mrb[38].mxu0  ;;  %v367_v56 = vld [vmem:[#allocation2 + $0x10] sm:$0xff] }
 0x145   : > { %v2722_v0 = vpop.f32.mrb[39].mxu1  ;;  %v2634_v8 = vpop.f32.mrb[39].mxu0 }
 0x146   : > { %v2723_v9 = vadd.f32 %v2722_v0, %v2721_v1  ;;  %v3388_v10 = vadd.f32 %v2634_v8, %v2633_v6  ;;  %v3390_v14 = vadd.f32 %v2720_v62, %v2608_v58  ;;  %v365_v1 = vld [vmem:[#allocation2] sm:$0xff] }
 0x148   : > { %v3392_v43 = vadd.f32 %v2723_v9, %v2611_v2 }
 0x14a   : > { %v2724_v48 = vpop.f32.mrb[40].mxu1  ;;  %v2636_v15 = vpop.f32.mrb[40].mxu0 }
 0x14b   : > { %v2725_v16 = vpop.f32.mrb[41].mxu1  ;;  %v2637_v18 = vpop.f32.mrb[41].mxu0 }
 0x14c   : > { %v2726_v7 = vadd.f32 %v2725_v16, %v2724_v48  ;;  %v2727_v25 = vpop.f32.mrb[42].mxu1  ;;  %v3394_v12 = vadd.f32 %v2637_v18, %v2636_v15  ;;  %v2639_v26 = vpop.f32.mrb[42].mxu0  ;;  %v368_v48 = vld [vmem:[#allocation2 + $0x18] sm:$0xff]  ;;  %v366_v18 = vld [vmem:[#allocation2 + $0x8] sm:$0xff] }
 0x14d   : > { %v2728_v27 = vpop.f32.mrb[43].mxu1  ;;  %v2640_v28 = vpop.f32.mrb[43].mxu0 }
 0x14e   : > { %v2729_v32 = vadd.f32 %v2728_v27, %v2727_v25  ;;  %v3396_v33 = vadd.f32 %v2640_v28, %v2639_v26  ;;  %v3398_v34 = vadd.f32 %v2726_v7, %v2614_v13 }
 0x150   : > { %v3400_v58 = vadd.f32 %v2729_v32, %v2617_v20 }
 0x152   : > { %v2730_v2 = vpop.f32.mrb[44].mxu1  ;;  %v2642_v37 = vpop.f32.mrb[44].mxu0 }
 0x153   : > { %v2731_v19 = vpop.f32.mrb[45].mxu1  ;;  %v2643_v41 = vpop.f32.mrb[45].mxu0 }
 0x154   : > { %v2732_v24 = vadd.f32 %v2731_v19, %v2730_v2  ;;  %v2733_v42 = vpop.f32.mrb[46].mxu1  ;;  %v3402_v44 = vadd.f32 %v2643_v41, %v2642_v37  ;;  %v2645_v45 = vpop.f32.mrb[46].mxu0  ;;  %v371_v2 = vld [vmem:[#allocation2 + $0x30] sm:$0xff] }
 0x155   : > { %v2734_v47 = vpop.f32.mrb[47].mxu1  ;;  %v2646_v51 = vpop.f32.mrb[47].mxu0 }
 0x156   : > { %v2735_v52 = vadd.f32 %v2734_v47, %v2733_v42  ;;  %v3404_v53 = vadd.f32 %v2646_v51, %v2645_v45  ;;  %v3406_v36 = vadd.f32 %v2732_v24, %v2620_v30  ;;  %v369_v24 = vld [vmem:[#allocation2 + $0x20] sm:$0xff] }
 0x158   : > { %v3408_v13 = vadd.f32 %v2735_v52, %v2623_v38  ;;  %v372_v52 = vld [vmem:[#allocation2 + $0x38] sm:$0xff] }
 0x15a   : > { %v2736_v20 = vpop.f32.mrb[48].mxu1  ;;  %v2814_v60 = vpop.f32.mrb[48].mxu0 }
 0x15b   : > { %v1595_v61 = vadd.f32 %v2814_v60, %v3366_v3  ;;  %v2737_v62 = vpop.f32.mrb[49].mxu1  ;;  %v1586_v6 = vpop.f32.mrb[49].mxu0 }
 0x15c   : > { %v2738_v0 = vadd.f32 %v2737_v62, %v2736_v20  ;;  %v1587_v8 = vadd.f32 %v1586_v6, %v3362_v49  ;;  %v2739_v9 = vpop.f32.mrb[50].mxu1  ;;  %v2815_v15 = vpop.f32.mrb[50].mxu0 }
 0x15d   : > { %v1715_v30 = vadd.f32 %v1595_v61, %v367_v56  ;;  %v1598_v38 = vadd.f32 %v2815_v15, %v3368_v4  ;;  %v2740_v16 = vpop.f32.mrb[51].mxu1  ;;  %v1589_v7 = vpop.f32.mrb[51].mxu0 }
 0x15e   : > { %v1713_v25 = vadd.f32 %v1587_v8, %v365_v1  ;;  %v2741_v26 = vadd.f32 %v2740_v16, %v2739_v9  ;;  %v1590_v3 = vadd.f32 %v1589_v7, %v3364_v50  ;;  %v3416_v27 = vadd.f32 %v2738_v0, %v3378_v46  ;;  %v2545_v50 = vld [vmem:[%s3423_s8 + $0x8] sm:$0xff]   ;;  %v3433_v46 = vld [vmem:[%s3423_s8] sm:$0xff]   ;;  %v3446_v8 = vld [vmem:[%s3423_s8 + $0x18] sm:$0xff]  }
 0x15f   : > { %1747 = vst.msk [vmem:[#allocation2 + $0x10] sm:$0xff] %vm332_vm0, %v1715_v30  ;;  %v1716_v49 = vadd.f32 %v1598_v38, %v368_v48  ;;  %v2487_v56 = vunpack.c.l.bf16 %v2545_v50  ;;  %v2483_v60 = vunpack.c.l.bf16 %v3433_v46  ;;  %v370_v1 = vld [vmem:[#allocation2 + $0x28] sm:$0xff]  ;;  %v2488_v16 = vunpack.c.h.bf16 %v2545_v50 }
 0x160   : > { %1745 = vst.msk [vmem:[#allocation2] sm:$0xff] %vm332_vm0, %v1713_v25  ;;  %v1714_v4 = vadd.f32 %v1590_v3, %v366_v18  ;;  %v3428_v28 = vadd.f32 %v2741_v26, %v3380_v54  ;;  %v3440_v54 = vld [vmem:[%s3705_s2] ss:$0 sm:$0xff]  ;;  %v2484_v26 = vunpack.c.h.bf16 %v3433_v46  ;;  %v2495_v50 = vunpack.c.l.bf16 %v3446_v8 }
 0x161   : > { %1748 = vst.msk [vmem:[#allocation2 + $0x18] sm:$0xff] %vm332_vm0, %v1716_v49 }
 0x162   : > { %1746 = vst.msk [vmem:[#allocation2 + $0x8] sm:$0xff] %vm332_vm0, %v1714_v4  ;;  %v2742_v32 = vpop.f32.mrb[52].mxu1  ;;  %v2818_v37 = vpop.f32.mrb[52].mxu0 }
 0x163   : > { %v1611_v19 = vadd.f32 %v2818_v37, %v3374_v39  ;;  %v2743_v41 = vpop.f32.mrb[53].mxu1  ;;  %v1602_v42 = vpop.f32.mrb[53].mxu0  ;;  %v2496_v37 = vunpack.c.h.bf16 %v3446_v8  ;;  %v380_v8 = vld [vmem:[#allocation2 + $0x78] sm:$0xff] }
 0x164   : > { %v2744_v45 = vadd.f32 %v2743_v41, %v2742_v32  ;;  %v1603_v47 = vadd.f32 %v1602_v42, %v3370_v21  ;;  %v2745_v51 = vpop.f32.mrb[54].mxu1  ;;  %v2819_v20 = vpop.f32.mrb[54].mxu0 }
 0x165   : > { %v1719_v39 = vadd.f32 %v1611_v19, %v371_v2  ;;  %v1614_v61 = vadd.f32 %v2819_v20, %v3376_v40  ;;  %v2746_v62 = vpop.f32.mrb[55].mxu1  ;;  %v1605_v6 = vpop.f32.mrb[55].mxu0  ;;  %v3455_v40 = vld [vmem:[%s3423_s8 + $0x10] sm:$0xff]  }
 0x166   : > { %v1782_v0 = vld [vmem:[#allocation2 + $0x10] sm:$0xff]  ;;  %v1717_v9 = vadd.f32 %v1603_v47, %v369_v24  ;;  %v2747_v48 = vadd.f32 %v2746_v62, %v2745_v51  ;;  %v1606_v21 = vadd.f32 %v1605_v6, %v3372_v22  ;;  %v3450_v15 = vadd.f32 %v2744_v45, %v3386_v59 }
 0x167   : > { %v1821_v30 = vadd.f32 %v3440_v54, %v1782_v0  ;;  %v1780_v38 = vld [vmem:[#allocation2] sm:$0xff]  ;;  %1751 = vst.msk [vmem:[#allocation2 + $0x30] sm:$0xff] %vm332_vm0, %v1719_v39  ;;  %v1720_v18 = vadd.f32 %v1614_v61, %v372_v52  ;;  %v2491_v46 = vunpack.c.l.bf16 %v3455_v40  ;;  %v375_v19 = vld [vmem:[#allocation2 + $0x50] sm:$0xff]  ;;  %v2492_v45 = vunpack.c.h.bf16 %v3455_v40 }
 0x168   : > { %v1819_v7 = vadd.f32 %v3440_v54, %v1780_v38  ;;  %v1783_v25 = vld [vmem:[#allocation2 + $0x18] sm:$0xff]  ;;  %1749 = vst.msk [vmem:[#allocation2 + $0x20] sm:$0xff] %vm332_vm0, %v1717_v9  ;;  %v1718_v22 = vadd.f32 %v1606_v21, %v370_v1  ;;  %v3461_v59 = vadd.f32 %v2747_v48, %v3388_v10  ;;  %v373_v52 = vld [vmem:[#allocation2 + $0x40] sm:$0xff] }
 0x169   : > { %v1917_v3 = vadd.f32 %v2487_v56, %v1821_v30  ;;  %v1822_v49 = vadd.f32 %v3440_v54, %v1783_v25  ;;  %v1781_v4 = vld [vmem:[#allocation2 + $0x8] sm:$0xff]  ;;  %1752 = vst.msk [vmem:[#allocation2 + $0x38] sm:$0xff] %vm332_vm0, %v1720_v18  ;;  %v376_v1 = vld [vmem:[#allocation2 + $0x58] sm:$0xff] }
 0x16a   : > { %v1915_v32 = vadd.f32 %v2483_v60, %v1819_v7  ;;  %v1820_v2 = vadd.f32 %v3440_v54, %v1781_v4  ;;  %1750 = vst.msk [vmem:[#allocation2 + $0x28] sm:$0xff] %vm332_vm0, %v1718_v22  ;;  %v2748_v10 = vpop.f32.mrb[56].mxu1  ;;  %v2822_v41 = vpop.f32.mrb[56].mxu0 }
 0x16b   : > { %v1949_v24 = vmax.f32 %v1917_v3, 0.0  ;;  %v1918_v42 = vadd.f32 %v2488_v16, %v1822_v49  ;;  %v1627_v47 = vadd.f32 %v2822_v41, %v3390_v14  ;;  %v2749_v51 = vpop.f32.mrb[57].mxu1  ;;  %v1618_v20 = vpop.f32.mrb[57].mxu0  ;;  %v3486_v49 = vld [vmem:[%s3423_s8 + $0x28] sm:$0xff]  }
 0x16c   : > { %v1947_v56 = vmax.f32 %v1915_v32, 0.0  ;;  %v1916_v60 = vadd.f32 %v2484_v26, %v1820_v2  ;;  %v2750_v39 = vadd.f32 %v2749_v51, %v2748_v10  ;;  %v1619_v61 = vadd.f32 %v1618_v20, %v3382_v55  ;;  %v2751_v62 = vpop.f32.mrb[58].mxu1  ;;  %v2823_v6 = vpop.f32.mrb[58].mxu0  ;;  %v374_v55 = vld [vmem:[#allocation2 + $0x48] sm:$0xff] }
 0x16d   : > { %v2451_v0 = vpack.c.bf16 %v1949_v24, %v1949_v24  ;;  %v1950_v14 = vmax.f32 %v1918_v42, 0.0  ;;  %v1723_v9 = vadd.f32 %v1627_v47, %v375_v19  ;;  %v1630_v48 = vadd.f32 %v2823_v6, %v3392_v43  ;;  %v2752_v21 = vpop.f32.mrb[59].mxu1  ;;  %v1621_v30 = vpop.f32.mrb[59].mxu0  ;;  %v3489_v43 = vld [vmem:[%s3423_s8 + $0x20] sm:$0xff]  }
 0x16e   : > { %v2449_v38 = vpack.c.bf16 %v1947_v56, %v1947_v56  ;;  %v1948_v16 = vmax.f32 %v1916_v60, 0.0  ;;  %v1786_v18 = vld [vmem:[#allocation2 + $0x30] sm:$0xff]  ;;  %v1721_v7 = vadd.f32 %v1619_v61, %v373_v52  ;;  %v2753_v25 = vadd.f32 %v2752_v21, %v2751_v62  ;;  %v377_v6 = vld [vmem:[#allocation2 + $0x60] sm:$0xff] }
 0x16f   : > { %2110 = vst.msk [vmem:[%s3477_s13 + $0x8] sm:$0xf] %vm2107_vm1, %v2451_v0  ;;  %v2452_v26 = vpack.c.bf16 %v1950_v14, %v1950_v14  ;;  %v1825_v22 = vadd.f32 %v3440_v54, %v1786_v18  ;;  %v1784_v3 = vld [vmem:[#allocation2 + $0x20] sm:$0xff]  ;;  %v1724_v4 = vadd.f32 %v1630_v48, %v376_v1  ;;  %v1622_v32 = vadd.f32 %v1621_v30, %v3384_v31  ;;  %v379_v60 = vld [vmem:[#allocation2 + $0x70] sm:$0xff] }
 0x170   : > { %1755 = vst.msk [vmem:[#allocation2 + $0x50] sm:$0xff] %vm332_vm0, %v1723_v9  ;;  %v2450_v2 = vpack.c.bf16 %v1948_v16, %v1948_v16  ;;  %v1823_v10 = vadd.f32 %v3440_v54, %v1784_v3  ;;  %v1787_v19 = vld [vmem:[#allocation2 + $0x38] sm:$0xff]  ;;  %1753 = vst.msk [vmem:[#allocation2 + $0x40] sm:$0xff] %vm332_vm0, %v1721_v7  ;;  %v3497_v41 = vadd.f32 %v2750_v39, %v3394_v12  ;;  %v2503_v12 = vunpack.c.l.bf16 %v3486_v49 }
 0x171   : > { %2108 = vst.msk [vmem:[%s3477_s13] sm:$0xf] %vm2107_vm1, %v2449_v38  ;;  %v3500_v24 = vadd.f32 %v2753_v25, %v3396_v33  ;;  %2111 = vst.msk [vmem:[%s3477_s13 + $0xc] sm:$0xf] %vm2107_vm1, %v2452_v26  ;;  %v1921_v42 = vadd.f32 %v2495_v50, %v1825_v22  ;;  %v1826_v47 = vadd.f32 %v3440_v54, %v1787_v19  ;;  %v1785_v31 = vld [vmem:[#allocation2 + $0x28] sm:$0xff]  ;;  %v2499_v56 = vunpack.c.l.bf16 %v3489_v43 }
 0x172   : > { %1756 = vst.msk [vmem:[#allocation2 + $0x58] sm:$0xff] %vm332_vm0, %v1724_v4  ;;  %v1722_v51 = vadd.f32 %v1622_v32, %v374_v55  ;;  %v1919_v52 = vadd.f32 %v2491_v46, %v1823_v10  ;;  %v1824_v20 = vadd.f32 %v3440_v54, %v1785_v31  ;;  %v2754_v33 = vpop.f32.mrb[60].mxu1  ;;  %v2826_v39 = vpop.f32.mrb[60].mxu0  ;;  %v2504_v62 = vunpack.c.h.bf16 %v3486_v49  ;;  %v3525_v32 = vld [vmem:[%s3423_s8 + $0x38] sm:$0xff]  }
 0x173   : > { %2109 = vst.msk [vmem:[%s3477_s13 + $0x4] sm:$0xf] %vm2107_vm1, %v2450_v2  ;;  %v1953_v61 = vmax.f32 %v1921_v42, 0.0  ;;  %v1922_v50 = vadd.f32 %v2496_v37, %v1826_v47  ;;  %v1643_v1 = vadd.f32 %v2826_v39, %v3406_v36  ;;  %v2755_v46 = vpop.f32.mrb[61].mxu1  ;;  %v1634_v0 = vpop.f32.mrb[61].mxu0 }
 0x174   : > { %1754 = vst.msk [vmem:[#allocation2 + $0x48] sm:$0xff] %vm332_vm0, %v1722_v51  ;;  %v1951_v14 = vmax.f32 %v1919_v52, 0.0  ;;  %v1920_v9 = vadd.f32 %v2492_v45, %v1824_v20  ;;  %v2756_v48 = vadd.f32 %v2755_v46, %v2754_v33  ;;  %v1635_v21 = vadd.f32 %v1634_v0, %v3398_v34  ;;  %v2757_v30 = vpop.f32.mrb[62].mxu1  ;;  %v2827_v37 = vpop.f32.mrb[62].mxu0  ;;  %v378_v34 = vld [vmem:[#allocation2 + $0x68] sm:$0xff] }
 0x175   : > { %v2455_v38 = vpack.c.bf16 %v1953_v61, %v1953_v61  ;;  %v1954_v16 = vmax.f32 %v1922_v50, 0.0  ;;  %v1727_v18 = vadd.f32 %v1643_v1, %v379_v60  ;;  %v1646_v36 = vadd.f32 %v2827_v37, %v3408_v13  ;;  %v2758_v7 = vpop.f32.mrb[63].mxu1  ;;  %v1637_v25 = vpop.f32.mrb[63].mxu0  ;;  %v3528_v13 = vld [vmem:[%s3423_s8 + $0x30] sm:$0xff]  }
 0x176   : > { %v2453_v55 = vpack.c.bf16 %v1951_v14, %v1951_v14  ;;  %v1952_v40 = vmax.f32 %v1920_v9, 0.0  ;;  %v1725_v26 = vadd.f32 %v1635_v21, %v377_v6  ;;  %v2759_v22 = vadd.f32 %v2758_v7, %v2757_v30  ;;  %v383_v1 = vld [vmem:[#allocation2 + $0x90] sm:$0xff]  ;;  %v384_v7 = vld [vmem:[#allocation2 + $0x98] sm:$0xff] }
 0x177   : > { %v1790_v45 = vld [vmem:[#allocation2 + $0x50] sm:$0xff]  ;;  %2114 = vst.msk [vmem:[%s3477_s13 + $0x18] sm:$0xf] %vm2107_vm1, %v2455_v38  ;;  %v2456_v3 = vpack.c.bf16 %v1954_v16, %v1954_v16  ;;  %v1788_v4 = vld [vmem:[#allocation2 + $0x40] sm:$0xff]  ;;  %v1728_v2 = vadd.f32 %v1646_v36, %v380_v8  ;;  %v1638_v10 = vadd.f32 %v1637_v25, %v3400_v58  ;;  %v3536_v31 = vadd.f32 %v2756_v48, %v3402_v44 }
 0x178   : > { %v1829_v49 = vadd.f32 %v3440_v54, %v1790_v45  ;;  %1759 = vst.msk [vmem:[#allocation2 + $0x70] sm:$0xff] %vm332_vm0, %v1727_v18  ;;  %v2454_v19 = vpack.c.bf16 %v1952_v40, %v1952_v40  ;;  %v1827_v42 = vadd.f32 %v3440_v54, %v1788_v4  ;;  %1757 = vst.msk [vmem:[#allocation2 + $0x60] sm:$0xff] %vm332_vm0, %v1725_v26  ;;  %v2500_v58 = vunpack.c.h.bf16 %v3489_v43 }
 0x179   : > { %2112 = vst.msk [vmem:[%s3477_s13 + $0x10] sm:$0xf] %vm2107_vm1, %v2453_v55  ;;  %v1791_v47 = vld [vmem:[#allocation2 + $0x58] sm:$0xff]  ;;  %v3539_v51 = vadd.f32 %v2759_v22, %v3404_v53  ;;  %2115 = vst.msk [vmem:[%s3477_s13 + $0x1c] sm:$0xf] %vm2107_vm1, %v2456_v3  ;;  %v1726_v33 = vadd.f32 %v1638_v10, %v378_v34  ;;  %v2511_v44 = vunpack.c.l.bf16 %v3525_v32  ;;  %v2507_v61 = vunpack.c.l.bf16 %v3528_v13 }
 0x17a   : > { %v1925_v52 = vadd.f32 %v2503_v12, %v1829_v49  ;;  %v1830_v20 = vadd.f32 %v3440_v54, %v1791_v47  ;;  %1760 = vst.msk [vmem:[#allocation2 + $0x78] sm:$0xff] %vm332_vm0, %v1728_v2  ;;  %v1923_v60 = vadd.f32 %v2499_v56, %v1827_v42  ;;  %v2512_v53 = vunpack.c.h.bf16 %v3525_v32  ;;  %v2760_v50 = vpop.f32.mrb[64].mxu1  ;;  %v2830_v12 = vpop.f32.mrb[64].mxu0  ;;  %v381_v56 = vld [vmem:[#allocation2 + $0x80] sm:$0xff]  ;;  %v3562_v32 = vld [vmem:[%s3423_s8 + $0x48] sm:$0xff]  }
 0x17b   : > { %2113 = vst.msk [vmem:[%s3477_s13 + $0x14] sm:$0xf] %vm2107_vm1, %v2454_v19  ;;  %v1789_v39 = vld [vmem:[#allocation2 + $0x48] sm:$0xff]  ;;  %v1659_v0 = vadd.f32 %v2830_v12, %v3450_v15  ;;  %v2761_v14 = vpop.f32.mrb[65].mxu1  ;;  %v1650_v9 = vpop.f32.mrb[65].mxu0  ;;  %v2508_v21 = vunpack.c.h.bf16 %v3528_v13  ;;  %v3565_v2 = vld [vmem:[%s3423_s8 + $0x40] sm:$0xff]  }
 0x17c   : > { %v1957_v46 = vmax.f32 %v1925_v52, 0.0  ;;  %v1926_v6 = vadd.f32 %v2504_v62, %v1830_v20  ;;  %v1828_v43 = vadd.f32 %v3440_v54, %v1789_v39  ;;  %1758 = vst.msk [vmem:[#allocation2 + $0x68] sm:$0xff] %vm332_vm0, %v1726_v33  ;;  %v1955_v48 = vmax.f32 %v1923_v60, 0.0  ;;  %v2763_v37 = vpop.f32.mrb[66].mxu1  ;;  %v2831_v38 = vpop.f32.mrb[66].mxu0  ;;  %v387_v12 = vld [vmem:[#allocation2 + $0xb0] sm:$0xff] }
 0x17d   : > { %v2762_v30 = vadd.f32 %v2761_v14, %v2760_v50  ;;  %v1651_v8 = vadd.f32 %v1650_v9, %v3416_v27  ;;  %v1731_v36 = vadd.f32 %v1659_v0, %v383_v1  ;;  %v2764_v15 = vpop.f32.mrb[67].mxu1  ;;  %v1653_v25 = vpop.f32.mrb[67].mxu0  ;;  %v1662_v26 = vadd.f32 %v2831_v38, %v3461_v59  ;;  %v382_v27 = vld [vmem:[#allocation2 + $0x88] sm:$0xff]  ;;  %v385_v0 = vld [vmem:[#allocation2 + $0xa0] sm:$0xff] }
 0x17e   : > { %v2459_v16 = vpack.c.bf16 %v1957_v46, %v1957_v46  ;;  %v1958_v62 = vmax.f32 %v1926_v6, 0.0  ;;  %v1924_v18 = vadd.f32 %v2500_v58, %v1828_v43  ;;  %v2457_v55 = vpack.c.bf16 %v1955_v48, %v1955_v48 }
 0x17f   : > { %v1794_v40 = vld [vmem:[#allocation2 + $0x70] sm:$0xff]  ;;  %v1729_v45 = vadd.f32 %v1651_v8, %v381_v56  ;;  %v2765_v22 = vadd.f32 %v2764_v15, %v2763_v37  ;;  %v1792_v4 = vld [vmem:[#allocation2 + $0x60] sm:$0xff]  ;;  %1763 = vst.msk [vmem:[#allocation2 + $0x90] sm:$0xff] %vm332_vm0, %v1731_v36  ;;  %v1654_v10 = vadd.f32 %v1653_v25, %v3428_v28  ;;  %v1732_v42 = vadd.f32 %v1662_v26, %v384_v7 }
 0x180   : > { %2118 = vst.msk [vmem:[%s3477_s13 + $0x28] sm:$0xf] %vm2107_vm1, %v2459_v16  ;;  %v2460_v34 = vpack.c.bf16 %v1958_v62, %v1958_v62  ;;  %v1956_v3 = vmax.f32 %v1924_v18, 0.0  ;;  %v1833_v49 = vadd.f32 %v3440_v54, %v1794_v40  ;;  %2116 = vst.msk [vmem:[%s3477_s13 + $0x20] sm:$0xf] %vm2107_vm1, %v2457_v55  ;;  %v1831_v59 = vadd.f32 %v3440_v54, %v1792_v4  ;;  %v386_v40 = vld [vmem:[#allocation2 + $0xa8] sm:$0xff] }
 0x181   : > { %v1795_v19 = vld [vmem:[#allocation2 + $0x78] sm:$0xff]  ;;  %1761 = vst.msk [vmem:[#allocation2 + $0x80] sm:$0xff] %vm332_vm0, %v1729_v45  ;;  %v3573_v47 = vadd.f32 %v2762_v30, %v3346_v57  ;;  %v3576_v52 = vadd.f32 %v2765_v22, %v3348_v63  ;;  %v1730_v33 = vadd.f32 %v1654_v10, %v382_v27  ;;  %v2519_v50 = vunpack.c.l.bf16 %v3562_v32  ;;  %1764 = vst.msk [vmem:[#allocation2 + $0x98] sm:$0xff] %vm332_vm0, %v1732_v42  ;;  %v3602_v27 = vld [vmem:[%s3423_s8 + $0x50] sm:$0xff]  }
 0x182   : > { %2119 = vst.msk [vmem:[%s3477_s13 + $0x2c] sm:$0xf] %vm2107_vm1, %v2460_v34  ;;  %v2458_v20 = vpack.c.bf16 %v1956_v3, %v1956_v3  ;;  %v1929_v58 = vadd.f32 %v2511_v44, %v1833_v49  ;;  %v1834_v28 = vadd.f32 %v3440_v54, %v1795_v19  ;;  %v1927_v60 = vadd.f32 %v2507_v61, %v1831_v59  ;;  %v2766_v57 = vpop.f32.mrb[68].mxu1  ;;  %v2834_v46 = vpop.f32.mrb[68].mxu0  ;;  %v3599_v22 = vld [vmem:[%s3423_s8 + $0x58] sm:$0xff]  }
 0x183   : > { %v1793_v39 = vld [vmem:[#allocation2 + $0x68] sm:$0xff]  ;;  %v2515_v1 = vunpack.c.l.bf16 %v3565_v2  ;;  %1762 = vst.msk [vmem:[#allocation2 + $0x88] sm:$0xff] %vm332_vm0, %v1730_v33  ;;  %v1675_v61 = vadd.f32 %v2834_v46, %v3536_v31  ;;  %v2767_v43 = vpop.f32.mrb[69].mxu1  ;;  %v1666_v14 = vpop.f32.mrb[69].mxu0  ;;  %v2520_v9 = vunpack.c.h.bf16 %v3562_v32  ;;  %v388_v31 = vld [vmem:[#allocation2 + $0xb8] sm:$0xff]  ;;  %v2516_v19 = vunpack.c.h.bf16 %v3565_v2 }
 0x184   : > { %2117 = vst.msk [vmem:[%s3477_s13 + $0x24] sm:$0xf] %vm2107_vm1, %v2458_v20  ;;  %v1961_v63 = vmax.f32 %v1929_v58, 0.0  ;;  %v1930_v6 = vadd.f32 %v2512_v53, %v1834_v28  ;;  %v1832_v44 = vadd.f32 %v3440_v54, %v1793_v39  ;;  %v1959_v56 = vmax.f32 %v1927_v60, 0.0  ;;  %v2769_v8 = vpop.f32.mrb[70].mxu1  ;;  %v2835_v37 = vpop.f32.mrb[70].mxu0 }
 0x185   : > { %v2768_v48 = vadd.f32 %v2767_v43, %v2766_v57  ;;  %v1667_v30 = vadd.f32 %v1666_v14, %v3497_v41  ;;  %v1735_v62 = vadd.f32 %v1675_v61, %v387_v12  ;;  %v2770_v18 = vpop.f32.mrb[71].mxu1  ;;  %v1669_v36 = vpop.f32.mrb[71].mxu0  ;;  %v1678_v41 = vadd.f32 %v2835_v37, %v3539_v51  ;;  %v389_v12 = vld [vmem:[#allocation2 + $0xc0] sm:$0xff] }
 0x186   : > { %v2463_v38 = vpack.c.bf16 %v1961_v63, %v1961_v63  ;;  %v1962_v53 = vmax.f32 %v1930_v6, 0.0  ;;  %v1928_v16 = vadd.f32 %v2508_v21, %v1832_v44  ;;  %v2461_v7 = vpack.c.bf16 %v1959_v56, %v1959_v56  ;;  %v1798_v15 = vld [vmem:[#allocation2 + $0x90] sm:$0xff] }
 0x187   : > { %v1733_v25 = vadd.f32 %v1667_v30, %v385_v0  ;;  %v2771_v55 = vadd.f32 %v2770_v18, %v2769_v8  ;;  %v1837_v21 = vadd.f32 %v3440_v54, %v1798_v15  ;;  %1767 = vst.msk [vmem:[#allocation2 + $0xb0] sm:$0xff] %vm332_vm0, %v1735_v62  ;;  %v1670_v34 = vadd.f32 %v1669_v36, %v3500_v24  ;;  %v392_v0 = vld [vmem:[#allocation2 + $0xd8] sm:$0xff]  ;;  %v390_v18 = vld [vmem:[#allocation2 + $0xc8] sm:$0xff] }
 0x188   : > { %2122 = vst.msk [vmem:[%s3477_s13 + $0x38] sm:$0xf] %vm2107_vm1, %v2463_v38  ;;  %v2464_v45 = vpack.c.bf16 %v1962_v53, %v1962_v53  ;;  %v1960_v13 = vmax.f32 %v1928_v16, 0.0  ;;  %v1796_v26 = vld [vmem:[#allocation2 + $0x80] sm:$0xff]  ;;  %2120 = vst.msk [vmem:[%s3477_s13 + $0x30] sm:$0xf] %vm2107_vm1, %v2461_v7  ;;  %v1736_v3 = vadd.f32 %v1678_v41, %v388_v31  ;;  %v1530_v49 = vadd.f32 %v2768_v48, %v3350_v5 }
 0x189   : > { %v1835_v51 = vadd.f32 %v3440_v54, %v1796_v26  ;;  %1765 = vst.msk [vmem:[#allocation2 + $0xa0] sm:$0xff] %vm332_vm0, %v1733_v25  ;;  %v1533_v4 = vadd.f32 %v2771_v55, %v3352_v11  ;;  %v1933_v10 = vadd.f32 %v2519_v50, %v1837_v21  ;;  %v1799_v59 = vld [vmem:[#allocation2 + $0x98] sm:$0xff]  ;;  %v1734_v24 = vadd.f32 %v1670_v34, %v386_v40  ;;  %v391_v11 = vld [vmem:[#allocation2 + $0xd0] sm:$0xff]  ;;  %v3633_v40 = vld [vmem:[%s3423_s8 + $0x68] sm:$0xff]  }
 0x18a   : > { %2123 = vst.msk [vmem:[%s3477_s13 + $0x3c] sm:$0xf] %vm2107_vm1, %v2464_v45  ;;  %v2462_v32 = vpack.c.bf16 %v1960_v13, %v1960_v13  ;;  %v1838_v20 = vadd.f32 %v3440_v54, %v1799_v59  ;;  %v1797_v58 = vld [vmem:[#allocation2 + $0x88] sm:$0xff]  ;;  %v2527_v28 = vunpack.c.l.bf16 %v3599_v22  ;;  %v2523_v33 = vunpack.c.l.bf16 %v3602_v27  ;;  %v2772_v5 = vpop.f32.mrb[72].mxu1  ;;  %v2838_v60 = vpop.f32.mrb[72].mxu0 }
 0x18b   : > { %v1931_v42 = vadd.f32 %v2515_v1, %v1835_v51  ;;  %1768 = vst.msk [vmem:[#allocation2 + $0xb8] sm:$0xff] %vm332_vm0, %v1736_v3  ;;  %v1965_v39 = vmax.f32 %v1933_v10, 0.0  ;;  %v1836_v50 = vadd.f32 %v3440_v54, %v1797_v58  ;;  %v2528_v2 = vunpack.c.h.bf16 %v3599_v22  ;;  %1766 = vst.msk [vmem:[#allocation2 + $0xa8] sm:$0xff] %vm332_vm0, %v1734_v24  ;;  %v2773_v57 = vpop.f32.mrb[73].mxu1  ;;  %v1682_v46 = vpop.f32.mrb[73].mxu0 }
 0x18c   : > { %2121 = vst.msk [vmem:[%s3477_s13 + $0x34] sm:$0xf] %vm2107_vm1, %v2462_v32  ;;  %v1691_v1 = vadd.f32 %v2838_v60, %v1530_v49  ;;  %v1934_v6 = vadd.f32 %v2520_v9, %v1838_v20  ;;  %v2774_v44 = vadd.f32 %v2773_v57, %v2772_v5  ;;  %v1683_v61 = vadd.f32 %v1682_v46, %v3573_v47  ;;  %v2775_v43 = vpop.f32.mrb[74].mxu1  ;;  %v2839_v14 = vpop.f32.mrb[74].mxu0 }
 0x18d   : > { %v1963_v63 = vmax.f32 %v1931_v42, 0.0  ;;  %v2467_v56 = vpack.c.bf16 %v1965_v39, %v1965_v39  ;;  %v1932_v48 = vadd.f32 %v2516_v19, %v1836_v50  ;;  %v1694_v8 = vadd.f32 %v2839_v14, %v1533_v4  ;;  %v2776_v37 = vpop.f32.mrb[75].mxu1  ;;  %v1685_v38 = vpop.f32.mrb[75].mxu0  ;;  %v3644_v4 = vld [vmem:[%s3423_s8 + $0x60] sm:$0xff]  }
 0x18e   : > { %v1739_v30 = vadd.f32 %v1691_v1, %v391_v11  ;;  %v1966_v16 = vmax.f32 %v1934_v6, 0.0  ;;  %v1802_v62 = vld [vmem:[#allocation2 + $0xb0] sm:$0xff]  ;;  %v1737_v31 = vadd.f32 %v1683_v61, %v389_v12  ;;  %v2777_v9 = vadd.f32 %v2776_v37, %v2775_v43  ;;  %v393_v19 = vld [vmem:[#allocation2 + $0xe0] sm:$0xff] }
 0x18f   : > { %v2465_v53 = vpack.c.bf16 %v1963_v63, %v1963_v63  ;;  %2126 = vst.msk [vmem:[%s3477_s13 + $0x48] sm:$0xf] %vm2107_vm1, %v2467_v56  ;;  %v1964_v47 = vmax.f32 %v1932_v48, 0.0  ;;  %v1841_v36 = vadd.f32 %v3440_v54, %v1802_v62  ;;  %v1740_v15 = vadd.f32 %v1694_v8, %v392_v0  ;;  %v395_v0 = vld [vmem:[#allocation2 + $0xf0] sm:$0xff]  ;;  %v394_v56 = vld [vmem:[#allocation2 + $0xe8] sm:$0xff] }
 0x190   : > { %v1800_v7 = vld [vmem:[#allocation2 + $0xa0] sm:$0xff]  ;;  %1771 = vst.msk [vmem:[#allocation2 + $0xd0] sm:$0xff] %vm332_vm0, %v1739_v30  ;;  %v1686_v25 = vadd.f32 %v1685_v38, %v3576_v52  ;;  %v2468_v41 = vpack.c.bf16 %v1966_v16, %v1966_v16  ;;  %1769 = vst.msk [vmem:[#allocation2 + $0xc0] sm:$0xff] %vm332_vm0, %v1737_v31  ;;  %v1538_v45 = vadd.f32 %v2774_v44, %v3354_v17  ;;  %v2524_v52 = vunpack.c.h.bf16 %v3602_v27 }
 0x191   : > { %2124 = vst.msk [vmem:[%s3477_s13 + $0x40] sm:$0xf] %vm2107_vm1, %v2465_v53  ;;  %v1839_v55 = vadd.f32 %v3440_v54, %v1800_v7  ;;  %v1541_v13 = vadd.f32 %v2777_v9, %v3356_v23  ;;  %v2466_v21 = vpack.c.bf16 %v1964_v47, %v1964_v47  ;;  %v1937_v26 = vadd.f32 %v2527_v28, %v1841_v36  ;;  %v396_v36 = vld [vmem:[#allocation2 + $0xf8] sm:$0xff] }
 0x192   : > { %v1803_v22 = vld [vmem:[#allocation2 + $0xb8] sm:$0xff]  ;;  %1772 = vst.msk [vmem:[#allocation2 + $0xd8] sm:$0xff] %vm332_vm0, %v1740_v15  ;;  %v1738_v34 = vadd.f32 %v1686_v25, %v390_v18  ;;  %v1801_v49 = vld [vmem:[#allocation2 + $0xa8] sm:$0xff]  ;;  %v2778_v32 = vpop.f32.mrb[76].mxu1  ;;  %v2842_v17 = vpop.f32.mrb[76].mxu0  ;;  %v2535_v27 = vunpack.c.l.bf16 %v3633_v40  ;;  %v2531_v39 = vunpack.c.l.bf16 %v3644_v4  ;;  %v2536_v50 = vunpack.c.h.bf16 %v3633_v40 }
 0x193   : > { %2127 = vst.msk [vmem:[%s3477_s13 + $0x4c] sm:$0xf] %vm2107_vm1, %v2468_v41  ;;  %v1935_v51 = vadd.f32 %v2523_v33, %v1839_v55  ;;  %v1842_v3 = vadd.f32 %v3440_v54, %v1803_v22  ;;  %2125 = vst.msk [vmem:[%s3477_s13 + $0x44] sm:$0xf] %vm2107_vm1, %v2466_v21  ;;  %v1969_v23 = vmax.f32 %v1937_v26, 0.0  ;;  %v1840_v10 = vadd.f32 %v3440_v54, %v1801_v49  ;;  %v2779_v59 = vpop.f32.mrb[77].mxu1 }
 0x194   : > { %1770 = vst.msk [vmem:[#allocation2 + $0xc8] sm:$0xff] %vm332_vm0, %v1738_v34  ;;  %v1698_v24 = vpop.f32.mrb[77].mxu0  ;;  %v2780_v58 = vadd.f32 %v2779_v59, %v2778_v32  ;;  %v2781_v33 = vpop.f32.mrb[78].mxu1  ;;  %v2558_v55 = vld [vmem:[%s3423_s8 + $0x70] sm:$0xff]  }
 0x195   : > { %v1967_v42 = vmax.f32 %v1935_v51, 0.0  ;;  %v1938_v20 = vadd.f32 %v2528_v2, %v1842_v3  ;;  %v1699_v28 = vadd.f32 %v1698_v24, %v1538_v45  ;;  %v2843_v5 = vpop.f32.mrb[78].mxu0  ;;  %v2471_v11 = vpack.c.bf16 %v1969_v23, %v1969_v23  ;;  %v2782_v1 = vpop.f32.mrb[79].mxu1  ;;  %v2559_v3 = vld [vmem:[%s3423_s8 + $0x78] sm:$0xff]  }
 0x196   : > { %v1936_v60 = vadd.f32 %v2524_v52, %v1840_v10  ;;  %v1701_v57 = vpop.f32.mrb[79].mxu0  ;;  %v1546_v6 = vadd.f32 %v2780_v58, %v3358_v29  ;;  %v2783_v14 = vadd.f32 %v2782_v1, %v2781_v33  ;;  %v2532_v29 = vunpack.c.h.bf16 %v3644_v4 }
 0x197   : > { %v2469_v12 = vpack.c.bf16 %v1967_v42, %v1967_v42  ;;  %v1970_v46 = vmax.f32 %v1938_v20, 0.0  ;;  %v1806_v63 = vld [vmem:[#allocation2 + $0xd0] sm:$0xff]  ;;  %v1741_v2 = vadd.f32 %v1699_v28, %v393_v19  ;;  %2130 = vst.msk [vmem:[%s3477_s13 + $0x58] sm:$0xf] %vm2107_vm1, %v2471_v11  ;;  %v1804_v43 = vld [vmem:[#allocation2 + $0xc0] sm:$0xff]  ;;  %v1702_v48 = vadd.f32 %v1701_v57, %v1541_v13 }
 0x198   : > { %v1968_v44 = vmax.f32 %v1936_v60, 0.0  ;;  %v1845_v61 = vadd.f32 %v3440_v54, %v1806_v63  ;;  %v1843_v8 = vadd.f32 %v3440_v54, %v1804_v43  ;;  %v1707_v38 = vadd.f32 %v2842_v17, %v1546_v6 }
 0x199   : > { %2128 = vst.msk [vmem:[%s3477_s13 + $0x50] sm:$0xf] %vm2107_vm1, %v2469_v12  ;;  %v2472_v30 = vpack.c.bf16 %v1970_v46, %v1970_v46  ;;  %v1807_v37 = vld [vmem:[#allocation2 + $0xd8] sm:$0xff]  ;;  %v1549_v31 = vadd.f32 %v2783_v14, %v3360_v35  ;;  %v1742_v7 = vadd.f32 %v1702_v48, %v394_v56  ;;  %v2539_v52 = vunpack.c.l.bf16 %v2558_v55 }
 0x19a   : > { %1773 = vst.msk [vmem:[#allocation2 + $0xe0] sm:$0xff] %vm332_vm0, %v1741_v2  ;;  %v2470_v53 = vpack.c.bf16 %v1968_v44, %v1968_v44  ;;  %v1941_v16 = vadd.f32 %v2535_v27, %v1845_v61  ;;  %v1846_v62 = vadd.f32 %v3440_v54, %v1807_v37  ;;  %v1939_v9 = vadd.f32 %v2531_v39, %v1843_v8 }
 0x19b   : > { %2131 = vst.msk [vmem:[%s3477_s13 + $0x5c] sm:$0xf] %vm2107_vm1, %v2472_v30  ;;  %v1805_v18 = vld [vmem:[#allocation2 + $0xc8] sm:$0xff]  ;;  %v1743_v47 = vadd.f32 %v1707_v38, %v395_v0  ;;  %v1710_v40 = vadd.f32 %v2843_v5, %v1549_v31  ;;  %v2543_v17 = vunpack.c.l.bf16 %v2559_v3  ;;  %v2540_v10 = vunpack.c.h.bf16 %v2558_v55 }
 0x19c   : > { %2129 = vst.msk [vmem:[%s3477_s13 + $0x54] sm:$0xf] %vm2107_vm1, %v2470_v53  ;;  %v1973_v15 = vmax.f32 %v1941_v16, 0.0  ;;  %v1942_v25 = vadd.f32 %v2536_v50, %v1846_v62  ;;  %v1844_v41 = vadd.f32 %v3440_v54, %v1805_v18  ;;  %v1971_v45 = vmax.f32 %v1939_v9, 0.0 }
 0x19d   : > { %1775 = vst.msk [vmem:[#allocation2 + $0xf0] sm:$0xff] %vm332_vm0, %v1743_v47  ;;  %1774 = vst.msk [vmem:[#allocation2 + $0xe8] sm:$0xff] %vm332_vm0, %v1742_v7  ;;  %v1744_v26 = vadd.f32 %v1710_v40, %v396_v36  ;;  %v2544_v20 = vunpack.c.h.bf16 %v2559_v3 }
 0x19e   : > { %v2475_v35 = vpack.c.bf16 %v1973_v15, %v1973_v15  ;;  %v1974_v13 = vmax.f32 %v1942_v25, 0.0  ;;  %v1940_v21 = vadd.f32 %v2532_v29, %v1844_v41  ;;  %v2473_v22 = vpack.c.bf16 %v1971_v45, %v1971_v45 }
 0x19f   : > { %1776 = vst.msk [vmem:[#allocation2 + $0xf8] sm:$0xff] %vm332_vm0, %v1744_v26 }
 0x1a0   : > { %2134 = vst.msk [vmem:[%s3477_s13 + $0x68] sm:$0xf] %vm2107_vm1, %v2475_v35  ;;  %v2476_v34 = vpack.c.bf16 %v1974_v13, %v1974_v13  ;;  %v1972_v51 = vmax.f32 %v1940_v21, 0.0  ;;  %2132 = vst.msk [vmem:[%s3477_s13 + $0x60] sm:$0xf] %vm2107_vm1, %v2473_v22 }
 0x1a1   : > { %v1808_v49 = vld [vmem:[#allocation2 + $0xe0] sm:$0xff] }
 0x1a2   : > { %v1847_v4 = vadd.f32 %v3440_v54, %v1808_v49  ;;  %2135 = vst.msk [vmem:[%s3477_s13 + $0x6c] sm:$0xf] %vm2107_vm1, %v2476_v34  ;;  %v2474_v32 = vpack.c.bf16 %v1972_v51, %v1972_v51 }
 0x1a4   : > { %v1943_v23 = vadd.f32 %v2539_v52, %v1847_v4  ;;  %2133 = vst.msk [vmem:[%s3477_s13 + $0x64] sm:$0xf] %vm2107_vm1, %v2474_v32  ;;  %v1810_v27 = vld [vmem:[#allocation2 + $0xf0] sm:$0xff]  ;;  %v1809_v59 = vld [vmem:[#allocation2 + $0xe8] sm:$0xff] }
 0x1a5   : > { %v1849_v19 = vadd.f32 %v3440_v54, %v1810_v27  ;;  %v1848_v42 = vadd.f32 %v3440_v54, %v1809_v59 }
 0x1a6   : > { %v1975_v24 = vmax.f32 %v1943_v23, 0.0  ;;  %v1811_v33 = vld [vmem:[#allocation2 + $0xf8] sm:$0xff] }
 0x1a7   : > { %v1945_v58 = vadd.f32 %v2543_v17, %v1849_v19  ;;  %v1944_v5 = vadd.f32 %v2540_v10, %v1848_v42  ;;  %v1850_v11 = vadd.f32 %v3440_v54, %v1811_v33 }
 0x1a8   : > { %v2477_v28 = vpack.c.bf16 %v1975_v24, %v1975_v24 }
 0x1a9   : > { %v1977_v60 = vmax.f32 %v1945_v58, 0.0  ;;  %v1976_v39 = vmax.f32 %v1944_v5, 0.0  ;;  %v1946_v50 = vadd.f32 %v2544_v20, %v1850_v11 }
 0x1aa   : > { %2136 = vst.msk [vmem:[%s3477_s13 + $0x70] sm:$0xf] %vm2107_vm1, %v2477_v28 }
 0x1ab   : > { %v2479_v1 = vpack.c.bf16 %v1977_v60, %v1977_v60  ;;  %v2478_v57 = vpack.c.bf16 %v1976_v39, %v1976_v39  ;;  %v1978_v12 = vmax.f32 %v1946_v50, 0.0 }
 0x1ad   : > { %2138 = vst.msk [vmem:[%s3477_s13 + $0x78] sm:$0xf] %vm2107_vm1, %v2479_v1  ;;  %2137 = vst.msk [vmem:[%s3477_s13 + $0x74] sm:$0xf] %vm2107_vm1, %v2478_v57  ;;  %v2480_v46 = vpack.c.bf16 %v1978_v12, %v1978_v12 }
 0x1af   : > { %2139 = vst.msk [vmem:[%s3477_s13 + $0x7c] sm:$0xf] %vm2107_vm1, %v2480_v46 }
 0x1b0 PF: > { %s14_s17 = sadd.s32 1, %s3056_s17   ;;  %s3708_s15 = smov %s3052_s16 }
 0x1b1   : > { %p11_p5 = scmp.ge.s32.totalorder %s14_s17, 4   ;;  %s3709_s16 = smov %s3711_s18 }
 0x1b3   :  { %13 = sbr.rel (!%p11_p5) target bundleno = 2 (0x2), region = 83 }

// kernel: _lambda_.27
= control target key start
LH: loop header
LB: loop body
LE: loop exit
PB: predicated region body
PF: predicated region fallthrough
CT: control target
= control target key end

     0   :  { %s1470_s12 = smov 0   ;;  %s1472_s13 = smov 0   ;;  %s1643_s0 = inlined_call_operand.vmem [shape: bf16[128,576], index: 0, kind: input, shape index: {}]   ;;  %s1644_s1 = inlined_call_operand.vmem [shape: bf16[576,128], index: 1, kind: input, shape index: {}]   ;;  %s1645_s2 = inlined_call_operand.vmem [shape: f32[1,128], index: 2, kind: input, shape index: {}]   ;;  %s1646_s3 = inlined_call_operand.vmem [shape: bf16[128,128], index: 3, kind: output, shape index: {}]  }
   0x1   :  { %s1474_s14 = smov 0  }
   0x2 LB: > { %s32_s15 = sadd.s32 1, %s1444_s13  ;;  %p1118_p0 = scmp.ge.s32.totalorder %s1448_s14, 1  ;;  %s1448_s14 = sphi %s1474_s14, %s13_s14   ;;  %s1444_s13 = sphi %s1472_s13, %s1648_s13   ;;  %s1440_s12 = sphi %s1470_s12, %s1647_s12  }
   0x3   : > { %p34_p1 = scmp.ge.s32.totalorder %s32_s15, 2  ;;  %p191_p2 = scmp.lt.s32.totalorder %s1448_s14, 3 }
   0x5   : > { %s1650_s15 = smov (%p34_p1, %s32_s15), 0  ;;  %p192_p3 = pnand %p1118_p0, %p191_p2 }
   0x6   : > { %v1362_v0 = vld [vmem:[%s1644_s1 + $0x40] sm:$0xff] (!%p192_p3)   ;;  %v1366_v4 = vld [vmem:[%s1644_s1 + $0x48] sm:$0xff] (!%p192_p3)   ;;  %v1370_v8 = vld [vmem:[%s1644_s1 + $0x50] sm:$0xff] (!%p192_p3)   ;;  %s1119_s23 = sshll.u32 (!%p192_p3), %s1440_s12, 3  ;;  %vm700_vm0 = vcmask (!%p192_p3), 523264  }
   0x7   : > { %195 = sbr.rel (%p192_p3) target bundleno = 297 (0x129), region = 32  ;;  %v1363_v1 = vld [vmem:[%s1644_s1 + $0xc0] sm:$0xff] (!%p192_p3)   ;;  %1225 = vmatprep.subr.bf16.mxu0 (!%p192_p3), %v1362_v0  ;;  %v1367_v5 = vld [vmem:[%s1644_s1 + $0xc8] sm:$0xff] (!%p192_p3)   ;;  %v1371_v9 = vld [vmem:[%s1644_s1 + $0xd0] sm:$0xff] (!%p192_p3)   ;;  %p236_p4 = scmp.lt.s32.totalorder (!%p192_p3), %s1119_s23, 15 }
   0x8   : > { %v1364_v2 = vld [vmem:[%s1644_s1] sm:$0xff] (!%p192_p3)   ;;  %1265 = vmatprep.subr.bf16.mxu1 (!%p192_p3), %v1363_v1  ;;  %v1368_v6 = vld [vmem:[%s1644_s1 + $0x8] sm:$0xff] (!%p192_p3)   ;;  %v1372_v10 = vld [vmem:[%s1644_s1 + $0x10] sm:$0xff] (!%p192_p3)  }
   0x9   : > { %v1365_v3 = vld [vmem:[%s1644_s1 + $0x80] sm:$0xff] (!%p192_p3)   ;;  %1226 = vmatpush3.bf16.msra.mxu0 (!%p192_p3), %v1364_v2  ;;  %v1369_v7 = vld [vmem:[%s1644_s1 + $0x88] sm:$0xff] (!%p192_p3)   ;;  %v1373_v11 = vld [vmem:[%s1644_s1 + $0x90] sm:$0xff] (!%p192_p3)  }
   0xa   : > { %1266 = vmatpush3.bf16.msra.mxu1 (!%p192_p3), %v1365_v3  ;;  %1227 = vmatprep.subr.bf16.mxu0 (!%p192_p3), %v1366_v4  ;;  %v1374_v12 = vld [vmem:[%s1644_s1 + $0x58] sm:$0xff] (!%p192_p3)   ;;  %v1378_v16 = vld [vmem:[%s1644_s1 + $0x60] sm:$0xff] (!%p192_p3)   ;;  %v1382_v20 = vld [vmem:[%s1644_s1 + $0x68] sm:$0xff] (!%p192_p3)  }
   0xb   : > { %1267 = vmatprep.subr.bf16.mxu1 (!%p192_p3), %v1367_v5  ;;  %v1375_v13 = vld [vmem:[%s1644_s1 + $0xd8] sm:$0xff] (!%p192_p3)   ;;  %v1379_v17 = vld [vmem:[%s1644_s1 + $0xe0] sm:$0xff] (!%p192_p3)   ;;  %v1383_v21 = vld [vmem:[%s1644_s1 + $0xe8] sm:$0xff] (!%p192_p3)  }
   0xc   : > { %v1376_v14 = vld [vmem:[%s1644_s1 + $0x18] sm:$0xff] (!%p192_p3)   ;;  %v1380_v18 = vld [vmem:[%s1644_s1 + $0x20] sm:$0xff] (!%p192_p3)   ;;  %v1384_v22 = vld [vmem:[%s1644_s1 + $0x28] sm:$0xff] (!%p192_p3)  }
   0xd   : > { %1228 = vmatpush3.bf16.msra.mxu0 (!%p192_p3), %v1368_v6  ;;  %v1377_v15 = vld [vmem:[%s1644_s1 + $0x98] sm:$0xff] (!%p192_p3)   ;;  %v1381_v19 = vld [vmem:[%s1644_s1 + $0xa0] sm:$0xff] (!%p192_p3)   ;;  %v1385_v23 = vld [vmem:[%s1644_s1 + $0xa8] sm:$0xff] (!%p192_p3)  }
   0xe   : > { %1268 = vmatpush3.bf16.msra.mxu1 %v1369_v7  ;;  %1229 = vmatprep.subr.bf16.mxu0 %v1370_v8  ;;  %s1652_s23 = smov (!%p236_p4, %s1119_s23), 15  ;;  %v1386_v24 = vld [vmem:[%s1644_s1 + $0x70] sm:$0xff]   ;;  %v1390_v28 = vld [vmem:[%s1644_s1 + $0x78] sm:$0xff]   ;;  %v1400_v36 = vld [vmem:[%s1644_s1 + $0x100] sm:$0xff]  }
   0xf   : > { %1269 = vmatprep.subr.bf16.mxu1 %v1371_v9  ;;  %v1387_v25 = vld [vmem:[%s1644_s1 + $0xf0] sm:$0xff]   ;;  %s1337_s22 = smul.u32 20, %s1652_s23  ;;  %v1391_v29 = vld [vmem:[%s1644_s1 + $0xf8] sm:$0xff]   ;;  %v1407_v39 = vld [vmem:[%s1644_s1 + $0x108] sm:$0xff]   ;;  %s1122_s26 = sshll.u32 %s1652_s23, 2 }
  0x10   : > { %v1388_v26 = vld [vmem:[%s1644_s1 + $0x30] sm:$0xff]   ;;  %v1392_v30 = vld [vmem:[%s1644_s1 + $0x38] sm:$0xff]   ;;  %s265_s29 = scalar_lea.vmem %s1646_s3, %s1122_s26 }
  0x11   : > { %1230 = vmatpush3.bf16.msra.mxu0 %v1372_v10  ;;  %v1389_v27 = vld [vmem:[%s1644_s1 + $0xb0] sm:$0xff]   ;;  %s1587_s6 = scalar_lea.vmem %s1643_s0, %s1337_s22  ;;  %v1393_v31 = vld [vmem:[%s1644_s1 + $0xb8] sm:$0xff]  }
  0x12   : > { %1270 = vmatpush3.bf16.msra.mxu1 %v1373_v11  ;;  %1231 = vmatprep.subr.bf16.mxu0 %v1374_v12  ;;  %v1394_v32 = vld [vmem:[%s1587_s6] ss:$20 sps:$4 sm:$0xff]   ;;  %v1396_v33 = vld [vmem:[%s1587_s6 + $0x4] ss:$20 sps:$4 sm:$0xff]   ;;  %v1397_v34 = vld [vmem:[%s1587_s6 + $0x8] ss:$20 sps:$4 sm:$0xff]  }
  0x13   : > { %1271 = vmatprep.subr.bf16.mxu1 %v1375_v13  ;;  %v1399_v35 = vld [vmem:[%s1587_s6 + $0xc] ss:$20 sps:$4 sm:$0xff]   ;;  %745 = vmatprep.mubr.bf16.mxu0 %v1396_v33  ;;  %v1403_v38 = vld [vmem:[%s1587_s6 + $0x34] ss:$20 sps:$4 sm:$0xff]   ;;  %v1406_v41 = vld [vmem:[%s1587_s6 + $0x30] ss:$20 sps:$4 sm:$0xff]  }
  0x14   : > { %810 = vmatprep.mubr.bf16.mxu1 %v1399_v35  ;;  %v1401_v37 = vld [vmem:[%s1587_s6 + $0x2c] ss:$20 sps:$4 sm:$0xff]   ;;  %v1405_v40 = vld [vmem:[%s1587_s6 + $0x28] ss:$20 sps:$4 sm:$0xff]   ;;  %v1414_v44 = vld [vmem:[%s1644_s1 + $0x110] sm:$0xff]  }
  0x15   : > { %1232 = vmatpush3.bf16.msra.mxu0 %v1376_v14  ;;  %v1408_v42 = vld [vmem:[%s1587_s6 + $0x54] ss:$20 sps:$4 sm:$0xff]   ;;  %v1410_v43 = vld [vmem:[%s1587_s6 + $0x5c] ss:$20 sps:$4 sm:$0xff]   ;;  %v1413_v47 = vld [vmem:[%s1587_s6 + $0x58] ss:$20 sps:$4 sm:$0xff]  }
  0x16   : > { %1272 = vmatpush3.bf16.msra.mxu1 %v1377_v15  ;;  %1233 = vmatprep.subr.bf16.mxu0 %v1378_v16  ;;  %v1421_v45 = vld [vmem:[%s1644_s1 + $0x118] sm:$0xff]   ;;  %v1412_v46 = vld [vmem:[%s1587_s6 + $0x50] ss:$20 sps:$4 sm:$0xff]   ;;  %v1420_v51 = vld [vmem:[%s1587_s6 + $0x80] ss:$20 sps:$4 sm:$0xff]  }
  0x17   : > { %1273 = vmatprep.subr.bf16.mxu1 %v1379_v17  ;;  %v1415_v48 = vld [vmem:[%s1587_s6 + $0x7c] ss:$20 sps:$4 sm:$0xff]   ;;  %v1417_v49 = vld [vmem:[%s1587_s6 + $0x84] ss:$20 sps:$4 sm:$0xff]   ;;  %v1423_v53 = vld [vmem:[%s1587_s6 + $0x60] ss:$20 sps:$4 sm:$0xff]  }
  0x18   : > { %v1419_v50 = vld [vmem:[%s1587_s6 + $0x78] ss:$20 sps:$4 sm:$0xff]   ;;  %v1422_v52 = vld [vmem:[%s1587_s6 + $0x10] ss:$20 sps:$4 sm:$0xff]   ;;  %v1425_v55 = vld [vmem:[%s1587_s6 + $0x88] ss:$20 sps:$4 sm:$0xff]  }
  0x19   : > { %1234 = vmatpush3.bf16.msra.mxu0 %v1380_v18  ;;  %v1424_v54 = vld [vmem:[%s1587_s6 + $0x38] ss:$20 sps:$4 sm:$0xff]  }
  0x1a   : > { %1274 = vmatpush3.bf16.msra.mxu1 %v1381_v19  ;;  %1235 = vmatprep.subr.bf16.mxu0 %v1382_v20 }
  0x1b   : > { %1275 = vmatprep.subr.bf16.mxu1 %v1383_v21 }
  0x1d   : > { %1236 = vmatpush3.bf16.msra.mxu0 %v1384_v22 }
  0x1e   : > { %1276 = vmatpush3.bf16.msra.mxu1 %v1385_v23  ;;  %1237 = vmatprep.subr.bf16.mxu0 %v1386_v24 }
  0x1f   : > { %1277 = vmatprep.subr.bf16.mxu1 %v1387_v25 }
  0x21   : > { %1238 = vmatpush3.bf16.msra.mxu0 %v1388_v26 }
  0x22   : > { %1278 = vmatpush3.bf16.msra.mxu1 %v1389_v27  ;;  %1239 = vmatprep.subr.bf16.mxu0 %v1390_v28 }
  0x23   : > { %1279 = vmatprep.subr.bf16.mxu1 %v1391_v29 }
  0x25   : > { %1240 = vmatpush3.bf16.msra.mxu0 %v1392_v30 }
  0x26   : > { %1280 = vmatpush3.bf16.msra.mxu1 %v1393_v31  ;;  %1313 = vmatprep.subr.bf16.mxu0 %v1400_v36 }
  0x27   : > { %1329 = vmatprep.subr.bf16.mxu1 %v1400_v36 }
  0x28   : > { %746 = vmatmul.mubr.bf16.vlgmr.msra.gmra.mrb[0].mxu0 %v1394_v32 }
  0x29   : > { %811 = vmatmul.mubr.bf16.vlgmr.msra.gmra.mrb[0].mxu1 %v1397_v34  ;;  %1314 = vmatpush3.bf16.msra.mxu0 %v1400_v36 }
  0x2a   : > { %1333 = vmatpush3.bf16.msra.mxu1 %v1400_v36  ;;  %753 = vmatprep.mubr.bf16.mxu0 %v1401_v37 }
  0x2b   : > { %818 = vmatprep.mubr.bf16.mxu1 %v1403_v38  ;;  %1315 = vmatprep.subr.bf16.mxu0 %v1407_v39 }
  0x2c   : > { %1330 = vmatprep.subr.bf16.mxu1 %v1407_v39 }
  0x2d   : > { %1316 = vmatpush3.bf16.msra.mxu0 %v1407_v39 }
  0x2e   : > { %1334 = vmatpush3.bf16.msra.mxu1 %v1407_v39  ;;  %1317 = vmatprep.subr.bf16.mxu0 %v1414_v44 }
  0x2f   : > { %1331 = vmatprep.subr.bf16.mxu1 %v1414_v44 }
  0x30   : > { %754 = vmatmul.mubr.bf16.gmra.mrb[4].mxu0 %v1405_v40 }
  0x31   : > { %819 = vmatmul.mubr.bf16.gmra.mrb[4].mxu1 %v1406_v41  ;;  %761 = vmatprep.mubr.bf16.mxu0 %v1408_v42 }
  0x32   : > { %826 = vmatprep.mubr.bf16.mxu1 %v1410_v43  ;;  %1318 = vmatpush3.bf16.msra.mxu0 %v1414_v44 }
  0x33   : > { %1335 = vmatpush3.bf16.msra.mxu1 %v1414_v44  ;;  %1319 = vmatprep.subr.bf16.mxu0 %v1421_v45 }
  0x34   : > { %1332 = vmatprep.subr.bf16.mxu1 %v1421_v45 }
  0x36   : > { %1320 = vmatpush3.bf16.msra.mxu0 %v1421_v45 }
  0x37   : > { %1336 = vmatpush3.bf16.msra.mxu1 %v1421_v45 }
  0x38   : > { %762 = vmatmul.mubr.bf16.gmra.mrb[8].mxu0 %v1412_v46 }
  0x39   : > { %827 = vmatmul.mubr.bf16.gmra.mrb[8].mxu1 %v1413_v47  ;;  %769 = vmatprep.mubr.bf16.mxu0 %v1415_v48 }
  0x3a   : > { %834 = vmatprep.mubr.bf16.mxu1 %v1417_v49  ;;  %v1183_v49 = vld [vmem:[%s1645_s2] ss:$0 sm:$0xff] }
  0x40   : > { %770 = vmatmul.mubr.bf16.gmra.mrb[12].mxu0 %v1419_v50 }
  0x41   : > { %835 = vmatmul.mubr.bf16.gmra.mrb[12].mxu1 %v1420_v51  ;;  %1321 = vmatprep.mubr.msk.bf16.mxu0 %vm700_vm0, %v1422_v52 }
  0x42   : > { %1325 = vmatprep.mubr.msk.bf16.mxu1 %vm700_vm0, %v1423_v53 }
  0x48   : > { %1322 = vmatmul.mubr.msk.bf16.vlgmr.msra.gmra.mrb[16].mxu0 %vm700_vm0, %v1424_v54 }
  0x49   : > { %1326 = vmatmul.mubr.msk.bf16.vlgmr.msra.gmra.mrb[16].mxu1 %vm700_vm0, %v1425_v55 }
  0xfb   : > { %v1241_v56 = vpop.f32.mrb[0].mxu0 }
  0xfc   : > { %v1281_v57 = vpop.f32.mrb[0].mxu1  ;;  %v1242_v58 = vpop.f32.mrb[1].mxu0 }
  0xfd   : > { %v1243_v59 = vadd.f32 %v1242_v58, %v1241_v56  ;;  %v1282_v60 = vpop.f32.mrb[1].mxu1  ;;  %v1244_v61 = vpop.f32.mrb[2].mxu0 }
  0xfe   : > { %v1283_v62 = vadd.f32 %v1282_v60, %v1281_v57  ;;  %v1284_v63 = vpop.f32.mrb[2].mxu1  ;;  %v1245_v0 = vpop.f32.mrb[3].mxu0 }
  0xff   : > { %v1246_v1 = vadd.f32 %v1245_v0, %v1244_v61  ;;  %v1285_v2 = vpop.f32.mrb[3].mxu1 }
 0x100   : > { %v1286_v3 = vadd.f32 %v1285_v2, %v1284_v63  ;;  %v813_v4 = vadd.f32 %v1283_v62, %v1243_v59 }
 0x102   : > { %v816_v5 = vadd.f32 %v1286_v3, %v1246_v1 }
 0x103   : > { %v1247_v6 = vpop.f32.mrb[4].mxu0 }
 0x104   : > { %v1287_v7 = vpop.f32.mrb[4].mxu1  ;;  %v1248_v8 = vpop.f32.mrb[5].mxu0 }
 0x105   : > { %v1249_v9 = vadd.f32 %v1248_v8, %v1247_v6  ;;  %v1288_v10 = vpop.f32.mrb[5].mxu1  ;;  %v1250_v11 = vpop.f32.mrb[6].mxu0 }
 0x106   : > { %v1289_v12 = vadd.f32 %v1288_v10, %v1287_v7  ;;  %v1290_v13 = vpop.f32.mrb[6].mxu1  ;;  %v1251_v14 = vpop.f32.mrb[7].mxu0 }
 0x107   : > { %v1252_v15 = vadd.f32 %v1251_v14, %v1250_v11  ;;  %v1291_v16 = vpop.f32.mrb[7].mxu1 }
 0x108   : > { %v1292_v17 = vadd.f32 %v1291_v16, %v1290_v13  ;;  %v821_v18 = vadd.f32 %v1289_v12, %v1249_v9 }
 0x10a   : > { %v824_v19 = vadd.f32 %v1292_v17, %v1252_v15 }
 0x10b   : > { %v1253_v20 = vpop.f32.mrb[8].mxu0 }
 0x10c   : > { %v1293_v21 = vpop.f32.mrb[8].mxu1  ;;  %v1254_v22 = vpop.f32.mrb[9].mxu0 }
 0x10d   : > { %v1255_v23 = vadd.f32 %v1254_v22, %v1253_v20  ;;  %v1294_v24 = vpop.f32.mrb[9].mxu1  ;;  %v1256_v25 = vpop.f32.mrb[10].mxu0 }
 0x10e   : > { %v1295_v26 = vadd.f32 %v1294_v24, %v1293_v21  ;;  %v1296_v27 = vpop.f32.mrb[10].mxu1  ;;  %v1257_v28 = vpop.f32.mrb[11].mxu0 }
 0x10f   : > { %v1258_v29 = vadd.f32 %v1257_v28, %v1256_v25  ;;  %v1297_v30 = vpop.f32.mrb[11].mxu1 }
 0x110   : > { %v1298_v31 = vadd.f32 %v1297_v30, %v1296_v27  ;;  %v829_v32 = vadd.f32 %v1295_v26, %v1255_v23 }
 0x112   : > { %v832_v33 = vadd.f32 %v1298_v31, %v1258_v29 }
 0x113   : > { %v1259_v34 = vpop.f32.mrb[12].mxu0 }
 0x114   : > { %v1299_v35 = vpop.f32.mrb[12].mxu1  ;;  %v1260_v36 = vpop.f32.mrb[13].mxu0 }
 0x115   : > { %v1261_v37 = vadd.f32 %v1260_v36, %v1259_v34  ;;  %v1300_v38 = vpop.f32.mrb[13].mxu1  ;;  %v1262_v39 = vpop.f32.mrb[14].mxu0 }
 0x116   : > { %v1301_v40 = vadd.f32 %v1300_v38, %v1299_v35  ;;  %v1302_v41 = vpop.f32.mrb[14].mxu1  ;;  %v1263_v42 = vpop.f32.mrb[15].mxu0 }
 0x117   : > { %v1264_v43 = vadd.f32 %v1263_v42, %v1262_v39  ;;  %v1303_v44 = vpop.f32.mrb[15].mxu1 }
 0x118   : > { %v1304_v45 = vadd.f32 %v1303_v44, %v1302_v41  ;;  %v837_v46 = vadd.f32 %v1301_v40, %v1261_v37 }
 0x11a   : > { %v840_v47 = vadd.f32 %v1304_v45, %v1264_v43 }
 0x11b   : > { %v1323_v48 = vpop.f32.mrb[16].mxu0 }
 0x11c   : > { %v886_v50 = vadd.f32 %v1323_v48, %v821_v18  ;;  %v1327_v51 = vpop.f32.mrb[16].mxu1  ;;  %v877_v52 = vpop.f32.mrb[17].mxu0 }
 0x11d   : > { %v902_v53 = vadd.f32 %v1327_v51, %v837_v46  ;;  %v878_v54 = vadd.f32 %v877_v52, %v813_v4  ;;  %v893_v55 = vpop.f32.mrb[17].mxu1  ;;  %v1324_v56 = vpop.f32.mrb[18].mxu0 }
 0x11e   : > { %v944_v57 = vadd.f32 %v1183_v49, %v886_v50  ;;  %v894_v58 = vadd.f32 %v893_v55, %v829_v32  ;;  %v889_v59 = vadd.f32 %v1324_v56, %v824_v19  ;;  %v1328_v60 = vpop.f32.mrb[18].mxu1  ;;  %v880_v61 = vpop.f32.mrb[19].mxu0 }
 0x11f   : > { %v948_v62 = vadd.f32 %v1183_v49, %v902_v53  ;;  %v942_v63 = vadd.f32 %v1183_v49, %v878_v54  ;;  %v905_v0 = vadd.f32 %v1328_v60, %v840_v47  ;;  %v881_v1 = vadd.f32 %v880_v61, %v816_v5  ;;  %v896_v2 = vpop.f32.mrb[19].mxu1 }
 0x120   : > { %v946_v3 = vadd.f32 %v1183_v49, %v894_v58  ;;  %v945_v6 = vadd.f32 %v1183_v49, %v889_v59  ;;  %v897_v7 = vadd.f32 %v896_v2, %v832_v33  ;;  %v952_v10 = vmax.f32 %v944_v57, 0.0 }
 0x121   : > { %v949_v8 = vadd.f32 %v1183_v49, %v905_v0  ;;  %v943_v9 = vadd.f32 %v1183_v49, %v881_v1  ;;  %v956_v12 = vmax.f32 %v948_v62, 0.0  ;;  %v950_v13 = vmax.f32 %v942_v63, 0.0 }
 0x122   : > { %v953_v4 = vmax.f32 %v945_v6, 0.0  ;;  %v947_v11 = vadd.f32 %v1183_v49, %v897_v7  ;;  %v954_v16 = vmax.f32 %v946_v3, 0.0 }
 0x123   : > { %v957_v14 = vmax.f32 %v949_v8, 0.0  ;;  %v951_v15 = vmax.f32 %v943_v9, 0.0 }
 0x124   : > { %v1210_v5 = vpack.c.bf16 %v953_v4, %v952_v10  ;;  %v955_v17 = vmax.f32 %v947_v11, 0.0 }
 0x125   : > { %v1220_v18 = vpack.c.bf16 %v957_v14, %v956_v12  ;;  %v1205_v19 = vpack.c.bf16 %v951_v15, %v950_v13 }
 0x126   : > { %1222 = vst [vmem:[%s265_s29 + $0x8] sm:$0xff] %v1210_v5   ;;  %v1215_v20 = vpack.c.bf16 %v955_v17, %v954_v16 }
 0x127   : > { %1224 = vst [vmem:[%s265_s29 + $0x18] sm:$0xff] %v1220_v18   ;;  %1206 = vst [vmem:[%s265_s29] sm:$0xff] %v1205_v19  }
 0x128   : > { %1223 = vst [vmem:[%s265_s29 + $0x10] sm:$0xff] %v1215_v20  }
 0x129 PF: > { %s13_s14 = sadd.s32 1, %s1448_s14   ;;  %s1647_s12 = smov %s1444_s13 }
 0x12a   : > { %p10_p5 = scmp.ge.s32.totalorder %s13_s14, 4   ;;  %s1648_s13 = smov %s1650_s15 }
 0x12c   :  { %12 = sbr.rel (!%p10_p5) target bundleno = 2 (0x2), region = 76 }

// kernel: _lambda_.28
= control target key start
LH: loop header
LB: loop body
LE: loop exit
PB: predicated region body
PF: predicated region fallthrough
CT: control target
= control target key end

     0   :  { %s784_s12 = smov 0   ;;  %s786_s13 = smov 0   ;;  %s843_s0 = inlined_call_operand.vmem [shape: bf16[128,64], index: 0, kind: input, shape index: {}]   ;;  %s844_s1 = inlined_call_operand.vmem [shape: bf16[64,128], index: 1, kind: input, shape index: {}]   ;;  %s845_s2 = inlined_call_operand.vmem [shape: f32[1,128], index: 2, kind: input, shape index: {}]   ;;  %s846_s3 = inlined_call_operand.vmem [shape: bf16[128,128], index: 3, kind: output, shape index: {}]  }
   0x1   :  { %s788_s14 = smov 0  }
   0x2 LB: > { %s32_s15 = sadd.s32 1, %s758_s13  ;;  %p617_p0 = scmp.ge.s32.totalorder %s762_s14, 1  ;;  %s762_s14 = sphi %s788_s14, %s13_s14   ;;  %s758_s13 = sphi %s786_s13, %s848_s13   ;;  %s754_s12 = sphi %s784_s12, %s847_s12  }
   0x3   : > { %p34_p1 = scmp.ge.s32.totalorder %s32_s15, 2  ;;  %p188_p2 = scmp.lt.s32.totalorder %s762_s14, 3 }
   0x5   : > { %s850_s15 = smov (%p34_p1, %s32_s15), 0  ;;  %p189_p3 = pnand %p617_p0, %p188_p2 }
   0x6   : > { %v732_v0 = vld [vmem:[%s844_s1] sm:$0xff] (!%p189_p3)   ;;  %s618_s18 = sshll.u32 (!%p189_p3), %s754_s12, 3  ;;  %v733_v1 = vld [vmem:[%s844_s1 + $0x8] sm:$0xff] (!%p189_p3)   ;;  %v734_v2 = vld [vmem:[%s844_s1 + $0x10] sm:$0xff] (!%p189_p3)   ;;  %vm340_vm0 = vcmask (!%p189_p3), 523264  }
   0x7   : > { %192 = sbr.rel (%p189_p3) target bundleno = 243 (0xf3), region = 32  ;;  %p230_p4 = scmp.lt.s32.totalorder (!%p189_p3), %s618_s18, 15  ;;  %684 = vmatprep.subr.bf16.mxu0 (!%p189_p3), %v732_v0  ;;  %700 = vmatprep.subr.bf16.mxu1 (!%p189_p3), %v732_v0  ;;  %v735_v3 = vld [vmem:[%s844_s1 + $0x18] sm:$0xff] (!%p189_p3)   ;;  %v634_v9 = vld [vmem:[%s845_s2] ss:$0 sm:$0xff] (!%p189_p3) }
   0x8   : > { %685 = vmatpush3.bf16.msra.mxu0 (!%p189_p3), %v732_v0  ;;  %704 = vmatpush3.bf16.msra.mxu1 (!%p189_p3), %v732_v0 }
   0x9   : > { %686 = vmatprep.subr.bf16.mxu0 (!%p189_p3), %v733_v1  ;;  %701 = vmatprep.subr.bf16.mxu1 (!%p189_p3), %v733_v1 }
   0xc   : > { %687 = vmatpush3.bf16.msra.mxu0 (!%p189_p3), %v733_v1  ;;  %705 = vmatpush3.bf16.msra.mxu1 (!%p189_p3), %v733_v1 }
   0xd   : > { %688 = vmatprep.subr.bf16.mxu0 (!%p189_p3), %v734_v2  ;;  %702 = vmatprep.subr.bf16.mxu1 (!%p189_p3), %v734_v2 }
   0xe   : > { %s852_s18 = smov (!%p230_p4, %s618_s18), 15 }
   0xf   : > { %s619_s23 = sshll.u32 %s852_s18, 2 }
  0x10   : > { %s236_s28 = scalar_lea.vmem %s843_s0, %s619_s23  ;;  %689 = vmatpush3.bf16.msra.mxu0 %v734_v2  ;;  %706 = vmatpush3.bf16.msra.mxu1 %v734_v2  ;;  %s257_s6 = scalar_lea.vmem %s846_s3, %s619_s23 }
  0x11   : > { %v736_v4 = vld [vmem:[%s236_s28] sm:$0xff]   ;;  %v737_v5 = vld [vmem:[%s236_s28 + $0x10] sm:$0xff]   ;;  %690 = vmatprep.subr.bf16.mxu0 %v735_v3  ;;  %703 = vmatprep.subr.bf16.mxu1 %v735_v3  ;;  %v738_v6 = vld [vmem:[%s236_s28 + $0x8] sm:$0xff]  }
  0x12   : > { %692 = vmatprep.mubr.msk.bf16.mxu0 %vm340_vm0, %v736_v4  ;;  %696 = vmatprep.mubr.msk.bf16.mxu1 %vm340_vm0, %v737_v5  ;;  %v739_v7 = vld [vmem:[%s236_s28 + $0x18] sm:$0xff]  }
  0x14   : > { %691 = vmatpush3.bf16.msra.mxu0 %v735_v3  ;;  %707 = vmatpush3.bf16.msra.mxu1 %v735_v3 }
  0x17   : > { %693 = vmatmul.mubr.msk.bf16.vlgmr.msra.gmra.mrb[0].mxu0 %vm340_vm0, %v738_v6  ;;  %697 = vmatmul.mubr.msk.bf16.vlgmr.msra.gmra.mrb[0].mxu1 %vm340_vm0, %v739_v7 }
  0xea   : > { %v694_v8 = vpop.f32.mrb[0].mxu0  ;;  %v698_v10 = vpop.f32.mrb[0].mxu1 }
  0xeb   : > { %v387_v11 = vpop.f32.mrb[1].mxu0  ;;  %v403_v12 = vpop.f32.mrb[1].mxu1  ;;  %v454_v15 = vadd.f32 %v694_v8, %v634_v9  ;;  %v458_v16 = vadd.f32 %v698_v10, %v634_v9 }
  0xec   : > { %v695_v13 = vpop.f32.mrb[2].mxu0  ;;  %v699_v14 = vpop.f32.mrb[2].mxu1  ;;  %v452_v21 = vadd.f32 %v634_v9, %v387_v11  ;;  %v456_v22 = vadd.f32 %v634_v9, %v403_v12 }
  0xed   : > { %v455_v17 = vadd.f32 %v695_v13, %v634_v9  ;;  %v459_v18 = vadd.f32 %v699_v14, %v634_v9  ;;  %v390_v19 = vpop.f32.mrb[3].mxu0  ;;  %v406_v20 = vpop.f32.mrb[3].mxu1 }
  0xee   : > { %v453_v23 = vadd.f32 %v634_v9, %v390_v19  ;;  %v457_v24 = vadd.f32 %v634_v9, %v406_v20 }
  0xef   : > { %v661_v25 = vpack.c.bf16 %v455_v17, %v454_v15  ;;  %v671_v26 = vpack.c.bf16 %v459_v18, %v458_v16 }
  0xf0   : > { %v656_v27 = vpack.c.bf16 %v453_v23, %v452_v21  ;;  %v666_v28 = vpack.c.bf16 %v457_v24, %v456_v22 }
  0xf1   : > { %673 = vst [vmem:[%s257_s6 + $0x8] sm:$0xff] %v661_v25   ;;  %675 = vst [vmem:[%s257_s6 + $0x18] sm:$0xff] %v671_v26  }
  0xf2   : > { %657 = vst [vmem:[%s257_s6] sm:$0xff] %v656_v27   ;;  %674 = vst [vmem:[%s257_s6 + $0x10] sm:$0xff] %v666_v28  }
  0xf3 PF: > { %s13_s14 = sadd.s32 1, %s762_s14   ;;  %s847_s12 = smov %s758_s13 }
  0xf4   : > { %p10_p5 = scmp.ge.s32.totalorder %s13_s14, 4   ;;  %s848_s13 = smov %s850_s15 }
  0xf6   :  { %12 = sbr.rel (!%p10_p5) target bundleno = 2 (0x2), region = 76 }

// kernel: _lambda_.30
= control target key start
LH: loop header
LB: loop body
LE: loop exit
PB: predicated region body
PF: predicated region fallthrough
CT: control target
= control target key end

     0   :  { %s1308_s12 = smov 0   ;;  %s1310_s13 = smov 0   ;;  %s1469_s0 = inlined_call_operand.vmem [shape: bf16[128,1152], index: 0, kind: input, shape index: {}]   ;;  %s1470_s1 = inlined_call_operand.vmem [shape: bf16[1152,128], index: 1, kind: input, shape index: {}]   ;;  %s1471_s2 = inlined_call_operand.vmem [shape: f32[1,128], index: 2, kind: input, shape index: {}]   ;;  %s1472_s3 = inlined_call_operand.vmem [shape: bf16[128,128], index: 3, kind: output, shape index: {}]  }
   0x1   :  { %s1312_s14 = smov 0   ;;  %s1314_s15 = smov 0  }
   0x2   :  { %s1316_s16 = smov 0   ;;  %s1318_s17 = smov 0  }
   0x3   :  { %s1320_s18 = smov 0  }
   0x4 LB: > { %s25_s19 = sadd.s32 1, %s1277_s16  ;;  %s32_s20 = sadd.s32 1, %s1281_s17  ;;  %s1285_s18 = sphi %s1320_s18, %s13_s18   ;;  %s1281_s17 = sphi %s1318_s17, %s1478_s17   ;;  %s1277_s16 = sphi %s1316_s16, %s1477_s16   ;;  %s1273_s15 = sphi %s1314_s15, %s1476_s15   ;;  %s1269_s14 = sphi %s1312_s14, %s1475_s14   ;;  %s1265_s13 = sphi %s1310_s13, %s1474_s13   ;;  %s1261_s12 = sphi %s1308_s12, %s1473_s12  }
   0x5   : > { %p26_p0 = scmp.ge.s32.totalorder %s25_s19, 3  ;;  %p48_p1 = scmp.ne.s32.totalorder %s1265_s13, %s1261_s12 }
   0x6   : > { %p49_p2 = scmp.eq.s32.totalorder %s1285_s18, 0  ;;  %s41_s24 = sadd.s32 1, %s1265_s13 }
   0x7   : > { %s1480_s19 = smov (%p26_p0, %s25_s19), 0  ;;  %s1482_s20 = smov (!%p26_p0, %s32_s20), %s1281_s17 }
   0x8   : > { %p50_p3 = por %p49_p2, %p48_p1  ;;  %p34_p4 = scmp.ge.s32.totalorder %s1482_s20, 2 }
   0x9   : > { %s37_s21 = ssub.s32 %s1277_s16, %s1480_s19  ;;  %p951_p6 = scmp.ge.s32.totalorder %s1285_s18, 6 }
   0xa   : > { %s1484_s20 = smov (%p34_p4, %s1482_s20), 0 }
   0xb   : > { %s36_s22 = ssub.s32 %s1281_s17, %s1484_s20  ;;  %162 = sbr.rel (%p951_p6) target bundleno = 36 (0x24), region = 20 }
   0xc   : > { %s38_s23 = sor.u32 %s37_s21, %s36_s22 }
   0xd   : > { %p39_p5 = scmp.eq.s32.totalorder %s38_s23, 0 }
   0xf   : > { %s1359_s25 = scalar_select %p39_p5, %s1265_s13, %s41_s24  }
  0x12   : > { %165 = sbr.rel (!%p50_p3) target bundleno = 36 (0x24), region = 24  ;;  %s167_s26 = sand.u32 (%p50_p3), 1, %s1265_s13  }
  0x13   : > { %s171_s27 = smul.u32 (%p50_p3), 3, %s1277_s16 }
  0x14   : > { %s1131_s28 = smul.u32 (%p50_p3), 96, %s167_s26 }
  0x15   : > { %s1132_s29 = smul.u32 (%p50_p3), 72, %s1281_s17 }
  0x16   : > { %s169_s8 = scalar_lea.vmem (%p50_p3), [#allocation3], %s1131_s28 }
  0x17   : > { %s173_s30 = sadd.s32 (%p50_p3), %s1132_s29, %s171_s27 }
  0x18   : > { %s954_s4 = sshll.u32 (%p50_p3), %s173_s30, 2 }
  0x19   : > { %s1368_s7 = scalar_lea.vmem %s1469_s0, %s954_s4 }
  0x1a   : > { %v190_v0 = vld [vmem:[%s1368_s7] sm:$0xff]  ;;  %v194_v2 = vld [vmem:[%s1368_s7 + $0x48] sm:$0xff]  ;;  %v198_v4 = vld [vmem:[%s1368_s7 + $0x90] sm:$0xff] }
  0x1b   : > { %v192_v1 = vld [vmem:[%s1368_s7 + $0x24] sm:$0xff]  ;;  %191 = vst [vmem:[%s169_s8] sm:$0xff] %v190_v0  ;;  %195 = vst [vmem:[%s169_s8 + $0x18] sm:$0xff] %v194_v2  ;;  %v196_v3 = vld [vmem:[%s1368_s7 + $0x6c] sm:$0xff] }
  0x1c   : > { %193 = vst [vmem:[%s169_s8 + $0xc] sm:$0xff] %v192_v1  ;;  %v200_v5 = vld [vmem:[%s1368_s7 + $0xb4] sm:$0xff]  ;;  %197 = vst [vmem:[%s169_s8 + $0x24] sm:$0xff] %v196_v3  ;;  %v204_v7 = vld [vmem:[%s1368_s7 + $0xfc] sm:$0xff] }
  0x1d   : > { %199 = vst [vmem:[%s169_s8 + $0x30] sm:$0xff] %v198_v4  ;;  %201 = vst [vmem:[%s169_s8 + $0x3c] sm:$0xff] %v200_v5  ;;  %v202_v6 = vld [vmem:[%s1368_s7 + $0xd8] sm:$0xff]  ;;  %v955_v8 = vld [vmem:[%s1368_s7 + $0x8] sm:$0xf] }
  0x1e   : > { %203 = vst [vmem:[%s169_s8 + $0x48] sm:$0xff] %v202_v6  ;;  %205 = vst [vmem:[%s169_s8 + $0x54] sm:$0xff] %v204_v7  ;;  %v957_v9 = vld [vmem:[%s1368_s7 + $0x2c] sm:$0xf]  ;;  %v959_v10 = vld [vmem:[%s1368_s7 + $0x50] sm:$0xf] }
  0x1f   : > { %956 = vst [vmem:[%s169_s8 + $0x8] sm:$0xf] %v955_v8  ;;  %v961_v11 = vld [vmem:[%s1368_s7 + $0x74] sm:$0xf]  ;;  %958 = vst [vmem:[%s169_s8 + $0x14] sm:$0xf] %v957_v9 }
  0x20   : > { %960 = vst [vmem:[%s169_s8 + $0x20] sm:$0xf] %v959_v10  ;;  %962 = vst [vmem:[%s169_s8 + $0x2c] sm:$0xf] %v961_v11  ;;  %v963_v12 = vld [vmem:[%s1368_s7 + $0x98] sm:$0xf] }
  0x21   : > { %v965_v13 = vld [vmem:[%s1368_s7 + $0xbc] sm:$0xf]  ;;  %v967_v14 = vld [vmem:[%s1368_s7 + $0xe0] sm:$0xf]  ;;  %964 = vst [vmem:[%s169_s8 + $0x38] sm:$0xf] %v963_v12 }
  0x22   : > { %966 = vst [vmem:[%s169_s8 + $0x44] sm:$0xf] %v965_v13  ;;  %968 = vst [vmem:[%s169_s8 + $0x50] sm:$0xf] %v967_v14  ;;  %v969_v15 = vld [vmem:[%s1368_s7 + $0x104] sm:$0xf] }
  0x23   : > { %970 = vst [vmem:[%s169_s8 + $0x5c] sm:$0xf] %v969_v15 }
  0x24 PF: > { %p971_p7 = scmp.ge.s32.totalorder %s1285_s18, 1  ;;  %p245_p8 = scmp.lt.s32.totalorder %s1285_s18, 7 }
  0x26   : > { %p246_p9 = pnand %p971_p7, %p245_p8 }
  0x27   : > { %s252_s9 = sand.u32 (!%p246_p9), 1, %s1261_s12   ;;  %s291_s10 = smul.u32 (!%p246_p9), 48, %s1269_s14 }
  0x28   : > { %249 = sbr.rel (%p246_p9) target bundleno = 350 (0x15e), region = 54  ;;  %s973_s21 = sshll.u32 (!%p246_p9), %s1273_s15, 3 }
  0x29   : > { %s1133_s11 = smul.u32 (!%p246_p9), 96, %s252_s9  ;;  %p292_p10 = scmp.lt.s32.totalorder (!%p246_p9), %s291_s10, 143 }
  0x2a   : > { %p304_p11 = scmp.lt.s32.totalorder (!%p246_p9), %s973_s21, 15  ;;  %p975_p12 = scmp.ne.s32.totalorder (!%p246_p9), %s1269_s14, 0 }
  0x2b   : > { %s1401_s12 = scalar_lea.vmem (!%p246_p9), [#allocation3], %s1133_s11 }
  0x2f   : > { %s1486_s10 = smov (!%p292_p10, %s291_s10), 143  ;;  %s1488_s21 = smov (!%p304_p11, %s973_s21), 15 }
  0x30   : > { %s972_s22 = sshll.u32 %s1486_s10, 2  ;;  %s974_s27 = sshll.u32 %s1488_s21, 2  ;;  %v1287_v16 = vmov (!%p975_p12), 0.0  }
  0x31   : > { %s1394_s26 = scalar_lea.vmem %s1470_s1, %s972_s22  ;;  %s1399_s30 = scalar_lea.vmem %s1472_s3, %s974_s27  ;;  %317 = vst [vmem:[#allocation2] sm:$0xff] (!%p975_p12), %v1287_v16  ;;  %318 = vst [vmem:[#allocation2 + $0x8] sm:$0xff] (!%p975_p12), %v1287_v16 }
  0x32   : > { %316 = sbr.rel (%p975_p12) target bundleno = 57 (0x39), region = 62  ;;  %319 = vst [vmem:[#allocation2 + $0x10] sm:$0xff] (!%p975_p12), %v1287_v16  ;;  %320 = vst [vmem:[#allocation2 + $0x18] sm:$0xff] (!%p975_p12), %v1287_v16 }
  0x33   : > { %321 = vst [vmem:[#allocation2 + $0x20] sm:$0xff] (!%p975_p12), %v1287_v16  ;;  %322 = vst [vmem:[#allocation2 + $0x28] sm:$0xff] (!%p975_p12), %v1287_v16 }
  0x34   : > { %323 = vst [vmem:[#allocation2 + $0x30] sm:$0xff] (!%p975_p12), %v1287_v16  ;;  %324 = vst [vmem:[#allocation2 + $0x38] sm:$0xff] (!%p975_p12), %v1287_v16 }
  0x39 PF: > { %v1191_v17 = vld [vmem:[%s1394_s26 + $0x40] sm:$0xff]   ;;  %v1194_v20 = vld [vmem:[%s1394_s26 + $0x48] sm:$0xff]   ;;  %v1197_v23 = vld [vmem:[%s1394_s26 + $0x50] sm:$0xff]   ;;  %p1012_p13 = scmp.ne.s32.totalorder %s1269_s14, 2 }
  0x3a   : > { %v1192_v18 = vld [vmem:[%s1394_s26] sm:$0xff]   ;;  %1055 = vmatprep.subr.bf16.mxu0 %v1191_v17  ;;  %v1195_v21 = vld [vmem:[%s1394_s26 + $0x8] sm:$0xff]   ;;  %v1198_v24 = vld [vmem:[%s1394_s26 + $0x10] sm:$0xff]  }
  0x3b   : > { %v1193_v19 = vld [vmem:[%s1394_s26 + $0x80] sm:$0xff]   ;;  %1056 = vmatpush3.bf16.msra.mxu0 %v1192_v18  ;;  %v1196_v22 = vld [vmem:[%s1394_s26 + $0x88] sm:$0xff]   ;;  %v1199_v25 = vld [vmem:[%s1394_s26 + $0x90] sm:$0xff]  }
  0x3c   : > { %1107 = vmatprep.subr.bf16.mxu1 %v1193_v19  ;;  %1057 = vmatprep.subr.bf16.mxu0 %v1194_v20  ;;  %v1200_v26 = vld [vmem:[%s1394_s26 + $0x58] sm:$0xff]   ;;  %v1203_v29 = vld [vmem:[%s1394_s26 + $0x60] sm:$0xff]   ;;  %v1206_v32 = vld [vmem:[%s1394_s26 + $0x68] sm:$0xff]  }
  0x3d   : > { %1108 = vmatpush3.bf16.msra.mxu1 %v1193_v19  ;;  %v1201_v27 = vld [vmem:[%s1394_s26 + $0x18] sm:$0xff]   ;;  %v1205_v30 = vld [vmem:[%s1394_s26 + $0xa0] sm:$0xff]   ;;  %v1208_v33 = vld [vmem:[%s1394_s26 + $0xa8] sm:$0xff]  }
  0x3e   : > { %1109 = vmatprep.subr.bf16.mxu1 %v1196_v22  ;;  %v1202_v28 = vld [vmem:[%s1394_s26 + $0x98] sm:$0xff]   ;;  %v1204_v31 = vld [vmem:[%s1394_s26 + $0x20] sm:$0xff]   ;;  %v1207_v34 = vld [vmem:[%s1394_s26 + $0x28] sm:$0xff]  }
  0x3f   : > { %1058 = vmatpush3.bf16.msra.mxu0 %v1195_v21  ;;  %v1209_v35 = vld [vmem:[%s1394_s26 + $0x70] sm:$0xff]   ;;  %v1212_v38 = vld [vmem:[%s1394_s26 + $0x78] sm:$0xff]   ;;  %v1215_v43 = vld [vmem:[%s1401_s12] ss:$12 sps:$4 sm:$0xff]  }
  0x40   : > { %1059 = vmatprep.subr.bf16.mxu0 %v1197_v23  ;;  %v1210_v36 = vld [vmem:[%s1394_s26 + $0x30] sm:$0xff]   ;;  %v1214_v39 = vld [vmem:[%s1394_s26 + $0xb8] sm:$0xff]   ;;  %v1219_v45 = vld [vmem:[%s1401_s12 + $0x20] ss:$12 sps:$4 sm:$0xff]  }
  0x41   : > { %1110 = vmatpush3.bf16.msra.mxu1 %v1196_v22  ;;  %v1211_v37 = vld [vmem:[%s1394_s26 + $0xb0] sm:$0xff]   ;;  %v1213_v42 = vld [vmem:[%s1394_s26 + $0x38] sm:$0xff]   ;;  %v325_v59 = vld [vmem:[#allocation2] sm:$0xff] }
  0x42   : > { %1111 = vmatprep.subr.bf16.mxu1 %v1199_v25  ;;  %v1217_v40 = vld [vmem:[%s1401_s12 + $0x4] ss:$12 sps:$4 sm:$0xff]   ;;  %v1218_v41 = vld [vmem:[%s1401_s12 + $0x8] ss:$12 sps:$4 sm:$0xff]   ;;  %v1228_v51 = vld [vmem:[%s1401_s12 + $0x4c] ss:$12 sps:$4 sm:$0xff]  }
  0x43   : > { %1060 = vmatpush3.bf16.msra.mxu0 %v1198_v24  ;;  %637 = vmatprep.mubr.bf16.mxu0 %v1217_v40  ;;  %v1220_v44 = vld [vmem:[%s1401_s12 + $0x1c] ss:$12 sps:$4 sm:$0xff]   ;;  %v1226_v46 = vld [vmem:[%s1401_s12 + $0x38] ss:$12 sps:$4 sm:$0xff]   ;;  %v1223_v48 = vld [vmem:[%s1401_s12 + $0x34] ss:$12 sps:$4 sm:$0xff]  }
  0x44   : > { %1061 = vmatprep.subr.bf16.mxu0 %v1200_v26  ;;  %1123 = vmatprep.mubr.bf16.mxu1 %v1218_v41  ;;  %v1222_v47 = vld [vmem:[%s1401_s12 + $0x18] ss:$12 sps:$4 sm:$0xff]   ;;  %v1227_v49 = vld [vmem:[%s1401_s12 + $0x50] ss:$12 sps:$4 sm:$0xff]   ;;  %v1230_v52 = vld [vmem:[%s1401_s12 + $0x48] ss:$12 sps:$4 sm:$0xff]  }
  0x45   : > { %1112 = vmatpush3.bf16.msra.mxu1 %v1199_v25  ;;  %v1225_v50 = vld [vmem:[%s1401_s12 + $0x30] ss:$12 sps:$4 sm:$0xff]   ;;  %v326_v0 = vld [vmem:[#allocation2 + $0x8] sm:$0xff]  ;;  %v329_v26 = vld [vmem:[#allocation2 + $0x20] sm:$0xff] }
  0x46   : > { %1113 = vmatprep.subr.bf16.mxu1 %v1202_v28  ;;  %v327_v10 = vld [vmem:[#allocation2 + $0x10] sm:$0xff]  ;;  %v328_v16 = vld [vmem:[#allocation2 + $0x18] sm:$0xff] }
  0x47   : > { %1062 = vmatpush3.bf16.msra.mxu0 %v1201_v27  ;;  %v332_v41 = vld [vmem:[#allocation2 + $0x38] sm:$0xff] }
  0x48   : > { %1063 = vmatprep.subr.bf16.mxu0 %v1203_v29  ;;  %v330_v29 = vld [vmem:[#allocation2 + $0x28] sm:$0xff] }
  0x49   : > { %1114 = vmatpush3.bf16.msra.mxu1 %v1202_v28 }
  0x4a   : > { %1115 = vmatprep.subr.bf16.mxu1 %v1205_v30 }
  0x4b   : > { %1064 = vmatpush3.bf16.msra.mxu0 %v1204_v31 }
  0x4c   : > { %1065 = vmatprep.subr.bf16.mxu0 %v1206_v32 }
  0x4d   : > { %1116 = vmatpush3.bf16.msra.mxu1 %v1205_v30 }
  0x4e   : > { %1117 = vmatprep.subr.bf16.mxu1 %v1208_v33 }
  0x4f   : > { %1066 = vmatpush3.bf16.msra.mxu0 %v1207_v34 }
  0x50   : > { %1067 = vmatprep.subr.bf16.mxu0 %v1209_v35 }
  0x51   : > { %1118 = vmatpush3.bf16.msra.mxu1 %v1208_v33 }
  0x52   : > { %1119 = vmatprep.subr.bf16.mxu1 %v1211_v37 }
  0x53   : > { %1068 = vmatpush3.bf16.msra.mxu0 %v1210_v36 }
  0x54   : > { %1069 = vmatprep.subr.bf16.mxu0 %v1212_v38 }
  0x55   : > { %1120 = vmatpush3.bf16.msra.mxu1 %v1211_v37  ;;  %v331_v37 = vld [vmem:[#allocation2 + $0x30] sm:$0xff] }
  0x56   : > { %1121 = vmatprep.subr.bf16.mxu1 %v1214_v39 }
  0x57   : > { %1070 = vmatpush3.bf16.msra.mxu0 %v1213_v42 }
  0x59   : > { %1122 = vmatpush3.bf16.msra.mxu1 %v1214_v39 }
  0x5a   : > { %638 = vmatmul.mubr.bf16.vlgmr.msra.gmra.mrb[0].mxu0 %v1215_v43 }
  0x5b   : > { %645 = vmatprep.mubr.bf16.mxu0 %v1220_v44 }
  0x5c   : > { %1124 = vmatmul.mubr.bf16.vlgmr.msra.gmra.mrb[0].mxu1 %v1219_v45 }
  0x5d   : > { %1127 = vmatprep.mubr.bf16.mxu1 %v1226_v46 }
  0x62   : > { %646 = vmatmul.mubr.bf16.gmra.mrb[4].mxu0 %v1222_v47  ;;  %v1013_v47 = vld [vmem:[%s1471_s2] ss:$0 sm:$0xff] (!%p1012_p13) }
  0x63   : > { %653 = vmatprep.mubr.bf16.mxu0 %v1223_v48 }
  0x64   : > { %1128 = vmatmul.mubr.bf16.gmra.mrb[4].mxu1 %v1227_v49 }
  0x6a   : > { %654 = vmatmul.mubr.bf16.gmra.mrb[8].mxu0 %v1225_v50 }
  0x6b   : > { %661 = vmatprep.mubr.bf16.mxu0 %v1228_v51 }
  0x72   : > { %662 = vmatmul.mubr.bf16.gmra.mrb[12].mxu0 %v1230_v52 }
 0x12d   : > { %v1071_v53 = vpop.f32.mrb[0].mxu0 }
 0x12e   : > { %v1072_v54 = vpop.f32.mrb[1].mxu0 }
 0x12f   : > { %v1073_v55 = vadd.f32 %v1072_v54, %v1071_v53  ;;  %v1074_v56 = vpop.f32.mrb[2].mxu0  ;;  %v1125_v57 = vpop.f32.mrb[0].mxu1 }
 0x130   : > { %v1075_v58 = vpop.f32.mrb[3].mxu0  ;;  %v704_v60 = vpop.f32.mrb[1].mxu1 }
 0x131   : > { %v1076_v61 = vadd.f32 %v1075_v58, %v1074_v56  ;;  %v705_v62 = vadd.f32 %v1073_v55, %v704_v60  ;;  %v1126_v63 = vpop.f32.mrb[2].mxu1 }
 0x132   : > { %v707_v1 = vpop.f32.mrb[3].mxu1 }
 0x133   : > { %v735_v2 = vadd.f32 %v705_v62, %v325_v59  ;;  %v708_v3 = vadd.f32 %v1076_v61, %v707_v1 }
 0x135   : > { %743 = vst [vmem:[#allocation2] sm:$0xff] %v735_v2  ;;  %v736_v4 = vadd.f32 %v708_v3, %v326_v0  ;;  %v1077_v5 = vpop.f32.mrb[4].mxu0 }
 0x136   : > { %v1078_v6 = vpop.f32.mrb[5].mxu0 }
 0x137   : > { %744 = vst [vmem:[#allocation2 + $0x8] sm:$0xff] %v736_v4  ;;  %v1079_v7 = vadd.f32 %v1078_v6, %v1077_v5  ;;  %v1080_v8 = vpop.f32.mrb[6].mxu0  ;;  %v1129_v9 = vpop.f32.mrb[4].mxu1 }
 0x138   : > { %v1081_v11 = vpop.f32.mrb[7].mxu0  ;;  %v720_v12 = vpop.f32.mrb[5].mxu1 }
 0x139   : > { %v713_v13 = vadd.f32 %v1125_v57, %v1079_v7  ;;  %v1082_v14 = vadd.f32 %v1081_v11, %v1080_v8  ;;  %v1130_v15 = vpop.f32.mrb[6].mxu1 }
 0x13a   : > { %v723_v17 = vpop.f32.mrb[7].mxu1 }
 0x13b   : > { %v737_v18 = vadd.f32 %v713_v13, %v327_v10  ;;  %v716_v19 = vadd.f32 %v1126_v63, %v1082_v14 }
 0x13c   : > { %v755_v45 = vld [vmem:[#allocation2] sm:$0xff] (!%p1012_p13) }
 0x13d   : > { %745 = vst [vmem:[#allocation2 + $0x10] sm:$0xff] %v737_v18  ;;  %v738_v20 = vadd.f32 %v716_v19, %v328_v16  ;;  %v1083_v21 = vpop.f32.mrb[8].mxu0  ;;  %v770_v48 = vadd.f32 (!%p1012_p13), %v1013_v47, %v755_v45 }
 0x13e   : > { %v1084_v22 = vpop.f32.mrb[9].mxu0  ;;  %v756_v46 = vld [vmem:[#allocation2 + $0x8] sm:$0xff] (!%p1012_p13) }
 0x13f   : > { %746 = vst [vmem:[#allocation2 + $0x18] sm:$0xff] %v738_v20  ;;  %v1085_v23 = vadd.f32 %v1084_v22, %v1083_v21  ;;  %v1086_v24 = vpop.f32.mrb[10].mxu0  ;;  %v771_v49 = vadd.f32 (!%p1012_p13), %v1013_v47, %v756_v46  ;;  %v778_v59 = vmax.f32 (!%p1012_p13), %v770_v48, 0.0 }
 0x140   : > { %v1087_v25 = vpop.f32.mrb[11].mxu0 }
 0x141   : > { %v1088_v27 = vadd.f32 %v1087_v25, %v1086_v24  ;;  %v721_v28 = vadd.f32 %v1085_v23, %v720_v12  ;;  %v779_v60 = vmax.f32 (!%p1012_p13), %v771_v49, 0.0 }
 0x143   : > { %v739_v30 = vadd.f32 %v721_v28, %v329_v26  ;;  %v724_v31 = vadd.f32 %v1088_v27, %v723_v17  ;;  %v1035_v3 = vpack.c.bf16 (!%p1012_p13), %v779_v60, %v778_v59 }
 0x144   : > { %v757_v50 = vld [vmem:[#allocation2 + $0x10] sm:$0xff] (!%p1012_p13) }
 0x145   : > { %747 = vst [vmem:[#allocation2 + $0x20] sm:$0xff] %v739_v30  ;;  %v740_v32 = vadd.f32 %v724_v31, %v330_v29  ;;  %v1089_v33 = vpop.f32.mrb[12].mxu0  ;;  %v772_v53 = vadd.f32 (!%p1012_p13), %v1013_v47, %v757_v50  ;;  %1036 = vst [vmem:[%s1399_s30] sm:$0xff] (!%p1012_p13), %v1035_v3  }
 0x146   : > { %v1090_v34 = vpop.f32.mrb[13].mxu0  ;;  %v758_v51 = vld [vmem:[#allocation2 + $0x18] sm:$0xff] (!%p1012_p13) }
 0x147   : > { %748 = vst [vmem:[#allocation2 + $0x28] sm:$0xff] %v740_v32  ;;  %v1091_v35 = vadd.f32 %v1090_v34, %v1089_v33  ;;  %v1092_v36 = vpop.f32.mrb[14].mxu0  ;;  %v773_v54 = vadd.f32 (!%p1012_p13), %v1013_v47, %v758_v51  ;;  %v780_v63 = vmax.f32 (!%p1012_p13), %v772_v53, 0.0 }
 0x148   : > { %v1093_v38 = vpop.f32.mrb[15].mxu0 }
 0x149   : > { %v729_v39 = vadd.f32 %v1129_v9, %v1091_v35  ;;  %v1094_v40 = vadd.f32 %v1093_v38, %v1092_v36  ;;  %754 = sbr.rel (%p1012_p13) target bundleno = 350 (0x15e), region = 66  ;;  %v781_v0 = vmax.f32 (!%p1012_p13), %v773_v54, 0.0 }
 0x14b   : > { %v741_v42 = vadd.f32 %v729_v39, %v331_v37  ;;  %v732_v43 = vadd.f32 %v1130_v15, %v1094_v40  ;;  %v1040_v6 = vpack.c.bf16 (!%p1012_p13), %v781_v0, %v780_v63 }
 0x14c   : > { %v759_v52 = vld [vmem:[#allocation2 + $0x20] sm:$0xff] (!%p1012_p13) }
 0x14d   : > { %749 = vst [vmem:[#allocation2 + $0x30] sm:$0xff] %v741_v42  ;;  %v742_v44 = vadd.f32 %v732_v43, %v332_v41  ;;  %v774_v56 = vadd.f32 (!%p1012_p13), %v1013_v47, %v759_v52  ;;  %1052 = vst [vmem:[%s1399_s30 + $0x8] sm:$0xff] (!%p1012_p13), %v1040_v6  }
 0x14e   : > { %v760_v55 = vld [vmem:[#allocation2 + $0x28] sm:$0xff] (!%p1012_p13) }
 0x14f   : > { %750 = vst [vmem:[#allocation2 + $0x38] sm:$0xff] %v742_v44  ;;  %v775_v61 = vadd.f32 (!%p1012_p13), %v1013_v47, %v760_v55  ;;  %v782_v1 = vmax.f32 (!%p1012_p13), %v774_v56, 0.0 }
 0x151   : > { %v783_v4 = vmax.f32 %v775_v61, 0.0 }
 0x153   : > { %v1045_v8 = vpack.c.bf16 %v783_v4, %v782_v1 }
 0x154   : > { %v761_v57 = vld [vmem:[#allocation2 + $0x30] sm:$0xff] }
 0x155   : > { %v776_v62 = vadd.f32 %v1013_v47, %v761_v57  ;;  %1053 = vst [vmem:[%s1399_s30 + $0x10] sm:$0xff] %v1045_v8  }
 0x156   : > { %v762_v58 = vld [vmem:[#allocation2 + $0x38] sm:$0xff] }
 0x157   : > { %v777_v2 = vadd.f32 %v1013_v47, %v762_v58  ;;  %v784_v5 = vmax.f32 %v776_v62, 0.0 }
 0x159   : > { %v785_v7 = vmax.f32 %v777_v2, 0.0 }
 0x15b   : > { %v1050_v9 = vpack.c.bf16 %v785_v7, %v784_v5 }
 0x15d   : > { %1054 = vst [vmem:[%s1399_s30 + $0x18] sm:$0xff] %v1050_v9  }
 0x15e PF: > { %s13_s18 = sadd.s32 1, %s1285_s18   ;;  %s1473_s12 = smov %s1265_s13 }
 0x15f   : > { %p10_p0 = scmp.ge.s32.totalorder %s13_s18, 8   ;;  %s1474_s13 = smov %s1359_s25 }
 0x160   : > { %s1475_s14 = smov %s1277_s16  ;;  %s1476_s15 = smov %s1281_s17 }
 0x161   : > { %s1477_s16 = smov %s1480_s19  ;;  %s1478_s17 = smov %s1484_s20 }
 0x162   :  { %12 = sbr.rel (!%p10_p0) target bundleno = 4 (0x4), region = 113 }

// kernel: _lambda_.29
= control target key start
LH: loop header
LB: loop body
LE: loop exit
PB: predicated region body
PF: predicated region fallthrough
CT: control target
= control target key end

     0   :  { %s1433_s15 = smov 0   ;;  %s1435_s16 = smov 0   ;;  %s1603_s0 = inlined_call_operand.vmem [shape: bf16[128,1152], index: 0, kind: input, shape index: {}]   ;;  %s1604_s1 = inlined_call_operand.vmem [shape: bf16[1152,128], index: 1, kind: input, shape index: {}]   ;;  %s1605_s2 = inlined_call_operand.vmem [shape: f32[1,128], index: 2, kind: input, shape index: {}]   ;;  %s1606_s3 = inlined_call_operand.vmem [shape: bf16[128,128], index: 3, kind: input, shape index: {}]   ;;  %s1607_s4 = inlined_call_operand.vmem [shape: bf16[128,128], index: 4, kind: output, shape index: {}]  }
   0x1   :  { %s1437_s17 = smov 0   ;;  %s1439_s18 = smov 0  }
   0x2   :  { %s1441_s19 = smov 0   ;;  %s1443_s20 = smov 0  }
   0x3   :  { %s1445_s21 = smov 0  }
   0x4 LB: > { %s26_s22 = sadd.s32 1, %s1397_s19  ;;  %s33_s23 = sadd.s32 1, %s1401_s20  ;;  %s1405_s21 = sphi %s1445_s21, %s14_s21   ;;  %s1401_s20 = sphi %s1443_s20, %s1613_s20   ;;  %s1397_s19 = sphi %s1441_s19, %s1612_s19   ;;  %s1393_s18 = sphi %s1439_s18, %s1611_s18   ;;  %s1389_s17 = sphi %s1437_s17, %s1610_s17   ;;  %s1385_s16 = sphi %s1435_s16, %s1609_s16   ;;  %s1381_s15 = sphi %s1433_s15, %s1608_s15  }
   0x5   : > { %p27_p0 = scmp.ge.s32.totalorder %s26_s22, 3  ;;  %p49_p1 = scmp.ne.s32.totalorder %s1385_s16, %s1381_s15 }
   0x6   : > { %p50_p2 = scmp.eq.s32.totalorder %s1405_s21, 0  ;;  %s42_s27 = sadd.s32 1, %s1385_s16 }
   0x7   : > { %s1615_s22 = smov (%p27_p0, %s26_s22), 0  ;;  %s1617_s23 = smov (!%p27_p0, %s33_s23), %s1401_s20 }
   0x8   : > { %p51_p3 = por %p50_p2, %p49_p1  ;;  %p35_p4 = scmp.ge.s32.totalorder %s1617_s23, 2 }
   0x9   : > { %s38_s24 = ssub.s32 %s1397_s19, %s1615_s22  ;;  %p1050_p6 = scmp.ge.s32.totalorder %s1405_s21, 6 }
   0xa   : > { %s1619_s23 = smov (%p35_p4, %s1617_s23), 0 }
   0xb   : > { %s37_s25 = ssub.s32 %s1401_s20, %s1619_s23  ;;  %191 = sbr.rel (%p1050_p6) target bundleno = 36 (0x24), region = 20 }
   0xc   : > { %s39_s26 = sor.u32 %s38_s24, %s37_s25 }
   0xd   : > { %p40_p5 = scmp.eq.s32.totalorder %s39_s26, 0 }
   0xf   : > { %s1484_s28 = scalar_select %p40_p5, %s1385_s16, %s42_s27  }
  0x12   : > { %194 = sbr.rel (!%p51_p3) target bundleno = 36 (0x24), region = 24  ;;  %s196_s29 = sand.u32 (%p51_p3), 1, %s1385_s16  }
  0x13   : > { %s200_s30 = smul.u32 (%p51_p3), 3, %s1397_s19 }
  0x14   : > { %s1251_s5 = smul.u32 (%p51_p3), 96, %s196_s29 }
  0x15   : > { %s1252_s6 = smul.u32 (%p51_p3), 72, %s1401_s20 }
  0x16   : > { %s198_s12 = scalar_lea.vmem (%p51_p3), [#allocation3], %s1251_s5 }
  0x17   : > { %s202_s7 = sadd.s32 (%p51_p3), %s1252_s6, %s200_s30 }
  0x18   : > { %s1053_s8 = sshll.u32 (%p51_p3), %s202_s7, 2 }
  0x19   : > { %s1493_s11 = scalar_lea.vmem %s1603_s0, %s1053_s8 }
  0x1a   : > { %v219_v0 = vld [vmem:[%s1493_s11] sm:$0xff]  ;;  %v223_v2 = vld [vmem:[%s1493_s11 + $0x48] sm:$0xff]  ;;  %v227_v4 = vld [vmem:[%s1493_s11 + $0x90] sm:$0xff] }
  0x1b   : > { %v221_v1 = vld [vmem:[%s1493_s11 + $0x24] sm:$0xff]  ;;  %220 = vst [vmem:[%s198_s12] sm:$0xff] %v219_v0  ;;  %224 = vst [vmem:[%s198_s12 + $0x18] sm:$0xff] %v223_v2  ;;  %v225_v3 = vld [vmem:[%s1493_s11 + $0x6c] sm:$0xff] }
  0x1c   : > { %222 = vst [vmem:[%s198_s12 + $0xc] sm:$0xff] %v221_v1  ;;  %v229_v5 = vld [vmem:[%s1493_s11 + $0xb4] sm:$0xff]  ;;  %226 = vst [vmem:[%s198_s12 + $0x24] sm:$0xff] %v225_v3  ;;  %v233_v7 = vld [vmem:[%s1493_s11 + $0xfc] sm:$0xff] }
  0x1d   : > { %228 = vst [vmem:[%s198_s12 + $0x30] sm:$0xff] %v227_v4  ;;  %230 = vst [vmem:[%s198_s12 + $0x3c] sm:$0xff] %v229_v5  ;;  %v231_v6 = vld [vmem:[%s1493_s11 + $0xd8] sm:$0xff]  ;;  %v1054_v8 = vld [vmem:[%s1493_s11 + $0x8] sm:$0xf] }
  0x1e   : > { %232 = vst [vmem:[%s198_s12 + $0x48] sm:$0xff] %v231_v6  ;;  %234 = vst [vmem:[%s198_s12 + $0x54] sm:$0xff] %v233_v7  ;;  %v1056_v9 = vld [vmem:[%s1493_s11 + $0x2c] sm:$0xf]  ;;  %v1058_v10 = vld [vmem:[%s1493_s11 + $0x50] sm:$0xf] }
  0x1f   : > { %1055 = vst [vmem:[%s198_s12 + $0x8] sm:$0xf] %v1054_v8  ;;  %v1060_v11 = vld [vmem:[%s1493_s11 + $0x74] sm:$0xf]  ;;  %1057 = vst [vmem:[%s198_s12 + $0x14] sm:$0xf] %v1056_v9 }
  0x20   : > { %1059 = vst [vmem:[%s198_s12 + $0x20] sm:$0xf] %v1058_v10  ;;  %1061 = vst [vmem:[%s198_s12 + $0x2c] sm:$0xf] %v1060_v11  ;;  %v1062_v12 = vld [vmem:[%s1493_s11 + $0x98] sm:$0xf] }
  0x21   : > { %v1064_v13 = vld [vmem:[%s1493_s11 + $0xbc] sm:$0xf]  ;;  %v1066_v14 = vld [vmem:[%s1493_s11 + $0xe0] sm:$0xf]  ;;  %1063 = vst [vmem:[%s198_s12 + $0x38] sm:$0xf] %v1062_v12 }
  0x22   : > { %1065 = vst [vmem:[%s198_s12 + $0x44] sm:$0xf] %v1064_v13  ;;  %1067 = vst [vmem:[%s198_s12 + $0x50] sm:$0xf] %v1066_v14  ;;  %v1068_v15 = vld [vmem:[%s1493_s11 + $0x104] sm:$0xf] }
  0x23   : > { %1069 = vst [vmem:[%s198_s12 + $0x5c] sm:$0xf] %v1068_v15 }
  0x24 PF: > { %p1070_p7 = scmp.ge.s32.totalorder %s1405_s21, 1  ;;  %p286_p8 = scmp.lt.s32.totalorder %s1405_s21, 7 }
  0x26   : > { %p287_p9 = pnand %p1070_p7, %p286_p8 }
  0x27   : > { %s293_s13 = sand.u32 (!%p287_p9), 1, %s1381_s15   ;;  %s342_s14 = smul.u32 (!%p287_p9), 48, %s1389_s17 }
  0x28   : > { %290 = sbr.rel (%p287_p9) target bundleno = 352 (0x160), region = 58  ;;  %s1072_s25 = sshll.u32 (!%p287_p9), %s1393_s18, 3 }
  0x29   : > { %s1253_s24 = smul.u32 (!%p287_p9), 96, %s293_s13  ;;  %p343_p10 = scmp.lt.s32.totalorder (!%p287_p9), %s342_s14, 143 }
  0x2a   : > { %p355_p11 = scmp.lt.s32.totalorder (!%p287_p9), %s1072_s25, 15  ;;  %p1076_p12 = scmp.ne.s32.totalorder (!%p287_p9), %s1389_s17, 0 }
  0x2b   : > { %s1531_s10 = scalar_lea.vmem (!%p287_p9), [#allocation3], %s1253_s24 }
  0x2f   : > { %s1621_s14 = smov (!%p343_p10, %s342_s14), 143  ;;  %s1623_s25 = smov (!%p355_p11, %s1072_s25), 15 }
  0x30   : > { %s1071_s26 = sshll.u32 %s1621_s14, 2  ;;  %s1073_s5 = sshll.u32 %s1623_s25, 2  ;;  %v1407_v16 = vmov (!%p1076_p12), 0.0  }
  0x31   : > { %s1519_s30 = scalar_lea.vmem %s1604_s1, %s1071_s26  ;;  %s1524_s8 = scalar_lea.vmem %s1606_s3, %s1073_s5  ;;  %377 = vst [vmem:[#allocation2] sm:$0xff] (!%p1076_p12), %v1407_v16  ;;  %378 = vst [vmem:[#allocation2 + $0x8] sm:$0xff] (!%p1076_p12), %v1407_v16 }
  0x32   : > { %s1529_s18 = scalar_lea.vmem %s1607_s4, %s1073_s5  ;;  %376 = sbr.rel (%p1076_p12) target bundleno = 57 (0x39), region = 66  ;;  %379 = vst [vmem:[#allocation2 + $0x10] sm:$0xff] (!%p1076_p12), %v1407_v16  ;;  %380 = vst [vmem:[#allocation2 + $0x18] sm:$0xff] (!%p1076_p12), %v1407_v16 }
  0x33   : > { %381 = vst [vmem:[#allocation2 + $0x20] sm:$0xff] (!%p1076_p12), %v1407_v16  ;;  %382 = vst [vmem:[#allocation2 + $0x28] sm:$0xff] (!%p1076_p12), %v1407_v16 }
  0x34   : > { %383 = vst [vmem:[#allocation2 + $0x30] sm:$0xff] (!%p1076_p12), %v1407_v16  ;;  %384 = vst [vmem:[#allocation2 + $0x38] sm:$0xff] (!%p1076_p12), %v1407_v16 }
  0x39 PF: > { %v1311_v17 = vld [vmem:[%s1519_s30 + $0x40] sm:$0xff]   ;;  %v1314_v20 = vld [vmem:[%s1519_s30 + $0x48] sm:$0xff]   ;;  %v1317_v23 = vld [vmem:[%s1519_s30 + $0x50] sm:$0xff]   ;;  %p1113_p13 = scmp.ne.s32.totalorder %s1389_s17, 2 }
  0x3a   : > { %v1312_v18 = vld [vmem:[%s1519_s30] sm:$0xff]   ;;  %1175 = vmatprep.subr.bf16.mxu0 %v1311_v17  ;;  %v1315_v21 = vld [vmem:[%s1519_s30 + $0x8] sm:$0xff]   ;;  %v1318_v24 = vld [vmem:[%s1519_s30 + $0x10] sm:$0xff]  }
  0x3b   : > { %v1313_v19 = vld [vmem:[%s1519_s30 + $0x80] sm:$0xff]   ;;  %1176 = vmatpush3.bf16.msra.mxu0 %v1312_v18  ;;  %v1316_v22 = vld [vmem:[%s1519_s30 + $0x88] sm:$0xff]   ;;  %v1319_v25 = vld [vmem:[%s1519_s30 + $0x90] sm:$0xff]  }
  0x3c   : > { %1227 = vmatprep.subr.bf16.mxu1 %v1313_v19  ;;  %1177 = vmatprep.subr.bf16.mxu0 %v1314_v20  ;;  %v1320_v26 = vld [vmem:[%s1519_s30 + $0x58] sm:$0xff]   ;;  %v1323_v29 = vld [vmem:[%s1519_s30 + $0x60] sm:$0xff]   ;;  %v1326_v32 = vld [vmem:[%s1519_s30 + $0x68] sm:$0xff]  }
  0x3d   : > { %1228 = vmatpush3.bf16.msra.mxu1 %v1313_v19  ;;  %v1321_v27 = vld [vmem:[%s1519_s30 + $0x18] sm:$0xff]   ;;  %v1325_v30 = vld [vmem:[%s1519_s30 + $0xa0] sm:$0xff]   ;;  %v1328_v33 = vld [vmem:[%s1519_s30 + $0xa8] sm:$0xff]  }
  0x3e   : > { %1229 = vmatprep.subr.bf16.mxu1 %v1316_v22  ;;  %v1322_v28 = vld [vmem:[%s1519_s30 + $0x98] sm:$0xff]   ;;  %v1324_v31 = vld [vmem:[%s1519_s30 + $0x20] sm:$0xff]   ;;  %v1327_v34 = vld [vmem:[%s1519_s30 + $0x28] sm:$0xff]  }
  0x3f   : > { %1178 = vmatpush3.bf16.msra.mxu0 %v1315_v21  ;;  %v1329_v35 = vld [vmem:[%s1519_s30 + $0x70] sm:$0xff]   ;;  %v1332_v38 = vld [vmem:[%s1519_s30 + $0x78] sm:$0xff]   ;;  %v1335_v43 = vld [vmem:[%s1531_s10] ss:$12 sps:$4 sm:$0xff]  }
  0x40   : > { %1179 = vmatprep.subr.bf16.mxu0 %v1317_v23  ;;  %v1330_v36 = vld [vmem:[%s1519_s30 + $0x30] sm:$0xff]   ;;  %v1334_v39 = vld [vmem:[%s1519_s30 + $0xb8] sm:$0xff]   ;;  %v1339_v45 = vld [vmem:[%s1531_s10 + $0x20] ss:$12 sps:$4 sm:$0xff]  }
  0x41   : > { %1230 = vmatpush3.bf16.msra.mxu1 %v1316_v22  ;;  %v1331_v37 = vld [vmem:[%s1519_s30 + $0xb0] sm:$0xff]   ;;  %v1333_v42 = vld [vmem:[%s1519_s30 + $0x38] sm:$0xff]   ;;  %v385_v59 = vld [vmem:[#allocation2] sm:$0xff] }
  0x42   : > { %1231 = vmatprep.subr.bf16.mxu1 %v1319_v25  ;;  %v1337_v40 = vld [vmem:[%s1531_s10 + $0x4] ss:$12 sps:$4 sm:$0xff]   ;;  %v1338_v41 = vld [vmem:[%s1531_s10 + $0x8] ss:$12 sps:$4 sm:$0xff]   ;;  %v1348_v51 = vld [vmem:[%s1531_s10 + $0x4c] ss:$12 sps:$4 sm:$0xff]  }
  0x43   : > { %1180 = vmatpush3.bf16.msra.mxu0 %v1318_v24  ;;  %697 = vmatprep.mubr.bf16.mxu0 %v1337_v40  ;;  %v1340_v44 = vld [vmem:[%s1531_s10 + $0x1c] ss:$12 sps:$4 sm:$0xff]   ;;  %v1346_v46 = vld [vmem:[%s1531_s10 + $0x38] ss:$12 sps:$4 sm:$0xff]   ;;  %v1343_v48 = vld [vmem:[%s1531_s10 + $0x34] ss:$12 sps:$4 sm:$0xff]  }
  0x44   : > { %1181 = vmatprep.subr.bf16.mxu0 %v1320_v26  ;;  %1243 = vmatprep.mubr.bf16.mxu1 %v1338_v41  ;;  %v1342_v47 = vld [vmem:[%s1531_s10 + $0x18] ss:$12 sps:$4 sm:$0xff]   ;;  %v1347_v49 = vld [vmem:[%s1531_s10 + $0x50] ss:$12 sps:$4 sm:$0xff]   ;;  %v1350_v52 = vld [vmem:[%s1531_s10 + $0x48] ss:$12 sps:$4 sm:$0xff]  }
  0x45   : > { %1232 = vmatpush3.bf16.msra.mxu1 %v1319_v25  ;;  %v1345_v50 = vld [vmem:[%s1531_s10 + $0x30] ss:$12 sps:$4 sm:$0xff]   ;;  %v386_v0 = vld [vmem:[#allocation2 + $0x8] sm:$0xff]  ;;  %v389_v26 = vld [vmem:[#allocation2 + $0x20] sm:$0xff] }
  0x46   : > { %1233 = vmatprep.subr.bf16.mxu1 %v1322_v28  ;;  %v387_v10 = vld [vmem:[#allocation2 + $0x10] sm:$0xff]  ;;  %v388_v16 = vld [vmem:[#allocation2 + $0x18] sm:$0xff] }
  0x47   : > { %1182 = vmatpush3.bf16.msra.mxu0 %v1321_v27  ;;  %v392_v41 = vld [vmem:[#allocation2 + $0x38] sm:$0xff] }
  0x48   : > { %1183 = vmatprep.subr.bf16.mxu0 %v1323_v29  ;;  %v390_v29 = vld [vmem:[#allocation2 + $0x28] sm:$0xff] }
  0x49   : > { %1234 = vmatpush3.bf16.msra.mxu1 %v1322_v28 }
  0x4a   : > { %1235 = vmatprep.subr.bf16.mxu1 %v1325_v30 }
  0x4b   : > { %1184 = vmatpush3.bf16.msra.mxu0 %v1324_v31 }
  0x4c   : > { %1185 = vmatprep.subr.bf16.mxu0 %v1326_v32 }
  0x4d   : > { %1236 = vmatpush3.bf16.msra.mxu1 %v1325_v30 }
  0x4e   : > { %1237 = vmatprep.subr.bf16.mxu1 %v1328_v33 }
  0x4f   : > { %1186 = vmatpush3.bf16.msra.mxu0 %v1327_v34 }
  0x50   : > { %1187 = vmatprep.subr.bf16.mxu0 %v1329_v35 }
  0x51   : > { %1238 = vmatpush3.bf16.msra.mxu1 %v1328_v33 }
  0x52   : > { %1239 = vmatprep.subr.bf16.mxu1 %v1331_v37 }
  0x53   : > { %1188 = vmatpush3.bf16.msra.mxu0 %v1330_v36 }
  0x54   : > { %1189 = vmatprep.subr.bf16.mxu0 %v1332_v38 }
  0x55   : > { %1240 = vmatpush3.bf16.msra.mxu1 %v1331_v37  ;;  %v391_v37 = vld [vmem:[#allocation2 + $0x30] sm:$0xff] }
  0x56   : > { %1241 = vmatprep.subr.bf16.mxu1 %v1334_v39 }
  0x57   : > { %1190 = vmatpush3.bf16.msra.mxu0 %v1333_v42 }
  0x59   : > { %1242 = vmatpush3.bf16.msra.mxu1 %v1334_v39 }
  0x5a   : > { %698 = vmatmul.mubr.bf16.vlgmr.msra.gmra.mrb[0].mxu0 %v1335_v43 }
  0x5b   : > { %705 = vmatprep.mubr.bf16.mxu0 %v1340_v44 }
  0x5c   : > { %1244 = vmatmul.mubr.bf16.vlgmr.msra.gmra.mrb[0].mxu1 %v1339_v45 }
  0x5d   : > { %1247 = vmatprep.mubr.bf16.mxu1 %v1346_v46 }
  0x62   : > { %706 = vmatmul.mubr.bf16.gmra.mrb[4].mxu0 %v1342_v47  ;;  %v1114_v47 = vld [vmem:[%s1605_s2] ss:$0 sm:$0xff] (!%p1113_p13) }
  0x63   : > { %713 = vmatprep.mubr.bf16.mxu0 %v1343_v48 }
  0x64   : > { %1248 = vmatmul.mubr.bf16.gmra.mrb[4].mxu1 %v1347_v49 }
  0x6a   : > { %714 = vmatmul.mubr.bf16.gmra.mrb[8].mxu0 %v1345_v50  ;;  %v1134_v50 = vld [vmem:[%s1524_s8] sm:$0xff] (!%p1113_p13)  }
  0x6b   : > { %721 = vmatprep.mubr.bf16.mxu0 %v1348_v51 }
  0x72   : > { %722 = vmatmul.mubr.bf16.gmra.mrb[12].mxu0 %v1350_v52 }
 0x12d   : > { %v1191_v53 = vpop.f32.mrb[0].mxu0 }
 0x12e   : > { %v1192_v54 = vpop.f32.mrb[1].mxu0 }
 0x12f   : > { %v1193_v55 = vadd.f32 %v1192_v54, %v1191_v53  ;;  %v1194_v56 = vpop.f32.mrb[2].mxu0  ;;  %v1245_v57 = vpop.f32.mrb[0].mxu1  ;;  %v1135_v53 = vunpack.c.l.bf16 (!%p1113_p13), %v1134_v50  ;;  %v1136_v54 = vunpack.c.h.bf16 (!%p1113_p13), %v1134_v50 }
 0x130   : > { %v1195_v58 = vpop.f32.mrb[3].mxu0  ;;  %v764_v60 = vpop.f32.mrb[1].mxu1 }
 0x131   : > { %v1196_v61 = vadd.f32 %v1195_v58, %v1194_v56  ;;  %v765_v62 = vadd.f32 %v1193_v55, %v764_v60  ;;  %v1246_v63 = vpop.f32.mrb[2].mxu1 }
 0x132   : > { %v767_v1 = vpop.f32.mrb[3].mxu1 }
 0x133   : > { %v795_v2 = vadd.f32 %v765_v62, %v385_v59  ;;  %v768_v3 = vadd.f32 %v1196_v61, %v767_v1 }
 0x135   : > { %803 = vst [vmem:[#allocation2] sm:$0xff] %v795_v2  ;;  %v796_v4 = vadd.f32 %v768_v3, %v386_v0  ;;  %v1197_v5 = vpop.f32.mrb[4].mxu0  ;;  %v1170_v0 = vld [vmem:[%s1524_s8 + $0x10] sm:$0xff] (!%p1113_p13)  }
 0x136   : > { %v1198_v6 = vpop.f32.mrb[5].mxu0 }
 0x137   : > { %804 = vst [vmem:[#allocation2 + $0x8] sm:$0xff] %v796_v4  ;;  %v1199_v7 = vadd.f32 %v1198_v6, %v1197_v5  ;;  %v1200_v8 = vpop.f32.mrb[6].mxu0  ;;  %v1249_v9 = vpop.f32.mrb[4].mxu1  ;;  %v1143_v5 = vunpack.c.l.bf16 (!%p1113_p13), %v1170_v0  ;;  %v1144_v6 = vunpack.c.h.bf16 (!%p1113_p13), %v1170_v0 }
 0x138   : > { %v1201_v11 = vpop.f32.mrb[7].mxu0  ;;  %v780_v12 = vpop.f32.mrb[5].mxu1 }
 0x139   : > { %v773_v13 = vadd.f32 %v1245_v57, %v1199_v7  ;;  %v1202_v14 = vadd.f32 %v1201_v11, %v1200_v8  ;;  %v1250_v15 = vpop.f32.mrb[6].mxu1  ;;  %v1169_v57 = vld [vmem:[%s1524_s8 + $0x8] sm:$0xff] (!%p1113_p13)   ;;  %v1171_v7 = vld [vmem:[%s1524_s8 + $0x18] sm:$0xff] (!%p1113_p13)  }
 0x13a   : > { %v783_v17 = vpop.f32.mrb[7].mxu1  ;;  %v1139_v60 = vunpack.c.l.bf16 (!%p1113_p13), %v1169_v57  ;;  %v1140_v61 = vunpack.c.h.bf16 (!%p1113_p13), %v1169_v57 }
 0x13b   : > { %v797_v18 = vadd.f32 %v773_v13, %v387_v10  ;;  %v776_v19 = vadd.f32 %v1246_v63, %v1202_v14 }
 0x13c   : > { %v815_v45 = vld [vmem:[#allocation2] sm:$0xff] (!%p1113_p13) }
 0x13d   : > { %805 = vst [vmem:[#allocation2 + $0x10] sm:$0xff] %v797_v18  ;;  %v798_v20 = vadd.f32 %v776_v19, %v388_v16  ;;  %v1203_v21 = vpop.f32.mrb[8].mxu0  ;;  %v830_v48 = vadd.f32 (!%p1113_p13), %v1114_v47, %v815_v45  ;;  %v1147_v18 = vunpack.c.l.bf16 (!%p1113_p13), %v1171_v7  ;;  %v1148_v19 = vunpack.c.h.bf16 (!%p1113_p13), %v1171_v7 }
 0x13e   : > { %v1204_v22 = vpop.f32.mrb[9].mxu0  ;;  %v816_v46 = vld [vmem:[#allocation2 + $0x8] sm:$0xff] (!%p1113_p13) }
 0x13f   : > { %806 = vst [vmem:[#allocation2 + $0x18] sm:$0xff] %v798_v20  ;;  %v1205_v23 = vadd.f32 %v1204_v22, %v1203_v21  ;;  %v1206_v24 = vpop.f32.mrb[10].mxu0  ;;  %v831_v49 = vadd.f32 (!%p1113_p13), %v1114_v47, %v816_v46  ;;  %v854_v3 = vadd.f32 (!%p1113_p13), %v1135_v53, %v830_v48 }
 0x140   : > { %v1207_v25 = vpop.f32.mrb[11].mxu0 }
 0x141   : > { %v1208_v27 = vadd.f32 %v1207_v25, %v1206_v24  ;;  %v781_v28 = vadd.f32 %v1205_v23, %v780_v12  ;;  %v855_v4 = vadd.f32 (!%p1113_p13), %v1136_v54, %v831_v49  ;;  %v862_v12 = vmax.f32 (!%p1113_p13), %v854_v3, 0.0 }
 0x143   : > { %v799_v30 = vadd.f32 %v781_v28, %v389_v26  ;;  %v784_v31 = vadd.f32 %v1208_v27, %v783_v17  ;;  %v863_v13 = vmax.f32 (!%p1113_p13), %v855_v4, 0.0 }
 0x144   : > { %v817_v51 = vld [vmem:[#allocation2 + $0x10] sm:$0xff] (!%p1113_p13) }
 0x145   : > { %807 = vst [vmem:[#allocation2 + $0x20] sm:$0xff] %v799_v30  ;;  %v800_v32 = vadd.f32 %v784_v31, %v390_v29  ;;  %v1209_v33 = vpop.f32.mrb[12].mxu0  ;;  %v832_v55 = vadd.f32 (!%p1113_p13), %v1114_v47, %v817_v51  ;;  %v1152_v20 = vpack.c.bf16 (!%p1113_p13), %v863_v13, %v862_v12 }
 0x146   : > { %v1210_v34 = vpop.f32.mrb[13].mxu0  ;;  %v818_v52 = vld [vmem:[#allocation2 + $0x18] sm:$0xff] (!%p1113_p13) }
 0x147   : > { %808 = vst [vmem:[#allocation2 + $0x28] sm:$0xff] %v800_v32  ;;  %v1211_v35 = vadd.f32 %v1210_v34, %v1209_v33  ;;  %v1212_v36 = vpop.f32.mrb[14].mxu0  ;;  %v833_v56 = vadd.f32 (!%p1113_p13), %v1114_v47, %v818_v52  ;;  %v856_v8 = vadd.f32 (!%p1113_p13), %v1139_v60, %v832_v55  ;;  %1153 = vst [vmem:[%s1529_s18] sm:$0xff] (!%p1113_p13), %v1152_v20  }
 0x148   : > { %v1213_v38 = vpop.f32.mrb[15].mxu0 }
 0x149   : > { %v789_v39 = vadd.f32 %v1249_v9, %v1211_v35  ;;  %v1214_v40 = vadd.f32 %v1213_v38, %v1212_v36  ;;  %814 = sbr.rel (%p1113_p13) target bundleno = 352 (0x160), region = 70  ;;  %v857_v9 = vadd.f32 (!%p1113_p13), %v1140_v61, %v833_v56  ;;  %v864_v16 = vmax.f32 (!%p1113_p13), %v856_v8, 0.0 }
 0x14b   : > { %v801_v42 = vadd.f32 %v789_v39, %v391_v37  ;;  %v792_v43 = vadd.f32 %v1250_v15, %v1214_v40  ;;  %v865_v17 = vmax.f32 (!%p1113_p13), %v857_v9, 0.0 }
 0x14c   : > { %v819_v58 = vld [vmem:[#allocation2 + $0x20] sm:$0xff] (!%p1113_p13) }
 0x14d   : > { %809 = vst [vmem:[#allocation2 + $0x30] sm:$0xff] %v801_v42  ;;  %v802_v44 = vadd.f32 %v792_v43, %v392_v41  ;;  %v834_v62 = vadd.f32 (!%p1113_p13), %v1114_v47, %v819_v58  ;;  %v1157_v23 = vpack.c.bf16 (!%p1113_p13), %v865_v17, %v864_v16 }
 0x14e   : > { %v820_v59 = vld [vmem:[#allocation2 + $0x28] sm:$0xff] (!%p1113_p13) }
 0x14f   : > { %810 = vst [vmem:[#allocation2 + $0x38] sm:$0xff] %v802_v44  ;;  %v835_v63 = vadd.f32 (!%p1113_p13), %v1114_v47, %v820_v59  ;;  %v858_v14 = vadd.f32 (!%p1113_p13), %v1143_v5, %v834_v62  ;;  %1172 = vst [vmem:[%s1529_s18 + $0x8] sm:$0xff] (!%p1113_p13), %v1157_v23  }
 0x151   : > { %v859_v15 = vadd.f32 %v1144_v6, %v835_v63  ;;  %v866_v21 = vmax.f32 %v858_v14, 0.0 }
 0x153   : > { %v867_v22 = vmax.f32 %v859_v15, 0.0 }
 0x154   : > { %v821_v1 = vld [vmem:[#allocation2 + $0x30] sm:$0xff] }
 0x155   : > { %v836_v10 = vadd.f32 %v1114_v47, %v821_v1  ;;  %v1162_v26 = vpack.c.bf16 %v867_v22, %v866_v21 }
 0x156   : > { %v822_v2 = vld [vmem:[#allocation2 + $0x38] sm:$0xff] }
 0x157   : > { %v837_v11 = vadd.f32 %v1114_v47, %v822_v2  ;;  %v860_v24 = vadd.f32 %v1147_v18, %v836_v10  ;;  %1173 = vst [vmem:[%s1529_s18 + $0x10] sm:$0xff] %v1162_v26  }
 0x159   : > { %v861_v25 = vadd.f32 %v1148_v19, %v837_v11  ;;  %v868_v27 = vmax.f32 %v860_v24, 0.0 }
 0x15b   : > { %v869_v28 = vmax.f32 %v861_v25, 0.0 }
 0x15d   : > { %v1167_v29 = vpack.c.bf16 %v869_v28, %v868_v27 }
 0x15f   : > { %1174 = vst [vmem:[%s1529_s18 + $0x18] sm:$0xff] %v1167_v29  }
 0x160 PF: > { %s14_s21 = sadd.s32 1, %s1405_s21   ;;  %s1608_s15 = smov %s1385_s16 }
 0x161   : > { %p11_p0 = scmp.ge.s32.totalorder %s14_s21, 8   ;;  %s1609_s16 = smov %s1484_s28 }
 0x162   : > { %s1610_s17 = smov %s1397_s19  ;;  %s1611_s18 = smov %s1401_s20 }
 0x163   : > { %s1612_s19 = smov %s1615_s22  ;;  %s1613_s20 = smov %s1619_s23 }
 0x164   :  { %13 = sbr.rel (!%p11_p0) target bundleno = 4 (0x4), region = 120 }

// kernel: _lambda_.32
= control target key start
LH: loop header
LB: loop body
LE: loop exit
PB: predicated region body
PF: predicated region fallthrough
CT: control target
= control target key end

     0   :  { %s1754_s0 = inlined_call_operand.vmem [shape: bf16[32,1152], index: 0, kind: input, shape index: {}]   ;;  %s1755_s1 = inlined_call_operand.vmem [shape: bf16[1152,256], index: 1, kind: input, shape index: {}]   ;;  %s1756_s2 = inlined_call_operand.vmem [shape: f32[1,256], index: 2, kind: input, shape index: {}]   ;;  %s1757_s3 = inlined_call_operand.vmem [shape: bf16[32,256], index: 3, kind: output, shape index: {}]  }
   0x1   :  { %1759 = sst [smem:[#allocation7_spill]] %s1754_s0 }
   0x2   :  { %1760 = sst [smem:[#allocation8_spill]] %s1755_s1 }
   0x3   :  { %s1439_s12 = smov 0   ;;  %s1441_s13 = smov 0  }
   0x4   :  { %s1443_s14 = smov 0   ;;  %s1445_s15 = smov 0  }
   0x5   :  { %s1447_s16 = smov 0   ;;  %s1449_s17 = smov 0  }
   0x6   :  { %s1451_s18 = smov 0   ;;  %s1453_s19 = smov 0  }
   0x7   :  { %s1455_s20 = smov 0   ;;  %s1457_s21 = smov 0  }
   0x8   :  { %s1459_s22 = smov 0  }
   0x9 LB: > { %s1072_s23 = sadd.s32 4294967295, %s1416_s22   ;;  %s25_s24 = sadd.s32 1, %s1408_s20  ;;  %s1416_s22 = sphi %s1459_s22, %s13_s22   ;;  %s1412_s21 = sphi %s1457_s21, %s1777_s21   ;;  %s1408_s20 = sphi %s1455_s20, %s1776_s20   ;;  %s1404_s19 = sphi %s1453_s19, %s1775_s19   ;;  %s1400_s18 = sphi %s1451_s18, %s1774_s18   ;;  %s1396_s17 = sphi %s1449_s17, %s1773_s17   ;;  %s1392_s16 = sphi %s1447_s16, %s1772_s16   ;;  %s1388_s15 = sphi %s1445_s15, %s1771_s15   ;;  %s1384_s14 = sphi %s1443_s14, %s1770_s14   ;;  %s1380_s13 = sphi %s1441_s13, %s1769_s13   ;;  %s1376_s12 = sphi %s1439_s12, %s1768_s12  }
   0xa   : > { %p26_p0 = scmp.ge.s32.totalorder %s25_s24, 3  ;;  %s28_s25 = sadd.s32 1, %s1412_s21 }
   0xb   : > { %s41_s26 = sadd.s32 1, %s1396_s17  ;;  %p48_p1 = scmp.ne.s32.totalorder %s1396_s17, %s1392_s16 }
   0xc   : > { %s1779_s24 = smov (%p26_p0, %s25_s24), 0  ;;  %s1781_s25 = smov (!%p26_p0, %s28_s25), %s1412_s21 }
   0xd   : > { %s37_s27 = ssub.s32 %s1408_s20, %s1779_s24  ;;  %p49_p2 = scmp.eq.s32.totalorder %s1416_s22, 0 }
   0xe   : > { %p30_p3 = scmp.ge.s32.totalorder %s1781_s25, 2  ;;  %p39_p4 = scmp.eq.s32.totalorder %s37_s27, 0 }
   0xf   : > { %p1506_p5 = por %p49_p2, %p48_p1  ;;  %s69_s29 = sadd.s32 1, %s1388_s15 }
  0x10   : > { %s1783_s25 = smov (%p30_p3, %s1781_s25), 0  ;;  %p76_p6 = scmp.ne.s32.totalorder %s1388_s15, %s1384_s14 }
  0x11   : > { %1762 = sst [smem:[#allocation6_spill]] %s1783_s25  ;;  %s65_s4 = ssub.s32 %s1412_s21, %s1783_s25 }
  0x12   : > { %s1514_s30 = scalar_select %p39_p4, %s1396_s17, %s41_s26  }
  0x13   : > { %s66_s5 = sor.u32 %s65_s4, %s37_s27  ;;  %p121_p7 = scmp.eq.s32.totalorder %s65_s4, 0 }
  0x14   : > { %p67_p8 = scmp.eq.s32.totalorder %s66_s5, 0  ;;  %p1520_p9 = por %p76_p6, %p49_p2 }
  0x15   : > { %s123_s7 = sadd.s32 1, %s1380_s13  ;;  %p133_p10 = scmp.ne.s32.totalorder %s1380_s13, %s1376_s12 }
  0x16   : > { %s1528_s8 = scalar_select %p67_p8, %s1388_s15, %s69_s29  }
  0x17   : > { %s1531_s9 = scalar_select %p121_p7, %s1380_s13, %s123_s7  }
  0x18   : > { %p134_p11 = scmp.eq.s32.totalorder %s1072_s23, 5  ;;  %p1075_p13 = scmp.ge.s32.totalorder %s1416_s22, 6 }
  0x1a   : > { %p1533_p12 = por %p134_p11, %p133_p10  ;;  %156 = sbr.rel (%p1075_p13) target bundleno = 87 (0x57), region = 16 }
  0x21   : > { %159 = sbr.rel (!%p1506_p5) target bundleno = 46 (0x2e), region = 20  ;;  %s161_s11 = sand.u32 (%p1506_p5), 1, %s1396_s17  }
  0x22   : > { %s1130_s26 = smul.u32 (%p1506_p5), 12, %s1408_s20  ;;  %s1765_s0 = sld [smem:[#allocation7_spill]] (%p1506_p5) }
  0x23   : > { %s1205_s27 = smul.u32 (%p1506_p5), 48, %s161_s11 }
  0x25   : > { %s163_s23 = scalar_lea.vmem (%p1506_p5), [#allocation3], %s1205_s27 }
  0x28   : > { %s169_s5 = scalar_lea.vmem %s1765_s0, %s1130_s26 }
  0x29   : > { %v184_v0 = vld [vmem:[%s169_s5] sm:$0xff]  ;;  %v188_v2 = vld [vmem:[%s169_s5 + $0x48] sm:$0xff]  ;;  %v1081_v6 = vld [vmem:[%s169_s5 + $0x50] sm:$0xf] }
  0x2a   : > { %v186_v1 = vld [vmem:[%s169_s5 + $0x24] sm:$0xff]  ;;  %185 = vst [vmem:[%s163_s23] sm:$0xff] %v184_v0  ;;  %189 = vst [vmem:[%s163_s23 + $0x18] sm:$0xff] %v188_v2  ;;  %v190_v3 = vld [vmem:[%s169_s5 + $0x6c] sm:$0xff] }
  0x2b   : > { %187 = vst [vmem:[%s163_s23 + $0xc] sm:$0xff] %v186_v1  ;;  %v1077_v4 = vld [vmem:[%s169_s5 + $0x8] sm:$0xf]  ;;  %v1079_v5 = vld [vmem:[%s169_s5 + $0x2c] sm:$0xf]  ;;  %191 = vst [vmem:[%s163_s23 + $0x24] sm:$0xff] %v190_v3 }
  0x2c   : > { %1078 = vst [vmem:[%s163_s23 + $0x8] sm:$0xf] %v1077_v4  ;;  %1080 = vst [vmem:[%s163_s23 + $0x14] sm:$0xf] %v1079_v5  ;;  %v1083_v7 = vld [vmem:[%s169_s5 + $0x74] sm:$0xf] }
  0x2d   : > { %1082 = vst [vmem:[%s163_s23 + $0x20] sm:$0xf] %v1081_v6  ;;  %1084 = vst [vmem:[%s163_s23 + $0x2c] sm:$0xf] %v1083_v7 }
  0x2e PF: > { %212 = sbr.rel (!%p1520_p9) target bundleno = 87 (0x57), region = 46  ;;  %s214_s28 = sand.u32 (%p1520_p9), 1, %s1388_s15  }
  0x2f   : > { %s1131_s7 = smul.u32 (%p1520_p9), 96, %s1408_s20  ;;  %s1766_s1 = sld [smem:[#allocation8_spill]] (%p1520_p9) }
  0x30   : > { %s1206_s11 = smul.u32 (%p1520_p9), 192, %s214_s28 }
  0x31   : > { %s219_s26 = sadd.s32 (%p1520_p9), %s1412_s21, %s1131_s7 }
  0x32   : > { %s1086_s27 = sshll.u32 (%p1520_p9), %s219_s26, 2  ;;  %s1558_s6 = scalar_lea.vmem (%p1520_p9), [#allocation4], %s1206_s11 }
  0x35   : > { %s1553_s0 = scalar_lea.vmem %s1766_s1, %s1086_s27 }
  0x36   : > { %v237_v8 = vld [vmem:[%s1553_s0] sm:$0xf]  ;;  %v239_v9 = vld [vmem:[%s1553_s0 + $0x8] sm:$0xf]  ;;  %v241_v10 = vld [vmem:[%s1553_s0 + $0x10] sm:$0xf] }
  0x37   : > { %238 = vst [vmem:[%s1558_s6] sm:$0xf] %v237_v8  ;;  %240 = vst [vmem:[%s1558_s6 + $0x4] sm:$0xf] %v239_v9  ;;  %v243_v11 = vld [vmem:[%s1553_s0 + $0x18] sm:$0xf] }
  0x38   : > { %242 = vst [vmem:[%s1558_s6 + $0x8] sm:$0xf] %v241_v10  ;;  %v245_v12 = vld [vmem:[%s1553_s0 + $0x20] sm:$0xf]  ;;  %v247_v13 = vld [vmem:[%s1553_s0 + $0x28] sm:$0xf] }
  0x39   : > { %244 = vst [vmem:[%s1558_s6 + $0xc] sm:$0xf] %v243_v11  ;;  %246 = vst [vmem:[%s1558_s6 + $0x10] sm:$0xf] %v245_v12  ;;  %v249_v14 = vld [vmem:[%s1553_s0 + $0x30] sm:$0xf] }
  0x3a   : > { %248 = vst [vmem:[%s1558_s6 + $0x14] sm:$0xf] %v247_v13  ;;  %v251_v15 = vld [vmem:[%s1553_s0 + $0x38] sm:$0xf]  ;;  %v253_v16 = vld [vmem:[%s1553_s0 + $0x40] sm:$0xf] }
  0x3b   : > { %250 = vst [vmem:[%s1558_s6 + $0x18] sm:$0xf] %v249_v14  ;;  %252 = vst [vmem:[%s1558_s6 + $0x1c] sm:$0xf] %v251_v15  ;;  %v255_v17 = vld [vmem:[%s1553_s0 + $0x48] sm:$0xf] }
  0x3c   : > { %254 = vst [vmem:[%s1558_s6 + $0x20] sm:$0xf] %v253_v16  ;;  %v257_v18 = vld [vmem:[%s1553_s0 + $0x50] sm:$0xf]  ;;  %v259_v19 = vld [vmem:[%s1553_s0 + $0x58] sm:$0xf] }
  0x3d   : > { %256 = vst [vmem:[%s1558_s6 + $0x24] sm:$0xf] %v255_v17  ;;  %258 = vst [vmem:[%s1558_s6 + $0x28] sm:$0xf] %v257_v18  ;;  %v261_v20 = vld [vmem:[%s1553_s0 + $0x60] sm:$0xf] }
  0x3e   : > { %260 = vst [vmem:[%s1558_s6 + $0x2c] sm:$0xf] %v259_v19  ;;  %v263_v21 = vld [vmem:[%s1553_s0 + $0x68] sm:$0xf]  ;;  %v265_v22 = vld [vmem:[%s1553_s0 + $0x70] sm:$0xf] }
  0x3f   : > { %262 = vst [vmem:[%s1558_s6 + $0x30] sm:$0xf] %v261_v20  ;;  %264 = vst [vmem:[%s1558_s6 + $0x34] sm:$0xf] %v263_v21  ;;  %v267_v23 = vld [vmem:[%s1553_s0 + $0x78] sm:$0xf] }
  0x40   : > { %266 = vst [vmem:[%s1558_s6 + $0x38] sm:$0xf] %v265_v22  ;;  %v269_v24 = vld [vmem:[%s1553_s0 + $0x80] sm:$0xf]  ;;  %v271_v25 = vld [vmem:[%s1553_s0 + $0x88] sm:$0xf] }
  0x41   : > { %268 = vst [vmem:[%s1558_s6 + $0x3c] sm:$0xf] %v267_v23  ;;  %270 = vst [vmem:[%s1558_s6 + $0x40] sm:$0xf] %v269_v24  ;;  %v273_v26 = vld [vmem:[%s1553_s0 + $0x90] sm:$0xf] }
  0x42   : > { %272 = vst [vmem:[%s1558_s6 + $0x44] sm:$0xf] %v271_v25  ;;  %v275_v27 = vld [vmem:[%s1553_s0 + $0x98] sm:$0xf]  ;;  %v277_v28 = vld [vmem:[%s1553_s0 + $0xa0] sm:$0xf] }
  0x43   : > { %274 = vst [vmem:[%s1558_s6 + $0x48] sm:$0xf] %v273_v26  ;;  %276 = vst [vmem:[%s1558_s6 + $0x4c] sm:$0xf] %v275_v27  ;;  %v279_v29 = vld [vmem:[%s1553_s0 + $0xa8] sm:$0xf] }
  0x44   : > { %278 = vst [vmem:[%s1558_s6 + $0x50] sm:$0xf] %v277_v28  ;;  %v281_v30 = vld [vmem:[%s1553_s0 + $0xb0] sm:$0xf]  ;;  %v283_v31 = vld [vmem:[%s1553_s0 + $0xb8] sm:$0xf] }
  0x45   : > { %280 = vst [vmem:[%s1558_s6 + $0x54] sm:$0xf] %v279_v29  ;;  %282 = vst [vmem:[%s1558_s6 + $0x58] sm:$0xf] %v281_v30  ;;  %v285_v32 = vld [vmem:[%s1553_s0 + $0xc0] sm:$0xf] }
  0x46   : > { %284 = vst [vmem:[%s1558_s6 + $0x5c] sm:$0xf] %v283_v31  ;;  %v287_v33 = vld [vmem:[%s1553_s0 + $0xc8] sm:$0xf]  ;;  %v289_v34 = vld [vmem:[%s1553_s0 + $0xd0] sm:$0xf] }
  0x47   : > { %286 = vst [vmem:[%s1558_s6 + $0x60] sm:$0xf] %v285_v32  ;;  %288 = vst [vmem:[%s1558_s6 + $0x64] sm:$0xf] %v287_v33  ;;  %v291_v35 = vld [vmem:[%s1553_s0 + $0xd8] sm:$0xf] }
  0x48   : > { %290 = vst [vmem:[%s1558_s6 + $0x68] sm:$0xf] %v289_v34  ;;  %v293_v36 = vld [vmem:[%s1553_s0 + $0xe0] sm:$0xf]  ;;  %v295_v37 = vld [vmem:[%s1553_s0 + $0xe8] sm:$0xf] }
  0x49   : > { %292 = vst [vmem:[%s1558_s6 + $0x6c] sm:$0xf] %v291_v35  ;;  %294 = vst [vmem:[%s1558_s6 + $0x70] sm:$0xf] %v293_v36  ;;  %v297_v38 = vld [vmem:[%s1553_s0 + $0xf0] sm:$0xf] }
  0x4a   : > { %296 = vst [vmem:[%s1558_s6 + $0x74] sm:$0xf] %v295_v37  ;;  %v299_v39 = vld [vmem:[%s1553_s0 + $0xf8] sm:$0xf]  ;;  %v301_v40 = vld [vmem:[%s1553_s0 + $0x100] sm:$0xf] }
  0x4b   : > { %298 = vst [vmem:[%s1558_s6 + $0x78] sm:$0xf] %v297_v38  ;;  %300 = vst [vmem:[%s1558_s6 + $0x7c] sm:$0xf] %v299_v39  ;;  %v303_v41 = vld [vmem:[%s1553_s0 + $0x108] sm:$0xf] }
  0x4c   : > { %302 = vst [vmem:[%s1558_s6 + $0x80] sm:$0xf] %v301_v40  ;;  %v305_v42 = vld [vmem:[%s1553_s0 + $0x110] sm:$0xf]  ;;  %v307_v43 = vld [vmem:[%s1553_s0 + $0x118] sm:$0xf] }
  0x4d   : > { %304 = vst [vmem:[%s1558_s6 + $0x84] sm:$0xf] %v303_v41  ;;  %306 = vst [vmem:[%s1558_s6 + $0x88] sm:$0xf] %v305_v42  ;;  %v309_v44 = vld [vmem:[%s1553_s0 + $0x120] sm:$0xf] }
  0x4e   : > { %308 = vst [vmem:[%s1558_s6 + $0x8c] sm:$0xf] %v307_v43  ;;  %v311_v45 = vld [vmem:[%s1553_s0 + $0x128] sm:$0xf]  ;;  %v313_v46 = vld [vmem:[%s1553_s0 + $0x130] sm:$0xf] }
  0x4f   : > { %310 = vst [vmem:[%s1558_s6 + $0x90] sm:$0xf] %v309_v44  ;;  %312 = vst [vmem:[%s1558_s6 + $0x94] sm:$0xf] %v311_v45  ;;  %v315_v47 = vld [vmem:[%s1553_s0 + $0x138] sm:$0xf] }
  0x50   : > { %314 = vst [vmem:[%s1558_s6 + $0x98] sm:$0xf] %v313_v46  ;;  %v317_v48 = vld [vmem:[%s1553_s0 + $0x140] sm:$0xf]  ;;  %v319_v49 = vld [vmem:[%s1553_s0 + $0x148] sm:$0xf] }
  0x51   : > { %316 = vst [vmem:[%s1558_s6 + $0x9c] sm:$0xf] %v315_v47  ;;  %318 = vst [vmem:[%s1558_s6 + $0xa0] sm:$0xf] %v317_v48  ;;  %v321_v50 = vld [vmem:[%s1553_s0 + $0x150] sm:$0xf] }
  0x52   : > { %320 = vst [vmem:[%s1558_s6 + $0xa4] sm:$0xf] %v319_v49  ;;  %v323_v51 = vld [vmem:[%s1553_s0 + $0x158] sm:$0xf]  ;;  %v325_v52 = vld [vmem:[%s1553_s0 + $0x160] sm:$0xf] }
  0x53   : > { %322 = vst [vmem:[%s1558_s6 + $0xa8] sm:$0xf] %v321_v50  ;;  %324 = vst [vmem:[%s1558_s6 + $0xac] sm:$0xf] %v323_v51  ;;  %v327_v53 = vld [vmem:[%s1553_s0 + $0x168] sm:$0xf] }
  0x54   : > { %326 = vst [vmem:[%s1558_s6 + $0xb0] sm:$0xf] %v325_v52  ;;  %v329_v54 = vld [vmem:[%s1553_s0 + $0x170] sm:$0xf]  ;;  %v331_v55 = vld [vmem:[%s1553_s0 + $0x178] sm:$0xf] }
  0x55   : > { %328 = vst [vmem:[%s1558_s6 + $0xb4] sm:$0xf] %v327_v53  ;;  %330 = vst [vmem:[%s1558_s6 + $0xb8] sm:$0xf] %v329_v54 }
  0x56   : > { %332 = vst [vmem:[%s1558_s6 + $0xbc] sm:$0xf] %v331_v55 }
  0x57 PF: > { %p1087_p0 = scmp.ge.s32.totalorder %s1416_s22, 1  ;;  %p456_p1 = scmp.lt.s32.totalorder %s1416_s22, 7 }
  0x59   : > { %p457_p2 = pnand %p1087_p0, %p456_p1 }
  0x5a   : > { %s463_s5 = sand.u32 (!%p457_p2), 1, %s1392_s16   ;;  %s470_s23 = sand.u32 (!%p457_p2), 1, %s1384_s14  }
  0x5b   : > { %460 = sbr.rel (%p457_p2) target bundleno = 391 (0x187), region = 91  ;;  %s496_s0 = sand.u32 (!%p457_p2), 1, %s1376_s12  }
  0x5c   : > { %s1207_s28 = smul.u32 (!%p457_p2), 48, %s463_s5  ;;  %s1088_s11 = sshll.u32 (!%p457_p2), %s496_s0, 4 }
  0x5d   : > { %s1208_s7 = smul.u32 (!%p457_p2), 192, %s470_s23  ;;  %p502_p3 = scmp.lt.s32.totalorder (!%p457_p2), %s1404_s19, 1 }
  0x5e   : > { %s1666_s6 = scalar_lea.vmem (!%p457_p2), [#allocation3], %s1207_s28  ;;  %s1670_s25 = scalar_lea.vmem (!%p457_p2), [#allocation5], %s1088_s11 }
  0x5f   : > { %s1668_s1 = scalar_lea.vmem (!%p457_p2), [#allocation4], %s1208_s7  ;;  %p1089_p4 = scmp.ne.s32.totalorder (!%p457_p2), %s1400_s18, 0 }
  0x62   : > { %s1660_s26 = scalar_select %p502_p3, %s1404_s19, 1 }
  0x63   : > { %510 = sbr.rel (%p1089_p4) target bundleno = 106 (0x6a), region = 103  ;;  %v1418_v56 = vmov (!%p1089_p4), 0.0  }
  0x64   : > { %s504_s4 = scalar_lea.vmem %s1756_s2, %s1660_s26  ;;  %511 = vst [vmem:[#allocation2] sm:$0xff] (!%p1089_p4), %v1418_v56  ;;  %512 = vst [vmem:[#allocation2 + $0x8] sm:$0xff] (!%p1089_p4), %v1418_v56 }
  0x65   : > { %513 = vst [vmem:[#allocation2 + $0x10] sm:$0xff] (!%p1089_p4), %v1418_v56  ;;  %514 = vst [vmem:[#allocation2 + $0x18] sm:$0xff] (!%p1089_p4), %v1418_v56 }
  0x6a PF: > { %v1298_v57 = vld [vmem:[%s1668_s1 + $0x40] sm:$0xff]   ;;  %v1301_v60 = vld [vmem:[%s1668_s1 + $0x48] sm:$0xff]   ;;  %v1304_v63 = vld [vmem:[%s1668_s1 + $0x50] sm:$0xff]   ;;  %p1120_p5 = scmp.ne.s32.totalorder %s1400_s18, 2 }
  0x6b   : > { %v1299_v58 = vld [vmem:[%s1668_s1] sm:$0xff]   ;;  %1147 = vmatprep.subr.bf16.mxu0 %v1298_v57  ;;  %v1302_v61 = vld [vmem:[%s1668_s1 + $0x8] sm:$0xff]   ;;  %v1305_v0 = vld [vmem:[%s1668_s1 + $0x10] sm:$0xff]  }
  0x6c   : > { %v1300_v59 = vld [vmem:[%s1668_s1 + $0x80] sm:$0xff]   ;;  %1148 = vmatpush3.bf16.msra.mxu0 %v1299_v58  ;;  %v1303_v62 = vld [vmem:[%s1668_s1 + $0x88] sm:$0xff]   ;;  %v1306_v1 = vld [vmem:[%s1668_s1 + $0x90] sm:$0xff]  }
  0x6d   : > { %1185 = vmatprep.subr.bf16.mxu1 %v1300_v59  ;;  %1149 = vmatprep.subr.bf16.mxu0 %v1301_v60  ;;  %v1307_v2 = vld [vmem:[%s1668_s1 + $0x58] sm:$0xff]   ;;  %v1310_v5 = vld [vmem:[%s1668_s1 + $0x60] sm:$0xff]   ;;  %v1313_v8 = vld [vmem:[%s1668_s1 + $0x68] sm:$0xff]  }
  0x6e   : > { %1186 = vmatpush3.bf16.msra.mxu1 %v1300_v59  ;;  %v1308_v3 = vld [vmem:[%s1668_s1 + $0x18] sm:$0xff]   ;;  %v1312_v6 = vld [vmem:[%s1668_s1 + $0xa0] sm:$0xff]   ;;  %v1315_v9 = vld [vmem:[%s1668_s1 + $0xa8] sm:$0xff]  }
  0x6f   : > { %1187 = vmatprep.subr.bf16.mxu1 %v1303_v62  ;;  %v1309_v4 = vld [vmem:[%s1668_s1 + $0x98] sm:$0xff]   ;;  %v1311_v7 = vld [vmem:[%s1668_s1 + $0x20] sm:$0xff]   ;;  %v1314_v10 = vld [vmem:[%s1668_s1 + $0x28] sm:$0xff]  }
  0x70   : > { %1150 = vmatpush3.bf16.msra.mxu0 %v1302_v61  ;;  %v1316_v11 = vld [vmem:[%s1668_s1 + $0x70] sm:$0xff]   ;;  %v1319_v14 = vld [vmem:[%s1668_s1 + $0x78] sm:$0xff]   ;;  %v515_v29 = vld [vmem:[#allocation2] sm:$0xff] }
  0x71   : > { %1151 = vmatprep.subr.bf16.mxu0 %v1304_v63  ;;  %v1317_v12 = vld [vmem:[%s1668_s1 + $0x30] sm:$0xff]   ;;  %v1321_v15 = vld [vmem:[%s1668_s1 + $0xb8] sm:$0xff]   ;;  %v516_v34 = vld [vmem:[#allocation2 + $0x8] sm:$0xff] }
  0x72   : > { %1188 = vmatpush3.bf16.msra.mxu1 %v1303_v62  ;;  %v1318_v13 = vld [vmem:[%s1668_s1 + $0xb0] sm:$0xff]   ;;  %v1320_v18 = vld [vmem:[%s1668_s1 + $0x38] sm:$0xff]   ;;  %v1121_v53 = vld [vmem:[%s504_s4] ss:$0 sm:$0xff] (!%p1120_p5) }
  0x73   : > { %1189 = vmatprep.subr.bf16.mxu1 %v1306_v1  ;;  %v1324_v16 = vld [vmem:[%s1666_s6 + $0x4] ss:$12 sps:$4 sm:$0xff]   ;;  %v1325_v17 = vld [vmem:[%s1666_s6 + $0x8] ss:$12 sps:$4 sm:$0xff]   ;;  %v1322_v19 = vld [vmem:[%s1666_s6] ss:$12 sps:$4 sm:$0xff]  }
  0x74   : > { %1152 = vmatpush3.bf16.msra.mxu0 %v1305_v0  ;;  %783 = vmatprep.mubr.bf16.mxu0 %v1324_v16  ;;  %v1327_v20 = vld [vmem:[%s1666_s6 + $0x1c] ss:$12 sps:$4 sm:$0xff]   ;;  %v1326_v21 = vld [vmem:[%s1666_s6 + $0x20] ss:$12 sps:$4 sm:$0xff]   ;;  %v1329_v22 = vld [vmem:[%s1666_s6 + $0x18] ss:$12 sps:$4 sm:$0xff]  }
  0x75   : > { %1153 = vmatprep.subr.bf16.mxu0 %v1307_v2  ;;  %1201 = vmatprep.mubr.bf16.mxu1 %v1325_v17  ;;  %v517_v43 = vld [vmem:[#allocation2 + $0x10] sm:$0xff]  ;;  %v518_v47 = vld [vmem:[#allocation2 + $0x18] sm:$0xff] }
  0x76   : > { %1190 = vmatpush3.bf16.msra.mxu1 %v1306_v1 }
  0x77   : > { %1191 = vmatprep.subr.bf16.mxu1 %v1309_v4 }
  0x78   : > { %1154 = vmatpush3.bf16.msra.mxu0 %v1308_v3 }
  0x79   : > { %1155 = vmatprep.subr.bf16.mxu0 %v1310_v5 }
  0x7a   : > { %1192 = vmatpush3.bf16.msra.mxu1 %v1309_v4 }
  0x7b   : > { %1193 = vmatprep.subr.bf16.mxu1 %v1312_v6 }
  0x7c   : > { %1156 = vmatpush3.bf16.msra.mxu0 %v1311_v7 }
  0x7d   : > { %1157 = vmatprep.subr.bf16.mxu0 %v1313_v8 }
  0x7e   : > { %1194 = vmatpush3.bf16.msra.mxu1 %v1312_v6 }
  0x7f   : > { %1195 = vmatprep.subr.bf16.mxu1 %v1315_v9 }
  0x80   : > { %1158 = vmatpush3.bf16.msra.mxu0 %v1314_v10 }
  0x81   : > { %1159 = vmatprep.subr.bf16.mxu0 %v1316_v11 }
  0x82   : > { %1196 = vmatpush3.bf16.msra.mxu1 %v1315_v9 }
  0x83   : > { %1197 = vmatprep.subr.bf16.mxu1 %v1318_v13 }
  0x84   : > { %1160 = vmatpush3.bf16.msra.mxu0 %v1317_v12 }
  0x85   : > { %1161 = vmatprep.subr.bf16.mxu0 %v1319_v14 }
  0x86   : > { %1198 = vmatpush3.bf16.msra.mxu1 %v1318_v13 }
  0x87   : > { %1199 = vmatprep.subr.bf16.mxu1 %v1321_v15 }
  0x88   : > { %1162 = vmatpush3.bf16.msra.mxu0 %v1320_v18 }
  0x8a   : > { %1200 = vmatpush3.bf16.msra.mxu1 %v1321_v15 }
  0x8b   : > { %784 = vmatmul.mubr.bf16.vlgmr.msra.gmra.mrb[0].mxu0 %v1322_v19 }
  0x8c   : > { %791 = vmatprep.mubr.bf16.mxu0 %v1327_v20 }
  0x8d   : > { %1202 = vmatmul.mubr.bf16.vlgmr.msra.gmra.mrb[0].mxu1 %v1326_v21 }
  0x93   : > { %792 = vmatmul.mubr.bf16.gmra.mrb[4].mxu0 %v1329_v22 }
 0x15e   : > { %v1163_v23 = vpop.f32.mrb[0].mxu0 }
 0x15f   : > { %v1164_v24 = vpop.f32.mrb[1].mxu0 }
 0x160   : > { %v1165_v25 = vadd.f32 %v1164_v24, %v1163_v23  ;;  %v1166_v26 = vpop.f32.mrb[2].mxu0  ;;  %v1203_v27 = vpop.f32.mrb[0].mxu1 }
 0x161   : > { %v1167_v28 = vpop.f32.mrb[3].mxu0  ;;  %v834_v30 = vpop.f32.mrb[1].mxu1 }
 0x162   : > { %v1168_v31 = vadd.f32 %v1167_v28, %v1166_v26  ;;  %v835_v32 = vadd.f32 %v1165_v25, %v834_v30  ;;  %v1204_v33 = vpop.f32.mrb[2].mxu1 }
 0x163   : > { %v837_v35 = vpop.f32.mrb[3].mxu1 }
 0x164   : > { %v849_v36 = vadd.f32 %v835_v32, %v515_v29  ;;  %v838_v37 = vadd.f32 %v1168_v31, %v837_v35 }
 0x166   : > { %853 = vst [vmem:[#allocation2] sm:$0xff] %v849_v36  ;;  %v850_v38 = vadd.f32 %v838_v37, %v516_v34  ;;  %v1169_v39 = vpop.f32.mrb[4].mxu0 }
 0x167   : > { %v1170_v40 = vpop.f32.mrb[5].mxu0 }
 0x168   : > { %854 = vst [vmem:[#allocation2 + $0x8] sm:$0xff] %v850_v38  ;;  %v1171_v41 = vadd.f32 %v1170_v40, %v1169_v39  ;;  %v1172_v42 = vpop.f32.mrb[6].mxu0 }
 0x169   : > { %v1173_v44 = vpop.f32.mrb[7].mxu0 }
 0x16a   : > { %v843_v45 = vadd.f32 %v1203_v27, %v1171_v41  ;;  %v1174_v46 = vadd.f32 %v1173_v44, %v1172_v42  ;;  %860 = sbr.rel (%p1120_p5) target bundleno = 383 (0x17f), region = 107 }
 0x16c   : > { %v851_v48 = vadd.f32 %v843_v45, %v517_v43  ;;  %v846_v49 = vadd.f32 %v1204_v33, %v1174_v46 }
 0x16d   : > { %v861_v51 = vld [vmem:[#allocation2] sm:$0xff] (!%p1120_p5) }
 0x16e   : > { %855 = vst [vmem:[#allocation2 + $0x10] sm:$0xff] %v851_v48  ;;  %v852_v50 = vadd.f32 %v846_v49, %v518_v47  ;;  %v872_v54 = vadd.f32 (!%p1120_p5), %v1121_v53, %v861_v51 }
 0x16f   : > { %v862_v52 = vld [vmem:[#allocation2 + $0x8] sm:$0xff] (!%p1120_p5) }
 0x170   : > { %856 = vst [vmem:[#allocation2 + $0x18] sm:$0xff] %v852_v50  ;;  %v873_v55 = vadd.f32 (!%p1120_p5), %v1121_v53, %v862_v52  ;;  %v876_v60 = vmax.f32 (!%p1120_p5), %v872_v54, 0.0 }
 0x172   : > { %v877_v61 = vmax.f32 %v873_v55, 0.0 }
 0x174   : > { %v1139_v0 = vpack.c.bf16 %v877_v61, %v876_v60 }
 0x175   : > { %v863_v56 = vld [vmem:[#allocation2 + $0x10] sm:$0xff] }
 0x176   : > { %v874_v58 = vadd.f32 %v1121_v53, %v863_v56  ;;  %1140 = vst [vmem:[%s1670_s25] sm:$0xff] %v1139_v0  }
 0x177   : > { %v864_v57 = vld [vmem:[#allocation2 + $0x18] sm:$0xff] }
 0x178   : > { %v875_v59 = vadd.f32 %v1121_v53, %v864_v57  ;;  %v878_v62 = vmax.f32 %v874_v58, 0.0 }
 0x17a   : > { %v879_v63 = vmax.f32 %v875_v59, 0.0 }
 0x17c   : > { %v1144_v1 = vpack.c.bf16 %v879_v63, %v878_v62 }
 0x17e   : > { %1146 = vst [vmem:[%s1670_s25 + $0x8] sm:$0xff] %v1144_v1  }
 0x17f PF: > { %906 = sbr.rel (!%p1533_p12) target bundleno = 391 (0x187), region = 111  ;;  %s1127_s14 = sshll.u32 (%p1533_p12), %s1404_s19, 2  ;;  %v927_v2 = vld [vmem:[%s1670_s25] sm:$0xf] (%p1533_p12)  ;;  %v929_v3 = vld [vmem:[%s1670_s25 + $0x4] sm:$0xf] (%p1533_p12) }
 0x180   : > { %s911_s5 = scalar_lea.vmem (%p1533_p12), %s1757_s3, %s1127_s14 }
 0x181   : > { %928 = vst [vmem:[%s911_s5] sm:$0xf] (%p1533_p12), %v927_v2  ;;  %930 = vst [vmem:[%s911_s5 + $0x8] sm:$0xf] (%p1533_p12), %v929_v3 }
 0x185   : > { %v931_v4 = vld [vmem:[%s1670_s25 + $0x8] sm:$0xf] (%p1533_p12)  ;;  %v933_v5 = vld [vmem:[%s1670_s25 + $0xc] sm:$0xf] (%p1533_p12) }
 0x186   : > { %932 = vst [vmem:[%s911_s5 + $0x10] sm:$0xf] %v931_v4  ;;  %934 = vst [vmem:[%s911_s5 + $0x18] sm:$0xf] %v933_v5 }
 0x187 PF: > { %s13_s22 = sadd.s32 1, %s1416_s22   ;;  %s1767_s10 = sld [smem:[#allocation6_spill]] }
 0x188   : > { %p10_p6 = scmp.ge.s32.totalorder %s13_s22, 8   ;;  %s1768_s12 = smov %s1380_s13 }
 0x189   : > { %s1769_s13 = smov %s1531_s9  ;;  %s1770_s14 = smov %s1388_s15 }
 0x18a   : > { %s1771_s15 = smov %s1528_s8  ;;  %s1772_s16 = smov %s1396_s17 }
 0x18b   : > { %s1773_s17 = smov %s1514_s30  ;;  %s1774_s18 = smov %s1408_s20 }
 0x18c   : > { %s1775_s19 = smov %s1412_s21  ;;  %s1776_s20 = smov %s1779_s24 }
 0x18d   : > { %s1777_s21 = smov %s1767_s10  ;;  %12 = sbr.rel (!%p10_p6) target bundleno = 9 (0x9), region = 200 }

// kernel: _lambda_.33
= control target key start
LH: loop header
LB: loop body
LE: loop exit
PB: predicated region body
PF: predicated region fallthrough
CT: control target
= control target key end

     0   :  { %s875_s12 = smov 0   ;;  %s877_s13 = smov 0   ;;  %s980_s0 = inlined_call_operand.vmem [shape: bf16[32,128], index: 0, kind: input, shape index: {}]   ;;  %s981_s1 = inlined_call_operand.vmem [shape: bf16[128,256], index: 1, kind: input, shape index: {}]   ;;  %s982_s2 = inlined_call_operand.vmem [shape: f32[1,256], index: 2, kind: input, shape index: {}]   ;;  %s983_s3 = inlined_call_operand.vmem [shape: bf16[32,256], index: 3, kind: output, shape index: {}]  }
   0x1   :  { %s879_s14 = smov 0   ;;  %s881_s15 = smov 0  }
   0x2   :  { %s883_s16 = smov 0  }
   0x3 LB: > { %s28_s17 = sadd.s32 1, %s849_s15  ;;  %s691_s18 = sadd.s32 4294967295, %s853_s16   ;;  %s853_s16 = sphi %s883_s16, %s13_s16   ;;  %s849_s15 = sphi %s881_s15, %s988_s15   ;;  %s845_s14 = sphi %s879_s14, %s987_s14   ;;  %s841_s13 = sphi %s877_s13, %s986_s13   ;;  %s837_s12 = sphi %s875_s12, %s985_s12  }
   0x4   : > { %p30_p0 = scmp.ge.s32.totalorder %s28_s17, 2  ;;  %p76_p1 = scmp.ne.s32.totalorder %s841_s13, %s837_s12 }
   0x5   : > { %p77_p2 = scmp.eq.s32.totalorder %s853_s16, 0  ;;  %p134_p4 = scmp.eq.s32.totalorder %s691_s18, 1 }
   0x6   : > { %s990_s17 = smov (%p30_p0, %s28_s17), 0  ;;  %s69_s20 = sadd.s32 1, %s841_s13 }
   0x7   : > { %p78_p3 = por %p77_p2, %p76_p1  ;;  %s65_s19 = ssub.s32 %s849_s15, %s990_s17 }
   0x8   : > { %p67_p5 = scmp.eq.s32.totalorder %s65_s19, 0  ;;  %p910_p6 = por %p134_p4, %p76_p1 }
   0x9   : > { %p695_p7 = scmp.ge.s32.totalorder %s853_s16, 2 }
   0xa   : > { %s915_s22 = scalar_select %p67_p5, %s841_s13, %s69_s20  }
   0xb   : > { %168 = sbr.rel (%p695_p7) target bundleno = 32 (0x20), region = 20 }
  0x12   : > { %171 = sbr.rel (!%p78_p3) target bundleno = 32 (0x20), region = 24  ;;  %s173_s23 = sand.u32 (%p78_p3), 1, %s841_s13  }
  0x13   : > { %s697_s24 = sshll.u32 (%p78_p3), %s849_s15, 2  ;;  %s696_s25 = sshll.u32 (%p78_p3), %s173_s23, 6 }
  0x14   : > { %s923_s28 = scalar_lea.vmem (%p78_p3), %s981_s1, %s697_s24  ;;  %s175_s29 = scalar_lea.vmem (%p78_p3), [#allocation3], %s696_s25 }
  0x15   : > { %v196_v0 = vld [vmem:[%s923_s28] sm:$0xf] (%p78_p3)  ;;  %v198_v1 = vld [vmem:[%s923_s28 + $0x8] sm:$0xf] (%p78_p3)  ;;  %v200_v2 = vld [vmem:[%s923_s28 + $0x10] sm:$0xf] (%p78_p3) }
  0x16   : > { %197 = vst [vmem:[%s175_s29] sm:$0xf] (%p78_p3), %v196_v0  ;;  %199 = vst [vmem:[%s175_s29 + $0x4] sm:$0xf] (%p78_p3), %v198_v1  ;;  %v202_v3 = vld [vmem:[%s923_s28 + $0x18] sm:$0xf] (%p78_p3) }
  0x17   : > { %v204_v4 = vld [vmem:[%s923_s28 + $0x20] sm:$0xf] (%p78_p3)  ;;  %201 = vst [vmem:[%s175_s29 + $0x8] sm:$0xf] (%p78_p3), %v200_v2  ;;  %203 = vst [vmem:[%s175_s29 + $0xc] sm:$0xf] (%p78_p3), %v202_v3 }
  0x18   : > { %205 = vst [vmem:[%s175_s29 + $0x10] sm:$0xf] (%p78_p3), %v204_v4  ;;  %v206_v5 = vld [vmem:[%s923_s28 + $0x28] sm:$0xf] (%p78_p3)  ;;  %v208_v6 = vld [vmem:[%s923_s28 + $0x30] sm:$0xf] (%p78_p3) }
  0x19   : > { %v210_v7 = vld [vmem:[%s923_s28 + $0x38] sm:$0xf]  ;;  %207 = vst [vmem:[%s175_s29 + $0x14] sm:$0xf] %v206_v5  ;;  %209 = vst [vmem:[%s175_s29 + $0x18] sm:$0xf] %v208_v6 }
  0x1a   : > { %211 = vst [vmem:[%s175_s29 + $0x1c] sm:$0xf] %v210_v7  ;;  %v212_v8 = vld [vmem:[%s923_s28 + $0x40] sm:$0xf]  ;;  %v214_v9 = vld [vmem:[%s923_s28 + $0x48] sm:$0xf] }
  0x1b   : > { %v216_v10 = vld [vmem:[%s923_s28 + $0x50] sm:$0xf]  ;;  %213 = vst [vmem:[%s175_s29 + $0x20] sm:$0xf] %v212_v8  ;;  %215 = vst [vmem:[%s175_s29 + $0x24] sm:$0xf] %v214_v9 }
  0x1c   : > { %217 = vst [vmem:[%s175_s29 + $0x28] sm:$0xf] %v216_v10  ;;  %v218_v11 = vld [vmem:[%s923_s28 + $0x58] sm:$0xf]  ;;  %v220_v12 = vld [vmem:[%s923_s28 + $0x60] sm:$0xf] }
  0x1d   : > { %v222_v13 = vld [vmem:[%s923_s28 + $0x68] sm:$0xf]  ;;  %219 = vst [vmem:[%s175_s29 + $0x2c] sm:$0xf] %v218_v11  ;;  %221 = vst [vmem:[%s175_s29 + $0x30] sm:$0xf] %v220_v12 }
  0x1e   : > { %223 = vst [vmem:[%s175_s29 + $0x34] sm:$0xf] %v222_v13  ;;  %v224_v14 = vld [vmem:[%s923_s28 + $0x70] sm:$0xf]  ;;  %v226_v15 = vld [vmem:[%s923_s28 + $0x78] sm:$0xf] }
  0x1f   : > { %225 = vst [vmem:[%s175_s29 + $0x38] sm:$0xf] %v224_v14  ;;  %227 = vst [vmem:[%s175_s29 + $0x3c] sm:$0xf] %v226_v15 }
  0x20 PF: > { %p698_p8 = scmp.ge.s32.totalorder %s853_s16, 1  ;;  %p287_p9 = scmp.lt.s32.totalorder %s853_s16, 3 }
  0x22   : > { %p288_p10 = pnand %p698_p8, %p287_p9 }
  0x23   : > { %s294_s30 = sand.u32 (!%p288_p10), 1, %s837_s12   ;;  %v813_v16 = vld [vmem:[%s980_s0] sm:$0xff] (!%p288_p10)   ;;  %v814_v25 = vld [vmem:[%s980_s0 + $0x8] sm:$0xff] (!%p288_p10)   ;;  %p337_p11 = scmp.lt.s32.totalorder (!%p288_p10), %s845_s14, 1 }
  0x24   : > { %291 = sbr.rel (%p288_p10) target bundleno = 300 (0x12c), region = 69  ;;  %s699_s6 = sshll.u32 (!%p288_p10), %s294_s30, 6  ;;  %761 = vmatprep.mubr.bf16.mxu0 (!%p288_p10), %v813_v16 }
  0x25   : > { %s296_s7 = scalar_lea.vmem (!%p288_p10), [#allocation3], %s699_s6  ;;  %s700_s20 = sshll.u32 (!%p288_p10), %s294_s30, 4 }
  0x26   : > { %v805_v17 = vld [vmem:[%s296_s7] sm:$0xff] (!%p288_p10)   ;;  %v806_v18 = vld [vmem:[%s296_s7 + $0x8] sm:$0xff] (!%p288_p10)   ;;  %v807_v19 = vld [vmem:[%s296_s7 + $0x10] sm:$0xff] (!%p288_p10)   ;;  %s326_s23 = scalar_lea.vmem (!%p288_p10), [#allocation4], %s700_s20 }
  0x27   : > { %745 = vmatprep.subr.bf16.mxu0 (!%p288_p10), %v805_v17  ;;  %v808_v20 = vld [vmem:[%s296_s7 + $0x18] sm:$0xff] (!%p288_p10)   ;;  %v809_v21 = vld [vmem:[%s296_s7 + $0x20] sm:$0xff] (!%p288_p10)   ;;  %v810_v22 = vld [vmem:[%s296_s7 + $0x28] sm:$0xff] (!%p288_p10)  }
  0x28   : > { %746 = vmatpush3.bf16.msra.mxu0 (!%p288_p10), %v805_v17  ;;  %v811_v23 = vld [vmem:[%s296_s7 + $0x30] sm:$0xff] (!%p288_p10)   ;;  %v812_v24 = vld [vmem:[%s296_s7 + $0x38] sm:$0xff] (!%p288_p10)  }
  0x29   : > { %747 = vmatprep.subr.bf16.mxu0 (!%p288_p10), %v806_v18 }
  0x2b   : > { %s338_s10 = scalar_select %p337_p11, %s845_s14, 1 }
  0x2c   : > { %748 = vmatpush3.bf16.msra.mxu0 %v806_v18  ;;  %s717_s24 = sshll.u32 (%p910_p6), %s845_s14, 2 }
  0x2d   : > { %749 = vmatprep.subr.bf16.mxu0 %v807_v19  ;;  %s339_s19 = scalar_lea.vmem %s982_s2, %s338_s10  ;;  %s540_s26 = scalar_lea.vmem (%p910_p6), %s983_s3, %s717_s24 }
  0x2e   : > { %v711_v27 = vld [vmem:[%s339_s19] ss:$0 sm:$0xff] }
  0x30   : > { %750 = vmatpush3.bf16.msra.mxu0 %v807_v19 }
  0x31   : > { %751 = vmatprep.subr.bf16.mxu0 %v808_v20 }
  0x34   : > { %752 = vmatpush3.bf16.msra.mxu0 %v808_v20 }
  0x35   : > { %753 = vmatprep.subr.bf16.mxu0 %v809_v21 }
  0x38   : > { %754 = vmatpush3.bf16.msra.mxu0 %v809_v21 }
  0x39   : > { %755 = vmatprep.subr.bf16.mxu0 %v810_v22 }
  0x3c   : > { %756 = vmatpush3.bf16.msra.mxu0 %v810_v22 }
  0x3d   : > { %757 = vmatprep.subr.bf16.mxu0 %v811_v23 }
  0x40   : > { %758 = vmatpush3.bf16.msra.mxu0 %v811_v23 }
  0x41   : > { %759 = vmatprep.subr.bf16.mxu0 %v812_v24 }
  0x44   : > { %760 = vmatpush3.bf16.msra.mxu0 %v812_v24 }
  0x47   : > { %762 = vmatmul.mubr.bf16.vlgmr.msra.gmra.mrb[0].mxu0 %v814_v25 }
 0x11a   : > { %v763_v26 = vpop.f32.mrb[0].mxu0 }
 0x11b   : > { %v468_v28 = vpop.f32.mrb[1].mxu0  ;;  %v507_v30 = vadd.f32 %v763_v26, %v711_v27 }
 0x11c   : > { %v764_v29 = vpop.f32.mrb[2].mxu0  ;;  %v505_v33 = vadd.f32 %v711_v27, %v468_v28  ;;  %535 = sbr.rel (!%p910_p6) target bundleno = 300 (0x12c), region = 85 }
 0x11d   : > { %v508_v31 = vadd.f32 %v764_v29, %v711_v27  ;;  %v471_v32 = vpop.f32.mrb[3].mxu0 }
 0x11e   : > { %v506_v34 = vadd.f32 %v711_v27, %v471_v32 }
 0x11f   : > { %v732_v35 = vpack.c.bf16 %v508_v31, %v507_v30 }
 0x120   : > { %v727_v36 = vpack.c.bf16 %v506_v34, %v505_v33 }
 0x121   : > { %734 = vst [vmem:[%s326_s23 + $0x8] sm:$0xff] %v732_v35  }
 0x122   : > { %728 = vst [vmem:[%s326_s23] sm:$0xff] %v727_v36  }
 0x128   : > { %v560_v39 = vld [vmem:[%s326_s23 + $0x8] sm:$0xf]  ;;  %v562_v40 = vld [vmem:[%s326_s23 + $0xc] sm:$0xf] }
 0x129   : > { %v556_v37 = vld [vmem:[%s326_s23] sm:$0xf]  ;;  %v558_v38 = vld [vmem:[%s326_s23 + $0x4] sm:$0xf]  ;;  %561 = vst [vmem:[%s540_s26 + $0x10] sm:$0xf] %v560_v39 }
 0x12a   : > { %557 = vst [vmem:[%s540_s26] sm:$0xf] %v556_v37  ;;  %559 = vst [vmem:[%s540_s26 + $0x8] sm:$0xf] %v558_v38 }
 0x12b   : > { %563 = vst [vmem:[%s540_s26 + $0x18] sm:$0xf] %v562_v40 }
 0x12c PF: > { %s13_s16 = sadd.s32 1, %s853_s16   ;;  %s985_s12 = smov %s841_s13 }
 0x12d   : > { %p10_p12 = scmp.ge.s32.totalorder %s13_s16, 4   ;;  %s986_s13 = smov %s915_s22 }
 0x12e   : > { %s987_s14 = smov %s849_s15  ;;  %s988_s15 = smov %s990_s17 }
 0x12f   :  { %12 = sbr.rel (!%p10_p12) target bundleno = 3 (0x3), region = 163 }

// kernel: _lambda_.34
= control target key start
LH: loop header
LB: loop body
LE: loop exit
PB: predicated region body
PF: predicated region fallthrough
CT: control target
= control target key end

     0   :  { %s1659_s0 = inlined_call_operand.vmem [shape: bf16[32,2304], index: 0, kind: input, shape index: {}]   ;;  %s1660_s1 = inlined_call_operand.vmem [shape: bf16[2304,256], index: 1, kind: input, shape index: {}]   ;;  %s1661_s2 = inlined_call_operand.vmem [shape: f32[1,256], index: 2, kind: input, shape index: {}]   ;;  %s1662_s3 = inlined_call_operand.vmem [shape: bf16[32,256], index: 3, kind: input, shape index: {}]   ;;  %s1663_s4 = inlined_call_operand.vmem [shape: bf16[32,256], index: 4, kind: output, shape index: {}]  }
   0x1   :  { %1666 = sst [smem:[#allocation9_spill]] %s1659_s0 }
   0x2   :  { %s1361_s15 = smov 0   ;;  %s1363_s16 = smov 0  }
   0x3   :  { %s1365_s17 = smov 0   ;;  %s1367_s18 = smov 0  }
   0x4   :  { %s1369_s19 = smov 0   ;;  %s1371_s20 = smov 0  }
   0x5   :  { %s1373_s21 = smov 0   ;;  %s1375_s22 = smov 0  }
   0x6   :  { %s1377_s23 = smov 0   ;;  %s1379_s24 = smov 0  }
   0x7   :  { %s1381_s25 = smov 0  }
   0x8 LB: > { %s1017_s26 = sadd.s32 4294967295, %s1333_s25   ;;  %s26_s27 = sadd.s32 1, %s1325_s23  ;;  %s1333_s25 = sphi %s1381_s25, %s14_s25   ;;  %s1329_s24 = sphi %s1379_s24, %s1685_s24   ;;  %s1325_s23 = sphi %s1377_s23, %s1684_s23   ;;  %s1321_s22 = sphi %s1375_s22, %s1683_s22   ;;  %s1317_s21 = sphi %s1373_s21, %s1682_s21   ;;  %s1313_s20 = sphi %s1371_s20, %s1681_s20   ;;  %s1309_s19 = sphi %s1369_s19, %s1680_s19   ;;  %s1305_s18 = sphi %s1367_s18, %s1679_s18   ;;  %s1301_s17 = sphi %s1365_s17, %s1678_s17   ;;  %s1297_s16 = sphi %s1363_s16, %s1677_s16   ;;  %s1293_s15 = sphi %s1361_s15, %s1676_s15  }
   0x9   : > { %p27_p0 = scmp.ge.s32.totalorder %s26_s27, 9  ;;  %s29_s28 = sadd.s32 1, %s1329_s24 }
   0xa   : > { %s42_s29 = sadd.s32 1, %s1313_s20  ;;  %p49_p1 = scmp.ne.s32.totalorder %s1313_s20, %s1309_s19 }
   0xb   : > { %s1687_s27 = smov (%p27_p0, %s26_s27), 0  ;;  %s1689_s28 = smov (!%p27_p0, %s29_s28), %s1329_s24 }
   0xc   : > { %1667 = sst [smem:[#allocation7_spill]] %s1687_s27  ;;  %s38_s30 = ssub.s32 %s1325_s23, %s1687_s27 }
   0xd   : > { %p50_p2 = scmp.eq.s32.totalorder %s1333_s25, 0  ;;  %p31_p3 = scmp.ge.s32.totalorder %s1689_s28, 2 }
   0xe   : > { %p40_p4 = scmp.eq.s32.totalorder %s38_s30, 0  ;;  %s70_s6 = sadd.s32 1, %s1305_s18 }
   0xf   : > { %p1430_p5 = por %p50_p2, %p49_p1  ;;  %s1691_s28 = smov (%p31_p3, %s1689_s28), 0 }
  0x10   : > { %1669 = sst [smem:[#allocation8_spill]] %s1691_s28  ;;  %s66_s8 = ssub.s32 %s1329_s24, %s1691_s28 }
  0x11   : > { %s1438_s7 = scalar_select %p40_p4, %s1313_s20, %s42_s29  }
  0x12   : > { %p77_p6 = scmp.ne.s32.totalorder %s1305_s18, %s1301_s17  ;;  %s67_s9 = sor.u32 %s66_s8, %s38_s30 }
  0x13   : > { %p122_p7 = scmp.eq.s32.totalorder %s66_s8, 0  ;;  %p68_p8 = scmp.eq.s32.totalorder %s67_s9, 0 }
  0x14   : > { %p1446_p9 = por %p77_p6, %p50_p2  ;;  %s124_s11 = sadd.s32 1, %s1297_s16 }
  0x15   : > { %p131_p10 = scmp.ne.s32.totalorder %s1297_s16, %s1293_s15  ;;  %p163_p12 = scmp.eq.s32.totalorder %s1017_s26, 17 }
  0x16   : > { %s1454_s12 = scalar_select %p68_p8, %s1305_s18, %s70_s6  }
  0x17   : > { %s1457_s13 = scalar_select %p122_p7, %s1297_s16, %s124_s11  }
  0x18   : > { %p1461_p11 = por %p131_p10, %p50_p2  ;;  %p1465_p13 = por %p163_p12, %p131_p10 }
  0x19   : > { %p1020_p0 = scmp.ge.s32.totalorder %s1333_s25, 18 }
  0x1b   : > { %185 = sbr.rel (%p1020_p0) target bundleno = 80 (0x50), region = 16 }
  0x22   : > { %188 = sbr.rel (!%p1430_p5) target bundleno = 46 (0x2e), region = 20  ;;  %s190_s30 = sand.u32 (%p1430_p5), 1, %s1313_s20  }
  0x23   : > { %s1066_s6 = sshll.u32 (%p1430_p5), %s1325_s23, 3  ;;  %s1021_s8 = sshll.u32 (%p1430_p5), %s190_s30, 5 }
  0x24   : > { %s1673_s0 = sld [smem:[#allocation9_spill]] (%p1430_p5)  ;;  %s192_s26 = scalar_lea.vmem (%p1430_p5), [#allocation3], %s1021_s8 }
  0x2a   : > { %s198_s28 = scalar_lea.vmem %s1673_s0, %s1066_s6 }
  0x2b   : > { %v232_v0 = vld [vmem:[%s198_s28] sm:$0xff]  ;;  %v234_v1 = vld [vmem:[%s198_s28 + $0x48] sm:$0xff]  ;;  %v236_v2 = vld [vmem:[%s198_s28 + $0x90] sm:$0xff] }
  0x2c   : > { %233 = vst [vmem:[%s192_s26] sm:$0xff] %v232_v0  ;;  %235 = vst [vmem:[%s192_s26 + $0x8] sm:$0xff] %v234_v1  ;;  %v238_v3 = vld [vmem:[%s198_s28 + $0xd8] sm:$0xff] }
  0x2d   : > { %237 = vst [vmem:[%s192_s26 + $0x10] sm:$0xff] %v236_v2  ;;  %239 = vst [vmem:[%s192_s26 + $0x18] sm:$0xff] %v238_v3 }
  0x2e PF: > { %245 = sbr.rel (!%p1446_p9) target bundleno = 73 (0x49), region = 58  ;;  %s247_s5 = sand.u32 (%p1446_p9), 1, %s1305_s18  }
  0x2f   : > { %s1067_s30 = sshll.u32 (%p1446_p9), %s1325_s23, 6  ;;  %s1024_s9 = sshll.u32 (%p1446_p9), %s247_s5, 7 }
  0x30   : > { %s252_s6 = sadd.s32 (%p1446_p9), %s1329_s24, %s1067_s30  ;;  %s1490_s28 = scalar_lea.vmem (%p1446_p9), [#allocation4], %s1024_s9 }
  0x31   : > { %s1027_s11 = sshll.u32 (%p1446_p9), %s252_s6, 2 }
  0x32   : > { %s1485_s8 = scalar_lea.vmem (%p1446_p9), %s1660_s1, %s1027_s11 }
  0x33   : > { %v270_v4 = vld [vmem:[%s1485_s8] sm:$0xf] (%p1446_p9)  ;;  %v272_v5 = vld [vmem:[%s1485_s8 + $0x8] sm:$0xf] (%p1446_p9)  ;;  %v274_v6 = vld [vmem:[%s1485_s8 + $0x10] sm:$0xf] (%p1446_p9) }
  0x34   : > { %271 = vst [vmem:[%s1490_s28] sm:$0xf] (%p1446_p9), %v270_v4  ;;  %273 = vst [vmem:[%s1490_s28 + $0x4] sm:$0xf] (%p1446_p9), %v272_v5  ;;  %v276_v7 = vld [vmem:[%s1485_s8 + $0x18] sm:$0xf] (%p1446_p9) }
  0x35   : > { %275 = vst [vmem:[%s1490_s28 + $0x8] sm:$0xf] %v274_v6  ;;  %v278_v8 = vld [vmem:[%s1485_s8 + $0x20] sm:$0xf]  ;;  %v280_v9 = vld [vmem:[%s1485_s8 + $0x28] sm:$0xf] }
  0x36   : > { %277 = vst [vmem:[%s1490_s28 + $0xc] sm:$0xf] %v276_v7  ;;  %279 = vst [vmem:[%s1490_s28 + $0x10] sm:$0xf] %v278_v8  ;;  %v282_v10 = vld [vmem:[%s1485_s8 + $0x30] sm:$0xf] }
  0x37   : > { %281 = vst [vmem:[%s1490_s28 + $0x14] sm:$0xf] %v280_v9  ;;  %v284_v11 = vld [vmem:[%s1485_s8 + $0x38] sm:$0xf]  ;;  %v286_v12 = vld [vmem:[%s1485_s8 + $0x40] sm:$0xf] }
  0x38   : > { %283 = vst [vmem:[%s1490_s28 + $0x18] sm:$0xf] %v282_v10  ;;  %285 = vst [vmem:[%s1490_s28 + $0x1c] sm:$0xf] %v284_v11  ;;  %v288_v13 = vld [vmem:[%s1485_s8 + $0x48] sm:$0xf] }
  0x39   : > { %287 = vst [vmem:[%s1490_s28 + $0x20] sm:$0xf] %v286_v12  ;;  %v290_v14 = vld [vmem:[%s1485_s8 + $0x50] sm:$0xf]  ;;  %v292_v15 = vld [vmem:[%s1485_s8 + $0x58] sm:$0xf] }
  0x3a   : > { %289 = vst [vmem:[%s1490_s28 + $0x24] sm:$0xf] %v288_v13  ;;  %291 = vst [vmem:[%s1490_s28 + $0x28] sm:$0xf] %v290_v14  ;;  %v294_v16 = vld [vmem:[%s1485_s8 + $0x60] sm:$0xf] }
  0x3b   : > { %293 = vst [vmem:[%s1490_s28 + $0x2c] sm:$0xf] %v292_v15  ;;  %v296_v17 = vld [vmem:[%s1485_s8 + $0x68] sm:$0xf]  ;;  %v298_v18 = vld [vmem:[%s1485_s8 + $0x70] sm:$0xf] }
  0x3c   : > { %295 = vst [vmem:[%s1490_s28 + $0x30] sm:$0xf] %v294_v16  ;;  %297 = vst [vmem:[%s1490_s28 + $0x34] sm:$0xf] %v296_v17  ;;  %v300_v19 = vld [vmem:[%s1485_s8 + $0x78] sm:$0xf] }
  0x3d   : > { %299 = vst [vmem:[%s1490_s28 + $0x38] sm:$0xf] %v298_v18  ;;  %v302_v20 = vld [vmem:[%s1485_s8 + $0x80] sm:$0xf]  ;;  %v304_v21 = vld [vmem:[%s1485_s8 + $0x88] sm:$0xf] }
  0x3e   : > { %301 = vst [vmem:[%s1490_s28 + $0x3c] sm:$0xf] %v300_v19  ;;  %303 = vst [vmem:[%s1490_s28 + $0x40] sm:$0xf] %v302_v20  ;;  %v306_v22 = vld [vmem:[%s1485_s8 + $0x90] sm:$0xf] }
  0x3f   : > { %305 = vst [vmem:[%s1490_s28 + $0x44] sm:$0xf] %v304_v21  ;;  %v308_v23 = vld [vmem:[%s1485_s8 + $0x98] sm:$0xf]  ;;  %v310_v24 = vld [vmem:[%s1485_s8 + $0xa0] sm:$0xf] }
  0x40   : > { %307 = vst [vmem:[%s1490_s28 + $0x48] sm:$0xf] %v306_v22  ;;  %309 = vst [vmem:[%s1490_s28 + $0x4c] sm:$0xf] %v308_v23  ;;  %v312_v25 = vld [vmem:[%s1485_s8 + $0xa8] sm:$0xf] }
  0x41   : > { %311 = vst [vmem:[%s1490_s28 + $0x50] sm:$0xf] %v310_v24  ;;  %v314_v26 = vld [vmem:[%s1485_s8 + $0xb0] sm:$0xf]  ;;  %v316_v27 = vld [vmem:[%s1485_s8 + $0xb8] sm:$0xf] }
  0x42   : > { %313 = vst [vmem:[%s1490_s28 + $0x54] sm:$0xf] %v312_v25  ;;  %315 = vst [vmem:[%s1490_s28 + $0x58] sm:$0xf] %v314_v26  ;;  %v318_v28 = vld [vmem:[%s1485_s8 + $0xc0] sm:$0xf] }
  0x43   : > { %317 = vst [vmem:[%s1490_s28 + $0x5c] sm:$0xf] %v316_v27  ;;  %v320_v29 = vld [vmem:[%s1485_s8 + $0xc8] sm:$0xf]  ;;  %v322_v30 = vld [vmem:[%s1485_s8 + $0xd0] sm:$0xf] }
  0x44   : > { %319 = vst [vmem:[%s1490_s28 + $0x60] sm:$0xf] %v318_v28  ;;  %321 = vst [vmem:[%s1490_s28 + $0x64] sm:$0xf] %v320_v29  ;;  %v324_v31 = vld [vmem:[%s1485_s8 + $0xd8] sm:$0xf] }
  0x45   : > { %323 = vst [vmem:[%s1490_s28 + $0x68] sm:$0xf] %v322_v30  ;;  %v326_v32 = vld [vmem:[%s1485_s8 + $0xe0] sm:$0xf]  ;;  %v328_v33 = vld [vmem:[%s1485_s8 + $0xe8] sm:$0xf] }
  0x46   : > { %325 = vst [vmem:[%s1490_s28 + $0x6c] sm:$0xf] %v324_v31  ;;  %327 = vst [vmem:[%s1490_s28 + $0x70] sm:$0xf] %v326_v32  ;;  %v330_v34 = vld [vmem:[%s1485_s8 + $0xf0] sm:$0xf] }
  0x47   : > { %329 = vst [vmem:[%s1490_s28 + $0x74] sm:$0xf] %v328_v33  ;;  %v332_v35 = vld [vmem:[%s1485_s8 + $0xf8] sm:$0xf]  ;;  %331 = vst [vmem:[%s1490_s28 + $0x78] sm:$0xf] %v330_v34 }
  0x48   : > { %333 = vst [vmem:[%s1490_s28 + $0x7c] sm:$0xf] %v332_v35 }
  0x49 PF: > { %426 = sbr.rel (!%p1461_p11) target bundleno = 80 (0x50), region = 103  ;;  %s428_s0 = sand.u32 (%p1461_p11), 1, %s1297_s16  }
  0x4a   : > { %s1029_s27 = sshll.u32 (%p1461_p11), %s1329_s24, 2  ;;  %s1028_s10 = sshll.u32 (%p1461_p11), %s428_s0, 4 }
  0x4b   : > { %s435_s30 = scalar_lea.vmem (%p1461_p11), %s1662_s3, %s1029_s27  ;;  %s430_s9 = scalar_lea.vmem (%p1461_p11), [#allocation5], %s1028_s10 }
  0x4c   : > { %v451_v36 = vld [vmem:[%s435_s30] sm:$0xf] (%p1461_p11)  ;;  %v453_v37 = vld [vmem:[%s435_s30 + $0x8] sm:$0xf] (%p1461_p11)  ;;  %v455_v38 = vld [vmem:[%s435_s30 + $0x10] sm:$0xf] (%p1461_p11) }
  0x4d   : > { %452 = vst [vmem:[%s430_s9] sm:$0xf] (%p1461_p11), %v451_v36  ;;  %454 = vst [vmem:[%s430_s9 + $0x4] sm:$0xf] (%p1461_p11), %v453_v37  ;;  %v457_v39 = vld [vmem:[%s435_s30 + $0x18] sm:$0xf] (%p1461_p11) }
  0x4e   : > { %456 = vst [vmem:[%s430_s9 + $0x8] sm:$0xf] (%p1461_p11), %v455_v38  ;;  %458 = vst [vmem:[%s430_s9 + $0xc] sm:$0xf] (%p1461_p11), %v457_v39 }
  0x50 PF: > { %p1030_p1 = scmp.ge.s32.totalorder %s1333_s25, 1  ;;  %p488_p2 = scmp.lt.s32.totalorder %s1333_s25, 19 }
  0x52   : > { %p489_p3 = pnand %p1030_p1, %p488_p2 }
  0x53   : > { %s495_s14 = sand.u32 (!%p489_p3), 1, %s1309_s19   ;;  %s502_s6 = sand.u32 (!%p489_p3), 1, %s1301_s17  }
  0x54   : > { %492 = sbr.rel (%p489_p3) target bundleno = 377 (0x179), region = 144  ;;  %s1031_s11 = sshll.u32 (!%p489_p3), %s495_s14, 5 }
  0x55   : > { %s1032_s8 = sshll.u32 (!%p489_p3), %s502_s6, 7  ;;  %s509_s28 = sand.u32 (!%p489_p3), 1, %s1293_s15  }
  0x56   : > { %p547_p4 = scmp.lt.s32.totalorder (!%p489_p3), %s1321_s22, 1  ;;  %s1566_s0 = sshll.u32 (!%p489_p3), %s509_s28, 4 }
  0x57   : > { %s1575_s30 = scalar_lea.vmem (!%p489_p3), [#allocation3], %s1031_s11  ;;  %s1577_s9 = scalar_lea.vmem (!%p489_p3), [#allocation4], %s1032_s8 }
  0x58   : > { %s511_s17 = scalar_lea.vmem (!%p489_p3), [#allocation5], %s1566_s0  ;;  %s1581_s19 = scalar_lea.vmem (!%p489_p3), [#allocation6], %s1566_s0 }
  0x59   : > { %p1035_p5 = scmp.ne.s32.totalorder (!%p489_p3), %s1317_s21, 0 }
  0x5b   : > { %s1569_s27 = scalar_select %p547_p4, %s1321_s22, 1 }
  0x5c   : > { %556 = sbr.rel (%p1035_p5) target bundleno = 99 (0x63), region = 160  ;;  %v1335_v40 = vmov (!%p1035_p5), 0.0  }
  0x5d   : > { %s549_s5 = scalar_lea.vmem %s1661_s2, %s1569_s27  ;;  %557 = vst [vmem:[#allocation2] sm:$0xff] (!%p1035_p5), %v1335_v40  ;;  %558 = vst [vmem:[#allocation2 + $0x8] sm:$0xff] (!%p1035_p5), %v1335_v40 }
  0x5e   : > { %559 = vst [vmem:[#allocation2 + $0x10] sm:$0xff] (!%p1035_p5), %v1335_v40  ;;  %560 = vst [vmem:[#allocation2 + $0x18] sm:$0xff] (!%p1035_p5), %v1335_v40 }
  0x63 PF: > { %v1225_v41 = vld [vmem:[%s1577_s9 + $0x40] sm:$0xff]   ;;  %v1227_v43 = vld [vmem:[%s1577_s9 + $0x48] sm:$0xff]   ;;  %v1229_v45 = vld [vmem:[%s1577_s9 + $0x50] sm:$0xff]   ;;  %p1056_p6 = scmp.ne.s32.totalorder %s1317_s21, 8 }
  0x64   : > { %v1226_v42 = vld [vmem:[%s1577_s9] sm:$0xff]   ;;  %1092 = vmatprep.subr.bf16.mxu0 %v1225_v41  ;;  %1120 = vmatprep.subr.bf16.mxu1 %v1225_v41  ;;  %v1228_v44 = vld [vmem:[%s1577_s9 + $0x8] sm:$0xff]   ;;  %v1230_v46 = vld [vmem:[%s1577_s9 + $0x10] sm:$0xff]  }
  0x65   : > { %1093 = vmatpush3.bf16.msra.mxu0 %v1226_v42  ;;  %1128 = vmatpush3.bf16.msra.mxu1 %v1226_v42  ;;  %v1231_v47 = vld [vmem:[%s1577_s9 + $0x58] sm:$0xff]   ;;  %v1233_v49 = vld [vmem:[%s1577_s9 + $0x60] sm:$0xff]   ;;  %v1235_v51 = vld [vmem:[%s1577_s9 + $0x68] sm:$0xff]  }
  0x66   : > { %1094 = vmatprep.subr.bf16.mxu0 %v1227_v43  ;;  %1121 = vmatprep.subr.bf16.mxu1 %v1227_v43  ;;  %v1232_v48 = vld [vmem:[%s1577_s9 + $0x18] sm:$0xff]   ;;  %v1234_v50 = vld [vmem:[%s1577_s9 + $0x20] sm:$0xff]   ;;  %v1236_v54 = vld [vmem:[%s1577_s9 + $0x28] sm:$0xff]  }
  0x67   : > { %v1243_v52 = vld [vmem:[%s1575_s30 + $0x4] ss:$8 sps:$4 sm:$0xff]   ;;  %v1246_v53 = vld [vmem:[%s1575_s30 + $0x14] ss:$8 sps:$4 sm:$0xff]   ;;  %v1241_v59 = vld [vmem:[%s1575_s30] ss:$8 sps:$4 sm:$0xff]  }
  0x68   : > { %v1237_v55 = vld [vmem:[%s1577_s9 + $0x70] sm:$0xff]   ;;  %749 = vmatprep.mubr.bf16.mxu0 %v1243_v52  ;;  %757 = vmatprep.mubr.bf16.mxu1 %v1246_v53  ;;  %v1239_v57 = vld [vmem:[%s1577_s9 + $0x78] sm:$0xff]   ;;  %v561_v63 = vld [vmem:[#allocation2] sm:$0xff] }
  0x69   : > { %1095 = vmatpush3.bf16.msra.mxu0 %v1228_v44  ;;  %1129 = vmatpush3.bf16.msra.mxu1 %v1228_v44  ;;  %v1238_v56 = vld [vmem:[%s1577_s9 + $0x30] sm:$0xff]   ;;  %v1240_v58 = vld [vmem:[%s1577_s9 + $0x38] sm:$0xff]   ;;  %v562_v7 = vld [vmem:[#allocation2 + $0x8] sm:$0xff] }
  0x6a   : > { %1096 = vmatprep.subr.bf16.mxu0 %v1229_v45  ;;  %1122 = vmatprep.subr.bf16.mxu1 %v1229_v45  ;;  %v1244_v60 = vld [vmem:[%s1575_s30 + $0x10] ss:$8 sps:$4 sm:$0xff]   ;;  %v1057_v19 = vld [vmem:[%s549_s5] ss:$0 sm:$0xff] (!%p1056_p6) }
  0x6b   : > { %v563_v1 = vld [vmem:[#allocation2 + $0x10] sm:$0xff]  ;;  %v564_v9 = vld [vmem:[#allocation2 + $0x18] sm:$0xff] }
  0x6c   : > { %v1073_v22 = vld [vmem:[%s511_s17] sm:$0xff] (!%p1056_p6)   ;;  %v1090_v29 = vld [vmem:[%s511_s17 + $0x8] sm:$0xff] (!%p1056_p6)  }
  0x6d   : > { %1097 = vmatpush3.bf16.msra.mxu0 %v1230_v46  ;;  %1130 = vmatpush3.bf16.msra.mxu1 %v1230_v46  ;;  %v1074_v25 = vunpack.c.l.bf16 (!%p1056_p6), %v1073_v22  ;;  %v1075_v26 = vunpack.c.h.bf16 (!%p1056_p6), %v1073_v22  ;;  %v1078_v30 = vunpack.c.l.bf16 (!%p1056_p6), %v1090_v29  ;;  %v1079_v31 = vunpack.c.h.bf16 (!%p1056_p6), %v1090_v29 }
  0x6e   : > { %1098 = vmatprep.subr.bf16.mxu0 %v1231_v47  ;;  %1123 = vmatprep.subr.bf16.mxu1 %v1231_v47 }
  0x71   : > { %1099 = vmatpush3.bf16.msra.mxu0 %v1232_v48  ;;  %1131 = vmatpush3.bf16.msra.mxu1 %v1232_v48 }
  0x72   : > { %1100 = vmatprep.subr.bf16.mxu0 %v1233_v49  ;;  %1124 = vmatprep.subr.bf16.mxu1 %v1233_v49 }
  0x75   : > { %1101 = vmatpush3.bf16.msra.mxu0 %v1234_v50  ;;  %1132 = vmatpush3.bf16.msra.mxu1 %v1234_v50 }
  0x76   : > { %1102 = vmatprep.subr.bf16.mxu0 %v1235_v51  ;;  %1125 = vmatprep.subr.bf16.mxu1 %v1235_v51 }
  0x79   : > { %1103 = vmatpush3.bf16.msra.mxu0 %v1236_v54  ;;  %1133 = vmatpush3.bf16.msra.mxu1 %v1236_v54 }
  0x7a   : > { %1104 = vmatprep.subr.bf16.mxu0 %v1237_v55  ;;  %1126 = vmatprep.subr.bf16.mxu1 %v1237_v55 }
  0x7d   : > { %1105 = vmatpush3.bf16.msra.mxu0 %v1238_v56  ;;  %1134 = vmatpush3.bf16.msra.mxu1 %v1238_v56 }
  0x7e   : > { %1106 = vmatprep.subr.bf16.mxu0 %v1239_v57  ;;  %1127 = vmatprep.subr.bf16.mxu1 %v1239_v57 }
  0x81   : > { %1107 = vmatpush3.bf16.msra.mxu0 %v1240_v58  ;;  %1135 = vmatpush3.bf16.msra.mxu1 %v1240_v58 }
  0x84   : > { %750 = vmatmul.mubr.bf16.vlgmr.msra.gmra.mrb[0].mxu0 %v1241_v59  ;;  %758 = vmatmul.mubr.bf16.vlgmr.msra.gmra.mrb[0].mxu1 %v1244_v60 }
 0x157   : > { %v1108_v61 = vpop.f32.mrb[0].mxu0  ;;  %v1114_v62 = vpop.f32.mrb[0].mxu1 }
 0x158   : > { %v1109_v0 = vpop.f32.mrb[1].mxu0  ;;  %v1115_v2 = vpop.f32.mrb[1].mxu1 }
 0x159   : > { %v1110_v3 = vadd.f32 %v1109_v0, %v1108_v61  ;;  %v1116_v4 = vadd.f32 %v1115_v2, %v1114_v62  ;;  %v1111_v5 = vpop.f32.mrb[2].mxu0  ;;  %v1117_v6 = vpop.f32.mrb[2].mxu1  ;;  %777 = sbr.rel (%p1056_p6) target bundleno = 368 (0x170), region = 164 }
 0x15a   : > { %v1112_v8 = vpop.f32.mrb[3].mxu0  ;;  %v1118_v10 = vpop.f32.mrb[3].mxu1 }
 0x15b   : > { %v766_v11 = vadd.f32 %v1110_v3, %v561_v63  ;;  %v768_v12 = vadd.f32 %v1116_v4, %v563_v1  ;;  %v1113_v13 = vadd.f32 %v1112_v8, %v1111_v5  ;;  %v1119_v14 = vadd.f32 %v1118_v10, %v1117_v6 }
 0x15d   : > { %770 = vst [vmem:[#allocation2] sm:$0xff] %v766_v11  ;;  %772 = vst [vmem:[#allocation2 + $0x10] sm:$0xff] %v768_v12  ;;  %v767_v15 = vadd.f32 %v1113_v13, %v562_v7  ;;  %v769_v16 = vadd.f32 %v1119_v14, %v564_v9 }
 0x15f   : > { %771 = vst [vmem:[#allocation2 + $0x8] sm:$0xff] %v767_v15  ;;  %773 = vst [vmem:[#allocation2 + $0x18] sm:$0xff] %v769_v16 }
 0x164   : > { %v778_v17 = vld [vmem:[#allocation2] sm:$0xff]  ;;  %v780_v23 = vld [vmem:[#allocation2 + $0x10] sm:$0xff] }
 0x165   : > { %v789_v20 = vadd.f32 %v1057_v19, %v778_v17  ;;  %v791_v27 = vadd.f32 %v1057_v19, %v780_v23 }
 0x166   : > { %v779_v18 = vld [vmem:[#allocation2 + $0x8] sm:$0xff]  ;;  %v781_v24 = vld [vmem:[#allocation2 + $0x18] sm:$0xff] }
 0x167   : > { %v790_v21 = vadd.f32 %v1057_v19, %v779_v18  ;;  %v792_v28 = vadd.f32 %v1057_v19, %v781_v24  ;;  %v801_v32 = vadd.f32 %v1074_v25, %v789_v20  ;;  %v803_v34 = vadd.f32 %v1078_v30, %v791_v27 }
 0x169   : > { %v802_v33 = vadd.f32 %v1075_v26, %v790_v21  ;;  %v804_v35 = vadd.f32 %v1079_v31, %v792_v28  ;;  %v805_v36 = vmax.f32 %v801_v32, 0.0  ;;  %v807_v38 = vmax.f32 %v803_v34, 0.0 }
 0x16b   : > { %v806_v37 = vmax.f32 %v802_v33, 0.0  ;;  %v808_v39 = vmax.f32 %v804_v35, 0.0 }
 0x16d   : > { %v1083_v40 = vpack.c.bf16 %v806_v37, %v805_v36  ;;  %v1088_v41 = vpack.c.bf16 %v808_v39, %v807_v38 }
 0x16f   : > { %1084 = vst [vmem:[%s1581_s19] sm:$0xff] %v1083_v40   ;;  %1091 = vst [vmem:[%s1581_s19 + $0x8] sm:$0xff] %v1088_v41  }
 0x170 PF: > { %835 = sbr.rel (!%p1465_p13) target bundleno = 377 (0x179), region = 168  ;;  %s1063_s21 = sshll.u32 (%p1465_p13), %s1321_s22, 2 }
 0x171   : > { %s840_s8 = scalar_lea.vmem (%p1465_p13), %s1663_s4, %s1063_s21 }
 0x176   : > { %v856_v42 = vld [vmem:[%s1581_s19] sm:$0xf] (%p1465_p13)  ;;  %v858_v43 = vld [vmem:[%s1581_s19 + $0x4] sm:$0xf] (%p1465_p13)  ;;  %v860_v44 = vld [vmem:[%s1581_s19 + $0x8] sm:$0xf] (%p1465_p13) }
 0x177   : > { %v862_v45 = vld [vmem:[%s1581_s19 + $0xc] sm:$0xf]  ;;  %857 = vst [vmem:[%s840_s8] sm:$0xf] %v856_v42  ;;  %859 = vst [vmem:[%s840_s8 + $0x8] sm:$0xf] %v858_v43 }
 0x178   : > { %861 = vst [vmem:[%s840_s8 + $0x10] sm:$0xf] %v860_v44  ;;  %863 = vst [vmem:[%s840_s8 + $0x18] sm:$0xf] %v862_v45 }
 0x179 PF: > { %s14_s25 = sadd.s32 1, %s1333_s25   ;;  %s1674_s29 = sld [smem:[#allocation7_spill]] }
 0x17a   : > { %p11_p7 = scmp.ge.s32.totalorder %s14_s25, 20   ;;  %s1675_s28 = sld [smem:[#allocation8_spill]] }
 0x17b   : > { %s1676_s15 = smov %s1297_s16  ;;  %s1677_s16 = smov %s1457_s13 }
 0x17c   : > { %s1678_s17 = smov %s1305_s18  ;;  %s1679_s18 = smov %s1454_s12 }
 0x17d   : > { %s1680_s19 = smov %s1313_s20  ;;  %s1681_s20 = smov %s1438_s7 }
 0x17e   : > { %s1682_s21 = smov %s1325_s23  ;;  %s1683_s22 = smov %s1329_s24 }
 0x17f   : > { %s1684_s23 = smov %s1674_s29  ;;  %13 = sbr.rel (!%p11_p7) target bundleno = 8 (0x8), region = 259 }
 0x180   : > { %s1685_s24 = smov %s1675_s28 }

// kernel: _lambda_.35
= control target key start
LH: loop header
LB: loop body
LE: loop exit
PB: predicated region body
PF: predicated region fallthrough
CT: control target
= control target key end

     0   :  { %s1479_s0 = inlined_call_operand.vmem [shape: bf16[32,2304], index: 0, kind: input, shape index: {}]   ;;  %s1480_s1 = inlined_call_operand.vmem [shape: bf16[2304,256], index: 1, kind: input, shape index: {}]   ;;  %s1481_s2 = inlined_call_operand.vmem [shape: f32[1,256], index: 2, kind: input, shape index: {}]   ;;  %s1482_s3 = inlined_call_operand.vmem [shape: bf16[32,256], index: 3, kind: output, shape index: {}]  }
   0x1   :  { %1484 = sst [smem:[#allocation7_spill]] %s1479_s0 }
   0x2   :  { %1485 = sst [smem:[#allocation8_spill]] %s1480_s1 }
   0x3   :  { %s1206_s12 = smov 0   ;;  %s1208_s13 = smov 0  }
   0x4   :  { %s1210_s14 = smov 0   ;;  %s1212_s15 = smov 0  }
   0x5   :  { %s1214_s16 = smov 0   ;;  %s1216_s17 = smov 0  }
   0x6   :  { %s1218_s18 = smov 0   ;;  %s1220_s19 = smov 0  }
   0x7   :  { %s1222_s20 = smov 0   ;;  %s1224_s21 = smov 0  }
   0x8   :  { %s1226_s22 = smov 0  }
   0x9 LB: > { %s879_s23 = sadd.s32 4294967295, %s1183_s22   ;;  %s25_s24 = sadd.s32 1, %s1175_s20  ;;  %s1183_s22 = sphi %s1226_s22, %s13_s22   ;;  %s1179_s21 = sphi %s1224_s21, %s1502_s21   ;;  %s1175_s20 = sphi %s1222_s20, %s1501_s20   ;;  %s1171_s19 = sphi %s1220_s19, %s1500_s19   ;;  %s1167_s18 = sphi %s1218_s18, %s1499_s18   ;;  %s1163_s17 = sphi %s1216_s17, %s1498_s17   ;;  %s1159_s16 = sphi %s1214_s16, %s1497_s16   ;;  %s1155_s15 = sphi %s1212_s15, %s1496_s15   ;;  %s1151_s14 = sphi %s1210_s14, %s1495_s14   ;;  %s1147_s13 = sphi %s1208_s13, %s1494_s13   ;;  %s1143_s12 = sphi %s1206_s12, %s1493_s12  }
   0xa   : > { %p26_p0 = scmp.ge.s32.totalorder %s25_s24, 9  ;;  %s28_s25 = sadd.s32 1, %s1179_s21 }
   0xb   : > { %s41_s26 = sadd.s32 1, %s1163_s17  ;;  %p48_p1 = scmp.ne.s32.totalorder %s1163_s17, %s1159_s16 }
   0xc   : > { %s1504_s24 = smov (%p26_p0, %s25_s24), 0  ;;  %s1506_s25 = smov (!%p26_p0, %s28_s25), %s1179_s21 }
   0xd   : > { %s37_s27 = ssub.s32 %s1175_s20, %s1504_s24  ;;  %p49_p2 = scmp.eq.s32.totalorder %s1183_s22, 0 }
   0xe   : > { %p30_p3 = scmp.ge.s32.totalorder %s1506_s25, 2  ;;  %p39_p4 = scmp.eq.s32.totalorder %s37_s27, 0 }
   0xf   : > { %p1273_p5 = por %p49_p2, %p48_p1  ;;  %s69_s29 = sadd.s32 1, %s1155_s15 }
  0x10   : > { %s1508_s25 = smov (%p30_p3, %s1506_s25), 0  ;;  %p76_p6 = scmp.ne.s32.totalorder %s1155_s15, %s1151_s14 }
  0x11   : > { %1487 = sst [smem:[#allocation6_spill]] %s1508_s25  ;;  %s65_s4 = ssub.s32 %s1179_s21, %s1508_s25 }
  0x12   : > { %s1281_s30 = scalar_select %p39_p4, %s1163_s17, %s41_s26  }
  0x13   : > { %s66_s5 = sor.u32 %s65_s4, %s37_s27  ;;  %p121_p7 = scmp.eq.s32.totalorder %s65_s4, 0 }
  0x14   : > { %p67_p8 = scmp.eq.s32.totalorder %s66_s5, 0  ;;  %p1287_p9 = por %p76_p6, %p49_p2 }
  0x15   : > { %s123_s7 = sadd.s32 1, %s1147_s13  ;;  %p133_p10 = scmp.ne.s32.totalorder %s1147_s13, %s1143_s12 }
  0x16   : > { %s1295_s8 = scalar_select %p67_p8, %s1155_s15, %s69_s29  }
  0x17   : > { %s1298_s9 = scalar_select %p121_p7, %s1147_s13, %s123_s7  }
  0x18   : > { %p134_p11 = scmp.eq.s32.totalorder %s879_s23, 17  ;;  %p882_p13 = scmp.ge.s32.totalorder %s1183_s22, 18 }
  0x1a   : > { %p1300_p12 = por %p134_p11, %p133_p10  ;;  %156 = sbr.rel (%p882_p13) target bundleno = 76 (0x4c), region = 16 }
  0x21   : > { %159 = sbr.rel (!%p1273_p5) target bundleno = 45 (0x2d), region = 20  ;;  %s161_s11 = sand.u32 (%p1273_p5), 1, %s1163_s17  }
  0x22   : > { %s925_s26 = sshll.u32 (%p1273_p5), %s1175_s20, 3  ;;  %s883_s27 = sshll.u32 (%p1273_p5), %s161_s11, 5 }
  0x23   : > { %s1490_s0 = sld [smem:[#allocation7_spill]] (%p1273_p5)  ;;  %s163_s23 = scalar_lea.vmem (%p1273_p5), [#allocation3], %s883_s27 }
  0x29   : > { %s169_s5 = scalar_lea.vmem %s1490_s0, %s925_s26 }
  0x2a   : > { %v203_v0 = vld [vmem:[%s169_s5] sm:$0xff]  ;;  %v205_v1 = vld [vmem:[%s169_s5 + $0x48] sm:$0xff]  ;;  %v207_v2 = vld [vmem:[%s169_s5 + $0x90] sm:$0xff] }
  0x2b   : > { %204 = vst [vmem:[%s163_s23] sm:$0xff] %v203_v0  ;;  %206 = vst [vmem:[%s163_s23 + $0x8] sm:$0xff] %v205_v1  ;;  %v209_v3 = vld [vmem:[%s169_s5 + $0xd8] sm:$0xff] }
  0x2c   : > { %208 = vst [vmem:[%s163_s23 + $0x10] sm:$0xff] %v207_v2  ;;  %210 = vst [vmem:[%s163_s23 + $0x18] sm:$0xff] %v209_v3 }
  0x2d PF: > { %216 = sbr.rel (!%p1287_p9) target bundleno = 76 (0x4c), region = 58  ;;  %s218_s28 = sand.u32 (%p1287_p9), 1, %s1155_s15  }
  0x2e   : > { %s926_s7 = sshll.u32 (%p1287_p9), %s1175_s20, 6  ;;  %s886_s11 = sshll.u32 (%p1287_p9), %s218_s28, 7 }
  0x2f   : > { %s223_s26 = sadd.s32 (%p1287_p9), %s1179_s21, %s926_s7  ;;  %s1491_s1 = sld [smem:[#allocation8_spill]] (%p1287_p9) }
  0x30   : > { %s889_s29 = sshll.u32 (%p1287_p9), %s223_s26, 2  ;;  %s1325_s6 = scalar_lea.vmem (%p1287_p9), [#allocation4], %s886_s11 }
  0x35   : > { %s1320_s27 = scalar_lea.vmem %s1491_s1, %s889_s29 }
  0x36   : > { %v241_v4 = vld [vmem:[%s1320_s27] sm:$0xf]  ;;  %v243_v5 = vld [vmem:[%s1320_s27 + $0x8] sm:$0xf]  ;;  %v245_v6 = vld [vmem:[%s1320_s27 + $0x10] sm:$0xf] }
  0x37   : > { %242 = vst [vmem:[%s1325_s6] sm:$0xf] %v241_v4  ;;  %244 = vst [vmem:[%s1325_s6 + $0x4] sm:$0xf] %v243_v5  ;;  %v247_v7 = vld [vmem:[%s1320_s27 + $0x18] sm:$0xf] }
  0x38   : > { %246 = vst [vmem:[%s1325_s6 + $0x8] sm:$0xf] %v245_v6  ;;  %v249_v8 = vld [vmem:[%s1320_s27 + $0x20] sm:$0xf]  ;;  %v251_v9 = vld [vmem:[%s1320_s27 + $0x28] sm:$0xf] }
  0x39   : > { %248 = vst [vmem:[%s1325_s6 + $0xc] sm:$0xf] %v247_v7  ;;  %250 = vst [vmem:[%s1325_s6 + $0x10] sm:$0xf] %v249_v8  ;;  %v253_v10 = vld [vmem:[%s1320_s27 + $0x30] sm:$0xf] }
  0x3a   : > { %252 = vst [vmem:[%s1325_s6 + $0x14] sm:$0xf] %v251_v9  ;;  %v255_v11 = vld [vmem:[%s1320_s27 + $0x38] sm:$0xf]  ;;  %v257_v12 = vld [vmem:[%s1320_s27 + $0x40] sm:$0xf] }
  0x3b   : > { %254 = vst [vmem:[%s1325_s6 + $0x18] sm:$0xf] %v253_v10  ;;  %256 = vst [vmem:[%s1325_s6 + $0x1c] sm:$0xf] %v255_v11  ;;  %v259_v13 = vld [vmem:[%s1320_s27 + $0x48] sm:$0xf] }
  0x3c   : > { %258 = vst [vmem:[%s1325_s6 + $0x20] sm:$0xf] %v257_v12  ;;  %v261_v14 = vld [vmem:[%s1320_s27 + $0x50] sm:$0xf]  ;;  %v263_v15 = vld [vmem:[%s1320_s27 + $0x58] sm:$0xf] }
  0x3d   : > { %260 = vst [vmem:[%s1325_s6 + $0x24] sm:$0xf] %v259_v13  ;;  %262 = vst [vmem:[%s1325_s6 + $0x28] sm:$0xf] %v261_v14  ;;  %v265_v16 = vld [vmem:[%s1320_s27 + $0x60] sm:$0xf] }
  0x3e   : > { %264 = vst [vmem:[%s1325_s6 + $0x2c] sm:$0xf] %v263_v15  ;;  %v267_v17 = vld [vmem:[%s1320_s27 + $0x68] sm:$0xf]  ;;  %v269_v18 = vld [vmem:[%s1320_s27 + $0x70] sm:$0xf] }
  0x3f   : > { %266 = vst [vmem:[%s1325_s6 + $0x30] sm:$0xf] %v265_v16  ;;  %268 = vst [vmem:[%s1325_s6 + $0x34] sm:$0xf] %v267_v17  ;;  %v271_v19 = vld [vmem:[%s1320_s27 + $0x78] sm:$0xf] }
  0x40   : > { %270 = vst [vmem:[%s1325_s6 + $0x38] sm:$0xf] %v269_v18  ;;  %v273_v20 = vld [vmem:[%s1320_s27 + $0x80] sm:$0xf]  ;;  %v275_v21 = vld [vmem:[%s1320_s27 + $0x88] sm:$0xf] }
  0x41   : > { %272 = vst [vmem:[%s1325_s6 + $0x3c] sm:$0xf] %v271_v19  ;;  %274 = vst [vmem:[%s1325_s6 + $0x40] sm:$0xf] %v273_v20  ;;  %v277_v22 = vld [vmem:[%s1320_s27 + $0x90] sm:$0xf] }
  0x42   : > { %276 = vst [vmem:[%s1325_s6 + $0x44] sm:$0xf] %v275_v21  ;;  %v279_v23 = vld [vmem:[%s1320_s27 + $0x98] sm:$0xf]  ;;  %v281_v24 = vld [vmem:[%s1320_s27 + $0xa0] sm:$0xf] }
  0x43   : > { %278 = vst [vmem:[%s1325_s6 + $0x48] sm:$0xf] %v277_v22  ;;  %280 = vst [vmem:[%s1325_s6 + $0x4c] sm:$0xf] %v279_v23  ;;  %v283_v25 = vld [vmem:[%s1320_s27 + $0xa8] sm:$0xf] }
  0x44   : > { %282 = vst [vmem:[%s1325_s6 + $0x50] sm:$0xf] %v281_v24  ;;  %v285_v26 = vld [vmem:[%s1320_s27 + $0xb0] sm:$0xf]  ;;  %v287_v27 = vld [vmem:[%s1320_s27 + $0xb8] sm:$0xf] }
  0x45   : > { %284 = vst [vmem:[%s1325_s6 + $0x54] sm:$0xf] %v283_v25  ;;  %286 = vst [vmem:[%s1325_s6 + $0x58] sm:$0xf] %v285_v26  ;;  %v289_v28 = vld [vmem:[%s1320_s27 + $0xc0] sm:$0xf] }
  0x46   : > { %288 = vst [vmem:[%s1325_s6 + $0x5c] sm:$0xf] %v287_v27  ;;  %v291_v29 = vld [vmem:[%s1320_s27 + $0xc8] sm:$0xf]  ;;  %v293_v30 = vld [vmem:[%s1320_s27 + $0xd0] sm:$0xf] }
  0x47   : > { %290 = vst [vmem:[%s1325_s6 + $0x60] sm:$0xf] %v289_v28  ;;  %292 = vst [vmem:[%s1325_s6 + $0x64] sm:$0xf] %v291_v29  ;;  %v295_v31 = vld [vmem:[%s1320_s27 + $0xd8] sm:$0xf] }
  0x48   : > { %294 = vst [vmem:[%s1325_s6 + $0x68] sm:$0xf] %v293_v30  ;;  %v297_v32 = vld [vmem:[%s1320_s27 + $0xe0] sm:$0xf]  ;;  %v299_v33 = vld [vmem:[%s1320_s27 + $0xe8] sm:$0xf] }
  0x49   : > { %296 = vst [vmem:[%s1325_s6 + $0x6c] sm:$0xf] %v295_v31  ;;  %298 = vst [vmem:[%s1325_s6 + $0x70] sm:$0xf] %v297_v32  ;;  %v301_v34 = vld [vmem:[%s1320_s27 + $0xf0] sm:$0xf] }
  0x4a   : > { %300 = vst [vmem:[%s1325_s6 + $0x74] sm:$0xf] %v299_v33  ;;  %v303_v35 = vld [vmem:[%s1320_s27 + $0xf8] sm:$0xf]  ;;  %302 = vst [vmem:[%s1325_s6 + $0x78] sm:$0xf] %v301_v34 }
  0x4b   : > { %304 = vst [vmem:[%s1325_s6 + $0x7c] sm:$0xf] %v303_v35 }
  0x4c PF: > { %p890_p0 = scmp.ge.s32.totalorder %s1183_s22, 1  ;;  %p396_p1 = scmp.lt.s32.totalorder %s1183_s22, 19 }
  0x4e   : > { %p397_p2 = pnand %p890_p0, %p396_p1 }
  0x4f   : > { %s403_s0 = sand.u32 (!%p397_p2), 1, %s1159_s16   ;;  %s410_s5 = sand.u32 (!%p397_p2), 1, %s1151_s14  }
  0x50   : > { %400 = sbr.rel (%p397_p2) target bundleno = 371 (0x173), region = 103  ;;  %s891_s23 = sshll.u32 (!%p397_p2), %s403_s0, 5 }
  0x51   : > { %s892_s28 = sshll.u32 (!%p397_p2), %s410_s5, 7  ;;  %s436_s7 = sand.u32 (!%p397_p2), 1, %s1143_s12  }
  0x52   : > { %p442_p3 = scmp.lt.s32.totalorder (!%p397_p2), %s1171_s19, 1  ;;  %s893_s11 = sshll.u32 (!%p397_p2), %s436_s7, 4 }
  0x53   : > { %s1401_s6 = scalar_lea.vmem (!%p397_p2), [#allocation3], %s891_s23  ;;  %s1403_s1 = scalar_lea.vmem (!%p397_p2), [#allocation4], %s892_s28 }
  0x54   : > { %s1405_s25 = scalar_lea.vmem (!%p397_p2), [#allocation5], %s893_s11  ;;  %p894_p4 = scmp.ne.s32.totalorder (!%p397_p2), %s1167_s18, 0 }
  0x57   : > { %s1395_s26 = scalar_select %p442_p3, %s1171_s19, 1 }
  0x58   : > { %450 = sbr.rel (%p894_p4) target bundleno = 95 (0x5f), region = 115  ;;  %v1185_v36 = vmov (!%p894_p4), 0.0  }
  0x59   : > { %s444_s27 = scalar_lea.vmem %s1481_s2, %s1395_s26  ;;  %451 = vst [vmem:[#allocation2] sm:$0xff] (!%p894_p4), %v1185_v36  ;;  %452 = vst [vmem:[#allocation2 + $0x8] sm:$0xff] (!%p894_p4), %v1185_v36 }
  0x5a   : > { %453 = vst [vmem:[#allocation2 + $0x10] sm:$0xff] (!%p894_p4), %v1185_v36  ;;  %454 = vst [vmem:[#allocation2 + $0x18] sm:$0xff] (!%p894_p4), %v1185_v36 }
  0x5f PF: > { %v1075_v37 = vld [vmem:[%s1403_s1 + $0x40] sm:$0xff]   ;;  %v1077_v39 = vld [vmem:[%s1403_s1 + $0x48] sm:$0xff]   ;;  %v1079_v41 = vld [vmem:[%s1403_s1 + $0x50] sm:$0xff]   ;;  %p915_p5 = scmp.ne.s32.totalorder %s1167_s18, 8 }
  0x60   : > { %v1076_v38 = vld [vmem:[%s1403_s1] sm:$0xff]   ;;  %942 = vmatprep.subr.bf16.mxu0 %v1075_v37  ;;  %970 = vmatprep.subr.bf16.mxu1 %v1075_v37  ;;  %v1078_v40 = vld [vmem:[%s1403_s1 + $0x8] sm:$0xff]   ;;  %v1080_v42 = vld [vmem:[%s1403_s1 + $0x10] sm:$0xff]  }
  0x61   : > { %943 = vmatpush3.bf16.msra.mxu0 %v1076_v38  ;;  %978 = vmatpush3.bf16.msra.mxu1 %v1076_v38  ;;  %v1081_v43 = vld [vmem:[%s1403_s1 + $0x58] sm:$0xff]   ;;  %v1083_v45 = vld [vmem:[%s1403_s1 + $0x60] sm:$0xff]   ;;  %v1085_v47 = vld [vmem:[%s1403_s1 + $0x68] sm:$0xff]  }
  0x62   : > { %944 = vmatprep.subr.bf16.mxu0 %v1077_v39  ;;  %971 = vmatprep.subr.bf16.mxu1 %v1077_v39  ;;  %v1082_v44 = vld [vmem:[%s1403_s1 + $0x18] sm:$0xff]   ;;  %v1084_v46 = vld [vmem:[%s1403_s1 + $0x20] sm:$0xff]   ;;  %v1086_v50 = vld [vmem:[%s1403_s1 + $0x28] sm:$0xff]  }
  0x63   : > { %v1093_v48 = vld [vmem:[%s1401_s6 + $0x4] ss:$8 sps:$4 sm:$0xff]   ;;  %v1096_v49 = vld [vmem:[%s1401_s6 + $0x14] ss:$8 sps:$4 sm:$0xff]   ;;  %v1091_v55 = vld [vmem:[%s1401_s6] ss:$8 sps:$4 sm:$0xff]  }
  0x64   : > { %v1087_v51 = vld [vmem:[%s1403_s1 + $0x70] sm:$0xff]   ;;  %643 = vmatprep.mubr.bf16.mxu0 %v1093_v48  ;;  %651 = vmatprep.mubr.bf16.mxu1 %v1096_v49  ;;  %v1089_v53 = vld [vmem:[%s1403_s1 + $0x78] sm:$0xff]   ;;  %v455_v59 = vld [vmem:[#allocation2] sm:$0xff] }
  0x65   : > { %945 = vmatpush3.bf16.msra.mxu0 %v1078_v40  ;;  %979 = vmatpush3.bf16.msra.mxu1 %v1078_v40  ;;  %v1088_v52 = vld [vmem:[%s1403_s1 + $0x30] sm:$0xff]   ;;  %v1090_v54 = vld [vmem:[%s1403_s1 + $0x38] sm:$0xff]   ;;  %v456_v3 = vld [vmem:[#allocation2 + $0x8] sm:$0xff] }
  0x66   : > { %946 = vmatprep.subr.bf16.mxu0 %v1079_v41  ;;  %972 = vmatprep.subr.bf16.mxu1 %v1079_v41  ;;  %v1094_v56 = vld [vmem:[%s1401_s6 + $0x10] ss:$8 sps:$4 sm:$0xff]   ;;  %v916_v15 = vld [vmem:[%s444_s27] ss:$0 sm:$0xff] (!%p915_p5) }
  0x67   : > { %v457_v61 = vld [vmem:[#allocation2 + $0x10] sm:$0xff]  ;;  %v458_v5 = vld [vmem:[#allocation2 + $0x18] sm:$0xff] }
  0x69   : > { %947 = vmatpush3.bf16.msra.mxu0 %v1080_v42  ;;  %980 = vmatpush3.bf16.msra.mxu1 %v1080_v42 }
  0x6a   : > { %948 = vmatprep.subr.bf16.mxu0 %v1081_v43  ;;  %973 = vmatprep.subr.bf16.mxu1 %v1081_v43 }
  0x6d   : > { %949 = vmatpush3.bf16.msra.mxu0 %v1082_v44  ;;  %981 = vmatpush3.bf16.msra.mxu1 %v1082_v44 }
  0x6e   : > { %950 = vmatprep.subr.bf16.mxu0 %v1083_v45  ;;  %974 = vmatprep.subr.bf16.mxu1 %v1083_v45 }
  0x71   : > { %951 = vmatpush3.bf16.msra.mxu0 %v1084_v46  ;;  %982 = vmatpush3.bf16.msra.mxu1 %v1084_v46 }
  0x72   : > { %952 = vmatprep.subr.bf16.mxu0 %v1085_v47  ;;  %975 = vmatprep.subr.bf16.mxu1 %v1085_v47 }
  0x75   : > { %953 = vmatpush3.bf16.msra.mxu0 %v1086_v50  ;;  %983 = vmatpush3.bf16.msra.mxu1 %v1086_v50 }
  0x76   : > { %954 = vmatprep.subr.bf16.mxu0 %v1087_v51  ;;  %976 = vmatprep.subr.bf16.mxu1 %v1087_v51 }
  0x79   : > { %955 = vmatpush3.bf16.msra.mxu0 %v1088_v52  ;;  %984 = vmatpush3.bf16.msra.mxu1 %v1088_v52 }
  0x7a   : > { %956 = vmatprep.subr.bf16.mxu0 %v1089_v53  ;;  %977 = vmatprep.subr.bf16.mxu1 %v1089_v53 }
  0x7d   : > { %957 = vmatpush3.bf16.msra.mxu0 %v1090_v54  ;;  %985 = vmatpush3.bf16.msra.mxu1 %v1090_v54 }
  0x80   : > { %644 = vmatmul.mubr.bf16.vlgmr.msra.gmra.mrb[0].mxu0 %v1091_v55  ;;  %652 = vmatmul.mubr.bf16.vlgmr.msra.gmra.mrb[0].mxu1 %v1094_v56 }
 0x153   : > { %v958_v57 = vpop.f32.mrb[0].mxu0  ;;  %v964_v58 = vpop.f32.mrb[0].mxu1 }
 0x154   : > { %v959_v60 = vpop.f32.mrb[1].mxu0  ;;  %v965_v62 = vpop.f32.mrb[1].mxu1 }
 0x155   : > { %v960_v63 = vadd.f32 %v959_v60, %v958_v57  ;;  %v966_v0 = vadd.f32 %v965_v62, %v964_v58  ;;  %v961_v1 = vpop.f32.mrb[2].mxu0  ;;  %v967_v2 = vpop.f32.mrb[2].mxu1  ;;  %671 = sbr.rel (%p915_p5) target bundleno = 362 (0x16a), region = 119 }
 0x156   : > { %v962_v4 = vpop.f32.mrb[3].mxu0  ;;  %v968_v6 = vpop.f32.mrb[3].mxu1 }
 0x157   : > { %v660_v7 = vadd.f32 %v960_v63, %v455_v59  ;;  %v662_v8 = vadd.f32 %v966_v0, %v457_v61  ;;  %v963_v9 = vadd.f32 %v962_v4, %v961_v1  ;;  %v969_v10 = vadd.f32 %v968_v6, %v967_v2 }
 0x159   : > { %664 = vst [vmem:[#allocation2] sm:$0xff] %v660_v7  ;;  %666 = vst [vmem:[#allocation2 + $0x10] sm:$0xff] %v662_v8  ;;  %v661_v11 = vadd.f32 %v963_v9, %v456_v3  ;;  %v663_v12 = vadd.f32 %v969_v10, %v458_v5 }
 0x15b   : > { %665 = vst [vmem:[#allocation2 + $0x8] sm:$0xff] %v661_v11  ;;  %667 = vst [vmem:[#allocation2 + $0x18] sm:$0xff] %v663_v12 }
 0x160   : > { %v672_v13 = vld [vmem:[#allocation2] sm:$0xff]  ;;  %v674_v18 = vld [vmem:[#allocation2 + $0x10] sm:$0xff] }
 0x161   : > { %v683_v16 = vadd.f32 %v916_v15, %v672_v13  ;;  %v685_v20 = vadd.f32 %v916_v15, %v674_v18 }
 0x162   : > { %v673_v14 = vld [vmem:[#allocation2 + $0x8] sm:$0xff]  ;;  %v675_v19 = vld [vmem:[#allocation2 + $0x18] sm:$0xff] }
 0x163   : > { %v684_v17 = vadd.f32 %v916_v15, %v673_v14  ;;  %v686_v21 = vadd.f32 %v916_v15, %v675_v19  ;;  %v687_v22 = vmax.f32 %v683_v16, 0.0  ;;  %v689_v24 = vmax.f32 %v685_v20, 0.0 }
 0x165   : > { %v688_v23 = vmax.f32 %v684_v17, 0.0  ;;  %v690_v25 = vmax.f32 %v686_v21, 0.0 }
 0x167   : > { %v934_v26 = vpack.c.bf16 %v688_v23, %v687_v22  ;;  %v939_v27 = vpack.c.bf16 %v690_v25, %v689_v24 }
 0x169   : > { %935 = vst [vmem:[%s1405_s25] sm:$0xff] %v934_v26   ;;  %941 = vst [vmem:[%s1405_s25 + $0x8] sm:$0xff] %v939_v27  }
 0x16a PF: > { %717 = sbr.rel (!%p1300_p12) target bundleno = 371 (0x173), region = 123  ;;  %s922_s14 = sshll.u32 (%p1300_p12), %s1171_s19, 2 }
 0x16b   : > { %s722_s0 = scalar_lea.vmem (%p1300_p12), %s1482_s3, %s922_s14 }
 0x170   : > { %v738_v28 = vld [vmem:[%s1405_s25] sm:$0xf] (%p1300_p12)  ;;  %v740_v29 = vld [vmem:[%s1405_s25 + $0x4] sm:$0xf] (%p1300_p12)  ;;  %v742_v30 = vld [vmem:[%s1405_s25 + $0x8] sm:$0xf] (%p1300_p12) }
 0x171   : > { %v744_v31 = vld [vmem:[%s1405_s25 + $0xc] sm:$0xf]  ;;  %739 = vst [vmem:[%s722_s0] sm:$0xf] %v738_v28  ;;  %741 = vst [vmem:[%s722_s0 + $0x8] sm:$0xf] %v740_v29 }
 0x172   : > { %743 = vst [vmem:[%s722_s0 + $0x10] sm:$0xf] %v742_v30  ;;  %745 = vst [vmem:[%s722_s0 + $0x18] sm:$0xf] %v744_v31 }
 0x173 PF: > { %s13_s22 = sadd.s32 1, %s1183_s22   ;;  %s1492_s10 = sld [smem:[#allocation6_spill]] }
 0x174   : > { %p10_p6 = scmp.ge.s32.totalorder %s13_s22, 20   ;;  %s1493_s12 = smov %s1147_s13 }
 0x175   : > { %s1494_s13 = smov %s1298_s9  ;;  %s1495_s14 = smov %s1155_s15 }
 0x176   : > { %s1496_s15 = smov %s1295_s8  ;;  %s1497_s16 = smov %s1163_s17 }
 0x177   : > { %s1498_s17 = smov %s1281_s30  ;;  %s1499_s18 = smov %s1175_s20 }
 0x178   : > { %s1500_s19 = smov %s1179_s21  ;;  %s1501_s20 = smov %s1504_s24 }
 0x179   : > { %s1502_s21 = smov %s1492_s10  ;;  %12 = sbr.rel (!%p10_p6) target bundleno = 9 (0x9), region = 206 }

// kernel: _lambda_.37
= control target key start
LH: loop header
LB: loop body
LE: loop exit
PB: predicated region body
PF: predicated region fallthrough
CT: control target
= control target key end

     0   :  { %s1070_s12 = smov 0   ;;  %s1072_s13 = smov 0   ;;  %s1284_s0 = inlined_call_operand.vmem [shape: bf16[8,2304], index: 0, kind: input, shape index: {}]   ;;  %s1285_s1 = inlined_call_operand.vmem [shape: bf16[2304,512], index: 1, kind: input, shape index: {}]   ;;  %s1286_s2 = inlined_call_operand.vmem [shape: f32[1,512], index: 2, kind: input, shape index: {}]   ;;  %s1287_s3 = inlined_call_operand.vmem [shape: bf16[8,512], index: 3, kind: output, shape index: {}]  }
   0x1   :  { %s1074_s14 = smov 0   ;;  %s1076_s15 = smov 0  }
   0x2   :  { %s1078_s16 = smov 0   ;;  %s1080_s17 = smov 0  }
   0x3   :  { %s1082_s18 = smov 0  }
   0x4 LB: > { %s25_s19 = sadd.s32 1, %s1039_s16  ;;  %s28_s20 = sadd.s32 1, %s1043_s17  ;;  %s1047_s18 = sphi %s1082_s18, %s13_s18   ;;  %s1043_s17 = sphi %s1080_s17, %s1293_s17   ;;  %s1039_s16 = sphi %s1078_s16, %s1292_s16   ;;  %s1035_s15 = sphi %s1076_s15, %s1291_s15   ;;  %s1031_s14 = sphi %s1074_s14, %s1290_s14   ;;  %s1027_s13 = sphi %s1072_s13, %s1289_s13   ;;  %s1023_s12 = sphi %s1070_s12, %s1288_s12  }
   0x5   : > { %p26_p0 = scmp.ge.s32.totalorder %s25_s19, 9  ;;  %p76_p1 = scmp.ne.s32.totalorder %s1027_s13, %s1023_s12 }
   0x6   : > { %p77_p2 = scmp.eq.s32.totalorder %s1047_s18, 0  ;;  %s69_s24 = sadd.s32 1, %s1027_s13 }
   0x7   : > { %s1295_s19 = smov (%p26_p0, %s25_s19), 0  ;;  %s1297_s20 = smov (!%p26_p0, %s28_s20), %s1043_s17 }
   0x8   : > { %p78_p3 = por %p77_p2, %p76_p1  ;;  %p30_p4 = scmp.ge.s32.totalorder %s1297_s20, 2 }
   0x9   : > { %s64_s21 = ssub.s32 %s1039_s16, %s1295_s19  ;;  %p832_p6 = scmp.ge.s32.totalorder %s1047_s18, 18 }
   0xa   : > { %s1299_s20 = smov (%p30_p4, %s1297_s20), 0 }
   0xb   : > { %s65_s22 = ssub.s32 %s1043_s17, %s1299_s20  ;;  %156 = sbr.rel (%p832_p6) target bundleno = 41 (0x29), region = 16 }
   0xc   : > { %s66_s23 = sor.u32 %s65_s22, %s64_s21 }
   0xd   : > { %p67_p5 = scmp.eq.s32.totalorder %s66_s23, 0 }
   0xf   : > { %s1121_s25 = scalar_select %p67_p5, %s1027_s13, %s69_s24  }
  0x12   : > { %172 = sbr.rel (!%p78_p3) target bundleno = 41 (0x29), region = 24  ;;  %s174_s26 = sand.u32 (%p78_p3), 1, %s1027_s13  }
  0x13   : > { %s835_s27 = sshll.u32 (%p78_p3), %s1043_s17, 1  ;;  %s833_s28 = sshll.u32 (%p78_p3), %s174_s26, 8 }
  0x14   : > { %s884_s29 = sshll.u32 (%p78_p3), %s1039_s16, 7  ;;  %s1135_s8 = scalar_lea.vmem (%p78_p3), [#allocation3], %s833_s28 }
  0x15   : > { %s180_s30 = sadd.s32 (%p78_p3), %s884_s29, %s835_s27 }
  0x16   : > { %s837_s4 = sshll.u32 (%p78_p3), %s180_s30, 2 }
  0x17   : > { %s1130_s7 = scalar_lea.vmem (%p78_p3), %s1285_s1, %s837_s4 }
  0x18   : > { %v272_v0 = vld [vmem:[%s1130_s7] sm:$0xff] (%p78_p3)  ;;  %v274_v1 = vld [vmem:[%s1130_s7 + $0x10] sm:$0xff] (%p78_p3) }
  0x19   : > { %v276_v2 = vld [vmem:[%s1130_s7 + $0x20] sm:$0xff]  ;;  %273 = vst [vmem:[%s1135_s8] sm:$0xff] %v272_v0  ;;  %275 = vst [vmem:[%s1135_s8 + $0x8] sm:$0xff] %v274_v1  ;;  %v278_v3 = vld [vmem:[%s1130_s7 + $0x30] sm:$0xff] }
  0x1a   : > { %277 = vst [vmem:[%s1135_s8 + $0x10] sm:$0xff] %v276_v2  ;;  %v280_v4 = vld [vmem:[%s1130_s7 + $0x40] sm:$0xff]  ;;  %v282_v5 = vld [vmem:[%s1130_s7 + $0x50] sm:$0xff]  ;;  %279 = vst [vmem:[%s1135_s8 + $0x18] sm:$0xff] %v278_v3 }
  0x1b   : > { %281 = vst [vmem:[%s1135_s8 + $0x20] sm:$0xff] %v280_v4  ;;  %283 = vst [vmem:[%s1135_s8 + $0x28] sm:$0xff] %v282_v5  ;;  %v284_v6 = vld [vmem:[%s1130_s7 + $0x60] sm:$0xff]  ;;  %v286_v7 = vld [vmem:[%s1130_s7 + $0x70] sm:$0xff] }
  0x1c   : > { %v288_v8 = vld [vmem:[%s1130_s7 + $0x80] sm:$0xff]  ;;  %285 = vst [vmem:[%s1135_s8 + $0x30] sm:$0xff] %v284_v6  ;;  %287 = vst [vmem:[%s1135_s8 + $0x38] sm:$0xff] %v286_v7  ;;  %v290_v9 = vld [vmem:[%s1130_s7 + $0x90] sm:$0xff] }
  0x1d   : > { %289 = vst [vmem:[%s1135_s8 + $0x40] sm:$0xff] %v288_v8  ;;  %v292_v10 = vld [vmem:[%s1130_s7 + $0xa0] sm:$0xff]  ;;  %v294_v11 = vld [vmem:[%s1130_s7 + $0xb0] sm:$0xff]  ;;  %291 = vst [vmem:[%s1135_s8 + $0x48] sm:$0xff] %v290_v9 }
  0x1e   : > { %293 = vst [vmem:[%s1135_s8 + $0x50] sm:$0xff] %v292_v10  ;;  %295 = vst [vmem:[%s1135_s8 + $0x58] sm:$0xff] %v294_v11  ;;  %v296_v12 = vld [vmem:[%s1130_s7 + $0xc0] sm:$0xff]  ;;  %v298_v13 = vld [vmem:[%s1130_s7 + $0xd0] sm:$0xff] }
  0x1f   : > { %v300_v14 = vld [vmem:[%s1130_s7 + $0xe0] sm:$0xff]  ;;  %297 = vst [vmem:[%s1135_s8 + $0x60] sm:$0xff] %v296_v12  ;;  %299 = vst [vmem:[%s1135_s8 + $0x68] sm:$0xff] %v298_v13  ;;  %v302_v15 = vld [vmem:[%s1130_s7 + $0xf0] sm:$0xff] }
  0x20   : > { %301 = vst [vmem:[%s1135_s8 + $0x70] sm:$0xff] %v300_v14  ;;  %v304_v16 = vld [vmem:[%s1130_s7 + $0x100] sm:$0xff]  ;;  %v306_v17 = vld [vmem:[%s1130_s7 + $0x110] sm:$0xff]  ;;  %303 = vst [vmem:[%s1135_s8 + $0x78] sm:$0xff] %v302_v15 }
  0x21   : > { %305 = vst [vmem:[%s1135_s8 + $0x80] sm:$0xff] %v304_v16  ;;  %307 = vst [vmem:[%s1135_s8 + $0x88] sm:$0xff] %v306_v17  ;;  %v308_v18 = vld [vmem:[%s1130_s7 + $0x120] sm:$0xff]  ;;  %v310_v19 = vld [vmem:[%s1130_s7 + $0x130] sm:$0xff] }
  0x22   : > { %v312_v20 = vld [vmem:[%s1130_s7 + $0x140] sm:$0xff]  ;;  %309 = vst [vmem:[%s1135_s8 + $0x90] sm:$0xff] %v308_v18  ;;  %311 = vst [vmem:[%s1135_s8 + $0x98] sm:$0xff] %v310_v19  ;;  %v314_v21 = vld [vmem:[%s1130_s7 + $0x150] sm:$0xff] }
  0x23   : > { %313 = vst [vmem:[%s1135_s8 + $0xa0] sm:$0xff] %v312_v20  ;;  %v316_v22 = vld [vmem:[%s1130_s7 + $0x160] sm:$0xff]  ;;  %v318_v23 = vld [vmem:[%s1130_s7 + $0x170] sm:$0xff]  ;;  %315 = vst [vmem:[%s1135_s8 + $0xa8] sm:$0xff] %v314_v21 }
  0x24   : > { %317 = vst [vmem:[%s1135_s8 + $0xb0] sm:$0xff] %v316_v22  ;;  %319 = vst [vmem:[%s1135_s8 + $0xb8] sm:$0xff] %v318_v23  ;;  %v320_v24 = vld [vmem:[%s1130_s7 + $0x180] sm:$0xff]  ;;  %v322_v25 = vld [vmem:[%s1130_s7 + $0x190] sm:$0xff] }
  0x25   : > { %v324_v26 = vld [vmem:[%s1130_s7 + $0x1a0] sm:$0xff]  ;;  %321 = vst [vmem:[%s1135_s8 + $0xc0] sm:$0xff] %v320_v24  ;;  %323 = vst [vmem:[%s1135_s8 + $0xc8] sm:$0xff] %v322_v25  ;;  %v326_v27 = vld [vmem:[%s1130_s7 + $0x1b0] sm:$0xff] }
  0x26   : > { %325 = vst [vmem:[%s1135_s8 + $0xd0] sm:$0xff] %v324_v26  ;;  %v328_v28 = vld [vmem:[%s1130_s7 + $0x1c0] sm:$0xff]  ;;  %v330_v29 = vld [vmem:[%s1130_s7 + $0x1d0] sm:$0xff]  ;;  %327 = vst [vmem:[%s1135_s8 + $0xd8] sm:$0xff] %v326_v27 }
  0x27   : > { %329 = vst [vmem:[%s1135_s8 + $0xe0] sm:$0xff] %v328_v28  ;;  %331 = vst [vmem:[%s1135_s8 + $0xe8] sm:$0xff] %v330_v29  ;;  %v332_v30 = vld [vmem:[%s1130_s7 + $0x1e0] sm:$0xff]  ;;  %v334_v31 = vld [vmem:[%s1130_s7 + $0x1f0] sm:$0xff] }
  0x28   : > { %333 = vst [vmem:[%s1135_s8 + $0xf0] sm:$0xff] %v332_v30  ;;  %335 = vst [vmem:[%s1135_s8 + $0xf8] sm:$0xff] %v334_v31 }
  0x29 PF: > { %p838_p7 = scmp.ge.s32.totalorder %s1047_s18, 1  ;;  %p348_p8 = scmp.lt.s32.totalorder %s1047_s18, 19 }
  0x2b   : > { %p349_p9 = pnand %p838_p7, %p348_p8 }
  0x2c   : > { %s355_s9 = sand.u32 (!%p349_p9), 1, %s1023_s12   ;;  %s840_s10 = sshll.u32 (!%p349_p9), %s1031_s14, 1 }
  0x2d   : > { %352 = sbr.rel (%p349_p9) target bundleno = 357 (0x165), region = 66  ;;  %s839_s11 = sshll.u32 (!%p349_p9), %s355_s9, 8 }
  0x2e   : > { %p398_p10 = scmp.lt.s32.totalorder (!%p349_p9), %s840_s10, 17  ;;  %s842_s21 = sshll.u32 (!%p349_p9), %s1035_s15, 1 }
  0x2f   : > { %p408_p11 = scmp.lt.s32.totalorder (!%p349_p9), %s842_s21, 3  ;;  %s1220_s5 = scalar_lea.vmem (!%p349_p9), [#allocation3], %s839_s11 }
  0x30   : > { %p845_p12 = scmp.ne.s32.totalorder (!%p349_p9), %s1031_s14, 0 }
  0x34   : > { %s1301_s10 = smov (!%p398_p10, %s840_s10), 17  ;;  %s1303_s21 = smov (!%p408_p11, %s842_s21), 3 }
  0x35   : > { %s841_s22 = sshll.u32 %s1301_s10, 2  ;;  %s410_s12 = scalar_lea.vmem %s1286_s2, %s1303_s21  ;;  %v1049_v32 = vmov (!%p845_p12), 0.0  }
  0x36   : > { %s1206_s26 = scalar_lea.vmem %s1284_s0, %s841_s22  ;;  %s844_s29 = sshll.u32 %s1303_s21, 2  ;;  %426 = vst [vmem:[#allocation2] sm:$0xff] (!%p845_p12), %v1049_v32  ;;  %427 = vst [vmem:[#allocation2 + $0x8] sm:$0xff] (!%p845_p12), %v1049_v32 }
  0x37   : > { %s1218_s15 = scalar_lea.vmem %s1287_s3, %s844_s29  ;;  %425 = sbr.rel (%p845_p12) target bundleno = 62 (0x3e), region = 74 }
  0x3e PF: > { %v943_v33 = vld [vmem:[%s1220_s5 + $0x4] ss:$8 sps:$4 sm:$0xff]   ;;  %v945_v34 = vld [vmem:[%s1220_s5] ss:$8 sps:$4 sm:$0xff]   ;;  %v946_v35 = vld [vmem:[%s1220_s5 + $0x14] ss:$8 sps:$4 sm:$0xff]  }
  0x3f   : > { %630 = vmatprep.subr.bf16.mxu0 %v943_v33  ;;  %v948_v36 = vld [vmem:[%s1220_s5 + $0x10] ss:$8 sps:$4 sm:$0xff]   ;;  %v949_v37 = vld [vmem:[%s1220_s5 + $0x24] ss:$8 sps:$4 sm:$0xff]   ;;  %v951_v38 = vld [vmem:[%s1220_s5 + $0x20] ss:$8 sps:$4 sm:$0xff]  }
  0x40   : > { %631 = vmatpush1.bf16.msra.mxu0 %v945_v34  ;;  %v952_v39 = vld [vmem:[%s1220_s5 + $0x34] ss:$8 sps:$4 sm:$0xff]   ;;  %v954_v40 = vld [vmem:[%s1220_s5 + $0x30] ss:$8 sps:$4 sm:$0xff]   ;;  %v955_v41 = vld [vmem:[%s1220_s5 + $0x44] ss:$8 sps:$4 sm:$0xff]  }
  0x41   : > { %632 = vmatprep.subr.bf16.mxu0 %v946_v35  ;;  %v957_v42 = vld [vmem:[%s1220_s5 + $0x40] ss:$8 sps:$4 sm:$0xff]   ;;  %v958_v43 = vld [vmem:[%s1220_s5 + $0x54] ss:$8 sps:$4 sm:$0xff]   ;;  %v960_v44 = vld [vmem:[%s1220_s5 + $0x50] ss:$8 sps:$4 sm:$0xff]  }
  0x42   : > { %v961_v45 = vld [vmem:[%s1220_s5 + $0x64] ss:$8 sps:$4 sm:$0xff]   ;;  %v430_v46 = vld [vmem:[%s1206_s26] sm:$0xff]  ;;  %v963_v48 = vld [vmem:[%s1220_s5 + $0x60] ss:$8 sps:$4 sm:$0xff]   ;;  %p880_p13 = scmp.ne.s32.totalorder %s1031_s14, 8 }
  0x43   : > { %v847_v47 = vcombine.high %v430_v46, %v430_v46  ;;  %v964_v49 = vld [vmem:[%s1220_s5 + $0x74] ss:$8 sps:$4 sm:$0xff]   ;;  %v966_v50 = vld [vmem:[%s1220_s5 + $0x70] ss:$8 sps:$4 sm:$0xff]   ;;  %v967_v51 = vld [vmem:[%s1220_s5 + $0x84] ss:$8 sps:$4 sm:$0xff]   ;;  %v846_v3 = vcombine.low %v430_v46, %v430_v46  ;;  %v683_v12 = vlaneseq (!%p880_p13) }
  0x44   : > { %633 = vmatpush1.bf16.msra.mxu0 %v948_v36  ;;  %v969_v52 = vld [vmem:[%s1220_s5 + $0x80] ss:$8 sps:$4 sm:$0xff]   ;;  %v970_v53 = vld [vmem:[%s1220_s5 + $0x94] ss:$8 sps:$4 sm:$0xff]   ;;  %v972_v54 = vld [vmem:[%s1220_s5 + $0x90] ss:$8 sps:$4 sm:$0xff]  }
  0x45   : > { %634 = vmatprep.subr.bf16.mxu0 %v949_v37  ;;  %662 = vmatprep.mubr.bf16.mxu0 %v847_v47  ;;  %v973_v55 = vld [vmem:[%s1220_s5 + $0xa4] ss:$8 sps:$4 sm:$0xff]   ;;  %v975_v56 = vld [vmem:[%s1220_s5 + $0xa0] ss:$8 sps:$4 sm:$0xff]   ;;  %v976_v57 = vld [vmem:[%s1220_s5 + $0xb4] ss:$8 sps:$4 sm:$0xff]  }
  0x46   : > { %v978_v58 = vld [vmem:[%s1220_s5 + $0xb0] ss:$8 sps:$4 sm:$0xff]   ;;  %v979_v59 = vld [vmem:[%s1220_s5 + $0xc4] ss:$8 sps:$4 sm:$0xff]   ;;  %v981_v60 = vld [vmem:[%s1220_s5 + $0xc0] ss:$8 sps:$4 sm:$0xff]  }
  0x47   : > { %v982_v61 = vld [vmem:[%s1220_s5 + $0xd4] ss:$8 sps:$4 sm:$0xff]   ;;  %v984_v62 = vld [vmem:[%s1220_s5 + $0xd0] ss:$8 sps:$4 sm:$0xff]   ;;  %v985_v63 = vld [vmem:[%s1220_s5 + $0xe4] ss:$8 sps:$4 sm:$0xff]  }
  0x48   : > { %635 = vmatpush1.bf16.msra.mxu0 %v951_v38  ;;  %v987_v0 = vld [vmem:[%s1220_s5 + $0xe0] ss:$8 sps:$4 sm:$0xff]   ;;  %v988_v1 = vld [vmem:[%s1220_s5 + $0xf4] ss:$8 sps:$4 sm:$0xff]   ;;  %v990_v2 = vld [vmem:[%s1220_s5 + $0xf0] ss:$8 sps:$4 sm:$0xff]  }
  0x49   : > { %636 = vmatprep.subr.bf16.mxu0 %v952_v39  ;;  %v428_v4 = vld [vmem:[#allocation2] sm:$0xff]  ;;  %v429_v5 = vld [vmem:[#allocation2 + $0x8] sm:$0xff]  ;;  %v684_v13 = vshrl.u32 (!%p880_p13), %v683_v12, 7 }
  0x4a   : > { %v681_v14 = vld [vmem:[%s410_s12] sm:$0x3] (!%p880_p13) }
  0x4b   : > { %v685_v15 = vsub.s32 (!%p880_p13), 0, %v684_v13  ;;  %v689_v16 = vsub.s32 (!%p880_p13), 1, %v684_v13 }
  0x4c   : > { %637 = vmatpush1.bf16.msra.mxu0 %v954_v40 }
  0x4d   : > { %638 = vmatprep.subr.bf16.mxu0 %v955_v41  ;;  %v686_v19 = vrot.slane (!%p880_p13), %v681_v14, %v685_v15  ;;  %v690_v20 = vrot.slane (!%p880_p13), %v681_v14, %v689_v16 }
  0x50   : > { %639 = vmatpush1.bf16.msra.mxu0 %v957_v42 }
  0x51   : > { %640 = vmatprep.subr.bf16.mxu0 %v958_v43 }
  0x54   : > { %641 = vmatpush1.bf16.msra.mxu0 %v960_v44 }
  0x55   : > { %642 = vmatprep.subr.bf16.mxu0 %v961_v45 }
  0x58   : > { %643 = vmatpush1.bf16.msra.mxu0 %v963_v48 }
  0x59   : > { %644 = vmatprep.subr.bf16.mxu0 %v964_v49 }
  0x5c   : > { %645 = vmatpush1.bf16.msra.mxu0 %v966_v50 }
  0x5d   : > { %646 = vmatprep.subr.bf16.mxu0 %v967_v51 }
  0x60   : > { %647 = vmatpush1.bf16.msra.mxu0 %v969_v52 }
  0x61   : > { %648 = vmatprep.subr.bf16.mxu0 %v970_v53 }
  0x64   : > { %649 = vmatpush1.bf16.msra.mxu0 %v972_v54 }
  0x65   : > { %650 = vmatprep.subr.bf16.mxu0 %v973_v55 }
  0x68   : > { %651 = vmatpush1.bf16.msra.mxu0 %v975_v56 }
  0x69   : > { %652 = vmatprep.subr.bf16.mxu0 %v976_v57 }
  0x6c   : > { %653 = vmatpush1.bf16.msra.mxu0 %v978_v58 }
  0x6d   : > { %654 = vmatprep.subr.bf16.mxu0 %v979_v59 }
  0x70   : > { %655 = vmatpush1.bf16.msra.mxu0 %v981_v60 }
  0x71   : > { %656 = vmatprep.subr.bf16.mxu0 %v982_v61 }
  0x74   : > { %657 = vmatpush1.bf16.msra.mxu0 %v984_v62 }
  0x75   : > { %658 = vmatprep.subr.bf16.mxu0 %v985_v63 }
  0x78   : > { %659 = vmatpush1.bf16.msra.mxu0 %v987_v0 }
  0x79   : > { %660 = vmatprep.subr.bf16.mxu0 %v988_v1 }
  0x7c   : > { %661 = vmatpush1.bf16.msra.mxu0 %v990_v2 }
  0x7f   : > { %663 = vmatmul.mubr.bf16.vlgmr.msra.gmra.mrb[0].mxu0 %v846_v3 }
 0x150   : > { %678 = sbr.rel (%p880_p13) target bundleno = 357 (0x165), region = 78 }
 0x152   : > { %v664_v6 = vpop.f32.mrb[0].mxu0 }
 0x153   : > { %v671_v7 = vadd.f32 %v664_v6, %v428_v4  ;;  %v666_v8 = vpop.f32.mrb[1].mxu0 }
 0x154   : > { %v672_v9 = vadd.f32 %v666_v8, %v429_v5  ;;  %v668_v10 = vpop.f32.mrb[2].mxu0 }
 0x155   : > { %673 = vst [vmem:[#allocation2] sm:$0xff] %v671_v7  ;;  %v669_v11 = vpop.f32.mrb[3].mxu0 }
 0x156   : > { %674 = vst [vmem:[#allocation2 + $0x8] sm:$0xff] %v672_v9 }
 0x15c   : > { %v679_v17 = vld [vmem:[#allocation2] sm:$0xff] }
 0x15d   : > { %v680_v18 = vld [vmem:[#allocation2 + $0x8] sm:$0xff]  ;;  %v693_v21 = vadd.f32 %v686_v19, %v679_v17 }
 0x15e   : > { %v694_v22 = vadd.f32 %v690_v20, %v680_v18 }
 0x15f   : > { %v695_v23 = vmax.f32 %v693_v21, 0.0 }
 0x160   : > { %v696_v24 = vmax.f32 %v694_v22, 0.0 }
 0x162   : > { %v885_v25 = vpack.c.bf16 %v696_v24, %v695_v23 }
 0x164   : > { %705 = vst [vmem:[%s1218_s15] sm:$0xff] %v885_v25 }
 0x165 PF: > { %s13_s18 = sadd.s32 1, %s1047_s18   ;;  %s1288_s12 = smov %s1027_s13 }
 0x166   : > { %p10_p0 = scmp.ge.s32.totalorder %s13_s18, 20   ;;  %s1289_s13 = smov %s1121_s25 }
 0x167   : > { %s1290_s14 = smov %s1039_s16  ;;  %s1291_s15 = smov %s1043_s17 }
 0x168   : > { %s1292_s16 = smov %s1295_s19  ;;  %s1293_s17 = smov %s1299_s20 }
 0x169   :  { %12 = sbr.rel (!%p10_p0) target bundleno = 4 (0x4), region = 119 }

// kernel: _lambda_.38
= control target key start
LH: loop header
LB: loop body
LE: loop exit
PB: predicated region body
PF: predicated region fallthrough
CT: control target
= control target key end

     0   :  { %s1028_s12 = smov 0   ;;  %s1030_s13 = smov 0   ;;  %s1207_s0 = inlined_call_operand.vmem [shape: bf16[8,256], index: 0, kind: input, shape index: {}]   ;;  %s1208_s1 = inlined_call_operand.vmem [shape: bf16[256,512], index: 1, kind: input, shape index: {}]   ;;  %s1209_s2 = inlined_call_operand.vmem [shape: f32[1,512], index: 2, kind: input, shape index: {}]   ;;  %s1210_s3 = inlined_call_operand.vmem [shape: bf16[8,512], index: 3, kind: output, shape index: {}]  }
   0x1   :  { %s1032_s14 = smov 0   ;;  %s1034_s15 = smov 0  }
   0x2   :  { %s1036_s16 = smov 0  }
   0x3 LB: > { %s28_s17 = sadd.s32 1, %s1002_s15  ;;  %p76_p1 = scmp.ne.s32.totalorder %s994_s13, %s990_s12  ;;  %s1006_s16 = sphi %s1036_s16, %s13_s16   ;;  %s1002_s15 = sphi %s1034_s15, %s1214_s15   ;;  %s998_s14 = sphi %s1032_s14, %s1213_s14   ;;  %s994_s13 = sphi %s1030_s13, %s1212_s13   ;;  %s990_s12 = sphi %s1028_s12, %s1211_s12  }
   0x4   : > { %p30_p0 = scmp.ge.s32.totalorder %s28_s17, 2  ;;  %p77_p2 = scmp.eq.s32.totalorder %s1006_s16, 0 }
   0x5   : > { %s69_s19 = sadd.s32 1, %s994_s13  ;;  %p830_p5 = scmp.ge.s32.totalorder %s1006_s16, 2 }
   0x6   : > { %s1216_s17 = smov (%p30_p0, %s28_s17), 0  ;;  %p78_p3 = por %p77_p2, %p76_p1 }
   0x7   : > { %s65_s18 = ssub.s32 %s1002_s15, %s1216_s17  ;;  %169 = sbr.rel (%p830_p5) target bundleno = 34 (0x22), region = 20 }
   0x8   : > { %p67_p4 = scmp.eq.s32.totalorder %s65_s18, 0 }
   0xa   : > { %s1063_s20 = scalar_select %p67_p4, %s994_s13, %s69_s19  }
   0xe   : > { %172 = sbr.rel (!%p78_p3) target bundleno = 34 (0x22), region = 24  ;;  %s174_s21 = sand.u32 (%p78_p3), 1, %s994_s13  }
   0xf   : > { %s876_s22 = sshll.u32 (%p78_p3), %s1002_s15, 3  ;;  %s831_s23 = sshll.u32 (%p78_p3), %s174_s21, 8 }
  0x10   : > { %s1071_s26 = scalar_lea.vmem (%p78_p3), %s1208_s1, %s876_s22  ;;  %s1076_s27 = scalar_lea.vmem (%p78_p3), [#allocation3], %s831_s23 }
  0x11   : > { %v272_v0 = vld [vmem:[%s1071_s26] sm:$0xff] (%p78_p3)  ;;  %v274_v1 = vld [vmem:[%s1071_s26 + $0x10] sm:$0xff] (%p78_p3) }
  0x12   : > { %v276_v2 = vld [vmem:[%s1071_s26 + $0x20] sm:$0xff] (%p78_p3)  ;;  %273 = vst [vmem:[%s1076_s27] sm:$0xff] (%p78_p3), %v272_v0  ;;  %275 = vst [vmem:[%s1076_s27 + $0x8] sm:$0xff] (%p78_p3), %v274_v1  ;;  %v278_v3 = vld [vmem:[%s1071_s26 + $0x30] sm:$0xff] (%p78_p3) }
  0x13   : > { %277 = vst [vmem:[%s1076_s27 + $0x10] sm:$0xff] (%p78_p3), %v276_v2  ;;  %v280_v4 = vld [vmem:[%s1071_s26 + $0x40] sm:$0xff] (%p78_p3)  ;;  %v282_v5 = vld [vmem:[%s1071_s26 + $0x50] sm:$0xff] (%p78_p3)  ;;  %279 = vst [vmem:[%s1076_s27 + $0x18] sm:$0xff] (%p78_p3), %v278_v3 }
  0x14   : > { %281 = vst [vmem:[%s1076_s27 + $0x20] sm:$0xff] (%p78_p3), %v280_v4  ;;  %283 = vst [vmem:[%s1076_s27 + $0x28] sm:$0xff] (%p78_p3), %v282_v5  ;;  %v284_v6 = vld [vmem:[%s1071_s26 + $0x60] sm:$0xff] (%p78_p3)  ;;  %v286_v7 = vld [vmem:[%s1071_s26 + $0x70] sm:$0xff] (%p78_p3) }
  0x15   : > { %v288_v8 = vld [vmem:[%s1071_s26 + $0x80] sm:$0xff]  ;;  %285 = vst [vmem:[%s1076_s27 + $0x30] sm:$0xff] %v284_v6  ;;  %287 = vst [vmem:[%s1076_s27 + $0x38] sm:$0xff] %v286_v7  ;;  %v290_v9 = vld [vmem:[%s1071_s26 + $0x90] sm:$0xff] }
  0x16   : > { %289 = vst [vmem:[%s1076_s27 + $0x40] sm:$0xff] %v288_v8  ;;  %v292_v10 = vld [vmem:[%s1071_s26 + $0xa0] sm:$0xff]  ;;  %v294_v11 = vld [vmem:[%s1071_s26 + $0xb0] sm:$0xff]  ;;  %291 = vst [vmem:[%s1076_s27 + $0x48] sm:$0xff] %v290_v9 }
  0x17   : > { %293 = vst [vmem:[%s1076_s27 + $0x50] sm:$0xff] %v292_v10  ;;  %295 = vst [vmem:[%s1076_s27 + $0x58] sm:$0xff] %v294_v11  ;;  %v296_v12 = vld [vmem:[%s1071_s26 + $0xc0] sm:$0xff]  ;;  %v298_v13 = vld [vmem:[%s1071_s26 + $0xd0] sm:$0xff] }
  0x18   : > { %v300_v14 = vld [vmem:[%s1071_s26 + $0xe0] sm:$0xff]  ;;  %297 = vst [vmem:[%s1076_s27 + $0x60] sm:$0xff] %v296_v12  ;;  %299 = vst [vmem:[%s1076_s27 + $0x68] sm:$0xff] %v298_v13  ;;  %v302_v15 = vld [vmem:[%s1071_s26 + $0xf0] sm:$0xff] }
  0x19   : > { %301 = vst [vmem:[%s1076_s27 + $0x70] sm:$0xff] %v300_v14  ;;  %v304_v16 = vld [vmem:[%s1071_s26 + $0x100] sm:$0xff]  ;;  %v306_v17 = vld [vmem:[%s1071_s26 + $0x110] sm:$0xff]  ;;  %303 = vst [vmem:[%s1076_s27 + $0x78] sm:$0xff] %v302_v15 }
  0x1a   : > { %305 = vst [vmem:[%s1076_s27 + $0x80] sm:$0xff] %v304_v16  ;;  %307 = vst [vmem:[%s1076_s27 + $0x88] sm:$0xff] %v306_v17  ;;  %v308_v18 = vld [vmem:[%s1071_s26 + $0x120] sm:$0xff]  ;;  %v310_v19 = vld [vmem:[%s1071_s26 + $0x130] sm:$0xff] }
  0x1b   : > { %v312_v20 = vld [vmem:[%s1071_s26 + $0x140] sm:$0xff]  ;;  %309 = vst [vmem:[%s1076_s27 + $0x90] sm:$0xff] %v308_v18  ;;  %311 = vst [vmem:[%s1076_s27 + $0x98] sm:$0xff] %v310_v19  ;;  %v314_v21 = vld [vmem:[%s1071_s26 + $0x150] sm:$0xff] }
  0x1c   : > { %313 = vst [vmem:[%s1076_s27 + $0xa0] sm:$0xff] %v312_v20  ;;  %v316_v22 = vld [vmem:[%s1071_s26 + $0x160] sm:$0xff]  ;;  %v318_v23 = vld [vmem:[%s1071_s26 + $0x170] sm:$0xff]  ;;  %315 = vst [vmem:[%s1076_s27 + $0xa8] sm:$0xff] %v314_v21 }
  0x1d   : > { %317 = vst [vmem:[%s1076_s27 + $0xb0] sm:$0xff] %v316_v22  ;;  %319 = vst [vmem:[%s1076_s27 + $0xb8] sm:$0xff] %v318_v23  ;;  %v320_v24 = vld [vmem:[%s1071_s26 + $0x180] sm:$0xff]  ;;  %v322_v25 = vld [vmem:[%s1071_s26 + $0x190] sm:$0xff] }
  0x1e   : > { %v324_v26 = vld [vmem:[%s1071_s26 + $0x1a0] sm:$0xff]  ;;  %321 = vst [vmem:[%s1076_s27 + $0xc0] sm:$0xff] %v320_v24  ;;  %323 = vst [vmem:[%s1076_s27 + $0xc8] sm:$0xff] %v322_v25  ;;  %v326_v27 = vld [vmem:[%s1071_s26 + $0x1b0] sm:$0xff] }
  0x1f   : > { %325 = vst [vmem:[%s1076_s27 + $0xd0] sm:$0xff] %v324_v26  ;;  %v328_v28 = vld [vmem:[%s1071_s26 + $0x1c0] sm:$0xff]  ;;  %v330_v29 = vld [vmem:[%s1071_s26 + $0x1d0] sm:$0xff]  ;;  %327 = vst [vmem:[%s1076_s27 + $0xd8] sm:$0xff] %v326_v27 }
  0x20   : > { %329 = vst [vmem:[%s1076_s27 + $0xe0] sm:$0xff] %v328_v28  ;;  %331 = vst [vmem:[%s1076_s27 + $0xe8] sm:$0xff] %v330_v29  ;;  %v332_v30 = vld [vmem:[%s1071_s26 + $0x1e0] sm:$0xff]  ;;  %v334_v31 = vld [vmem:[%s1071_s26 + $0x1f0] sm:$0xff] }
  0x21   : > { %333 = vst [vmem:[%s1076_s27 + $0xf0] sm:$0xff] %v332_v30  ;;  %335 = vst [vmem:[%s1076_s27 + $0xf8] sm:$0xff] %v334_v31 }
  0x22 PF: > { %p834_p6 = scmp.ge.s32.totalorder %s1006_s16, 1  ;;  %p348_p7 = scmp.lt.s32.totalorder %s1006_s16, 3 }
  0x24   : > { %p349_p8 = pnand %p834_p6, %p348_p7 }
  0x25   : > { %s355_s28 = sand.u32 (!%p349_p8), 1, %s990_s12   ;;  %v1145_v32 = vld [vmem:[%s1207_s0] sm:$0xff] (!%p349_p8)  ;;  %s836_s6 = sshll.u32 (!%p349_p8), %s998_s14, 1  ;;  %v682_v3 = vlaneseq (!%p349_p8) }
  0x26   : > { %352 = sbr.rel (%p349_p8) target bundleno = 323 (0x143), region = 66  ;;  %s835_s4 = sshll.u32 (!%p349_p8), %s355_s28, 8  ;;  %v840_v33 = vcombine.high (!%p349_p8), %v1145_v32, %v1145_v32  ;;  %v839_v2 = vcombine.low (!%p349_p8), %v1145_v32, %v1145_v32 }
  0x27   : > { %s1149_s5 = scalar_lea.vmem (!%p349_p8), [#allocation3], %s835_s4  ;;  %p408_p9 = scmp.lt.s32.totalorder (!%p349_p8), %s836_s6, 3  ;;  %v683_v4 = vshrl.u32 (!%p349_p8), %v682_v3, 7 }
  0x28   : > { %v918_v34 = vld [vmem:[%s1149_s5 + $0x4] ss:$8 sps:$4 sm:$0xff] (!%p349_p8)   ;;  %662 = vmatprep.mubr.bf16.mxu0 (!%p349_p8), %v840_v33  ;;  %v920_v35 = vld [vmem:[%s1149_s5] ss:$8 sps:$4 sm:$0xff] (!%p349_p8)   ;;  %v921_v36 = vld [vmem:[%s1149_s5 + $0x14] ss:$8 sps:$4 sm:$0xff] (!%p349_p8)  }
  0x29   : > { %630 = vmatprep.subr.bf16.mxu0 (!%p349_p8), %v918_v34  ;;  %v923_v37 = vld [vmem:[%s1149_s5 + $0x10] ss:$8 sps:$4 sm:$0xff] (!%p349_p8)   ;;  %v924_v38 = vld [vmem:[%s1149_s5 + $0x24] ss:$8 sps:$4 sm:$0xff] (!%p349_p8)   ;;  %v926_v39 = vld [vmem:[%s1149_s5 + $0x20] ss:$8 sps:$4 sm:$0xff] (!%p349_p8)  }
  0x2a   : > { %631 = vmatpush1.bf16.msra.mxu0 (!%p349_p8), %v920_v35  ;;  %v927_v40 = vld [vmem:[%s1149_s5 + $0x34] ss:$8 sps:$4 sm:$0xff] (!%p349_p8)   ;;  %v929_v41 = vld [vmem:[%s1149_s5 + $0x30] ss:$8 sps:$4 sm:$0xff] (!%p349_p8)   ;;  %v930_v42 = vld [vmem:[%s1149_s5 + $0x44] ss:$8 sps:$4 sm:$0xff] (!%p349_p8)  }
  0x2b   : > { %632 = vmatprep.subr.bf16.mxu0 (!%p349_p8), %v921_v36  ;;  %v932_v43 = vld [vmem:[%s1149_s5 + $0x40] ss:$8 sps:$4 sm:$0xff] (!%p349_p8)   ;;  %v933_v44 = vld [vmem:[%s1149_s5 + $0x54] ss:$8 sps:$4 sm:$0xff] (!%p349_p8)   ;;  %v935_v45 = vld [vmem:[%s1149_s5 + $0x50] ss:$8 sps:$4 sm:$0xff] (!%p349_p8)  }
  0x2c   : > { %v936_v46 = vld [vmem:[%s1149_s5 + $0x64] ss:$8 sps:$4 sm:$0xff] (!%p349_p8)   ;;  %v938_v47 = vld [vmem:[%s1149_s5 + $0x60] ss:$8 sps:$4 sm:$0xff] (!%p349_p8)   ;;  %v939_v48 = vld [vmem:[%s1149_s5 + $0x74] ss:$8 sps:$4 sm:$0xff] (!%p349_p8)  }
  0x2d   : > { %v941_v49 = vld [vmem:[%s1149_s5 + $0x70] ss:$8 sps:$4 sm:$0xff]   ;;  %v942_v50 = vld [vmem:[%s1149_s5 + $0x84] ss:$8 sps:$4 sm:$0xff]   ;;  %v944_v51 = vld [vmem:[%s1149_s5 + $0x80] ss:$8 sps:$4 sm:$0xff]  }
  0x2e   : > { %633 = vmatpush1.bf16.msra.mxu0 %v923_v37  ;;  %v945_v52 = vld [vmem:[%s1149_s5 + $0x94] ss:$8 sps:$4 sm:$0xff]   ;;  %v947_v53 = vld [vmem:[%s1149_s5 + $0x90] ss:$8 sps:$4 sm:$0xff]   ;;  %v948_v54 = vld [vmem:[%s1149_s5 + $0xa4] ss:$8 sps:$4 sm:$0xff]  }
  0x2f   : > { %634 = vmatprep.subr.bf16.mxu0 %v924_v38  ;;  %v950_v55 = vld [vmem:[%s1149_s5 + $0xa0] ss:$8 sps:$4 sm:$0xff]   ;;  %v951_v56 = vld [vmem:[%s1149_s5 + $0xb4] ss:$8 sps:$4 sm:$0xff]   ;;  %v953_v57 = vld [vmem:[%s1149_s5 + $0xb0] ss:$8 sps:$4 sm:$0xff]  }
  0x30   : > { %v954_v58 = vld [vmem:[%s1149_s5 + $0xc4] ss:$8 sps:$4 sm:$0xff]   ;;  %v956_v59 = vld [vmem:[%s1149_s5 + $0xc0] ss:$8 sps:$4 sm:$0xff]   ;;  %v957_v60 = vld [vmem:[%s1149_s5 + $0xd4] ss:$8 sps:$4 sm:$0xff]  }
  0x31   : > { %v959_v61 = vld [vmem:[%s1149_s5 + $0xd0] ss:$8 sps:$4 sm:$0xff]   ;;  %v960_v62 = vld [vmem:[%s1149_s5 + $0xe4] ss:$8 sps:$4 sm:$0xff]   ;;  %v962_v63 = vld [vmem:[%s1149_s5 + $0xe0] ss:$8 sps:$4 sm:$0xff]  }
  0x32   : > { %635 = vmatpush1.bf16.msra.mxu0 %v926_v39  ;;  %v963_v0 = vld [vmem:[%s1149_s5 + $0xf4] ss:$8 sps:$4 sm:$0xff]   ;;  %v965_v1 = vld [vmem:[%s1149_s5 + $0xf0] ss:$8 sps:$4 sm:$0xff]   ;;  %s1218_s6 = smov (!%p408_p9, %s836_s6), 3  ;;  %v684_v5 = vsub.s32 0, %v683_v4 }
  0x33   : > { %636 = vmatprep.subr.bf16.mxu0 %v927_v40  ;;  %s410_s9 = scalar_lea.vmem %s1209_s2, %s1218_s6  ;;  %v688_v7 = vsub.s32 1, %v683_v4  ;;  %s838_s10 = sshll.u32 %s1218_s6, 2 }
  0x34   : > { %v680_v6 = vld [vmem:[%s410_s9] sm:$0x3]  ;;  %s420_s14 = scalar_lea.vmem %s1210_s3, %s838_s10 }
  0x35   : > { %v685_v8 = vrot.slane %v680_v6, %v684_v5  ;;  %v689_v9 = vrot.slane %v680_v6, %v688_v7 }
  0x36   : > { %637 = vmatpush1.bf16.msra.mxu0 %v929_v41 }
  0x37   : > { %638 = vmatprep.subr.bf16.mxu0 %v930_v42 }
  0x3a   : > { %639 = vmatpush1.bf16.msra.mxu0 %v932_v43 }
  0x3b   : > { %640 = vmatprep.subr.bf16.mxu0 %v933_v44 }
  0x3e   : > { %641 = vmatpush1.bf16.msra.mxu0 %v935_v45 }
  0x3f   : > { %642 = vmatprep.subr.bf16.mxu0 %v936_v46 }
  0x42   : > { %643 = vmatpush1.bf16.msra.mxu0 %v938_v47 }
  0x43   : > { %644 = vmatprep.subr.bf16.mxu0 %v939_v48 }
  0x46   : > { %645 = vmatpush1.bf16.msra.mxu0 %v941_v49 }
  0x47   : > { %646 = vmatprep.subr.bf16.mxu0 %v942_v50 }
  0x4a   : > { %647 = vmatpush1.bf16.msra.mxu0 %v944_v51 }
  0x4b   : > { %648 = vmatprep.subr.bf16.mxu0 %v945_v52 }
  0x4e   : > { %649 = vmatpush1.bf16.msra.mxu0 %v947_v53 }
  0x4f   : > { %650 = vmatprep.subr.bf16.mxu0 %v948_v54 }
  0x52   : > { %651 = vmatpush1.bf16.msra.mxu0 %v950_v55 }
  0x53   : > { %652 = vmatprep.subr.bf16.mxu0 %v951_v56 }
  0x56   : > { %653 = vmatpush1.bf16.msra.mxu0 %v953_v57 }
  0x57   : > { %654 = vmatprep.subr.bf16.mxu0 %v954_v58 }
  0x5a   : > { %655 = vmatpush1.bf16.msra.mxu0 %v956_v59 }
  0x5b   : > { %656 = vmatprep.subr.bf16.mxu0 %v957_v60 }
  0x5e   : > { %657 = vmatpush1.bf16.msra.mxu0 %v959_v61 }
  0x5f   : > { %658 = vmatprep.subr.bf16.mxu0 %v960_v62 }
  0x62   : > { %659 = vmatpush1.bf16.msra.mxu0 %v962_v63 }
  0x63   : > { %660 = vmatprep.subr.bf16.mxu0 %v963_v0 }
  0x66   : > { %661 = vmatpush1.bf16.msra.mxu0 %v965_v1 }
  0x69   : > { %663 = vmatmul.mubr.bf16.vlgmr.msra.gmra.mrb[0].mxu0 %v839_v2 }
 0x13c   : > { %v664_v10 = vpop.f32.mrb[0].mxu0 }
 0x13d   : > { %v692_v11 = vadd.f32 %v685_v8, %v664_v10  ;;  %v666_v12 = vpop.f32.mrb[1].mxu0 }
 0x13e   : > { %v693_v13 = vadd.f32 %v689_v9, %v666_v12  ;;  %v668_v14 = vpop.f32.mrb[2].mxu0 }
 0x13f   : > { %v669_v15 = vpop.f32.mrb[3].mxu0 }
 0x140   : > { %v877_v16 = vpack.c.bf16 %v693_v13, %v692_v11 }
 0x142   : > { %702 = vst [vmem:[%s420_s14] sm:$0xff] %v877_v16 }
 0x143 PF: > { %s13_s16 = sadd.s32 1, %s1006_s16   ;;  %s1211_s12 = smov %s994_s13 }
 0x144   : > { %p10_p10 = scmp.ge.s32.totalorder %s13_s16, 4   ;;  %s1212_s13 = smov %s1063_s20 }
 0x145   : > { %s1213_s14 = smov %s1002_s15  ;;  %s1214_s15 = smov %s1216_s17 }
 0x146   :  { %12 = sbr.rel (!%p10_p10) target bundleno = 3 (0x3), region = 119 }

// kernel: _lambda_.39
= control target key start
LH: loop header
LB: loop body
LE: loop exit
PB: predicated region body
PF: predicated region fallthrough
CT: control target
= control target key end

     0   :  { %s1616_s15 = smov 0   ;;  %s1618_s16 = smov 0   ;;  %s1933_s0 = inlined_call_operand.vmem [shape: bf16[8,4608], index: 0, kind: input, shape index: {}]   ;;  %s1934_s1 = inlined_call_operand.vmem [shape: bf16[4608,512], index: 1, kind: input, shape index: {}]   ;;  %s1935_s2 = inlined_call_operand.vmem [shape: f32[1,512], index: 2, kind: input, shape index: {}]   ;;  %s1936_s3 = inlined_call_operand.vmem [shape: bf16[8,512], index: 3, kind: input, shape index: {}]   ;;  %s1937_s4 = inlined_call_operand.vmem [shape: bf16[8,512], index: 4, kind: output, shape index: {}]  }
   0x1   :  { %s1620_s17 = smov 0   ;;  %s1622_s18 = smov 0  }
   0x2   :  { %s1624_s19 = smov 0   ;;  %s1626_s20 = smov 0  }
   0x3   :  { %s1628_s21 = smov 0  }
   0x4 LB: > { %s26_s22 = sadd.s32 1, %s1580_s19  ;;  %s29_s23 = sadd.s32 1, %s1584_s20  ;;  %s1588_s21 = sphi %s1628_s21, %s14_s21   ;;  %s1584_s20 = sphi %s1626_s20, %s1943_s20   ;;  %s1580_s19 = sphi %s1624_s19, %s1942_s19   ;;  %s1576_s18 = sphi %s1622_s18, %s1941_s18   ;;  %s1572_s17 = sphi %s1620_s17, %s1940_s17   ;;  %s1568_s16 = sphi %s1618_s16, %s1939_s16   ;;  %s1564_s15 = sphi %s1616_s15, %s1938_s15  }
   0x5   : > { %p27_p0 = scmp.ge.s32.totalorder %s26_s22, 9  ;;  %p77_p1 = scmp.ne.s32.totalorder %s1568_s16, %s1564_s15 }
   0x6   : > { %p78_p2 = scmp.eq.s32.totalorder %s1588_s21, 0  ;;  %s70_s27 = sadd.s32 1, %s1568_s16 }
   0x7   : > { %s1945_s22 = smov (%p27_p0, %s26_s22), 0  ;;  %s1947_s23 = smov (!%p27_p0, %s29_s23), %s1584_s20 }
   0x8   : > { %p79_p3 = por %p78_p2, %p77_p1  ;;  %p31_p4 = scmp.ge.s32.totalorder %s1947_s23, 2 }
   0x9   : > { %s65_s24 = ssub.s32 %s1580_s19, %s1945_s22  ;;  %p1287_p6 = scmp.ge.s32.totalorder %s1588_s21, 18 }
   0xa   : > { %s1949_s23 = smov (%p31_p4, %s1947_s23), 0 }
   0xb   : > { %s66_s25 = ssub.s32 %s1584_s20, %s1949_s23  ;;  %185 = sbr.rel (%p1287_p6) target bundleno = 57 (0x39), region = 16 }
   0xc   : > { %s67_s26 = sor.u32 %s66_s25, %s65_s24 }
   0xd   : > { %p68_p5 = scmp.eq.s32.totalorder %s67_s26, 0 }
   0xf   : > { %s1667_s28 = scalar_select %p68_p5, %s1568_s16, %s70_s27  }
  0x12   : > { %201 = sbr.rel (!%p79_p3) target bundleno = 57 (0x39), region = 24  ;;  %s203_s29 = sand.u32 (%p79_p3), 1, %s1568_s16  }
  0x13   : > { %s1290_s30 = sshll.u32 (%p79_p3), %s1584_s20, 1  ;;  %s1288_s5 = sshll.u32 (%p79_p3), %s203_s29, 9 }
  0x14   : > { %s1375_s6 = sshll.u32 (%p79_p3), %s1580_s19, 8  ;;  %s1681_s12 = scalar_lea.vmem (%p79_p3), [#allocation3], %s1288_s5 }
  0x15   : > { %s209_s7 = sadd.s32 (%p79_p3), %s1375_s6, %s1290_s30 }
  0x16   : > { %s1292_s8 = sshll.u32 (%p79_p3), %s209_s7, 2 }
  0x17   : > { %s1676_s11 = scalar_lea.vmem (%p79_p3), %s1934_s1, %s1292_s8 }
  0x18   : > { %v365_v0 = vld [vmem:[%s1676_s11] sm:$0xff] (%p79_p3)  ;;  %v367_v1 = vld [vmem:[%s1676_s11 + $0x10] sm:$0xff] (%p79_p3) }
  0x19   : > { %v369_v2 = vld [vmem:[%s1676_s11 + $0x20] sm:$0xff]  ;;  %366 = vst [vmem:[%s1681_s12] sm:$0xff] %v365_v0  ;;  %368 = vst [vmem:[%s1681_s12 + $0x8] sm:$0xff] %v367_v1  ;;  %v371_v3 = vld [vmem:[%s1676_s11 + $0x30] sm:$0xff] }
  0x1a   : > { %370 = vst [vmem:[%s1681_s12 + $0x10] sm:$0xff] %v369_v2  ;;  %v373_v4 = vld [vmem:[%s1676_s11 + $0x40] sm:$0xff]  ;;  %v375_v5 = vld [vmem:[%s1676_s11 + $0x50] sm:$0xff]  ;;  %372 = vst [vmem:[%s1681_s12 + $0x18] sm:$0xff] %v371_v3 }
  0x1b   : > { %374 = vst [vmem:[%s1681_s12 + $0x20] sm:$0xff] %v373_v4  ;;  %376 = vst [vmem:[%s1681_s12 + $0x28] sm:$0xff] %v375_v5  ;;  %v377_v6 = vld [vmem:[%s1676_s11 + $0x60] sm:$0xff]  ;;  %v379_v7 = vld [vmem:[%s1676_s11 + $0x70] sm:$0xff] }
  0x1c   : > { %v381_v8 = vld [vmem:[%s1676_s11 + $0x80] sm:$0xff]  ;;  %378 = vst [vmem:[%s1681_s12 + $0x30] sm:$0xff] %v377_v6  ;;  %380 = vst [vmem:[%s1681_s12 + $0x38] sm:$0xff] %v379_v7  ;;  %v383_v9 = vld [vmem:[%s1676_s11 + $0x90] sm:$0xff] }
  0x1d   : > { %382 = vst [vmem:[%s1681_s12 + $0x40] sm:$0xff] %v381_v8  ;;  %v385_v10 = vld [vmem:[%s1676_s11 + $0xa0] sm:$0xff]  ;;  %v387_v11 = vld [vmem:[%s1676_s11 + $0xb0] sm:$0xff]  ;;  %384 = vst [vmem:[%s1681_s12 + $0x48] sm:$0xff] %v383_v9 }
  0x1e   : > { %386 = vst [vmem:[%s1681_s12 + $0x50] sm:$0xff] %v385_v10  ;;  %388 = vst [vmem:[%s1681_s12 + $0x58] sm:$0xff] %v387_v11  ;;  %v389_v12 = vld [vmem:[%s1676_s11 + $0xc0] sm:$0xff]  ;;  %v391_v13 = vld [vmem:[%s1676_s11 + $0xd0] sm:$0xff] }
  0x1f   : > { %v393_v14 = vld [vmem:[%s1676_s11 + $0xe0] sm:$0xff]  ;;  %390 = vst [vmem:[%s1681_s12 + $0x60] sm:$0xff] %v389_v12  ;;  %392 = vst [vmem:[%s1681_s12 + $0x68] sm:$0xff] %v391_v13  ;;  %v395_v15 = vld [vmem:[%s1676_s11 + $0xf0] sm:$0xff] }
  0x20   : > { %394 = vst [vmem:[%s1681_s12 + $0x70] sm:$0xff] %v393_v14  ;;  %v397_v16 = vld [vmem:[%s1676_s11 + $0x100] sm:$0xff]  ;;  %v399_v17 = vld [vmem:[%s1676_s11 + $0x110] sm:$0xff]  ;;  %396 = vst [vmem:[%s1681_s12 + $0x78] sm:$0xff] %v395_v15 }
  0x21   : > { %398 = vst [vmem:[%s1681_s12 + $0x80] sm:$0xff] %v397_v16  ;;  %400 = vst [vmem:[%s1681_s12 + $0x88] sm:$0xff] %v399_v17  ;;  %v401_v18 = vld [vmem:[%s1676_s11 + $0x120] sm:$0xff]  ;;  %v403_v19 = vld [vmem:[%s1676_s11 + $0x130] sm:$0xff] }
  0x22   : > { %v405_v20 = vld [vmem:[%s1676_s11 + $0x140] sm:$0xff]  ;;  %402 = vst [vmem:[%s1681_s12 + $0x90] sm:$0xff] %v401_v18  ;;  %404 = vst [vmem:[%s1681_s12 + $0x98] sm:$0xff] %v403_v19  ;;  %v407_v21 = vld [vmem:[%s1676_s11 + $0x150] sm:$0xff] }
  0x23   : > { %406 = vst [vmem:[%s1681_s12 + $0xa0] sm:$0xff] %v405_v20  ;;  %v409_v22 = vld [vmem:[%s1676_s11 + $0x160] sm:$0xff]  ;;  %v411_v23 = vld [vmem:[%s1676_s11 + $0x170] sm:$0xff]  ;;  %408 = vst [vmem:[%s1681_s12 + $0xa8] sm:$0xff] %v407_v21 }
  0x24   : > { %410 = vst [vmem:[%s1681_s12 + $0xb0] sm:$0xff] %v409_v22  ;;  %412 = vst [vmem:[%s1681_s12 + $0xb8] sm:$0xff] %v411_v23  ;;  %v413_v24 = vld [vmem:[%s1676_s11 + $0x180] sm:$0xff]  ;;  %v415_v25 = vld [vmem:[%s1676_s11 + $0x190] sm:$0xff] }
  0x25   : > { %v417_v26 = vld [vmem:[%s1676_s11 + $0x1a0] sm:$0xff]  ;;  %414 = vst [vmem:[%s1681_s12 + $0xc0] sm:$0xff] %v413_v24  ;;  %416 = vst [vmem:[%s1681_s12 + $0xc8] sm:$0xff] %v415_v25  ;;  %v419_v27 = vld [vmem:[%s1676_s11 + $0x1b0] sm:$0xff] }
  0x26   : > { %418 = vst [vmem:[%s1681_s12 + $0xd0] sm:$0xff] %v417_v26  ;;  %v421_v28 = vld [vmem:[%s1676_s11 + $0x1c0] sm:$0xff]  ;;  %v423_v29 = vld [vmem:[%s1676_s11 + $0x1d0] sm:$0xff]  ;;  %420 = vst [vmem:[%s1681_s12 + $0xd8] sm:$0xff] %v419_v27 }
  0x27   : > { %422 = vst [vmem:[%s1681_s12 + $0xe0] sm:$0xff] %v421_v28  ;;  %424 = vst [vmem:[%s1681_s12 + $0xe8] sm:$0xff] %v423_v29  ;;  %v425_v30 = vld [vmem:[%s1676_s11 + $0x1e0] sm:$0xff]  ;;  %v427_v31 = vld [vmem:[%s1676_s11 + $0x1f0] sm:$0xff] }
  0x28   : > { %v429_v32 = vld [vmem:[%s1676_s11 + $0x200] sm:$0xff]  ;;  %426 = vst [vmem:[%s1681_s12 + $0xf0] sm:$0xff] %v425_v30  ;;  %428 = vst [vmem:[%s1681_s12 + $0xf8] sm:$0xff] %v427_v31  ;;  %v431_v33 = vld [vmem:[%s1676_s11 + $0x210] sm:$0xff] }
  0x29   : > { %430 = vst [vmem:[%s1681_s12 + $0x100] sm:$0xff] %v429_v32  ;;  %v433_v34 = vld [vmem:[%s1676_s11 + $0x220] sm:$0xff]  ;;  %v435_v35 = vld [vmem:[%s1676_s11 + $0x230] sm:$0xff]  ;;  %432 = vst [vmem:[%s1681_s12 + $0x108] sm:$0xff] %v431_v33 }
  0x2a   : > { %434 = vst [vmem:[%s1681_s12 + $0x110] sm:$0xff] %v433_v34  ;;  %436 = vst [vmem:[%s1681_s12 + $0x118] sm:$0xff] %v435_v35  ;;  %v437_v36 = vld [vmem:[%s1676_s11 + $0x240] sm:$0xff]  ;;  %v439_v37 = vld [vmem:[%s1676_s11 + $0x250] sm:$0xff] }
  0x2b   : > { %v441_v38 = vld [vmem:[%s1676_s11 + $0x260] sm:$0xff]  ;;  %438 = vst [vmem:[%s1681_s12 + $0x120] sm:$0xff] %v437_v36  ;;  %440 = vst [vmem:[%s1681_s12 + $0x128] sm:$0xff] %v439_v37  ;;  %v443_v39 = vld [vmem:[%s1676_s11 + $0x270] sm:$0xff] }
  0x2c   : > { %442 = vst [vmem:[%s1681_s12 + $0x130] sm:$0xff] %v441_v38  ;;  %v445_v40 = vld [vmem:[%s1676_s11 + $0x280] sm:$0xff]  ;;  %v447_v41 = vld [vmem:[%s1676_s11 + $0x290] sm:$0xff]  ;;  %444 = vst [vmem:[%s1681_s12 + $0x138] sm:$0xff] %v443_v39 }
  0x2d   : > { %446 = vst [vmem:[%s1681_s12 + $0x140] sm:$0xff] %v445_v40  ;;  %448 = vst [vmem:[%s1681_s12 + $0x148] sm:$0xff] %v447_v41  ;;  %v449_v42 = vld [vmem:[%s1676_s11 + $0x2a0] sm:$0xff]  ;;  %v451_v43 = vld [vmem:[%s1676_s11 + $0x2b0] sm:$0xff] }
  0x2e   : > { %v453_v44 = vld [vmem:[%s1676_s11 + $0x2c0] sm:$0xff]  ;;  %450 = vst [vmem:[%s1681_s12 + $0x150] sm:$0xff] %v449_v42  ;;  %452 = vst [vmem:[%s1681_s12 + $0x158] sm:$0xff] %v451_v43  ;;  %v455_v45 = vld [vmem:[%s1676_s11 + $0x2d0] sm:$0xff] }
  0x2f   : > { %454 = vst [vmem:[%s1681_s12 + $0x160] sm:$0xff] %v453_v44  ;;  %v457_v46 = vld [vmem:[%s1676_s11 + $0x2e0] sm:$0xff]  ;;  %v459_v47 = vld [vmem:[%s1676_s11 + $0x2f0] sm:$0xff]  ;;  %456 = vst [vmem:[%s1681_s12 + $0x168] sm:$0xff] %v455_v45 }
  0x30   : > { %458 = vst [vmem:[%s1681_s12 + $0x170] sm:$0xff] %v457_v46  ;;  %460 = vst [vmem:[%s1681_s12 + $0x178] sm:$0xff] %v459_v47  ;;  %v461_v48 = vld [vmem:[%s1676_s11 + $0x300] sm:$0xff]  ;;  %v463_v49 = vld [vmem:[%s1676_s11 + $0x310] sm:$0xff] }
  0x31   : > { %v465_v50 = vld [vmem:[%s1676_s11 + $0x320] sm:$0xff]  ;;  %462 = vst [vmem:[%s1681_s12 + $0x180] sm:$0xff] %v461_v48  ;;  %464 = vst [vmem:[%s1681_s12 + $0x188] sm:$0xff] %v463_v49  ;;  %v467_v51 = vld [vmem:[%s1676_s11 + $0x330] sm:$0xff] }
  0x32   : > { %466 = vst [vmem:[%s1681_s12 + $0x190] sm:$0xff] %v465_v50  ;;  %v469_v52 = vld [vmem:[%s1676_s11 + $0x340] sm:$0xff]  ;;  %v471_v53 = vld [vmem:[%s1676_s11 + $0x350] sm:$0xff]  ;;  %468 = vst [vmem:[%s1681_s12 + $0x198] sm:$0xff] %v467_v51 }
  0x33   : > { %470 = vst [vmem:[%s1681_s12 + $0x1a0] sm:$0xff] %v469_v52  ;;  %472 = vst [vmem:[%s1681_s12 + $0x1a8] sm:$0xff] %v471_v53  ;;  %v473_v54 = vld [vmem:[%s1676_s11 + $0x360] sm:$0xff]  ;;  %v475_v55 = vld [vmem:[%s1676_s11 + $0x370] sm:$0xff] }
  0x34   : > { %v477_v56 = vld [vmem:[%s1676_s11 + $0x380] sm:$0xff]  ;;  %474 = vst [vmem:[%s1681_s12 + $0x1b0] sm:$0xff] %v473_v54  ;;  %476 = vst [vmem:[%s1681_s12 + $0x1b8] sm:$0xff] %v475_v55  ;;  %v479_v57 = vld [vmem:[%s1676_s11 + $0x390] sm:$0xff] }
  0x35   : > { %478 = vst [vmem:[%s1681_s12 + $0x1c0] sm:$0xff] %v477_v56  ;;  %v481_v58 = vld [vmem:[%s1676_s11 + $0x3a0] sm:$0xff]  ;;  %v483_v59 = vld [vmem:[%s1676_s11 + $0x3b0] sm:$0xff]  ;;  %480 = vst [vmem:[%s1681_s12 + $0x1c8] sm:$0xff] %v479_v57 }
  0x36   : > { %482 = vst [vmem:[%s1681_s12 + $0x1d0] sm:$0xff] %v481_v58  ;;  %484 = vst [vmem:[%s1681_s12 + $0x1d8] sm:$0xff] %v483_v59  ;;  %v485_v60 = vld [vmem:[%s1676_s11 + $0x3c0] sm:$0xff]  ;;  %v487_v61 = vld [vmem:[%s1676_s11 + $0x3d0] sm:$0xff] }
  0x37   : > { %v489_v62 = vld [vmem:[%s1676_s11 + $0x3e0] sm:$0xff]  ;;  %486 = vst [vmem:[%s1681_s12 + $0x1e0] sm:$0xff] %v485_v60  ;;  %488 = vst [vmem:[%s1681_s12 + $0x1e8] sm:$0xff] %v487_v61  ;;  %v491_v63 = vld [vmem:[%s1676_s11 + $0x3f0] sm:$0xff] }
  0x38   : > { %490 = vst [vmem:[%s1681_s12 + $0x1f0] sm:$0xff] %v489_v62  ;;  %492 = vst [vmem:[%s1681_s12 + $0x1f8] sm:$0xff] %v491_v63 }
  0x39 PF: > { %p1293_p7 = scmp.ge.s32.totalorder %s1588_s21, 1  ;;  %p518_p8 = scmp.lt.s32.totalorder %s1588_s21, 19 }
  0x3b   : > { %p519_p9 = pnand %p1293_p7, %p518_p8 }
  0x3c   : > { %s525_s13 = sand.u32 (!%p519_p9), 1, %s1564_s15   ;;  %s1295_s14 = sshll.u32 (!%p519_p9), %s1572_s17, 2 }
  0x3d   : > { %522 = sbr.rel (%p519_p9) target bundleno = 379 (0x17b), region = 70  ;;  %s1294_s24 = sshll.u32 (!%p519_p9), %s525_s13, 9 }
  0x3e   : > { %p579_p10 = scmp.lt.s32.totalorder (!%p519_p9), %s1295_s14, 35  ;;  %s1297_s25 = sshll.u32 (!%p519_p9), %s1576_s18, 1 }
  0x3f   : > { %p589_p11 = scmp.lt.s32.totalorder (!%p519_p9), %s1297_s25, 3  ;;  %s1835_s13 = scalar_lea.vmem (!%p519_p9), [#allocation3], %s1294_s24 }
  0x40   : > { %p1302_p12 = scmp.ne.s32.totalorder (!%p519_p9), %s1572_s17, 0 }
  0x44   : > { %s1951_s14 = smov (!%p579_p10, %s1295_s14), 35  ;;  %s1953_s25 = smov (!%p589_p11, %s1297_s25), 3 }
  0x45   : > { %s1296_s26 = sshll.u32 %s1951_s14, 2  ;;  %s591_s15 = scalar_lea.vmem %s1935_s2, %s1953_s25  ;;  %v1590_v0 = vmov (!%p1302_p12), 0.0  }
  0x46   : > { %s1816_s30 = scalar_lea.vmem %s1933_s0, %s1296_s26  ;;  %s1299_s7 = sshll.u32 %s1953_s25, 2  ;;  %617 = vst [vmem:[#allocation2] sm:$0xff] (!%p1302_p12), %v1590_v0  ;;  %618 = vst [vmem:[#allocation2 + $0x8] sm:$0xff] (!%p1302_p12), %v1590_v0 }
  0x47   : > { %s1828_s18 = scalar_lea.vmem %s1936_s3, %s1299_s7  ;;  %s1833_s12 = scalar_lea.vmem %s1937_s4, %s1299_s7 }
  0x48   : > { %616 = sbr.rel (%p1302_p12) target bundleno = 79 (0x4f), region = 78 }
  0x4f PF: > { %v1434_v1 = vld [vmem:[%s1835_s13 + $0x4] ss:$8 sps:$4 sm:$0xff]   ;;  %v1438_v3 = vld [vmem:[%s1835_s13] ss:$8 sps:$4 sm:$0xff]   ;;  %v1440_v5 = vld [vmem:[%s1835_s13 + $0x14] ss:$8 sps:$4 sm:$0xff]  }
  0x50   : > { %v1436_v2 = vld [vmem:[%s1835_s13 + $0x104] ss:$8 sps:$4 sm:$0xff]   ;;  %1021 = vmatprep.subr.bf16.mxu0 %v1434_v1  ;;  %v1439_v4 = vld [vmem:[%s1835_s13 + $0x100] ss:$8 sps:$4 sm:$0xff]   ;;  %v1442_v6 = vld [vmem:[%s1835_s13 + $0x114] ss:$8 sps:$4 sm:$0xff]  }
  0x51   : > { %1062 = vmatprep.subr.bf16.mxu1 %v1436_v2  ;;  %1022 = vmatpush1.bf16.msra.mxu0 %v1438_v3  ;;  %v1444_v7 = vld [vmem:[%s1835_s13 + $0x10] ss:$8 sps:$4 sm:$0xff]   ;;  %v1446_v9 = vld [vmem:[%s1835_s13 + $0x24] ss:$8 sps:$4 sm:$0xff]   ;;  %v1450_v11 = vld [vmem:[%s1835_s13 + $0x20] ss:$8 sps:$4 sm:$0xff]  }
  0x52   : > { %1063 = vmatpush1.bf16.msra.mxu1 %v1439_v4  ;;  %1023 = vmatprep.subr.bf16.mxu0 %v1440_v5  ;;  %v1445_v8 = vld [vmem:[%s1835_s13 + $0x110] ss:$8 sps:$4 sm:$0xff]   ;;  %v1448_v10 = vld [vmem:[%s1835_s13 + $0x124] ss:$8 sps:$4 sm:$0xff]   ;;  %v1451_v12 = vld [vmem:[%s1835_s13 + $0x120] ss:$8 sps:$4 sm:$0xff]  }
  0x53   : > { %1064 = vmatprep.subr.bf16.mxu1 %v1442_v6  ;;  %v1452_v13 = vld [vmem:[%s1835_s13 + $0x34] ss:$8 sps:$4 sm:$0xff]   ;;  %v1456_v15 = vld [vmem:[%s1835_s13 + $0x30] ss:$8 sps:$4 sm:$0xff]   ;;  %v1458_v17 = vld [vmem:[%s1835_s13 + $0x44] ss:$8 sps:$4 sm:$0xff]  }
  0x54   : > { %v1454_v14 = vld [vmem:[%s1835_s13 + $0x134] ss:$8 sps:$4 sm:$0xff]   ;;  %v1457_v16 = vld [vmem:[%s1835_s13 + $0x130] ss:$8 sps:$4 sm:$0xff]   ;;  %v1460_v18 = vld [vmem:[%s1835_s13 + $0x144] ss:$8 sps:$4 sm:$0xff]  }
  0x55   : > { %1024 = vmatpush1.bf16.msra.mxu0 %v1444_v7  ;;  %v1462_v19 = vld [vmem:[%s1835_s13 + $0x40] ss:$8 sps:$4 sm:$0xff]   ;;  %v1464_v21 = vld [vmem:[%s1835_s13 + $0x54] ss:$8 sps:$4 sm:$0xff]   ;;  %v1468_v23 = vld [vmem:[%s1835_s13 + $0x50] ss:$8 sps:$4 sm:$0xff]  }
  0x56   : > { %1065 = vmatpush1.bf16.msra.mxu1 %v1445_v8  ;;  %1025 = vmatprep.subr.bf16.mxu0 %v1446_v9  ;;  %v1463_v20 = vld [vmem:[%s1835_s13 + $0x140] ss:$8 sps:$4 sm:$0xff]   ;;  %v1466_v22 = vld [vmem:[%s1835_s13 + $0x154] ss:$8 sps:$4 sm:$0xff]   ;;  %v1469_v24 = vld [vmem:[%s1835_s13 + $0x150] ss:$8 sps:$4 sm:$0xff]  }
  0x57   : > { %1066 = vmatprep.subr.bf16.mxu1 %v1448_v10  ;;  %v1470_v25 = vld [vmem:[%s1835_s13 + $0x64] ss:$8 sps:$4 sm:$0xff]   ;;  %v1474_v27 = vld [vmem:[%s1835_s13 + $0x60] ss:$8 sps:$4 sm:$0xff]   ;;  %v1476_v29 = vld [vmem:[%s1835_s13 + $0x74] ss:$8 sps:$4 sm:$0xff]  }
  0x58   : > { %v1472_v26 = vld [vmem:[%s1835_s13 + $0x164] ss:$8 sps:$4 sm:$0xff]   ;;  %v1475_v28 = vld [vmem:[%s1835_s13 + $0x160] ss:$8 sps:$4 sm:$0xff]   ;;  %v1478_v30 = vld [vmem:[%s1835_s13 + $0x174] ss:$8 sps:$4 sm:$0xff]  }
  0x59   : > { %1026 = vmatpush1.bf16.msra.mxu0 %v1450_v11  ;;  %v1480_v31 = vld [vmem:[%s1835_s13 + $0x70] ss:$8 sps:$4 sm:$0xff]   ;;  %v1482_v33 = vld [vmem:[%s1835_s13 + $0x84] ss:$8 sps:$4 sm:$0xff]   ;;  %v1486_v35 = vld [vmem:[%s1835_s13 + $0x80] ss:$8 sps:$4 sm:$0xff]  }
  0x5a   : > { %1067 = vmatpush1.bf16.msra.mxu1 %v1451_v12  ;;  %1027 = vmatprep.subr.bf16.mxu0 %v1452_v13  ;;  %v1481_v32 = vld [vmem:[%s1835_s13 + $0x170] ss:$8 sps:$4 sm:$0xff]   ;;  %v1484_v34 = vld [vmem:[%s1835_s13 + $0x184] ss:$8 sps:$4 sm:$0xff]   ;;  %v1487_v36 = vld [vmem:[%s1835_s13 + $0x180] ss:$8 sps:$4 sm:$0xff]  }
  0x5b   : > { %1068 = vmatprep.subr.bf16.mxu1 %v1454_v14  ;;  %v1488_v37 = vld [vmem:[%s1835_s13 + $0x94] ss:$8 sps:$4 sm:$0xff]   ;;  %v1492_v39 = vld [vmem:[%s1835_s13 + $0x90] ss:$8 sps:$4 sm:$0xff]   ;;  %v1494_v41 = vld [vmem:[%s1835_s13 + $0xa4] ss:$8 sps:$4 sm:$0xff]  }
  0x5c   : > { %v1490_v38 = vld [vmem:[%s1835_s13 + $0x194] ss:$8 sps:$4 sm:$0xff]   ;;  %v1493_v40 = vld [vmem:[%s1835_s13 + $0x190] ss:$8 sps:$4 sm:$0xff]   ;;  %v1496_v42 = vld [vmem:[%s1835_s13 + $0x1a4] ss:$8 sps:$4 sm:$0xff]  }
  0x5d   : > { %1028 = vmatpush1.bf16.msra.mxu0 %v1456_v15  ;;  %v1498_v43 = vld [vmem:[%s1835_s13 + $0xa0] ss:$8 sps:$4 sm:$0xff]   ;;  %v1500_v45 = vld [vmem:[%s1835_s13 + $0xb4] ss:$8 sps:$4 sm:$0xff]   ;;  %v1504_v50 = vld [vmem:[%s1835_s13 + $0xb0] ss:$8 sps:$4 sm:$0xff]  }
  0x5e   : > { %1069 = vmatpush1.bf16.msra.mxu1 %v1457_v16  ;;  %1029 = vmatprep.subr.bf16.mxu0 %v1458_v17  ;;  %v1499_v44 = vld [vmem:[%s1835_s13 + $0x1a0] ss:$8 sps:$4 sm:$0xff]   ;;  %v1502_v46 = vld [vmem:[%s1835_s13 + $0x1b4] ss:$8 sps:$4 sm:$0xff]   ;;  %v1505_v51 = vld [vmem:[%s1835_s13 + $0x1b0] ss:$8 sps:$4 sm:$0xff]  }
  0x5f   : > { %1070 = vmatprep.subr.bf16.mxu1 %v1460_v18  ;;  %v621_v47 = vld [vmem:[%s1816_s30] sm:$0xff]  ;;  %v622_v49 = vld [vmem:[%s1816_s30 + $0x8] sm:$0xff]  ;;  %v1506_v53 = vld [vmem:[%s1835_s13 + $0xc4] ss:$8 sps:$4 sm:$0xff]   ;;  %p1371_p13 = scmp.ne.s32.totalorder %s1572_s17, 8 }
  0x60   : > { %v1304_v48 = vcombine.high %v621_v47, %v621_v47  ;;  %v1306_v52 = vcombine.high %v622_v49, %v622_v49  ;;  %v1508_v54 = vld [vmem:[%s1835_s13 + $0x1c4] ss:$8 sps:$4 sm:$0xff]   ;;  %v1510_v55 = vld [vmem:[%s1835_s13 + $0xc0] ss:$8 sps:$4 sm:$0xff]   ;;  %v1512_v57 = vld [vmem:[%s1835_s13 + $0xd4] ss:$8 sps:$4 sm:$0xff]   ;;  %v1303_v5 = vcombine.low %v621_v47, %v621_v47  ;;  %v1305_v6 = vcombine.low %v622_v49, %v622_v49 }
  0x61   : > { %1030 = vmatpush1.bf16.msra.mxu0 %v1462_v19  ;;  %v1511_v56 = vld [vmem:[%s1835_s13 + $0x1c0] ss:$8 sps:$4 sm:$0xff]   ;;  %v1514_v58 = vld [vmem:[%s1835_s13 + $0x1d4] ss:$8 sps:$4 sm:$0xff]   ;;  %v1516_v59 = vld [vmem:[%s1835_s13 + $0xd0] ss:$8 sps:$4 sm:$0xff]  }
  0x62   : > { %1071 = vmatpush1.bf16.msra.mxu1 %v1463_v20  ;;  %1031 = vmatprep.subr.bf16.mxu0 %v1464_v21  ;;  %v1517_v60 = vld [vmem:[%s1835_s13 + $0x1d0] ss:$8 sps:$4 sm:$0xff]   ;;  %v1518_v61 = vld [vmem:[%s1835_s13 + $0xe4] ss:$8 sps:$4 sm:$0xff]   ;;  %v1522_v63 = vld [vmem:[%s1835_s13 + $0xe0] ss:$8 sps:$4 sm:$0xff]   ;;  %v1115_v21 = vlaneseq (!%p1371_p13) }
  0x63   : > { %1072 = vmatprep.subr.bf16.mxu1 %v1466_v22  ;;  %1053 = vmatprep.mubr.bf16.mxu0 %v1304_v48  ;;  %v1520_v62 = vld [vmem:[%s1835_s13 + $0x1e4] ss:$8 sps:$4 sm:$0xff]   ;;  %v1523_v0 = vld [vmem:[%s1835_s13 + $0x1e0] ss:$8 sps:$4 sm:$0xff]   ;;  %v1524_v1 = vld [vmem:[%s1835_s13 + $0xf4] ss:$8 sps:$4 sm:$0xff]  }
  0x64   : > { %1094 = vmatprep.mubr.bf16.mxu1 %v1306_v52  ;;  %v1526_v2 = vld [vmem:[%s1835_s13 + $0x1f4] ss:$8 sps:$4 sm:$0xff]   ;;  %v1528_v3 = vld [vmem:[%s1835_s13 + $0xf0] ss:$8 sps:$4 sm:$0xff]   ;;  %v1116_v22 = vshrl.u32 (!%p1371_p13), %v1115_v21, 7 }
  0x65   : > { %1032 = vmatpush1.bf16.msra.mxu0 %v1468_v23  ;;  %v1529_v4 = vld [vmem:[%s1835_s13 + $0x1f0] ss:$8 sps:$4 sm:$0xff]  }
  0x66   : > { %1073 = vmatpush1.bf16.msra.mxu1 %v1469_v24  ;;  %1033 = vmatprep.subr.bf16.mxu0 %v1470_v25  ;;  %v619_v8 = vld [vmem:[#allocation2] sm:$0xff]  ;;  %v620_v12 = vld [vmem:[#allocation2 + $0x8] sm:$0xff]  ;;  %v1117_v25 = vsub.s32 (!%p1371_p13), 0, %v1116_v22 }
  0x67   : > { %1074 = vmatprep.subr.bf16.mxu1 %v1472_v26  ;;  %v1113_v23 = vld [vmem:[%s591_s15] sm:$0x3] (!%p1371_p13)  ;;  %v1121_v26 = vsub.s32 (!%p1371_p13), 1, %v1116_v22 }
  0x68   : > { %v1127_v24 = vld [vmem:[%s1828_s18] sm:$0xff] (!%p1371_p13) }
  0x69   : > { %1034 = vmatpush1.bf16.msra.mxu0 %v1474_v27 }
  0x6a   : > { %1075 = vmatpush1.bf16.msra.mxu1 %v1475_v28  ;;  %1035 = vmatprep.subr.bf16.mxu0 %v1476_v29  ;;  %v1118_v29 = vrot.slane (!%p1371_p13), %v1113_v23, %v1117_v25 }
  0x6b   : > { %1076 = vmatprep.subr.bf16.mxu1 %v1478_v30  ;;  %v1122_v30 = vrot.slane (!%p1371_p13), %v1113_v23, %v1121_v26 }
  0x6d   : > { %1036 = vmatpush1.bf16.msra.mxu0 %v1480_v31  ;;  %v1128_v31 = vunpack.c.l.bf16 (!%p1371_p13), %v1127_v24 }
  0x6e   : > { %1077 = vmatpush1.bf16.msra.mxu1 %v1481_v32  ;;  %1037 = vmatprep.subr.bf16.mxu0 %v1482_v33  ;;  %v1129_v32 = vunpack.c.h.bf16 (!%p1371_p13), %v1127_v24 }
  0x6f   : > { %1078 = vmatprep.subr.bf16.mxu1 %v1484_v34 }
  0x71   : > { %1038 = vmatpush1.bf16.msra.mxu0 %v1486_v35 }
  0x72   : > { %1079 = vmatpush1.bf16.msra.mxu1 %v1487_v36  ;;  %1039 = vmatprep.subr.bf16.mxu0 %v1488_v37 }
  0x73   : > { %1080 = vmatprep.subr.bf16.mxu1 %v1490_v38 }
  0x75   : > { %1040 = vmatpush1.bf16.msra.mxu0 %v1492_v39 }
  0x76   : > { %1081 = vmatpush1.bf16.msra.mxu1 %v1493_v40  ;;  %1041 = vmatprep.subr.bf16.mxu0 %v1494_v41 }
  0x77   : > { %1082 = vmatprep.subr.bf16.mxu1 %v1496_v42 }
  0x79   : > { %1042 = vmatpush1.bf16.msra.mxu0 %v1498_v43 }
  0x7a   : > { %1083 = vmatpush1.bf16.msra.mxu1 %v1499_v44  ;;  %1043 = vmatprep.subr.bf16.mxu0 %v1500_v45 }
  0x7b   : > { %1084 = vmatprep.subr.bf16.mxu1 %v1502_v46 }
  0x7d   : > { %1044 = vmatpush1.bf16.msra.mxu0 %v1504_v50 }
  0x7e   : > { %1085 = vmatpush1.bf16.msra.mxu1 %v1505_v51  ;;  %1045 = vmatprep.subr.bf16.mxu0 %v1506_v53 }
  0x7f   : > { %1086 = vmatprep.subr.bf16.mxu1 %v1508_v54 }
  0x81   : > { %1046 = vmatpush1.bf16.msra.mxu0 %v1510_v55 }
  0x82   : > { %1087 = vmatpush1.bf16.msra.mxu1 %v1511_v56  ;;  %1047 = vmatprep.subr.bf16.mxu0 %v1512_v57 }
  0x83   : > { %1088 = vmatprep.subr.bf16.mxu1 %v1514_v58 }
  0x85   : > { %1048 = vmatpush1.bf16.msra.mxu0 %v1516_v59 }
  0x86   : > { %1089 = vmatpush1.bf16.msra.mxu1 %v1517_v60  ;;  %1049 = vmatprep.subr.bf16.mxu0 %v1518_v61 }
  0x87   : > { %1090 = vmatprep.subr.bf16.mxu1 %v1520_v62 }
  0x89   : > { %1050 = vmatpush1.bf16.msra.mxu0 %v1522_v63 }
  0x8a   : > { %1091 = vmatpush1.bf16.msra.mxu1 %v1523_v0  ;;  %1051 = vmatprep.subr.bf16.mxu0 %v1524_v1 }
  0x8b   : > { %1092 = vmatprep.subr.bf16.mxu1 %v1526_v2 }
  0x8d   : > { %1052 = vmatpush1.bf16.msra.mxu0 %v1528_v3 }
  0x8e   : > { %1093 = vmatpush1.bf16.msra.mxu1 %v1529_v4 }
  0x90   : > { %1054 = vmatmul.mubr.bf16.vlgmr.msra.gmra.mrb[0].mxu0 %v1303_v5 }
  0x91   : > { %1095 = vmatmul.mubr.bf16.vlgmr.msra.gmra.mrb[0].mxu1 %v1305_v6 }
 0x163   : > { %v1055_v7 = vpop.f32.mrb[0].mxu0 }
 0x164   : > { %v1096_v9 = vpop.f32.mrb[0].mxu1  ;;  %v1057_v11 = vpop.f32.mrb[1].mxu0  ;;  %1110 = sbr.rel (%p1371_p13) target bundleno = 379 (0x17b), region = 82 }
 0x165   : > { %v1097_v10 = vadd.f32 %v1096_v9, %v1055_v7  ;;  %v1098_v13 = vpop.f32.mrb[1].mxu1  ;;  %v1059_v15 = vpop.f32.mrb[2].mxu0 }
 0x166   : > { %v1099_v14 = vadd.f32 %v1098_v13, %v1057_v11  ;;  %v1100_v16 = vpop.f32.mrb[2].mxu1  ;;  %v1060_v18 = vpop.f32.mrb[3].mxu0 }
 0x167   : > { %v1103_v17 = vadd.f32 %v1097_v10, %v619_v8  ;;  %v1101_v19 = vpop.f32.mrb[3].mxu1 }
 0x168   : > { %v1104_v20 = vadd.f32 %v1099_v14, %v620_v12 }
 0x169   : > { %1105 = vst [vmem:[#allocation2] sm:$0xff] %v1103_v17 }
 0x16a   : > { %1106 = vst [vmem:[#allocation2 + $0x8] sm:$0xff] %v1104_v20 }
 0x170   : > { %v1111_v27 = vld [vmem:[#allocation2] sm:$0xff] }
 0x171   : > { %v1112_v28 = vld [vmem:[#allocation2 + $0x8] sm:$0xff]  ;;  %v1125_v33 = vadd.f32 %v1118_v29, %v1111_v27 }
 0x172   : > { %v1126_v34 = vadd.f32 %v1122_v30, %v1112_v28 }
 0x173   : > { %v1130_v35 = vadd.f32 %v1128_v31, %v1125_v33 }
 0x174   : > { %v1131_v36 = vadd.f32 %v1129_v32, %v1126_v34 }
 0x175   : > { %v1132_v37 = vmax.f32 %v1130_v35, 0.0 }
 0x176   : > { %v1133_v38 = vmax.f32 %v1131_v36, 0.0 }
 0x178   : > { %v1376_v39 = vpack.c.bf16 %v1133_v38, %v1132_v37 }
 0x17a   : > { %1142 = vst [vmem:[%s1833_s12] sm:$0xff] %v1376_v39 }
 0x17b PF: > { %s14_s21 = sadd.s32 1, %s1588_s21   ;;  %s1938_s15 = smov %s1568_s16 }
 0x17c   : > { %p11_p0 = scmp.ge.s32.totalorder %s14_s21, 20   ;;  %s1939_s16 = smov %s1667_s28 }
 0x17d   : > { %s1940_s17 = smov %s1580_s19  ;;  %s1941_s18 = smov %s1584_s20 }
 0x17e   : > { %s1942_s19 = smov %s1945_s22  ;;  %s1943_s20 = smov %s1949_s23 }
 0x17f   :  { %13 = sbr.rel (!%p11_p0) target bundleno = 4 (0x4), region = 126 }

// kernel: _lambda_.40
= control target key start
LH: loop header
LB: loop body
LE: loop exit
PB: predicated region body
PF: predicated region fallthrough
CT: control target
= control target key end

     0   :  { %s1523_s12 = smov 0   ;;  %s1525_s13 = smov 0   ;;  %s1834_s0 = inlined_call_operand.vmem [shape: bf16[8,4608], index: 0, kind: input, shape index: {}]   ;;  %s1835_s1 = inlined_call_operand.vmem [shape: bf16[4608,512], index: 1, kind: input, shape index: {}]   ;;  %s1836_s2 = inlined_call_operand.vmem [shape: f32[1,512], index: 2, kind: input, shape index: {}]   ;;  %s1837_s3 = inlined_call_operand.vmem [shape: bf16[8,512], index: 3, kind: output, shape index: {}]  }
   0x1   :  { %s1527_s14 = smov 0   ;;  %s1529_s15 = smov 0  }
   0x2   :  { %s1531_s16 = smov 0   ;;  %s1533_s17 = smov 0  }
   0x3   :  { %s1535_s18 = smov 0  }
   0x4 LB: > { %s25_s19 = sadd.s32 1, %s1492_s16  ;;  %s28_s20 = sadd.s32 1, %s1496_s17  ;;  %s1500_s18 = sphi %s1535_s18, %s13_s18   ;;  %s1496_s17 = sphi %s1533_s17, %s1843_s17   ;;  %s1492_s16 = sphi %s1531_s16, %s1842_s16   ;;  %s1488_s15 = sphi %s1529_s15, %s1841_s15   ;;  %s1484_s14 = sphi %s1527_s14, %s1840_s14   ;;  %s1480_s13 = sphi %s1525_s13, %s1839_s13   ;;  %s1476_s12 = sphi %s1523_s12, %s1838_s12  }
   0x5   : > { %p26_p0 = scmp.ge.s32.totalorder %s25_s19, 9  ;;  %p76_p1 = scmp.ne.s32.totalorder %s1480_s13, %s1476_s12 }
   0x6   : > { %p77_p2 = scmp.eq.s32.totalorder %s1500_s18, 0  ;;  %s69_s24 = sadd.s32 1, %s1480_s13 }
   0x7   : > { %s1845_s19 = smov (%p26_p0, %s25_s19), 0  ;;  %s1847_s20 = smov (!%p26_p0, %s28_s20), %s1496_s17 }
   0x8   : > { %p78_p3 = por %p77_p2, %p76_p1  ;;  %p30_p4 = scmp.ge.s32.totalorder %s1847_s20, 2 }
   0x9   : > { %s64_s21 = ssub.s32 %s1492_s16, %s1845_s19  ;;  %p1201_p6 = scmp.ge.s32.totalorder %s1500_s18, 18 }
   0xa   : > { %s1849_s20 = smov (%p30_p4, %s1847_s20), 0 }
   0xb   : > { %s65_s22 = ssub.s32 %s1496_s17, %s1849_s20  ;;  %156 = sbr.rel (%p1201_p6) target bundleno = 57 (0x39), region = 16 }
   0xc   : > { %s66_s23 = sor.u32 %s65_s22, %s64_s21 }
   0xd   : > { %p67_p5 = scmp.eq.s32.totalorder %s66_s23, 0 }
   0xf   : > { %s1574_s25 = scalar_select %p67_p5, %s1480_s13, %s69_s24  }
  0x12   : > { %172 = sbr.rel (!%p78_p3) target bundleno = 57 (0x39), region = 24  ;;  %s174_s26 = sand.u32 (%p78_p3), 1, %s1480_s13  }
  0x13   : > { %s1204_s27 = sshll.u32 (%p78_p3), %s1496_s17, 1  ;;  %s1202_s28 = sshll.u32 (%p78_p3), %s174_s26, 9 }
  0x14   : > { %s1287_s29 = sshll.u32 (%p78_p3), %s1492_s16, 8  ;;  %s1588_s8 = scalar_lea.vmem (%p78_p3), [#allocation3], %s1202_s28 }
  0x15   : > { %s180_s30 = sadd.s32 (%p78_p3), %s1287_s29, %s1204_s27 }
  0x16   : > { %s1206_s4 = sshll.u32 (%p78_p3), %s180_s30, 2 }
  0x17   : > { %s1583_s7 = scalar_lea.vmem (%p78_p3), %s1835_s1, %s1206_s4 }
  0x18   : > { %v336_v0 = vld [vmem:[%s1583_s7] sm:$0xff] (%p78_p3)  ;;  %v338_v1 = vld [vmem:[%s1583_s7 + $0x10] sm:$0xff] (%p78_p3) }
  0x19   : > { %v340_v2 = vld [vmem:[%s1583_s7 + $0x20] sm:$0xff]  ;;  %337 = vst [vmem:[%s1588_s8] sm:$0xff] %v336_v0  ;;  %339 = vst [vmem:[%s1588_s8 + $0x8] sm:$0xff] %v338_v1  ;;  %v342_v3 = vld [vmem:[%s1583_s7 + $0x30] sm:$0xff] }
  0x1a   : > { %341 = vst [vmem:[%s1588_s8 + $0x10] sm:$0xff] %v340_v2  ;;  %v344_v4 = vld [vmem:[%s1583_s7 + $0x40] sm:$0xff]  ;;  %v346_v5 = vld [vmem:[%s1583_s7 + $0x50] sm:$0xff]  ;;  %343 = vst [vmem:[%s1588_s8 + $0x18] sm:$0xff] %v342_v3 }
  0x1b   : > { %345 = vst [vmem:[%s1588_s8 + $0x20] sm:$0xff] %v344_v4  ;;  %347 = vst [vmem:[%s1588_s8 + $0x28] sm:$0xff] %v346_v5  ;;  %v348_v6 = vld [vmem:[%s1583_s7 + $0x60] sm:$0xff]  ;;  %v350_v7 = vld [vmem:[%s1583_s7 + $0x70] sm:$0xff] }
  0x1c   : > { %v352_v8 = vld [vmem:[%s1583_s7 + $0x80] sm:$0xff]  ;;  %349 = vst [vmem:[%s1588_s8 + $0x30] sm:$0xff] %v348_v6  ;;  %351 = vst [vmem:[%s1588_s8 + $0x38] sm:$0xff] %v350_v7  ;;  %v354_v9 = vld [vmem:[%s1583_s7 + $0x90] sm:$0xff] }
  0x1d   : > { %353 = vst [vmem:[%s1588_s8 + $0x40] sm:$0xff] %v352_v8  ;;  %v356_v10 = vld [vmem:[%s1583_s7 + $0xa0] sm:$0xff]  ;;  %v358_v11 = vld [vmem:[%s1583_s7 + $0xb0] sm:$0xff]  ;;  %355 = vst [vmem:[%s1588_s8 + $0x48] sm:$0xff] %v354_v9 }
  0x1e   : > { %357 = vst [vmem:[%s1588_s8 + $0x50] sm:$0xff] %v356_v10  ;;  %359 = vst [vmem:[%s1588_s8 + $0x58] sm:$0xff] %v358_v11  ;;  %v360_v12 = vld [vmem:[%s1583_s7 + $0xc0] sm:$0xff]  ;;  %v362_v13 = vld [vmem:[%s1583_s7 + $0xd0] sm:$0xff] }
  0x1f   : > { %v364_v14 = vld [vmem:[%s1583_s7 + $0xe0] sm:$0xff]  ;;  %361 = vst [vmem:[%s1588_s8 + $0x60] sm:$0xff] %v360_v12  ;;  %363 = vst [vmem:[%s1588_s8 + $0x68] sm:$0xff] %v362_v13  ;;  %v366_v15 = vld [vmem:[%s1583_s7 + $0xf0] sm:$0xff] }
  0x20   : > { %365 = vst [vmem:[%s1588_s8 + $0x70] sm:$0xff] %v364_v14  ;;  %v368_v16 = vld [vmem:[%s1583_s7 + $0x100] sm:$0xff]  ;;  %v370_v17 = vld [vmem:[%s1583_s7 + $0x110] sm:$0xff]  ;;  %367 = vst [vmem:[%s1588_s8 + $0x78] sm:$0xff] %v366_v15 }
  0x21   : > { %369 = vst [vmem:[%s1588_s8 + $0x80] sm:$0xff] %v368_v16  ;;  %371 = vst [vmem:[%s1588_s8 + $0x88] sm:$0xff] %v370_v17  ;;  %v372_v18 = vld [vmem:[%s1583_s7 + $0x120] sm:$0xff]  ;;  %v374_v19 = vld [vmem:[%s1583_s7 + $0x130] sm:$0xff] }
  0x22   : > { %v376_v20 = vld [vmem:[%s1583_s7 + $0x140] sm:$0xff]  ;;  %373 = vst [vmem:[%s1588_s8 + $0x90] sm:$0xff] %v372_v18  ;;  %375 = vst [vmem:[%s1588_s8 + $0x98] sm:$0xff] %v374_v19  ;;  %v378_v21 = vld [vmem:[%s1583_s7 + $0x150] sm:$0xff] }
  0x23   : > { %377 = vst [vmem:[%s1588_s8 + $0xa0] sm:$0xff] %v376_v20  ;;  %v380_v22 = vld [vmem:[%s1583_s7 + $0x160] sm:$0xff]  ;;  %v382_v23 = vld [vmem:[%s1583_s7 + $0x170] sm:$0xff]  ;;  %379 = vst [vmem:[%s1588_s8 + $0xa8] sm:$0xff] %v378_v21 }
  0x24   : > { %381 = vst [vmem:[%s1588_s8 + $0xb0] sm:$0xff] %v380_v22  ;;  %383 = vst [vmem:[%s1588_s8 + $0xb8] sm:$0xff] %v382_v23  ;;  %v384_v24 = vld [vmem:[%s1583_s7 + $0x180] sm:$0xff]  ;;  %v386_v25 = vld [vmem:[%s1583_s7 + $0x190] sm:$0xff] }
  0x25   : > { %v388_v26 = vld [vmem:[%s1583_s7 + $0x1a0] sm:$0xff]  ;;  %385 = vst [vmem:[%s1588_s8 + $0xc0] sm:$0xff] %v384_v24  ;;  %387 = vst [vmem:[%s1588_s8 + $0xc8] sm:$0xff] %v386_v25  ;;  %v390_v27 = vld [vmem:[%s1583_s7 + $0x1b0] sm:$0xff] }
  0x26   : > { %389 = vst [vmem:[%s1588_s8 + $0xd0] sm:$0xff] %v388_v26  ;;  %v392_v28 = vld [vmem:[%s1583_s7 + $0x1c0] sm:$0xff]  ;;  %v394_v29 = vld [vmem:[%s1583_s7 + $0x1d0] sm:$0xff]  ;;  %391 = vst [vmem:[%s1588_s8 + $0xd8] sm:$0xff] %v390_v27 }
  0x27   : > { %393 = vst [vmem:[%s1588_s8 + $0xe0] sm:$0xff] %v392_v28  ;;  %395 = vst [vmem:[%s1588_s8 + $0xe8] sm:$0xff] %v394_v29  ;;  %v396_v30 = vld [vmem:[%s1583_s7 + $0x1e0] sm:$0xff]  ;;  %v398_v31 = vld [vmem:[%s1583_s7 + $0x1f0] sm:$0xff] }
  0x28   : > { %v400_v32 = vld [vmem:[%s1583_s7 + $0x200] sm:$0xff]  ;;  %397 = vst [vmem:[%s1588_s8 + $0xf0] sm:$0xff] %v396_v30  ;;  %399 = vst [vmem:[%s1588_s8 + $0xf8] sm:$0xff] %v398_v31  ;;  %v402_v33 = vld [vmem:[%s1583_s7 + $0x210] sm:$0xff] }
  0x29   : > { %401 = vst [vmem:[%s1588_s8 + $0x100] sm:$0xff] %v400_v32  ;;  %v404_v34 = vld [vmem:[%s1583_s7 + $0x220] sm:$0xff]  ;;  %v406_v35 = vld [vmem:[%s1583_s7 + $0x230] sm:$0xff]  ;;  %403 = vst [vmem:[%s1588_s8 + $0x108] sm:$0xff] %v402_v33 }
  0x2a   : > { %405 = vst [vmem:[%s1588_s8 + $0x110] sm:$0xff] %v404_v34  ;;  %407 = vst [vmem:[%s1588_s8 + $0x118] sm:$0xff] %v406_v35  ;;  %v408_v36 = vld [vmem:[%s1583_s7 + $0x240] sm:$0xff]  ;;  %v410_v37 = vld [vmem:[%s1583_s7 + $0x250] sm:$0xff] }
  0x2b   : > { %v412_v38 = vld [vmem:[%s1583_s7 + $0x260] sm:$0xff]  ;;  %409 = vst [vmem:[%s1588_s8 + $0x120] sm:$0xff] %v408_v36  ;;  %411 = vst [vmem:[%s1588_s8 + $0x128] sm:$0xff] %v410_v37  ;;  %v414_v39 = vld [vmem:[%s1583_s7 + $0x270] sm:$0xff] }
  0x2c   : > { %413 = vst [vmem:[%s1588_s8 + $0x130] sm:$0xff] %v412_v38  ;;  %v416_v40 = vld [vmem:[%s1583_s7 + $0x280] sm:$0xff]  ;;  %v418_v41 = vld [vmem:[%s1583_s7 + $0x290] sm:$0xff]  ;;  %415 = vst [vmem:[%s1588_s8 + $0x138] sm:$0xff] %v414_v39 }
  0x2d   : > { %417 = vst [vmem:[%s1588_s8 + $0x140] sm:$0xff] %v416_v40  ;;  %419 = vst [vmem:[%s1588_s8 + $0x148] sm:$0xff] %v418_v41  ;;  %v420_v42 = vld [vmem:[%s1583_s7 + $0x2a0] sm:$0xff]  ;;  %v422_v43 = vld [vmem:[%s1583_s7 + $0x2b0] sm:$0xff] }
  0x2e   : > { %v424_v44 = vld [vmem:[%s1583_s7 + $0x2c0] sm:$0xff]  ;;  %421 = vst [vmem:[%s1588_s8 + $0x150] sm:$0xff] %v420_v42  ;;  %423 = vst [vmem:[%s1588_s8 + $0x158] sm:$0xff] %v422_v43  ;;  %v426_v45 = vld [vmem:[%s1583_s7 + $0x2d0] sm:$0xff] }
  0x2f   : > { %425 = vst [vmem:[%s1588_s8 + $0x160] sm:$0xff] %v424_v44  ;;  %v428_v46 = vld [vmem:[%s1583_s7 + $0x2e0] sm:$0xff]  ;;  %v430_v47 = vld [vmem:[%s1583_s7 + $0x2f0] sm:$0xff]  ;;  %427 = vst [vmem:[%s1588_s8 + $0x168] sm:$0xff] %v426_v45 }
  0x30   : > { %429 = vst [vmem:[%s1588_s8 + $0x170] sm:$0xff] %v428_v46  ;;  %431 = vst [vmem:[%s1588_s8 + $0x178] sm:$0xff] %v430_v47  ;;  %v432_v48 = vld [vmem:[%s1583_s7 + $0x300] sm:$0xff]  ;;  %v434_v49 = vld [vmem:[%s1583_s7 + $0x310] sm:$0xff] }
  0x31   : > { %v436_v50 = vld [vmem:[%s1583_s7 + $0x320] sm:$0xff]  ;;  %433 = vst [vmem:[%s1588_s8 + $0x180] sm:$0xff] %v432_v48  ;;  %435 = vst [vmem:[%s1588_s8 + $0x188] sm:$0xff] %v434_v49  ;;  %v438_v51 = vld [vmem:[%s1583_s7 + $0x330] sm:$0xff] }
  0x32   : > { %437 = vst [vmem:[%s1588_s8 + $0x190] sm:$0xff] %v436_v50  ;;  %v440_v52 = vld [vmem:[%s1583_s7 + $0x340] sm:$0xff]  ;;  %v442_v53 = vld [vmem:[%s1583_s7 + $0x350] sm:$0xff]  ;;  %439 = vst [vmem:[%s1588_s8 + $0x198] sm:$0xff] %v438_v51 }
  0x33   : > { %441 = vst [vmem:[%s1588_s8 + $0x1a0] sm:$0xff] %v440_v52  ;;  %443 = vst [vmem:[%s1588_s8 + $0x1a8] sm:$0xff] %v442_v53  ;;  %v444_v54 = vld [vmem:[%s1583_s7 + $0x360] sm:$0xff]  ;;  %v446_v55 = vld [vmem:[%s1583_s7 + $0x370] sm:$0xff] }
  0x34   : > { %v448_v56 = vld [vmem:[%s1583_s7 + $0x380] sm:$0xff]  ;;  %445 = vst [vmem:[%s1588_s8 + $0x1b0] sm:$0xff] %v444_v54  ;;  %447 = vst [vmem:[%s1588_s8 + $0x1b8] sm:$0xff] %v446_v55  ;;  %v450_v57 = vld [vmem:[%s1583_s7 + $0x390] sm:$0xff] }
  0x35   : > { %449 = vst [vmem:[%s1588_s8 + $0x1c0] sm:$0xff] %v448_v56  ;;  %v452_v58 = vld [vmem:[%s1583_s7 + $0x3a0] sm:$0xff]  ;;  %v454_v59 = vld [vmem:[%s1583_s7 + $0x3b0] sm:$0xff]  ;;  %451 = vst [vmem:[%s1588_s8 + $0x1c8] sm:$0xff] %v450_v57 }
  0x36   : > { %453 = vst [vmem:[%s1588_s8 + $0x1d0] sm:$0xff] %v452_v58  ;;  %455 = vst [vmem:[%s1588_s8 + $0x1d8] sm:$0xff] %v454_v59  ;;  %v456_v60 = vld [vmem:[%s1583_s7 + $0x3c0] sm:$0xff]  ;;  %v458_v61 = vld [vmem:[%s1583_s7 + $0x3d0] sm:$0xff] }
  0x37   : > { %v460_v62 = vld [vmem:[%s1583_s7 + $0x3e0] sm:$0xff]  ;;  %457 = vst [vmem:[%s1588_s8 + $0x1e0] sm:$0xff] %v456_v60  ;;  %459 = vst [vmem:[%s1588_s8 + $0x1e8] sm:$0xff] %v458_v61  ;;  %v462_v63 = vld [vmem:[%s1583_s7 + $0x3f0] sm:$0xff] }
  0x38   : > { %461 = vst [vmem:[%s1588_s8 + $0x1f0] sm:$0xff] %v460_v62  ;;  %463 = vst [vmem:[%s1588_s8 + $0x1f8] sm:$0xff] %v462_v63 }
  0x39 PF: > { %p1207_p7 = scmp.ge.s32.totalorder %s1500_s18, 1  ;;  %p476_p8 = scmp.lt.s32.totalorder %s1500_s18, 19 }
  0x3b   : > { %p477_p9 = pnand %p1207_p7, %p476_p8 }
  0x3c   : > { %s483_s9 = sand.u32 (!%p477_p9), 1, %s1476_s12   ;;  %s1209_s10 = sshll.u32 (!%p477_p9), %s1484_s14, 2 }
  0x3d   : > { %480 = sbr.rel (%p477_p9) target bundleno = 376 (0x178), region = 66  ;;  %s1208_s11 = sshll.u32 (!%p477_p9), %s483_s9, 9 }
  0x3e   : > { %p526_p10 = scmp.lt.s32.totalorder (!%p477_p9), %s1209_s10, 35  ;;  %s1211_s21 = sshll.u32 (!%p477_p9), %s1488_s15, 1 }
  0x3f   : > { %p536_p11 = scmp.lt.s32.totalorder (!%p477_p9), %s1211_s21, 3  ;;  %s1737_s5 = scalar_lea.vmem (!%p477_p9), [#allocation3], %s1208_s11 }
  0x40   : > { %p1214_p12 = scmp.ne.s32.totalorder (!%p477_p9), %s1484_s14, 0 }
  0x44   : > { %s1851_s10 = smov (!%p526_p10, %s1209_s10), 35  ;;  %s1853_s21 = smov (!%p536_p11, %s1211_s21), 3 }
  0x45   : > { %s1210_s22 = sshll.u32 %s1851_s10, 2  ;;  %s538_s12 = scalar_lea.vmem %s1836_s2, %s1853_s21  ;;  %v1502_v0 = vmov (!%p1214_p12), 0.0  }
  0x46   : > { %s1723_s26 = scalar_lea.vmem %s1834_s0, %s1210_s22  ;;  %s1213_s29 = sshll.u32 %s1853_s21, 2  ;;  %554 = vst [vmem:[#allocation2] sm:$0xff] (!%p1214_p12), %v1502_v0  ;;  %555 = vst [vmem:[#allocation2 + $0x8] sm:$0xff] (!%p1214_p12), %v1502_v0 }
  0x47   : > { %s1735_s15 = scalar_lea.vmem %s1837_s3, %s1213_s29  ;;  %553 = sbr.rel (%p1214_p12) target bundleno = 78 (0x4e), region = 74 }
  0x4e PF: > { %v1346_v1 = vld [vmem:[%s1737_s5 + $0x4] ss:$8 sps:$4 sm:$0xff]   ;;  %v1350_v3 = vld [vmem:[%s1737_s5] ss:$8 sps:$4 sm:$0xff]   ;;  %v1352_v5 = vld [vmem:[%s1737_s5 + $0x14] ss:$8 sps:$4 sm:$0xff]  }
  0x4f   : > { %v1348_v2 = vld [vmem:[%s1737_s5 + $0x104] ss:$8 sps:$4 sm:$0xff]   ;;  %958 = vmatprep.subr.bf16.mxu0 %v1346_v1  ;;  %v1351_v4 = vld [vmem:[%s1737_s5 + $0x100] ss:$8 sps:$4 sm:$0xff]   ;;  %v1354_v6 = vld [vmem:[%s1737_s5 + $0x114] ss:$8 sps:$4 sm:$0xff]  }
  0x50   : > { %999 = vmatprep.subr.bf16.mxu1 %v1348_v2  ;;  %959 = vmatpush1.bf16.msra.mxu0 %v1350_v3  ;;  %v1356_v7 = vld [vmem:[%s1737_s5 + $0x10] ss:$8 sps:$4 sm:$0xff]   ;;  %v1358_v9 = vld [vmem:[%s1737_s5 + $0x24] ss:$8 sps:$4 sm:$0xff]   ;;  %v1362_v11 = vld [vmem:[%s1737_s5 + $0x20] ss:$8 sps:$4 sm:$0xff]  }
  0x51   : > { %1000 = vmatpush1.bf16.msra.mxu1 %v1351_v4  ;;  %960 = vmatprep.subr.bf16.mxu0 %v1352_v5  ;;  %v1357_v8 = vld [vmem:[%s1737_s5 + $0x110] ss:$8 sps:$4 sm:$0xff]   ;;  %v1360_v10 = vld [vmem:[%s1737_s5 + $0x124] ss:$8 sps:$4 sm:$0xff]   ;;  %v1363_v12 = vld [vmem:[%s1737_s5 + $0x120] ss:$8 sps:$4 sm:$0xff]  }
  0x52   : > { %1001 = vmatprep.subr.bf16.mxu1 %v1354_v6  ;;  %v1364_v13 = vld [vmem:[%s1737_s5 + $0x34] ss:$8 sps:$4 sm:$0xff]   ;;  %v1368_v15 = vld [vmem:[%s1737_s5 + $0x30] ss:$8 sps:$4 sm:$0xff]   ;;  %v1370_v17 = vld [vmem:[%s1737_s5 + $0x44] ss:$8 sps:$4 sm:$0xff]  }
  0x53   : > { %v1366_v14 = vld [vmem:[%s1737_s5 + $0x134] ss:$8 sps:$4 sm:$0xff]   ;;  %v1369_v16 = vld [vmem:[%s1737_s5 + $0x130] ss:$8 sps:$4 sm:$0xff]   ;;  %v1372_v18 = vld [vmem:[%s1737_s5 + $0x144] ss:$8 sps:$4 sm:$0xff]  }
  0x54   : > { %961 = vmatpush1.bf16.msra.mxu0 %v1356_v7  ;;  %v1374_v19 = vld [vmem:[%s1737_s5 + $0x40] ss:$8 sps:$4 sm:$0xff]   ;;  %v1376_v21 = vld [vmem:[%s1737_s5 + $0x54] ss:$8 sps:$4 sm:$0xff]   ;;  %v1380_v23 = vld [vmem:[%s1737_s5 + $0x50] ss:$8 sps:$4 sm:$0xff]  }
  0x55   : > { %1002 = vmatpush1.bf16.msra.mxu1 %v1357_v8  ;;  %962 = vmatprep.subr.bf16.mxu0 %v1358_v9  ;;  %v1375_v20 = vld [vmem:[%s1737_s5 + $0x140] ss:$8 sps:$4 sm:$0xff]   ;;  %v1378_v22 = vld [vmem:[%s1737_s5 + $0x154] ss:$8 sps:$4 sm:$0xff]   ;;  %v1381_v24 = vld [vmem:[%s1737_s5 + $0x150] ss:$8 sps:$4 sm:$0xff]  }
  0x56   : > { %1003 = vmatprep.subr.bf16.mxu1 %v1360_v10  ;;  %v1382_v25 = vld [vmem:[%s1737_s5 + $0x64] ss:$8 sps:$4 sm:$0xff]   ;;  %v1386_v27 = vld [vmem:[%s1737_s5 + $0x60] ss:$8 sps:$4 sm:$0xff]   ;;  %v1388_v29 = vld [vmem:[%s1737_s5 + $0x74] ss:$8 sps:$4 sm:$0xff]  }
  0x57   : > { %v1384_v26 = vld [vmem:[%s1737_s5 + $0x164] ss:$8 sps:$4 sm:$0xff]   ;;  %v1387_v28 = vld [vmem:[%s1737_s5 + $0x160] ss:$8 sps:$4 sm:$0xff]   ;;  %v1390_v30 = vld [vmem:[%s1737_s5 + $0x174] ss:$8 sps:$4 sm:$0xff]  }
  0x58   : > { %963 = vmatpush1.bf16.msra.mxu0 %v1362_v11  ;;  %v1392_v31 = vld [vmem:[%s1737_s5 + $0x70] ss:$8 sps:$4 sm:$0xff]   ;;  %v1394_v33 = vld [vmem:[%s1737_s5 + $0x84] ss:$8 sps:$4 sm:$0xff]   ;;  %v1398_v35 = vld [vmem:[%s1737_s5 + $0x80] ss:$8 sps:$4 sm:$0xff]  }
  0x59   : > { %1004 = vmatpush1.bf16.msra.mxu1 %v1363_v12  ;;  %964 = vmatprep.subr.bf16.mxu0 %v1364_v13  ;;  %v1393_v32 = vld [vmem:[%s1737_s5 + $0x170] ss:$8 sps:$4 sm:$0xff]   ;;  %v1396_v34 = vld [vmem:[%s1737_s5 + $0x184] ss:$8 sps:$4 sm:$0xff]   ;;  %v1399_v36 = vld [vmem:[%s1737_s5 + $0x180] ss:$8 sps:$4 sm:$0xff]  }
  0x5a   : > { %1005 = vmatprep.subr.bf16.mxu1 %v1366_v14  ;;  %v1400_v37 = vld [vmem:[%s1737_s5 + $0x94] ss:$8 sps:$4 sm:$0xff]   ;;  %v1404_v39 = vld [vmem:[%s1737_s5 + $0x90] ss:$8 sps:$4 sm:$0xff]   ;;  %v1406_v41 = vld [vmem:[%s1737_s5 + $0xa4] ss:$8 sps:$4 sm:$0xff]  }
  0x5b   : > { %v1402_v38 = vld [vmem:[%s1737_s5 + $0x194] ss:$8 sps:$4 sm:$0xff]   ;;  %v1405_v40 = vld [vmem:[%s1737_s5 + $0x190] ss:$8 sps:$4 sm:$0xff]   ;;  %v1408_v42 = vld [vmem:[%s1737_s5 + $0x1a4] ss:$8 sps:$4 sm:$0xff]  }
  0x5c   : > { %965 = vmatpush1.bf16.msra.mxu0 %v1368_v15  ;;  %v1410_v43 = vld [vmem:[%s1737_s5 + $0xa0] ss:$8 sps:$4 sm:$0xff]   ;;  %v1412_v45 = vld [vmem:[%s1737_s5 + $0xb4] ss:$8 sps:$4 sm:$0xff]   ;;  %v1416_v50 = vld [vmem:[%s1737_s5 + $0xb0] ss:$8 sps:$4 sm:$0xff]  }
  0x5d   : > { %1006 = vmatpush1.bf16.msra.mxu1 %v1369_v16  ;;  %966 = vmatprep.subr.bf16.mxu0 %v1370_v17  ;;  %v1411_v44 = vld [vmem:[%s1737_s5 + $0x1a0] ss:$8 sps:$4 sm:$0xff]   ;;  %v1414_v46 = vld [vmem:[%s1737_s5 + $0x1b4] ss:$8 sps:$4 sm:$0xff]   ;;  %v1417_v51 = vld [vmem:[%s1737_s5 + $0x1b0] ss:$8 sps:$4 sm:$0xff]  }
  0x5e   : > { %1007 = vmatprep.subr.bf16.mxu1 %v1372_v18  ;;  %v558_v47 = vld [vmem:[%s1723_s26] sm:$0xff]  ;;  %v559_v49 = vld [vmem:[%s1723_s26 + $0x8] sm:$0xff]  ;;  %v1418_v53 = vld [vmem:[%s1737_s5 + $0xc4] ss:$8 sps:$4 sm:$0xff]   ;;  %p1283_p13 = scmp.ne.s32.totalorder %s1484_s14, 8 }
  0x5f   : > { %v1216_v48 = vcombine.high %v558_v47, %v558_v47  ;;  %v1218_v52 = vcombine.high %v559_v49, %v559_v49  ;;  %v1420_v54 = vld [vmem:[%s1737_s5 + $0x1c4] ss:$8 sps:$4 sm:$0xff]   ;;  %v1422_v55 = vld [vmem:[%s1737_s5 + $0xc0] ss:$8 sps:$4 sm:$0xff]   ;;  %v1424_v57 = vld [vmem:[%s1737_s5 + $0xd4] ss:$8 sps:$4 sm:$0xff]   ;;  %v1215_v5 = vcombine.low %v558_v47, %v558_v47  ;;  %v1217_v6 = vcombine.low %v559_v49, %v559_v49 }
  0x60   : > { %967 = vmatpush1.bf16.msra.mxu0 %v1374_v19  ;;  %v1423_v56 = vld [vmem:[%s1737_s5 + $0x1c0] ss:$8 sps:$4 sm:$0xff]   ;;  %v1426_v58 = vld [vmem:[%s1737_s5 + $0x1d4] ss:$8 sps:$4 sm:$0xff]   ;;  %v1428_v59 = vld [vmem:[%s1737_s5 + $0xd0] ss:$8 sps:$4 sm:$0xff]  }
  0x61   : > { %1008 = vmatpush1.bf16.msra.mxu1 %v1375_v20  ;;  %968 = vmatprep.subr.bf16.mxu0 %v1376_v21  ;;  %v1429_v60 = vld [vmem:[%s1737_s5 + $0x1d0] ss:$8 sps:$4 sm:$0xff]   ;;  %v1430_v61 = vld [vmem:[%s1737_s5 + $0xe4] ss:$8 sps:$4 sm:$0xff]   ;;  %v1434_v63 = vld [vmem:[%s1737_s5 + $0xe0] ss:$8 sps:$4 sm:$0xff]   ;;  %v1052_v21 = vlaneseq (!%p1283_p13) }
  0x62   : > { %1009 = vmatprep.subr.bf16.mxu1 %v1378_v22  ;;  %990 = vmatprep.mubr.bf16.mxu0 %v1216_v48  ;;  %v1432_v62 = vld [vmem:[%s1737_s5 + $0x1e4] ss:$8 sps:$4 sm:$0xff]   ;;  %v1435_v0 = vld [vmem:[%s1737_s5 + $0x1e0] ss:$8 sps:$4 sm:$0xff]   ;;  %v1436_v1 = vld [vmem:[%s1737_s5 + $0xf4] ss:$8 sps:$4 sm:$0xff]  }
  0x63   : > { %1031 = vmatprep.mubr.bf16.mxu1 %v1218_v52  ;;  %v1438_v2 = vld [vmem:[%s1737_s5 + $0x1f4] ss:$8 sps:$4 sm:$0xff]   ;;  %v1440_v3 = vld [vmem:[%s1737_s5 + $0xf0] ss:$8 sps:$4 sm:$0xff]   ;;  %v1053_v22 = vshrl.u32 (!%p1283_p13), %v1052_v21, 7 }
  0x64   : > { %969 = vmatpush1.bf16.msra.mxu0 %v1380_v23  ;;  %v1441_v4 = vld [vmem:[%s1737_s5 + $0x1f0] ss:$8 sps:$4 sm:$0xff]  }
  0x65   : > { %1010 = vmatpush1.bf16.msra.mxu1 %v1381_v24  ;;  %970 = vmatprep.subr.bf16.mxu0 %v1382_v25  ;;  %v556_v8 = vld [vmem:[#allocation2] sm:$0xff]  ;;  %v557_v12 = vld [vmem:[#allocation2 + $0x8] sm:$0xff]  ;;  %v1054_v24 = vsub.s32 (!%p1283_p13), 0, %v1053_v22  ;;  %v1058_v25 = vsub.s32 (!%p1283_p13), 1, %v1053_v22 }
  0x66   : > { %1011 = vmatprep.subr.bf16.mxu1 %v1384_v26  ;;  %v1050_v23 = vld [vmem:[%s538_s12] sm:$0x3] (!%p1283_p13) }
  0x68   : > { %971 = vmatpush1.bf16.msra.mxu0 %v1386_v27 }
  0x69   : > { %1012 = vmatpush1.bf16.msra.mxu1 %v1387_v28  ;;  %972 = vmatprep.subr.bf16.mxu0 %v1388_v29  ;;  %v1055_v28 = vrot.slane (!%p1283_p13), %v1050_v23, %v1054_v24  ;;  %v1059_v29 = vrot.slane (!%p1283_p13), %v1050_v23, %v1058_v25 }
  0x6a   : > { %1013 = vmatprep.subr.bf16.mxu1 %v1390_v30 }
  0x6c   : > { %973 = vmatpush1.bf16.msra.mxu0 %v1392_v31 }
  0x6d   : > { %1014 = vmatpush1.bf16.msra.mxu1 %v1393_v32  ;;  %974 = vmatprep.subr.bf16.mxu0 %v1394_v33 }
  0x6e   : > { %1015 = vmatprep.subr.bf16.mxu1 %v1396_v34 }
  0x70   : > { %975 = vmatpush1.bf16.msra.mxu0 %v1398_v35 }
  0x71   : > { %1016 = vmatpush1.bf16.msra.mxu1 %v1399_v36  ;;  %976 = vmatprep.subr.bf16.mxu0 %v1400_v37 }
  0x72   : > { %1017 = vmatprep.subr.bf16.mxu1 %v1402_v38 }
  0x74   : > { %977 = vmatpush1.bf16.msra.mxu0 %v1404_v39 }
  0x75   : > { %1018 = vmatpush1.bf16.msra.mxu1 %v1405_v40  ;;  %978 = vmatprep.subr.bf16.mxu0 %v1406_v41 }
  0x76   : > { %1019 = vmatprep.subr.bf16.mxu1 %v1408_v42 }
  0x78   : > { %979 = vmatpush1.bf16.msra.mxu0 %v1410_v43 }
  0x79   : > { %1020 = vmatpush1.bf16.msra.mxu1 %v1411_v44  ;;  %980 = vmatprep.subr.bf16.mxu0 %v1412_v45 }
  0x7a   : > { %1021 = vmatprep.subr.bf16.mxu1 %v1414_v46 }
  0x7c   : > { %981 = vmatpush1.bf16.msra.mxu0 %v1416_v50 }
  0x7d   : > { %1022 = vmatpush1.bf16.msra.mxu1 %v1417_v51  ;;  %982 = vmatprep.subr.bf16.mxu0 %v1418_v53 }
  0x7e   : > { %1023 = vmatprep.subr.bf16.mxu1 %v1420_v54 }
  0x80   : > { %983 = vmatpush1.bf16.msra.mxu0 %v1422_v55 }
  0x81   : > { %1024 = vmatpush1.bf16.msra.mxu1 %v1423_v56  ;;  %984 = vmatprep.subr.bf16.mxu0 %v1424_v57 }
  0x82   : > { %1025 = vmatprep.subr.bf16.mxu1 %v1426_v58 }
  0x84   : > { %985 = vmatpush1.bf16.msra.mxu0 %v1428_v59 }
  0x85   : > { %1026 = vmatpush1.bf16.msra.mxu1 %v1429_v60  ;;  %986 = vmatprep.subr.bf16.mxu0 %v1430_v61 }
  0x86   : > { %1027 = vmatprep.subr.bf16.mxu1 %v1432_v62 }
  0x88   : > { %987 = vmatpush1.bf16.msra.mxu0 %v1434_v63 }
  0x89   : > { %1028 = vmatpush1.bf16.msra.mxu1 %v1435_v0  ;;  %988 = vmatprep.subr.bf16.mxu0 %v1436_v1 }
  0x8a   : > { %1029 = vmatprep.subr.bf16.mxu1 %v1438_v2 }
  0x8c   : > { %989 = vmatpush1.bf16.msra.mxu0 %v1440_v3 }
  0x8d   : > { %1030 = vmatpush1.bf16.msra.mxu1 %v1441_v4 }
  0x8f   : > { %991 = vmatmul.mubr.bf16.vlgmr.msra.gmra.mrb[0].mxu0 %v1215_v5 }
  0x90   : > { %1032 = vmatmul.mubr.bf16.vlgmr.msra.gmra.mrb[0].mxu1 %v1217_v6 }
 0x162   : > { %v992_v7 = vpop.f32.mrb[0].mxu0 }
 0x163   : > { %v1033_v9 = vpop.f32.mrb[0].mxu1  ;;  %v994_v11 = vpop.f32.mrb[1].mxu0  ;;  %1047 = sbr.rel (%p1283_p13) target bundleno = 376 (0x178), region = 78 }
 0x164   : > { %v1034_v10 = vadd.f32 %v1033_v9, %v992_v7  ;;  %v1035_v13 = vpop.f32.mrb[1].mxu1  ;;  %v996_v15 = vpop.f32.mrb[2].mxu0 }
 0x165   : > { %v1036_v14 = vadd.f32 %v1035_v13, %v994_v11  ;;  %v1037_v16 = vpop.f32.mrb[2].mxu1  ;;  %v997_v18 = vpop.f32.mrb[3].mxu0 }
 0x166   : > { %v1040_v17 = vadd.f32 %v1034_v10, %v556_v8  ;;  %v1038_v19 = vpop.f32.mrb[3].mxu1 }
 0x167   : > { %v1041_v20 = vadd.f32 %v1036_v14, %v557_v12 }
 0x168   : > { %1042 = vst [vmem:[#allocation2] sm:$0xff] %v1040_v17 }
 0x169   : > { %1043 = vst [vmem:[#allocation2 + $0x8] sm:$0xff] %v1041_v20 }
 0x16f   : > { %v1048_v26 = vld [vmem:[#allocation2] sm:$0xff] }
 0x170   : > { %v1049_v27 = vld [vmem:[#allocation2 + $0x8] sm:$0xff]  ;;  %v1062_v30 = vadd.f32 %v1055_v28, %v1048_v26 }
 0x171   : > { %v1063_v31 = vadd.f32 %v1059_v29, %v1049_v27 }
 0x172   : > { %v1064_v32 = vmax.f32 %v1062_v30, 0.0 }
 0x173   : > { %v1065_v33 = vmax.f32 %v1063_v31, 0.0 }
 0x175   : > { %v1288_v34 = vpack.c.bf16 %v1065_v33, %v1064_v32 }
 0x177   : > { %1074 = vst [vmem:[%s1735_s15] sm:$0xff] %v1288_v34 }
 0x178 PF: > { %s13_s18 = sadd.s32 1, %s1500_s18   ;;  %s1838_s12 = smov %s1480_s13 }
 0x179   : > { %p10_p0 = scmp.ge.s32.totalorder %s13_s18, 20   ;;  %s1839_s13 = smov %s1574_s25 }
 0x17a   : > { %s1840_s14 = smov %s1492_s16  ;;  %s1841_s15 = smov %s1496_s17 }
 0x17b   : > { %s1842_s16 = smov %s1845_s19  ;;  %s1843_s17 = smov %s1849_s20 }
 0x17c   :  { %12 = sbr.rel (!%p10_p0) target bundleno = 4 (0x4), region = 119 }

</bundles_post_ra>
